<compile_context>
chip_gen: v7x
topology: tpu7x:2x2x1
jax: 0.10.0
libtpu: 0.0.40
codegen_flags: <defaults>
</compile_context>

<pallas_src>
import math

import jax
import jax.numpy as jnp
from jax.experimental import pallas as pl
from jax.experimental.pallas import tpu as pltpu

_SQRT2 = math.sqrt(2.0)
_NUM_GROUPS = 8
_GN_EPS = 1e-5  # torch.nn.GroupNorm default


# ----------------------------------------------------------------------------
# Exact GELU without relying on an erf primitive inside the kernel.
# ----------------------------------------------------------------------------
def _erf_approx(x):
    """Abramowitz & Stegun 7.1.26 rational approximation, |err| < 1.5e-7.

    Only uses exp (EUP slot), a divide and a short polynomial (VALU), so it
    lowers cleanly in Mosaic and matches PyTorch's exact erf to ~1e-7.
    """
    p = 0.3275911
    a1, a2, a3, a4, a5 = (0.254829592, -0.284496736, 1.421413741,
                          -1.453152027, 1.061405429)
    ax = jnp.abs(x)
    t = 1.0 / (1.0 + p * ax)
    poly = t * (a1 + t * (a2 + t * (a3 + t * (a4 + t * a5))))
    y = 1.0 - poly * jnp.exp(-ax * ax)
    return jnp.where(x >= 0.0, y, -y)


def _gelu_exact(x):
    # torch.nn.GELU() default (approximate='none'): 0.5*x*(1+erf(x/sqrt(2)))
    return 0.5 * x * (1.0 + _erf_approx(x / _SQRT2))


# ----------------------------------------------------------------------------
# In-kernel helper: 3x3 conv (zero-padded VMEM tile) -> GroupNorm(8) -> GELU.
# ----------------------------------------------------------------------------
def _conv3x3_gn_gelu(xp_ref, w_ref, b, gamma, beta, member, member_t, h, w):
    """xp_ref: (h+2, w+2, Cin) f32 padded tile (halo is zero).
    w_ref : (9, Cin, Cout) bf16 conv weights, k = 3*dy + dx.
    Returns (h*w, Cout) f32."""
    cin = xp_ref.shape[-1]
    cout = w_ref.shape[-1]

    # 3x3 conv as 9 accumulating MXU dots of K=Cin (bf16 operands, f32 acc).
    # No (h*w, 9*Cin) im2col tensor is ever materialized.
    acc = jnp.zeros((h * w, cout), jnp.float32) + b
    for k in range(9):
        dy, dx = k // 3, k % 3
        patch = xp_ref[pl.ds(dy, h), pl.ds(dx, w), :].astype(jnp.bfloat16)
        acc = acc + jnp.dot(patch.reshape(h * w, cin), w_ref[k],
                            preferred_element_type=jnp.float32)
    conv = acc                                                  # (h*w, Cout)

    # GroupNorm(8): one-pass stats per group over (h*w, C/G); channel<->group
    # reduce / broadcast via the precomputed membership matmuls.
    cpg = cout // _NUM_GROUPS
    inv_cnt = 1.0 / float(cpg * h * w)
    s1 = jnp.sum(conv, axis=0, keepdims=True)                   # (1, C)
    s2 = jnp.sum(conv * conv, axis=0, keepdims=True)            # (1, C)
    gmean = jnp.dot(s1, member, preferred_element_type=jnp.float32) * inv_cnt
    gmsq = jnp.dot(s2, member, preferred_element_type=jnp.float32) * inv_cnt
    ginv = jax.lax.rsqrt(jnp.maximum(gmsq - gmean * gmean, 0.0) + _GN_EPS)
    mean_c = jnp.dot(gmean, member_t, preferred_element_type=jnp.float32)
    inv_c = jnp.dot(ginv, member_t, preferred_element_type=jnp.float32)

    # Fold everything into one per-channel scale/shift -> single FMA sweep.
    scale = inv_c * gamma                                       # (1, C)
    shift = beta - mean_c * scale                               # (1, C)
    return _gelu_exact(conv * scale + shift)                    # (h*w, C)


def _zero_halo(ref, h, w):
    """Zero only the 1-pixel border of a (h+2, w+2, C) padded scratch tile."""
    c = ref.shape[-1]
    zrow = jnp.zeros((1, w + 2, c), jnp.float32)
    zcol = jnp.zeros((h + 2, 1, c), jnp.float32)
    ref[pl.ds(0, 1), pl.ds(0, w + 2), :] = zrow
    ref[pl.ds(h + 1, 1), pl.ds(0, w + 2), :] = zrow
    ref[pl.ds(0, h + 2), pl.ds(0, 1), :] = zcol
    ref[pl.ds(0, h + 2), pl.ds(w + 1, 1), :] = zcol


# ----------------------------------------------------------------------------
# Fused kernel: one grid step == one batch sample.
# ----------------------------------------------------------------------------
def _double_conv_kernel(x_ref, t_ref, tw_ref, tb_ref,
                        w1_ref, b1_ref, g1_ref, be1_ref,
                        w2_ref, b2_ref, g2_ref, be2_ref,
                        mem_ref, memt_ref,
                        o_ref, xp_ref, h1p_ref):
    h = xp_ref.shape[0] - 2
    w = xp_ref.shape[1] - 2
    cin = xp_ref.shape[2]
    cout = h1p_ref.shape[2]

    # Time MLP: GELU(t @ Wt + bt), broadcast-added to every pixel.
    emb = jnp.dot(t_ref[0], tw_ref[...], preferred_element_type=jnp.float32)
    emb = _gelu_exact(emb + tb_ref[...])                        # (1, Cin)

    # Halo-only zeroing (interior fully overwritten right below); runs every
    # step so it stays correct when the grid is split across TensorCores.
    _zero_halo(xp_ref, h, w)
    xp_ref[pl.ds(1, h), pl.ds(1, w), :] = x_ref[0] + emb.reshape(1, 1, cin)

    member = mem_ref[...]
    member_t = memt_ref[...]

    # Conv1 -> GN -> GELU (intermediate stays in VMEM).
    h1 = _conv3x3_gn_gelu(xp_ref, w1_ref, b1_ref[...], g1_ref[...],
                          be1_ref[...], member, member_t, h, w)

    _zero_halo(h1p_ref, h, w)
    h1p_ref[pl.ds(1, h), pl.ds(1, w), :] = h1.reshape(h, w, cout)

    # Conv2 -> GN -> GELU.
    h2 = _conv3x3_gn_gelu(h1p_ref, w2_ref, b2_ref[...], g2_ref[...],
                          be2_ref[...], member, member_t, h, w)
    o_ref[0] = h2.reshape(h, w, cout)


# ----------------------------------------------------------------------------
# Wrapper / pallas_call plumbing.
# ----------------------------------------------------------------------------
def _full_spec(shape):
    zeros = (0,) * len(shape)
    return pl.BlockSpec(shape, lambda i, z=zeros: z)


def _vmem_limit_bytes(h, w, cin, cout, temb):
    f32, bf16 = 4, 2
    blocks = 2 * (h * w * cin * f32                       # x block (x2 buffers)
                  + temb * f32                            # t block
                  + temb * cin * f32 + cin * f32          # time MLP params
                  + 9 * cin * cout * bf16                 # conv1 weights (bf16)
                  + 9 * cout * cout * bf16                # conv2 weights (bf16)
                  + 6 * cout * f32                        # biases / gammas / betas
                  + 2 * _NUM_GROUPS * cout * f32          # membership matrices
                  + h * w * cout * f32)                   # output block
    scratch = (h + 2) * (w + 2) * (cin + cout) * f32      # padded tiles
    live = (6 * h * w * cout + 2 * h * w * cin) * f32     # conv acc / h1 / temps
    est = blocks + scratch + live
    return int(min(64 * 1024 * 1024, max(32 * 1024 * 1024, 2 * est)))


def double_conv_forward(x_nchw, t, params):
    """Matches DoubleConv.forward(x, t) of the PyTorch reference."""
    x = jnp.transpose(x_nchw, (0, 2, 3, 1)).astype(jnp.float32)   # NCHW -> NHWC
    n, h, w, cin = x.shape
    cout = params["conv1_w"].shape[-1]
    temb = t.shape[-1]
    assert cout % _NUM_GROUPS == 0

    # Host-side constant prep (constant-folded by XLA).
    w1 = params["conv1_w"].reshape(9, cin, cout).astype(jnp.bfloat16)
    w2 = params["conv2_w"].reshape(9, cout, cout).astype(jnp.bfloat16)
    cpg = cout // _NUM_GROUPS
    member = (jnp.arange(cout)[:, None] // cpg ==
              jnp.arange(_NUM_GROUPS)[None, :]).astype(jnp.float32)  # (Cout, G)
    member_t = jnp.transpose(member)                                 # (G, Cout)
    t3 = t.astype(jnp.float32)[:, None, :]                           # (N, 1, Temb)

    out = pl.pallas_call(
        _double_conv_kernel,
        grid=(n,),
        in_specs=[
            pl.BlockSpec((1, h, w, cin), lambda i: (i, 0, 0, 0)),
            pl.BlockSpec((1, 1, temb), lambda i: (i, 0, 0)),
            _full_spec(params["time_w"].shape),
            _full_spec(params["time_b"].shape),
            _full_spec(w1.shape),
            _full_spec(params["conv1_b"].shape),
            _full_spec(params["gn1_gamma"].shape),
            _full_spec(params["gn1_beta"].shape),
            _full_spec(w2.shape),
            _full_spec(params["conv2_b"].shape),
            _full_spec(params["gn2_gamma"].shape),
            _full_spec(params["gn2_beta"].shape),
            _full_spec(member.shape),
            _full_spec(member_t.shape),
        ],
        out_specs=pl.BlockSpec((1, h, w, cout), lambda i: (i, 0, 0, 0)),
        out_shape=jax.ShapeDtypeStruct((n, h, w, cout), jnp.float32),
        scratch_shapes=[
            pltpu.VMEM((h + 2, w + 2, cin), jnp.float32),    # padded input tile
            pltpu.VMEM((h + 2, w + 2, cout), jnp.float32),   # padded h1 tile
        ],
        compiler_params=pltpu.CompilerParams(
            dimension_semantics=("parallel",),               # batch -> both TCs (v7x)
            vmem_limit_bytes=_vmem_limit_bytes(h, w, cin, cout, temb),
        ),
    )(x, t3, params["time_w"], params["time_b"],
      w1, params["conv1_b"], params["gn1_gamma"], params["gn1_beta"],
      w2, params["conv2_b"], params["gn2_gamma"], params["gn2_beta"],
      member, member_t)

    return jnp.transpose(out, (0, 3, 1, 2))                  # NHWC -> NCHW


# ----------------------------------------------------------------------------
# Pure-JAX reference (for correctness check) and parameter init.
# ----------------------------------------------------------------------------
def _reference_forward(x_nchw, t, params):
    x = jnp.transpose(x_nchw, (0, 2, 3, 1)).astype(jnp.float32)
    emb = jax.nn.gelu(t @ params["time_w"] + params["time_b"], approximate=False)
    x = x + emb[:, None, None, :]

    def block(hh, wgt, b, gamma, beta):
        out = jax.lax.conv_general_dilated(
            hh, wgt, window_strides=(1, 1), padding=((1, 1), (1, 1)),
            dimension_numbers=("NHWC", "HWIO", "NHWC"),
            precision=jax.lax.Precision.HIGHEST) + b
        n_, H, W, c = out.shape
        g = out.reshape(n_, H * W, _NUM_GROUPS, c // _NUM_GROUPS)
        mean = g.mean(axis=(1, 3), keepdims=True)
        var = ((g - mean) ** 2).mean(axis=(1, 3), keepdims=True)
        g = (g - mean) * jax.lax.rsqrt(var + _GN_EPS)
        return jax.nn.gelu(g.reshape(n_, H, W, c) * gamma + beta,
                           approximate=False)

    h1 = block(x, params["conv1_w"], params["conv1_b"],
               params["gn1_gamma"], params["gn1_beta"])
    h2 = block(h1, params["conv2_w"], params["conv2_b"],
               params["gn2_gamma"], params["gn2_beta"])
    return jnp.transpose(h2, (0, 3, 1, 2))


def init_params(key, in_channels, out_channels, time_emb_dim):
    ks = jax.random.split(key, 10)

    def nrm(k, shape, scale):
        return jax.random.normal(k, shape, jnp.float32) * scale

    return dict(
        time_w=nrm(ks[0], (time_emb_dim, in_channels),
                   1.0 / math.sqrt(time_emb_dim)),
        time_b=nrm(ks[1], (1, in_channels), 0.02),
        conv1_w=nrm(ks[2], (3, 3, in_channels, out_channels),
                    1.0 / math.sqrt(9 * in_channels)),
        conv1_b=nrm(ks[3], (1, out_channels), 0.02),
        gn1_gamma=1.0 + nrm(ks[4], (1, out_channels), 0.02),
        gn1_beta=nrm(ks[5], (1, out_channels), 0.02),
        conv2_w=nrm(ks[6], (3, 3, out_channels, out_channels),
                    1.0 / math.sqrt(9 * out_channels)),
        conv2_b=nrm(ks[7], (1, out_channels), 0.02),
        gn2_gamma=1.0 + nrm(ks[8], (1, out_channels), 0.02),
        gn2_beta=nrm(ks[9], (1, out_channels), 0.02),
    )


if __name__ == "__main__":
    N, Cin, Cout, H, W, Temb = 2, 4, 16, 16, 16, 32  # Cout % 8 == 0 for GN(8)
    key = jax.random.PRNGKey(0)
    kx, kt, kp = jax.random.split(key, 3)

    x = jax.random.normal(kx, (N, Cin, H, W), jnp.float32)   # PyTorch NCHW
    t = jax.random.normal(kt, (N, Temb), jnp.float32)
    params = init_params(kp, Cin, Cout, Temb)

    out = jax.jit(double_conv_forward)(x, t, params)
    jax.block_until_ready(out)
    assert out.shape == (N, Cout, H, W) and out.dtype == jnp.float32

    ref = jax.jit(_reference_forward)(x, t, params)
    max_diff = float(jnp.max(jnp.abs(out - ref)))
    assert max_diff < 5e-2, f"mismatch vs JAX reference: max|diff|={max_diff}"

    print("KERNEL_OK")
</pallas_src>

<mosaic_0001>
module attributes {stable_mosaic.version = 11 : i64} {
  func.func @_double_conv_kernel(%arg0: i32, %arg1: memref<1x16x16x4xf32, #tpu.memory_space<vmem>>, %arg2: memref<1x1x32xf32, #tpu.memory_space<vmem>>, %arg3: memref<32x4xf32, #tpu.memory_space<vmem>>, %arg4: memref<1x4xf32, #tpu.memory_space<vmem>>, %arg5: memref<9x4x16xbf16, #tpu.memory_space<vmem>>, %arg6: memref<1x16xf32, #tpu.memory_space<vmem>>, %arg7: memref<1x16xf32, #tpu.memory_space<vmem>>, %arg8: memref<1x16xf32, #tpu.memory_space<vmem>>, %arg9: memref<9x16x16xbf16, #tpu.memory_space<vmem>>, %arg10: memref<1x16xf32, #tpu.memory_space<vmem>>, %arg11: memref<1x16xf32, #tpu.memory_space<vmem>>, %arg12: memref<1x16xf32, #tpu.memory_space<vmem>>, %arg13: memref<16x8xf32, #tpu.memory_space<vmem>>, %arg14: memref<8x16xf32, #tpu.memory_space<vmem>>, %arg15: memref<1x16x16x16xf32, #tpu.memory_space<vmem>>, %arg16: memref<18x18x4xf32, #tpu.memory_space<vmem>>, %arg17: memref<18x18x16xf32, #tpu.memory_space<vmem>>) attributes {dimension_semantics = [#tpu.dimension_semantics<parallel>], iteration_bounds = array<i64: 2>, scalar_prefetch = 0 : i64, scratch_operands = 2 : i64, tpu.core_type = #tpu.core_type<tc>, window_params = [{transform_indices = @transform_0, window_bounds = array<i64: 1, 16, 16, 4>}, {transform_indices = @transform_1, window_bounds = array<i64: 1, 1, 32>}, {pipeline_mode = #tpu.pipeline_mode<synchronous>, transform_indices = @transform_2, window_bounds = array<i64: 32, 4>}, {pipeline_mode = #tpu.pipeline_mode<synchronous>, transform_indices = @transform_3, window_bounds = array<i64: 1, 4>}, {pipeline_mode = #tpu.pipeline_mode<synchronous>, transform_indices = @transform_4, window_bounds = array<i64: 9, 4, 16>}, {pipeline_mode = #tpu.pipeline_mode<synchronous>, transform_indices = @transform_5, window_bounds = array<i64: 1, 16>}, {pipeline_mode = #tpu.pipeline_mode<synchronous>, transform_indices = @transform_6, window_bounds = array<i64: 1, 16>}, {pipeline_mode = #tpu.pipeline_mode<synchronous>, transform_indices = @transform_7, window_bounds = array<i64: 1, 16>}, {pipeline_mode = #tpu.pipeline_mode<synchronous>, transform_indices = @transform_8, window_bounds = array<i64: 9, 16, 16>}, {pipeline_mode = #tpu.pipeline_mode<synchronous>, transform_indices = @transform_9, window_bounds = array<i64: 1, 16>}, {pipeline_mode = #tpu.pipeline_mode<synchronous>, transform_indices = @transform_10, window_bounds = array<i64: 1, 16>}, {pipeline_mode = #tpu.pipeline_mode<synchronous>, transform_indices = @transform_11, window_bounds = array<i64: 1, 16>}, {pipeline_mode = #tpu.pipeline_mode<synchronous>, transform_indices = @transform_12, window_bounds = array<i64: 16, 8>}, {pipeline_mode = #tpu.pipeline_mode<synchronous>, transform_indices = @transform_13, window_bounds = array<i64: 8, 16>}, {transform_indices = @transform_14, window_bounds = array<i64: 1, 16, 16, 16>}]} {
    %c0 = arith.constant 0 : index
    %c0_0 = arith.constant 0 : index
    %c0_1 = arith.constant 0 : index
    %0 = vector.load %arg2[%c0, %c0_0, %c0_1] : memref<1x1x32xf32, #tpu.memory_space<vmem>>, vector<1x1x32xf32>
    %1 = vector.shape_cast %0 : vector<1x1x32xf32> to vector<1x32xf32>
    %c0_2 = arith.constant 0 : index
    %c0_3 = arith.constant 0 : index
    %2 = vector.load %arg3[%c0_2, %c0_3] : memref<32x4xf32, #tpu.memory_space<vmem>>, vector<32x4xf32>
    %cst = arith.constant dense<0.000000e+00> : vector<1x4xf32>
    %3 = tpu.matmul %1, %2, %cst {dimension_numbers = #tpu.dot_dimension_numbers<[1], [0], [0], [1], [0, 0, 1, 1], [], []>} : vector<1x32xf32>, vector<32x4xf32>, vector<1x4xf32> -> vector<1x4xf32>
    %c0_4 = arith.constant 0 : index
    %c0_5 = arith.constant 0 : index
    %4 = vector.load %arg4[%c0_4, %c0_5] : memref<1x4xf32, #tpu.memory_space<vmem>>, vector<1x4xf32>
    %5 = arith.addf %3, %4 : vector<1x4xf32>
    %cst_6 = arith.constant 5.000000e-01 : f32
    %6 = vector.broadcast %cst_6 : f32 to vector<1x4xf32>
    %7 = arith.mulf %6, %5 : vector<1x4xf32>
    %cst_7 = arith.constant 1.41421354 : f32
    %8 = vector.broadcast %cst_7 : f32 to vector<1x4xf32>
    %9 = arith.divf %5, %8 : vector<1x4xf32>
    %10 = math.absf %9 : vector<1x4xf32>
    %cst_8 = arith.constant 0.327591091 : f32
    %11 = vector.broadcast %cst_8 : f32 to vector<1x4xf32>
    %12 = arith.mulf %11, %10 : vector<1x4xf32>
    %cst_9 = arith.constant 1.000000e+00 : f32
    %13 = vector.broadcast %cst_9 : f32 to vector<1x4xf32>
    %14 = arith.addf %13, %12 : vector<1x4xf32>
    %cst_10 = arith.constant 1.000000e+00 : f32
    %15 = vector.broadcast %cst_10 : f32 to vector<1x4xf32>
    %16 = arith.divf %15, %14 : vector<1x4xf32>
    %cst_11 = arith.constant 1.06140542 : f32
    %17 = vector.broadcast %cst_11 : f32 to vector<1x4xf32>
    %18 = arith.mulf %16, %17 : vector<1x4xf32>
    %cst_12 = arith.constant -1.45315206 : f32
    %19 = vector.broadcast %cst_12 : f32 to vector<1x4xf32>
    %20 = arith.addf %19, %18 : vector<1x4xf32>
    %21 = arith.mulf %16, %20 : vector<1x4xf32>
    %cst_13 = arith.constant 1.42141378 : f32
    %22 = vector.broadcast %cst_13 : f32 to vector<1x4xf32>
    %23 = arith.addf %22, %21 : vector<1x4xf32>
    %24 = arith.mulf %16, %23 : vector<1x4xf32>
    %cst_14 = arith.constant -0.284496725 : f32
    %25 = vector.broadcast %cst_14 : f32 to vector<1x4xf32>
    %26 = arith.addf %25, %24 : vector<1x4xf32>
    %27 = arith.mulf %16, %26 : vector<1x4xf32>
    %cst_15 = arith.constant 0.254829586 : f32
    %28 = vector.broadcast %cst_15 : f32 to vector<1x4xf32>
    %29 = arith.addf %28, %27 : vector<1x4xf32>
    %30 = arith.mulf %16, %29 : vector<1x4xf32>
    %cst_16 = arith.constant 0.000000e+00 : f32
    %31 = vector.broadcast %cst_16 : f32 to vector<1x4xf32>
    %32 = arith.subf %31, %10 : vector<1x4xf32>
    %33 = arith.mulf %32, %10 : vector<1x4xf32>
    %34 = math.exp %33 : vector<1x4xf32>
    %35 = arith.mulf %30, %34 : vector<1x4xf32>
    %cst_17 = arith.constant 1.000000e+00 : f32
    %36 = vector.broadcast %cst_17 : f32 to vector<1x4xf32>
    %37 = arith.subf %36, %35 : vector<1x4xf32>
    %cst_18 = arith.constant 0.000000e+00 : f32
    %38 = vector.broadcast %cst_18 : f32 to vector<1x4xf32>
    %39 = arith.cmpf oge, %9, %38 : vector<1x4xf32>
    %cst_19 = arith.constant 0.000000e+00 : f32
    %40 = vector.broadcast %cst_19 : f32 to vector<1x4xf32>
    %41 = arith.subf %40, %37 : vector<1x4xf32>
    %42 = arith.select %39, %37, %41 : vector<1x4xi1>, vector<1x4xf32>
    %cst_20 = arith.constant 1.000000e+00 : f32
    %43 = vector.broadcast %cst_20 : f32 to vector<1x4xf32>
    %44 = arith.addf %43, %42 : vector<1x4xf32>
    %45 = arith.mulf %7, %44 : vector<1x4xf32>
    %cst_21 = arith.constant 0.000000e+00 : f32
    %46 = vector.broadcast %cst_21 : f32 to vector<1x18x4xf32>
    %cst_22 = arith.constant 0.000000e+00 : f32
    %47 = vector.broadcast %cst_22 : f32 to vector<18x1x4xf32>
    %c0_23 = arith.constant 0 : index
    %c0_24 = arith.constant 0 : index
    %c0_25 = arith.constant 0 : index
    %48 = vector.load %arg16[%c0_23, %c0_24, %c0_25] : memref<18x18x4xf32, #tpu.memory_space<vmem>>, vector<1x18x4xf32>
    tpu.vector_store %arg16[%c0_23, %c0_24, %c0_25], %46 {strides = array<i32>} : memref<18x18x4xf32, #tpu.memory_space<vmem>>, vector<1x18x4xf32>,
    %c17 = arith.constant 17 : index
    %c0_26 = arith.constant 0 : index
    %c0_27 = arith.constant 0 : index
    %49 = vector.load %arg16[%c17, %c0_26, %c0_27] : memref<18x18x4xf32, #tpu.memory_space<vmem>>, vector<1x18x4xf32>
    tpu.vector_store %arg16[%c17, %c0_26, %c0_27], %46 {strides = array<i32>} : memref<18x18x4xf32, #tpu.memory_space<vmem>>, vector<1x18x4xf32>,
    %c0_28 = arith.constant 0 : index
    %c0_29 = arith.constant 0 : index
    %c0_30 = arith.constant 0 : index
    %50 = vector.load %arg16[%c0_28, %c0_29, %c0_30] : memref<18x18x4xf32, #tpu.memory_space<vmem>>, vector<18x1x4xf32>
    tpu.vector_store %arg16[%c0_28, %c0_29, %c0_30], %47 {strides = array<i32>} : memref<18x18x4xf32, #tpu.memory_space<vmem>>, vector<18x1x4xf32>,
    %c0_31 = arith.constant 0 : index
    %c17_32 = arith.constant 17 : index
    %c0_33 = arith.constant 0 : index
    %51 = vector.load %arg16[%c0_31, %c17_32, %c0_33] : memref<18x18x4xf32, #tpu.memory_space<vmem>>, vector<18x1x4xf32>
    tpu.vector_store %arg16[%c0_31, %c17_32, %c0_33], %47 {strides = array<i32>} : memref<18x18x4xf32, #tpu.memory_space<vmem>>, vector<18x1x4xf32>,
    %c0_34 = arith.constant 0 : index
    %c0_35 = arith.constant 0 : index
    %c0_36 = arith.constant 0 : index
    %c0_37 = arith.constant 0 : index
    %52 = vector.load %arg1[%c0_34, %c0_35, %c0_36, %c0_37] : memref<1x16x16x4xf32, #tpu.memory_space<vmem>>, vector<1x16x16x4xf32>
    %53 = vector.shape_cast %52 : vector<1x16x16x4xf32> to vector<16x16x4xf32>
    %54 = vector.shape_cast %45 : vector<1x4xf32> to vector<1x1x4xf32>
    %55 = vector.broadcast %54 : vector<1x1x4xf32> to vector<16x16x4xf32>
    %56 = arith.addf %53, %55 : vector<16x16x4xf32>
    %c1 = arith.constant 1 : index
    %c1_38 = arith.constant 1 : index
    %c0_39 = arith.constant 0 : index
    %57 = vector.load %arg16[%c1, %c1_38, %c0_39] : memref<18x18x4xf32, #tpu.memory_space<vmem>>, vector<16x16x4xf32>
    tpu.vector_store %arg16[%c1, %c1_38, %c0_39], %56 {strides = array<i32>} : memref<18x18x4xf32, #tpu.memory_space<vmem>>, vector<16x16x4xf32>,
    %c0_40 = arith.constant 0 : index
    %c0_41 = arith.constant 0 : index
    %58 = vector.load %arg13[%c0_40, %c0_41] : memref<16x8xf32, #tpu.memory_space<vmem>>, vector<16x8xf32>
    %c0_42 = arith.constant 0 : index
    %c0_43 = arith.constant 0 : index
    %59 = vector.load %arg14[%c0_42, %c0_43] : memref<8x16xf32, #tpu.memory_space<vmem>>, vector<8x16xf32>
    %c0_44 = arith.constant 0 : index
    %c0_45 = arith.constant 0 : index
    %60 = vector.load %arg6[%c0_44, %c0_45] : memref<1x16xf32, #tpu.memory_space<vmem>>, vector<1x16xf32>
    %c0_46 = arith.constant 0 : index
    %c0_47 = arith.constant 0 : index
    %61 = vector.load %arg7[%c0_46, %c0_47] : memref<1x16xf32, #tpu.memory_space<vmem>>, vector<1x16xf32>
    %c0_48 = arith.constant 0 : index
    %c0_49 = arith.constant 0 : index
    %62 = vector.load %arg8[%c0_48, %c0_49] : memref<1x16xf32, #tpu.memory_space<vmem>>, vector<1x16xf32>
    %cst_50 = arith.constant 0.000000e+00 : f32
    %63 = vector.broadcast %cst_50 : f32 to vector<256x16xf32>
    %64 = vector.broadcast %60 : vector<1x16xf32> to vector<256x16xf32>
    %65 = arith.addf %63, %64 : vector<256x16xf32>
    %c0_51 = arith.constant 0 : index
    %c0_52 = arith.constant 0 : index
    %c0_53 = arith.constant 0 : index
    %66 = vector.load %arg16[%c0_51, %c0_52, %c0_53] : memref<18x18x4xf32, #tpu.memory_space<vmem>>, vector<16x16x4xf32>
    %67 = arith.truncf %66 : vector<16x16x4xf32> to vector<16x16x4xbf16>
    %68 = vector.shape_cast %67 : vector<16x16x4xbf16> to vector<256x4xbf16>
    %c0_54 = arith.constant 0 : index
    %c0_55 = arith.constant 0 : index
    %c0_56 = arith.constant 0 : index
    %69 = vector.load %arg5[%c0_54, %c0_55, %c0_56] : memref<9x4x16xbf16, #tpu.memory_space<vmem>>, vector<1x4x16xbf16>
    %70 = vector.shape_cast %69 : vector<1x4x16xbf16> to vector<4x16xbf16>
    %cst_57 = arith.constant dense<0.000000e+00> : vector<256x16xf32>
    %71 = tpu.matmul %68, %70, %cst_57 {dimension_numbers = #tpu.dot_dimension_numbers<[1], [0], [0], [1], [0, 0, 1, 1], [], []>} : vector<256x4xbf16>, vector<4x16xbf16>, vector<256x16xf32> -> vector<256x16xf32>
    %72 = arith.addf %65, %71 : vector<256x16xf32>
    %c0_58 = arith.constant 0 : index
    %c1_59 = arith.constant 1 : index
    %c0_60 = arith.constant 0 : index
    %73 = vector.load %arg16[%c0_58, %c1_59, %c0_60] : memref<18x18x4xf32, #tpu.memory_space<vmem>>, vector<16x16x4xf32>
    %74 = arith.truncf %73 : vector<16x16x4xf32> to vector<16x16x4xbf16>
    %75 = vector.shape_cast %74 : vector<16x16x4xbf16> to vector<256x4xbf16>
    %c1_61 = arith.constant 1 : index
    %c0_62 = arith.constant 0 : index
    %c0_63 = arith.constant 0 : index
    %76 = vector.load %arg5[%c1_61, %c0_62, %c0_63] : memref<9x4x16xbf16, #tpu.memory_space<vmem>>, vector<1x4x16xbf16>
    %77 = vector.shape_cast %76 : vector<1x4x16xbf16> to vector<4x16xbf16>
    %cst_64 = arith.constant dense<0.000000e+00> : vector<256x16xf32>
    %78 = tpu.matmul %75, %77, %cst_64 {dimension_numbers = #tpu.dot_dimension_numbers<[1], [0], [0], [1], [0, 0, 1, 1], [], []>} : vector<256x4xbf16>, vector<4x16xbf16>, vector<256x16xf32> -> vector<256x16xf32>
    %79 = arith.addf %72, %78 : vector<256x16xf32>
    %c0_65 = arith.constant 0 : index
    %c2 = arith.constant 2 : index
    %c0_66 = arith.constant 0 : index
    %80 = vector.load %arg16[%c0_65, %c2, %c0_66] : memref<18x18x4xf32, #tpu.memory_space<vmem>>, vector<16x16x4xf32>
    %81 = arith.truncf %80 : vector<16x16x4xf32> to vector<16x16x4xbf16>
    %82 = vector.shape_cast %81 : vector<16x16x4xbf16> to vector<256x4xbf16>
    %c2_67 = arith.constant 2 : index
    %c0_68 = arith.constant 0 : index
    %c0_69 = arith.constant 0 : index
    %83 = vector.load %arg5[%c2_67, %c0_68, %c0_69] : memref<9x4x16xbf16, #tpu.memory_space<vmem>>, vector<1x4x16xbf16>
    %84 = vector.shape_cast %83 : vector<1x4x16xbf16> to vector<4x16xbf16>
    %cst_70 = arith.constant dense<0.000000e+00> : vector<256x16xf32>
    %85 = tpu.matmul %82, %84, %cst_70 {dimension_numbers = #tpu.dot_dimension_numbers<[1], [0], [0], [1], [0, 0, 1, 1], [], []>} : vector<256x4xbf16>, vector<4x16xbf16>, vector<256x16xf32> -> vector<256x16xf32>
    %86 = arith.addf %79, %85 : vector<256x16xf32>
    %c1_71 = arith.constant 1 : index
    %c0_72 = arith.constant 0 : index
    %c0_73 = arith.constant 0 : index
    %87 = vector.load %arg16[%c1_71, %c0_72, %c0_73] : memref<18x18x4xf32, #tpu.memory_space<vmem>>, vector<16x16x4xf32>
    %88 = arith.truncf %87 : vector<16x16x4xf32> to vector<16x16x4xbf16>
    %89 = vector.shape_cast %88 : vector<16x16x4xbf16> to vector<256x4xbf16>
    %c3 = arith.constant 3 : index
    %c0_74 = arith.constant 0 : index
    %c0_75 = arith.constant 0 : index
    %90 = vector.load %arg5[%c3, %c0_74, %c0_75] : memref<9x4x16xbf16, #tpu.memory_space<vmem>>, vector<1x4x16xbf16>
    %91 = vector.shape_cast %90 : vector<1x4x16xbf16> to vector<4x16xbf16>
    %cst_76 = arith.constant dense<0.000000e+00> : vector<256x16xf32>
    %92 = tpu.matmul %89, %91, %cst_76 {dimension_numbers = #tpu.dot_dimension_numbers<[1], [0], [0], [1], [0, 0, 1, 1], [], []>} : vector<256x4xbf16>, vector<4x16xbf16>, vector<256x16xf32> -> vector<256x16xf32>
    %93 = arith.addf %86, %92 : vector<256x16xf32>
    %c1_77 = arith.constant 1 : index
    %c1_78 = arith.constant 1 : index
    %c0_79 = arith.constant 0 : index
    %94 = vector.load %arg16[%c1_77, %c1_78, %c0_79] : memref<18x18x4xf32, #tpu.memory_space<vmem>>, vector<16x16x4xf32>
    %95 = arith.truncf %94 : vector<16x16x4xf32> to vector<16x16x4xbf16>
    %96 = vector.shape_cast %95 : vector<16x16x4xbf16> to vector<256x4xbf16>
    %c4 = arith.constant 4 : index
    %c0_80 = arith.constant 0 : index
    %c0_81 = arith.constant 0 : index
    %97 = vector.load %arg5[%c4, %c0_80, %c0_81] : memref<9x4x16xbf16, #tpu.memory_space<vmem>>, vector<1x4x16xbf16>
    %98 = vector.shape_cast %97 : vector<1x4x16xbf16> to vector<4x16xbf16>
    %cst_82 = arith.constant dense<0.000000e+00> : vector<256x16xf32>
    %99 = tpu.matmul %96, %98, %cst_82 {dimension_numbers = #tpu.dot_dimension_numbers<[1], [0], [0], [1], [0, 0, 1, 1], [], []>} : vector<256x4xbf16>, vector<4x16xbf16>, vector<256x16xf32> -> vector<256x16xf32>
    %100 = arith.addf %93, %99 : vector<256x16xf32>
    %c1_83 = arith.constant 1 : index
    %c2_84 = arith.constant 2 : index
    %c0_85 = arith.constant 0 : index
    %101 = vector.load %arg16[%c1_83, %c2_84, %c0_85] : memref<18x18x4xf32, #tpu.memory_space<vmem>>, vector<16x16x4xf32>
    %102 = arith.truncf %101 : vector<16x16x4xf32> to vector<16x16x4xbf16>
    %103 = vector.shape_cast %102 : vector<16x16x4xbf16> to vector<256x4xbf16>
    %c5 = arith.constant 5 : index
    %c0_86 = arith.constant 0 : index
    %c0_87 = arith.constant 0 : index
    %104 = vector.load %arg5[%c5, %c0_86, %c0_87] : memref<9x4x16xbf16, #tpu.memory_space<vmem>>, vector<1x4x16xbf16>
    %105 = vector.shape_cast %104 : vector<1x4x16xbf16> to vector<4x16xbf16>
    %cst_88 = arith.constant dense<0.000000e+00> : vector<256x16xf32>
    %106 = tpu.matmul %103, %105, %cst_88 {dimension_numbers = #tpu.dot_dimension_numbers<[1], [0], [0], [1], [0, 0, 1, 1], [], []>} : vector<256x4xbf16>, vector<4x16xbf16>, vector<256x16xf32> -> vector<256x16xf32>
    %107 = arith.addf %100, %106 : vector<256x16xf32>
    %c2_89 = arith.constant 2 : index
    %c0_90 = arith.constant 0 : index
    %c0_91 = arith.constant 0 : index
    %108 = vector.load %arg16[%c2_89, %c0_90, %c0_91] : memref<18x18x4xf32, #tpu.memory_space<vmem>>, vector<16x16x4xf32>
    %109 = arith.truncf %108 : vector<16x16x4xf32> to vector<16x16x4xbf16>
    %110 = vector.shape_cast %109 : vector<16x16x4xbf16> to vector<256x4xbf16>
    %c6 = arith.constant 6 : index
    %c0_92 = arith.constant 0 : index
    %c0_93 = arith.constant 0 : index
    %111 = vector.load %arg5[%c6, %c0_92, %c0_93] : memref<9x4x16xbf16, #tpu.memory_space<vmem>>, vector<1x4x16xbf16>
    %112 = vector.shape_cast %111 : vector<1x4x16xbf16> to vector<4x16xbf16>
    %cst_94 = arith.constant dense<0.000000e+00> : vector<256x16xf32>
    %113 = tpu.matmul %110, %112, %cst_94 {dimension_numbers = #tpu.dot_dimension_numbers<[1], [0], [0], [1], [0, 0, 1, 1], [], []>} : vector<256x4xbf16>, vector<4x16xbf16>, vector<256x16xf32> -> vector<256x16xf32>
    %114 = arith.addf %107, %113 : vector<256x16xf32>
    %c2_95 = arith.constant 2 : index
    %c1_96 = arith.constant 1 : index
    %c0_97 = arith.constant 0 : index
    %115 = vector.load %arg16[%c2_95, %c1_96, %c0_97] : memref<18x18x4xf32, #tpu.memory_space<vmem>>, vector<16x16x4xf32>
    %116 = arith.truncf %115 : vector<16x16x4xf32> to vector<16x16x4xbf16>
    %117 = vector.shape_cast %116 : vector<16x16x4xbf16> to vector<256x4xbf16>
    %c7 = arith.constant 7 : index
    %c0_98 = arith.constant 0 : index
    %c0_99 = arith.constant 0 : index
    %118 = vector.load %arg5[%c7, %c0_98, %c0_99] : memref<9x4x16xbf16, #tpu.memory_space<vmem>>, vector<1x4x16xbf16>
    %119 = vector.shape_cast %118 : vector<1x4x16xbf16> to vector<4x16xbf16>
    %cst_100 = arith.constant dense<0.000000e+00> : vector<256x16xf32>
    %120 = tpu.matmul %117, %119, %cst_100 {dimension_numbers = #tpu.dot_dimension_numbers<[1], [0], [0], [1], [0, 0, 1, 1], [], []>} : vector<256x4xbf16>, vector<4x16xbf16>, vector<256x16xf32> -> vector<256x16xf32>
    %121 = arith.addf %114, %120 : vector<256x16xf32>
    %c2_101 = arith.constant 2 : index
    %c2_102 = arith.constant 2 : index
    %c0_103 = arith.constant 0 : index
    %122 = vector.load %arg16[%c2_101, %c2_102, %c0_103] : memref<18x18x4xf32, #tpu.memory_space<vmem>>, vector<16x16x4xf32>
    %123 = arith.truncf %122 : vector<16x16x4xf32> to vector<16x16x4xbf16>
    %124 = vector.shape_cast %123 : vector<16x16x4xbf16> to vector<256x4xbf16>
    %c8 = arith.constant 8 : index
    %c0_104 = arith.constant 0 : index
    %c0_105 = arith.constant 0 : index
    %125 = vector.load %arg5[%c8, %c0_104, %c0_105] : memref<9x4x16xbf16, #tpu.memory_space<vmem>>, vector<1x4x16xbf16>
    %126 = vector.shape_cast %125 : vector<1x4x16xbf16> to vector<4x16xbf16>
    %cst_106 = arith.constant dense<0.000000e+00> : vector<256x16xf32>
    %127 = tpu.matmul %124, %126, %cst_106 {dimension_numbers = #tpu.dot_dimension_numbers<[1], [0], [0], [1], [0, 0, 1, 1], [], []>} : vector<256x4xbf16>, vector<4x16xbf16>, vector<256x16xf32> -> vector<256x16xf32>
    %128 = arith.addf %121, %127 : vector<256x16xf32>
    %cst_107 = arith.constant dense<0.000000e+00> : vector<16xf32>
    %129 = vector.multi_reduction <add>, %128, %cst_107 [0] : vector<256x16xf32> to vector<16xf32>
    %130 = vector.shape_cast %129 : vector<16xf32> to vector<1x16xf32>
    %131 = arith.mulf %128, %128 : vector<256x16xf32>
    %cst_108 = arith.constant dense<0.000000e+00> : vector<16xf32>
    %132 = vector.multi_reduction <add>, %131, %cst_108 [0] : vector<256x16xf32> to vector<16xf32>
    %133 = vector.shape_cast %132 : vector<16xf32> to vector<1x16xf32>
    %cst_109 = arith.constant dense<0.000000e+00> : vector<1x8xf32>
    %134 = tpu.matmul %130, %58, %cst_109 {dimension_numbers = #tpu.dot_dimension_numbers<[1], [0], [0], [1], [0, 0, 1, 1], [], []>} : vector<1x16xf32>, vector<16x8xf32>, vector<1x8xf32> -> vector<1x8xf32>
    %cst_110 = arith.constant 0.001953125 : f32
    %135 = vector.broadcast %cst_110 : f32 to vector<1x8xf32>
    %136 = arith.mulf %134, %135 : vector<1x8xf32>
    %cst_111 = arith.constant dense<0.000000e+00> : vector<1x8xf32>
    %137 = tpu.matmul %133, %58, %cst_111 {dimension_numbers = #tpu.dot_dimension_numbers<[1], [0], [0], [1], [0, 0, 1, 1], [], []>} : vector<1x16xf32>, vector<16x8xf32>, vector<1x8xf32> -> vector<1x8xf32>
    %cst_112 = arith.constant 0.001953125 : f32
    %138 = vector.broadcast %cst_112 : f32 to vector<1x8xf32>
    %139 = arith.mulf %137, %138 : vector<1x8xf32>
    %140 = arith.mulf %136, %136 : vector<1x8xf32>
    %141 = arith.subf %139, %140 : vector<1x8xf32>
    %cst_113 = arith.constant 0.000000e+00 : f32
    %142 = vector.broadcast %cst_113 : f32 to vector<1x8xf32>
    %143 = arith.maximumf %141, %142 : vector<1x8xf32>
    %cst_114 = arith.constant 9.99999974E-6 : f32
    %144 = vector.broadcast %cst_114 : f32 to vector<1x8xf32>
    %145 = arith.addf %143, %144 : vector<1x8xf32>
    %146 = math.rsqrt %145 : vector<1x8xf32>
    %cst_115 = arith.constant dense<0.000000e+00> : vector<1x16xf32>
    %147 = tpu.matmul %136, %59, %cst_115 {dimension_numbers = #tpu.dot_dimension_numbers<[1], [0], [0], [1], [0, 0, 1, 1], [], []>} : vector<1x8xf32>, vector<8x16xf32>, vector<1x16xf32> -> vector<1x16xf32>
    %cst_116 = arith.constant dense<0.000000e+00> : vector<1x16xf32>
    %148 = tpu.matmul %146, %59, %cst_116 {dimension_numbers = #tpu.dot_dimension_numbers<[1], [0], [0], [1], [0, 0, 1, 1], [], []>} : vector<1x8xf32>, vector<8x16xf32>, vector<1x16xf32> -> vector<1x16xf32>
    %149 = arith.mulf %148, %61 : vector<1x16xf32>
    %150 = arith.mulf %147, %149 : vector<1x16xf32>
    %151 = arith.subf %62, %150 : vector<1x16xf32>
    %152 = vector.broadcast %149 : vector<1x16xf32> to vector<256x16xf32>
    %153 = arith.mulf %128, %152 : vector<256x16xf32>
    %154 = vector.broadcast %151 : vector<1x16xf32> to vector<256x16xf32>
    %155 = arith.addf %153, %154 : vector<256x16xf32>
    %cst_117 = arith.constant 5.000000e-01 : f32
    %156 = vector.broadcast %cst_117 : f32 to vector<256x16xf32>
    %157 = arith.mulf %156, %155 : vector<256x16xf32>
    %cst_118 = arith.constant 1.41421354 : f32
    %158 = vector.broadcast %cst_118 : f32 to vector<256x16xf32>
    %159 = arith.divf %155, %158 : vector<256x16xf32>
    %160 = math.absf %159 : vector<256x16xf32>
    %cst_119 = arith.constant 0.327591091 : f32
    %161 = vector.broadcast %cst_119 : f32 to vector<256x16xf32>
    %162 = arith.mulf %161, %160 : vector<256x16xf32>
    %cst_120 = arith.constant 1.000000e+00 : f32
    %163 = vector.broadcast %cst_120 : f32 to vector<256x16xf32>
    %164 = arith.addf %163, %162 : vector<256x16xf32>
    %cst_121 = arith.constant 1.000000e+00 : f32
    %165 = vector.broadcast %cst_121 : f32 to vector<256x16xf32>
    %166 = arith.divf %165, %164 : vector<256x16xf32>
    %cst_122 = arith.constant 1.06140542 : f32
    %167 = vector.broadcast %cst_122 : f32 to vector<256x16xf32>
    %168 = arith.mulf %166, %167 : vector<256x16xf32>
    %cst_123 = arith.constant -1.45315206 : f32
    %169 = vector.broadcast %cst_123 : f32 to vector<256x16xf32>
    %170 = arith.addf %169, %168 : vector<256x16xf32>
    %171 = arith.mulf %166, %170 : vector<256x16xf32>
    %cst_124 = arith.constant 1.42141378 : f32
    %172 = vector.broadcast %cst_124 : f32 to vector<256x16xf32>
    %173 = arith.addf %172, %171 : vector<256x16xf32>
    %174 = arith.mulf %166, %173 : vector<256x16xf32>
    %cst_125 = arith.constant -0.284496725 : f32
    %175 = vector.broadcast %cst_125 : f32 to vector<256x16xf32>
    %176 = arith.addf %175, %174 : vector<256x16xf32>
    %177 = arith.mulf %166, %176 : vector<256x16xf32>
    %cst_126 = arith.constant 0.254829586 : f32
    %178 = vector.broadcast %cst_126 : f32 to vector<256x16xf32>
    %179 = arith.addf %178, %177 : vector<256x16xf32>
    %180 = arith.mulf %166, %179 : vector<256x16xf32>
    %cst_127 = arith.constant 0.000000e+00 : f32
    %181 = vector.broadcast %cst_127 : f32 to vector<256x16xf32>
    %182 = arith.subf %181, %160 : vector<256x16xf32>
    %183 = arith.mulf %182, %160 : vector<256x16xf32>
    %184 = math.exp %183 : vector<256x16xf32>
    %185 = arith.mulf %180, %184 : vector<256x16xf32>
    %cst_128 = arith.constant 1.000000e+00 : f32
    %186 = vector.broadcast %cst_128 : f32 to vector<256x16xf32>
    %187 = arith.subf %186, %185 : vector<256x16xf32>
    %cst_129 = arith.constant 0.000000e+00 : f32
    %188 = vector.broadcast %cst_129 : f32 to vector<256x16xf32>
    %189 = arith.cmpf oge, %159, %188 : vector<256x16xf32>
    %cst_130 = arith.constant 0.000000e+00 : f32
    %190 = vector.broadcast %cst_130 : f32 to vector<256x16xf32>
    %191 = arith.subf %190, %187 : vector<256x16xf32>
    %192 = arith.select %189, %187, %191 : vector<256x16xi1>, vector<256x16xf32>
    %cst_131 = arith.constant 1.000000e+00 : f32
    %193 = vector.broadcast %cst_131 : f32 to vector<256x16xf32>
    %194 = arith.addf %193, %192 : vector<256x16xf32>
    %195 = arith.mulf %157, %194 : vector<256x16xf32>
    %cst_132 = arith.constant 0.000000e+00 : f32
    %196 = vector.broadcast %cst_132 : f32 to vector<1x18x16xf32>
    %cst_133 = arith.constant 0.000000e+00 : f32
    %197 = vector.broadcast %cst_133 : f32 to vector<18x1x16xf32>
    %c0_134 = arith.constant 0 : index
    %c0_135 = arith.constant 0 : index
    %c0_136 = arith.constant 0 : index
    %198 = vector.load %arg17[%c0_134, %c0_135, %c0_136] : memref<18x18x16xf32, #tpu.memory_space<vmem>>, vector<1x18x16xf32>
    tpu.vector_store %arg17[%c0_134, %c0_135, %c0_136], %196 {strides = array<i32>} : memref<18x18x16xf32, #tpu.memory_space<vmem>>, vector<1x18x16xf32>,
    %c17_137 = arith.constant 17 : index
    %c0_138 = arith.constant 0 : index
    %c0_139 = arith.constant 0 : index
    %199 = vector.load %arg17[%c17_137, %c0_138, %c0_139] : memref<18x18x16xf32, #tpu.memory_space<vmem>>, vector<1x18x16xf32>
    tpu.vector_store %arg17[%c17_137, %c0_138, %c0_139], %196 {strides = array<i32>} : memref<18x18x16xf32, #tpu.memory_space<vmem>>, vector<1x18x16xf32>,
    %c0_140 = arith.constant 0 : index
    %c0_141 = arith.constant 0 : index
    %c0_142 = arith.constant 0 : index
    %200 = vector.load %arg17[%c0_140, %c0_141, %c0_142] : memref<18x18x16xf32, #tpu.memory_space<vmem>>, vector<18x1x16xf32>
    tpu.vector_store %arg17[%c0_140, %c0_141, %c0_142], %197 {strides = array<i32>} : memref<18x18x16xf32, #tpu.memory_space<vmem>>, vector<18x1x16xf32>,
    %c0_143 = arith.constant 0 : index
    %c17_144 = arith.constant 17 : index
    %c0_145 = arith.constant 0 : index
    %201 = vector.load %arg17[%c0_143, %c17_144, %c0_145] : memref<18x18x16xf32, #tpu.memory_space<vmem>>, vector<18x1x16xf32>
    tpu.vector_store %arg17[%c0_143, %c17_144, %c0_145], %197 {strides = array<i32>} : memref<18x18x16xf32, #tpu.memory_space<vmem>>, vector<18x1x16xf32>,
    %202 = vector.shape_cast %195 : vector<256x16xf32> to vector<16x16x16xf32>
    %c1_146 = arith.constant 1 : index
    %c1_147 = arith.constant 1 : index
    %c0_148 = arith.constant 0 : index
    %203 = vector.load %arg17[%c1_146, %c1_147, %c0_148] : memref<18x18x16xf32, #tpu.memory_space<vmem>>, vector<16x16x16xf32>
    tpu.vector_store %arg17[%c1_146, %c1_147, %c0_148], %202 {strides = array<i32>} : memref<18x18x16xf32, #tpu.memory_space<vmem>>, vector<16x16x16xf32>,
    %c0_149 = arith.constant 0 : index
    %c0_150 = arith.constant 0 : index
    %204 = vector.load %arg10[%c0_149, %c0_150] : memref<1x16xf32, #tpu.memory_space<vmem>>, vector<1x16xf32>
    %c0_151 = arith.constant 0 : index
    %c0_152 = arith.constant 0 : index
    %205 = vector.load %arg11[%c0_151, %c0_152] : memref<1x16xf32, #tpu.memory_space<vmem>>, vector<1x16xf32>
    %c0_153 = arith.constant 0 : index
    %c0_154 = arith.constant 0 : index
    %206 = vector.load %arg12[%c0_153, %c0_154] : memref<1x16xf32, #tpu.memory_space<vmem>>, vector<1x16xf32>
    %cst_155 = arith.constant 0.000000e+00 : f32
    %207 = vector.broadcast %cst_155 : f32 to vector<256x16xf32>
    %208 = vector.broadcast %204 : vector<1x16xf32> to vector<256x16xf32>
    %209 = arith.addf %207, %208 : vector<256x16xf32>
    %c0_156 = arith.constant 0 : index
    %c0_157 = arith.constant 0 : index
    %c0_158 = arith.constant 0 : index
    %210 = vector.load %arg17[%c0_156, %c0_157, %c0_158] : memref<18x18x16xf32, #tpu.memory_space<vmem>>, vector<16x16x16xf32>
    %211 = arith.truncf %210 : vector<16x16x16xf32> to vector<16x16x16xbf16>
    %212 = vector.shape_cast %211 : vector<16x16x16xbf16> to vector<256x16xbf16>
    %c0_159 = arith.constant 0 : index
    %c0_160 = arith.constant 0 : index
    %c0_161 = arith.constant 0 : index
    %213 = vector.load %arg9[%c0_159, %c0_160, %c0_161] : memref<9x16x16xbf16, #tpu.memory_space<vmem>>, vector<1x16x16xbf16>
    %214 = vector.shape_cast %213 : vector<1x16x16xbf16> to vector<16x16xbf16>
    %cst_162 = arith.constant dense<0.000000e+00> : vector<256x16xf32>
    %215 = tpu.matmul %212, %214, %cst_162 {dimension_numbers = #tpu.dot_dimension_numbers<[1], [0], [0], [1], [0, 0, 1, 1], [], []>} : vector<256x16xbf16>, vector<16x16xbf16>, vector<256x16xf32> -> vector<256x16xf32>
    %216 = arith.addf %209, %215 : vector<256x16xf32>
    %c0_163 = arith.constant 0 : index
    %c1_164 = arith.constant 1 : index
    %c0_165 = arith.constant 0 : index
    %217 = vector.load %arg17[%c0_163, %c1_164, %c0_165] : memref<18x18x16xf32, #tpu.memory_space<vmem>>, vector<16x16x16xf32>
    %218 = arith.truncf %217 : vector<16x16x16xf32> to vector<16x16x16xbf16>
    %219 = vector.shape_cast %218 : vector<16x16x16xbf16> to vector<256x16xbf16>
    %c1_166 = arith.constant 1 : index
    %c0_167 = arith.constant 0 : index
    %c0_168 = arith.constant 0 : index
    %220 = vector.load %arg9[%c1_166, %c0_167, %c0_168] : memref<9x16x16xbf16, #tpu.memory_space<vmem>>, vector<1x16x16xbf16>
    %221 = vector.shape_cast %220 : vector<1x16x16xbf16> to vector<16x16xbf16>
    %cst_169 = arith.constant dense<0.000000e+00> : vector<256x16xf32>
    %222 = tpu.matmul %219, %221, %cst_169 {dimension_numbers = #tpu.dot_dimension_numbers<[1], [0], [0], [1], [0, 0, 1, 1], [], []>} : vector<256x16xbf16>, vector<16x16xbf16>, vector<256x16xf32> -> vector<256x16xf32>
    %223 = arith.addf %216, %222 : vector<256x16xf32>
    %c0_170 = arith.constant 0 : index
    %c2_171 = arith.constant 2 : index
    %c0_172 = arith.constant 0 : index
    %224 = vector.load %arg17[%c0_170, %c2_171, %c0_172] : memref<18x18x16xf32, #tpu.memory_space<vmem>>, vector<16x16x16xf32>
    %225 = arith.truncf %224 : vector<16x16x16xf32> to vector<16x16x16xbf16>
    %226 = vector.shape_cast %225 : vector<16x16x16xbf16> to vector<256x16xbf16>
    %c2_173 = arith.constant 2 : index
    %c0_174 = arith.constant 0 : index
    %c0_175 = arith.constant 0 : index
    %227 = vector.load %arg9[%c2_173, %c0_174, %c0_175] : memref<9x16x16xbf16, #tpu.memory_space<vmem>>, vector<1x16x16xbf16>
    %228 = vector.shape_cast %227 : vector<1x16x16xbf16> to vector<16x16xbf16>
    %cst_176 = arith.constant dense<0.000000e+00> : vector<256x16xf32>
    %229 = tpu.matmul %226, %228, %cst_176 {dimension_numbers = #tpu.dot_dimension_numbers<[1], [0], [0], [1], [0, 0, 1, 1], [], []>} : vector<256x16xbf16>, vector<16x16xbf16>, vector<256x16xf32> -> vector<256x16xf32>
    %230 = arith.addf %223, %229 : vector<256x16xf32>
    %c1_177 = arith.constant 1 : index
    %c0_178 = arith.constant 0 : index
    %c0_179 = arith.constant 0 : index
    %231 = vector.load %arg17[%c1_177, %c0_178, %c0_179] : memref<18x18x16xf32, #tpu.memory_space<vmem>>, vector<16x16x16xf32>
    %232 = arith.truncf %231 : vector<16x16x16xf32> to vector<16x16x16xbf16>
    %233 = vector.shape_cast %232 : vector<16x16x16xbf16> to vector<256x16xbf16>
    %c3_180 = arith.constant 3 : index
    %c0_181 = arith.constant 0 : index
    %c0_182 = arith.constant 0 : index
    %234 = vector.load %arg9[%c3_180, %c0_181, %c0_182] : memref<9x16x16xbf16, #tpu.memory_space<vmem>>, vector<1x16x16xbf16>
    %235 = vector.shape_cast %234 : vector<1x16x16xbf16> to vector<16x16xbf16>
    %cst_183 = arith.constant dense<0.000000e+00> : vector<256x16xf32>
    %236 = tpu.matmul %233, %235, %cst_183 {dimension_numbers = #tpu.dot_dimension_numbers<[1], [0], [0], [1], [0, 0, 1, 1], [], []>} : vector<256x16xbf16>, vector<16x16xbf16>, vector<256x16xf32> -> vector<256x16xf32>
    %237 = arith.addf %230, %236 : vector<256x16xf32>
    %c1_184 = arith.constant 1 : index
    %c1_185 = arith.constant 1 : index
    %c0_186 = arith.constant 0 : index
    %238 = vector.load %arg17[%c1_184, %c1_185, %c0_186] : memref<18x18x16xf32, #tpu.memory_space<vmem>>, vector<16x16x16xf32>
    %239 = arith.truncf %238 : vector<16x16x16xf32> to vector<16x16x16xbf16>
    %240 = vector.shape_cast %239 : vector<16x16x16xbf16> to vector<256x16xbf16>
    %c4_187 = arith.constant 4 : index
    %c0_188 = arith.constant 0 : index
    %c0_189 = arith.constant 0 : index
    %241 = vector.load %arg9[%c4_187, %c0_188, %c0_189] : memref<9x16x16xbf16, #tpu.memory_space<vmem>>, vector<1x16x16xbf16>
    %242 = vector.shape_cast %241 : vector<1x16x16xbf16> to vector<16x16xbf16>
    %cst_190 = arith.constant dense<0.000000e+00> : vector<256x16xf32>
    %243 = tpu.matmul %240, %242, %cst_190 {dimension_numbers = #tpu.dot_dimension_numbers<[1], [0], [0], [1], [0, 0, 1, 1], [], []>} : vector<256x16xbf16>, vector<16x16xbf16>, vector<256x16xf32> -> vector<256x16xf32>
    %244 = arith.addf %237, %243 : vector<256x16xf32>
    %c1_191 = arith.constant 1 : index
    %c2_192 = arith.constant 2 : index
    %c0_193 = arith.constant 0 : index
    %245 = vector.load %arg17[%c1_191, %c2_192, %c0_193] : memref<18x18x16xf32, #tpu.memory_space<vmem>>, vector<16x16x16xf32>
    %246 = arith.truncf %245 : vector<16x16x16xf32> to vector<16x16x16xbf16>
    %247 = vector.shape_cast %246 : vector<16x16x16xbf16> to vector<256x16xbf16>
    %c5_194 = arith.constant 5 : index
    %c0_195 = arith.constant 0 : index
    %c0_196 = arith.constant 0 : index
    %248 = vector.load %arg9[%c5_194, %c0_195, %c0_196] : memref<9x16x16xbf16, #tpu.memory_space<vmem>>, vector<1x16x16xbf16>
    %249 = vector.shape_cast %248 : vector<1x16x16xbf16> to vector<16x16xbf16>
    %cst_197 = arith.constant dense<0.000000e+00> : vector<256x16xf32>
    %250 = tpu.matmul %247, %249, %cst_197 {dimension_numbers = #tpu.dot_dimension_numbers<[1], [0], [0], [1], [0, 0, 1, 1], [], []>} : vector<256x16xbf16>, vector<16x16xbf16>, vector<256x16xf32> -> vector<256x16xf32>
    %251 = arith.addf %244, %250 : vector<256x16xf32>
    %c2_198 = arith.constant 2 : index
    %c0_199 = arith.constant 0 : index
    %c0_200 = arith.constant 0 : index
    %252 = vector.load %arg17[%c2_198, %c0_199, %c0_200] : memref<18x18x16xf32, #tpu.memory_space<vmem>>, vector<16x16x16xf32>
    %253 = arith.truncf %252 : vector<16x16x16xf32> to vector<16x16x16xbf16>
    %254 = vector.shape_cast %253 : vector<16x16x16xbf16> to vector<256x16xbf16>
    %c6_201 = arith.constant 6 : index
    %c0_202 = arith.constant 0 : index
    %c0_203 = arith.constant 0 : index
    %255 = vector.load %arg9[%c6_201, %c0_202, %c0_203] : memref<9x16x16xbf16, #tpu.memory_space<vmem>>, vector<1x16x16xbf16>
    %256 = vector.shape_cast %255 : vector<1x16x16xbf16> to vector<16x16xbf16>
    %cst_204 = arith.constant dense<0.000000e+00> : vector<256x16xf32>
    %257 = tpu.matmul %254, %256, %cst_204 {dimension_numbers = #tpu.dot_dimension_numbers<[1], [0], [0], [1], [0, 0, 1, 1], [], []>} : vector<256x16xbf16>, vector<16x16xbf16>, vector<256x16xf32> -> vector<256x16xf32>
    %258 = arith.addf %251, %257 : vector<256x16xf32>
    %c2_205 = arith.constant 2 : index
    %c1_206 = arith.constant 1 : index
    %c0_207 = arith.constant 0 : index
    %259 = vector.load %arg17[%c2_205, %c1_206, %c0_207] : memref<18x18x16xf32, #tpu.memory_space<vmem>>, vector<16x16x16xf32>
    %260 = arith.truncf %259 : vector<16x16x16xf32> to vector<16x16x16xbf16>
    %261 = vector.shape_cast %260 : vector<16x16x16xbf16> to vector<256x16xbf16>
    %c7_208 = arith.constant 7 : index
    %c0_209 = arith.constant 0 : index
    %c0_210 = arith.constant 0 : index
    %262 = vector.load %arg9[%c7_208, %c0_209, %c0_210] : memref<9x16x16xbf16, #tpu.memory_space<vmem>>, vector<1x16x16xbf16>
    %263 = vector.shape_cast %262 : vector<1x16x16xbf16> to vector<16x16xbf16>
    %cst_211 = arith.constant dense<0.000000e+00> : vector<256x16xf32>
    %264 = tpu.matmul %261, %263, %cst_211 {dimension_numbers = #tpu.dot_dimension_numbers<[1], [0], [0], [1], [0, 0, 1, 1], [], []>} : vector<256x16xbf16>, vector<16x16xbf16>, vector<256x16xf32> -> vector<256x16xf32>
    %265 = arith.addf %258, %264 : vector<256x16xf32>
    %c2_212 = arith.constant 2 : index
    %c2_213 = arith.constant 2 : index
    %c0_214 = arith.constant 0 : index
    %266 = vector.load %arg17[%c2_212, %c2_213, %c0_214] : memref<18x18x16xf32, #tpu.memory_space<vmem>>, vector<16x16x16xf32>
    %267 = arith.truncf %266 : vector<16x16x16xf32> to vector<16x16x16xbf16>
    %268 = vector.shape_cast %267 : vector<16x16x16xbf16> to vector<256x16xbf16>
    %c8_215 = arith.constant 8 : index
    %c0_216 = arith.constant 0 : index
    %c0_217 = arith.constant 0 : index
    %269 = vector.load %arg9[%c8_215, %c0_216, %c0_217] : memref<9x16x16xbf16, #tpu.memory_space<vmem>>, vector<1x16x16xbf16>
    %270 = vector.shape_cast %269 : vector<1x16x16xbf16> to vector<16x16xbf16>
    %cst_218 = arith.constant dense<0.000000e+00> : vector<256x16xf32>
    %271 = tpu.matmul %268, %270, %cst_218 {dimension_numbers = #tpu.dot_dimension_numbers<[1], [0], [0], [1], [0, 0, 1, 1], [], []>} : vector<256x16xbf16>, vector<16x16xbf16>, vector<256x16xf32> -> vector<256x16xf32>
    %272 = arith.addf %265, %271 : vector<256x16xf32>
    %cst_219 = arith.constant dense<0.000000e+00> : vector<16xf32>
    %273 = vector.multi_reduction <add>, %272, %cst_219 [0] : vector<256x16xf32> to vector<16xf32>
    %274 = vector.shape_cast %273 : vector<16xf32> to vector<1x16xf32>
    %275 = arith.mulf %272, %272 : vector<256x16xf32>
    %cst_220 = arith.constant dense<0.000000e+00> : vector<16xf32>
    %276 = vector.multi_reduction <add>, %275, %cst_220 [0] : vector<256x16xf32> to vector<16xf32>
    %277 = vector.shape_cast %276 : vector<16xf32> to vector<1x16xf32>
    %cst_221 = arith.constant dense<0.000000e+00> : vector<1x8xf32>
    %278 = tpu.matmul %274, %58, %cst_221 {dimension_numbers = #tpu.dot_dimension_numbers<[1], [0], [0], [1], [0, 0, 1, 1], [], []>} : vector<1x16xf32>, vector<16x8xf32>, vector<1x8xf32> -> vector<1x8xf32>
    %cst_222 = arith.constant 0.001953125 : f32
    %279 = vector.broadcast %cst_222 : f32 to vector<1x8xf32>
    %280 = arith.mulf %278, %279 : vector<1x8xf32>
    %cst_223 = arith.constant dense<0.000000e+00> : vector<1x8xf32>
    %281 = tpu.matmul %277, %58, %cst_223 {dimension_numbers = #tpu.dot_dimension_numbers<[1], [0], [0], [1], [0, 0, 1, 1], [], []>} : vector<1x16xf32>, vector<16x8xf32>, vector<1x8xf32> -> vector<1x8xf32>
    %cst_224 = arith.constant 0.001953125 : f32
    %282 = vector.broadcast %cst_224 : f32 to vector<1x8xf32>
    %283 = arith.mulf %281, %282 : vector<1x8xf32>
    %284 = arith.mulf %280, %280 : vector<1x8xf32>
    %285 = arith.subf %283, %284 : vector<1x8xf32>
    %cst_225 = arith.constant 0.000000e+00 : f32
    %286 = vector.broadcast %cst_225 : f32 to vector<1x8xf32>
    %287 = arith.maximumf %285, %286 : vector<1x8xf32>
    %cst_226 = arith.constant 9.99999974E-6 : f32
    %288 = vector.broadcast %cst_226 : f32 to vector<1x8xf32>
    %289 = arith.addf %287, %288 : vector<1x8xf32>
    %290 = math.rsqrt %289 : vector<1x8xf32>
    %cst_227 = arith.constant dense<0.000000e+00> : vector<1x16xf32>
    %291 = tpu.matmul %280, %59, %cst_227 {dimension_numbers = #tpu.dot_dimension_numbers<[1], [0], [0], [1], [0, 0, 1, 1], [], []>} : vector<1x8xf32>, vector<8x16xf32>, vector<1x16xf32> -> vector<1x16xf32>
    %cst_228 = arith.constant dense<0.000000e+00> : vector<1x16xf32>
    %292 = tpu.matmul %290, %59, %cst_228 {dimension_numbers = #tpu.dot_dimension_numbers<[1], [0], [0], [1], [0, 0, 1, 1], [], []>} : vector<1x8xf32>, vector<8x16xf32>, vector<1x16xf32> -> vector<1x16xf32>
    %293 = arith.mulf %292, %205 : vector<1x16xf32>
    %294 = arith.mulf %291, %293 : vector<1x16xf32>
    %295 = arith.subf %206, %294 : vector<1x16xf32>
    %296 = vector.broadcast %293 : vector<1x16xf32> to vector<256x16xf32>
    %297 = arith.mulf %272, %296 : vector<256x16xf32>
    %298 = vector.broadcast %295 : vector<1x16xf32> to vector<256x16xf32>
    %299 = arith.addf %297, %298 : vector<256x16xf32>
    %cst_229 = arith.constant 5.000000e-01 : f32
    %300 = vector.broadcast %cst_229 : f32 to vector<256x16xf32>
    %301 = arith.mulf %300, %299 : vector<256x16xf32>
    %cst_230 = arith.constant 1.41421354 : f32
    %302 = vector.broadcast %cst_230 : f32 to vector<256x16xf32>
    %303 = arith.divf %299, %302 : vector<256x16xf32>
    %304 = math.absf %303 : vector<256x16xf32>
    %cst_231 = arith.constant 0.327591091 : f32
    %305 = vector.broadcast %cst_231 : f32 to vector<256x16xf32>
    %306 = arith.mulf %305, %304 : vector<256x16xf32>
    %cst_232 = arith.constant 1.000000e+00 : f32
    %307 = vector.broadcast %cst_232 : f32 to vector<256x16xf32>
    %308 = arith.addf %307, %306 : vector<256x16xf32>
    %cst_233 = arith.constant 1.000000e+00 : f32
    %309 = vector.broadcast %cst_233 : f32 to vector<256x16xf32>
    %310 = arith.divf %309, %308 : vector<256x16xf32>
    %cst_234 = arith.constant 1.06140542 : f32
    %311 = vector.broadcast %cst_234 : f32 to vector<256x16xf32>
    %312 = arith.mulf %310, %311 : vector<256x16xf32>
    %cst_235 = arith.constant -1.45315206 : f32
    %313 = vector.broadcast %cst_235 : f32 to vector<256x16xf32>
    %314 = arith.addf %313, %312 : vector<256x16xf32>
    %315 = arith.mulf %310, %314 : vector<256x16xf32>
    %cst_236 = arith.constant 1.42141378 : f32
    %316 = vector.broadcast %cst_236 : f32 to vector<256x16xf32>
    %317 = arith.addf %316, %315 : vector<256x16xf32>
    %318 = arith.mulf %310, %317 : vector<256x16xf32>
    %cst_237 = arith.constant -0.284496725 : f32
    %319 = vector.broadcast %cst_237 : f32 to vector<256x16xf32>
    %320 = arith.addf %319, %318 : vector<256x16xf32>
    %321 = arith.mulf %310, %320 : vector<256x16xf32>
    %cst_238 = arith.constant 0.254829586 : f32
    %322 = vector.broadcast %cst_238 : f32 to vector<256x16xf32>
    %323 = arith.addf %322, %321 : vector<256x16xf32>
    %324 = arith.mulf %310, %323 : vector<256x16xf32>
    %cst_239 = arith.constant 0.000000e+00 : f32
    %325 = vector.broadcast %cst_239 : f32 to vector<256x16xf32>
    %326 = arith.subf %325, %304 : vector<256x16xf32>
    %327 = arith.mulf %326, %304 : vector<256x16xf32>
    %328 = math.exp %327 : vector<256x16xf32>
    %329 = arith.mulf %324, %328 : vector<256x16xf32>
    %cst_240 = arith.constant 1.000000e+00 : f32
    %330 = vector.broadcast %cst_240 : f32 to vector<256x16xf32>
    %331 = arith.subf %330, %329 : vector<256x16xf32>
    %cst_241 = arith.constant 0.000000e+00 : f32
    %332 = vector.broadcast %cst_241 : f32 to vector<256x16xf32>
    %333 = arith.cmpf oge, %303, %332 : vector<256x16xf32>
    %cst_242 = arith.constant 0.000000e+00 : f32
    %334 = vector.broadcast %cst_242 : f32 to vector<256x16xf32>
    %335 = arith.subf %334, %331 : vector<256x16xf32>
    %336 = arith.select %333, %331, %335 : vector<256x16xi1>, vector<256x16xf32>
    %cst_243 = arith.constant 1.000000e+00 : f32
    %337 = vector.broadcast %cst_243 : f32 to vector<256x16xf32>
    %338 = arith.addf %337, %336 : vector<256x16xf32>
    %339 = arith.mulf %301, %338 : vector<256x16xf32>
    %340 = vector.shape_cast %339 : vector<256x16xf32> to vector<16x16x16xf32>
    %c0_244 = arith.constant 0 : index
    %c0_245 = arith.constant 0 : index
    %c0_246 = arith.constant 0 : index
    %c0_247 = arith.constant 0 : index
    %341 = vector.load %arg15[%c0_244, %c0_245, %c0_246, %c0_247] : memref<1x16x16x16xf32, #tpu.memory_space<vmem>>, vector<1x16x16x16xf32>
    %342 = vector.shape_cast %341 : vector<1x16x16x16xf32> to vector<16x16x16xf32>
    %343 = vector.shape_cast %340 : vector<16x16x16xf32> to vector<1x16x16x16xf32>
    tpu.vector_store %arg15[%c0_244, %c0_245, %c0_246, %c0_247], %343 {strides = array<i32>} : memref<1x16x16x16xf32, #tpu.memory_space<vmem>>, vector<1x16x16x16xf32>,
    return
  }
  func.func @transform_0(%arg0: i32) -> (i32, i32, i32, i32) {
    %c0_i32 = arith.constant 0 : i32
    %c0_i32_0 = arith.constant 0 : i32
    %c0_i32_1 = arith.constant 0 : i32
    %c0_i32_2 = arith.constant 0 : i32
    return %arg0, %c0_i32, %c0_i32_0, %c0_i32_1 : i32, i32, i32, i32
  }
  func.func @transform_1(%arg0: i32) -> (i32, i32, i32) {
    %c0_i32 = arith.constant 0 : i32
    %c0_i32_0 = arith.constant 0 : i32
    %c0_i32_1 = arith.constant 0 : i32
    return %arg0, %c0_i32, %c0_i32_0 : i32, i32, i32
  }
  func.func @transform_2(%arg0: i32) -> (i32, i32) {
    %c0_i32 = arith.constant 0 : i32
    %c0_i32_0 = arith.constant 0 : i32
    %c0_i32_1 = arith.constant 0 : i32
    return %c0_i32, %c0_i32_0 : i32, i32
  }
  func.func @transform_3(%arg0: i32) -> (i32, i32) {
    %c0_i32 = arith.constant 0 : i32
    %c0_i32_0 = arith.constant 0 : i32
    %c0_i32_1 = arith.constant 0 : i32
    return %c0_i32, %c0_i32_0 : i32, i32
  }
  func.func @transform_4(%arg0: i32) -> (i32, i32, i32) {
    %c0_i32 = arith.constant 0 : i32
    %c0_i32_0 = arith.constant 0 : i32
    %c0_i32_1 = arith.constant 0 : i32
    %c0_i32_2 = arith.constant 0 : i32
    return %c0_i32, %c0_i32_0, %c0_i32_1 : i32, i32, i32
  }
  func.func @transform_5(%arg0: i32) -> (i32, i32) {
    %c0_i32 = arith.constant 0 : i32
    %c0_i32_0 = arith.constant 0 : i32
    %c0_i32_1 = arith.constant 0 : i32
    return %c0_i32, %c0_i32_0 : i32, i32
  }
  func.func @transform_6(%arg0: i32) -> (i32, i32) {
    %c0_i32 = arith.constant 0 : i32
    %c0_i32_0 = arith.constant 0 : i32
    %c0_i32_1 = arith.constant 0 : i32
    return %c0_i32, %c0_i32_0 : i32, i32
  }
  func.func @transform_7(%arg0: i32) -> (i32, i32) {
    %c0_i32 = arith.constant 0 : i32
    %c0_i32_0 = arith.constant 0 : i32
    %c0_i32_1 = arith.constant 0 : i32
    return %c0_i32, %c0_i32_0 : i32, i32
  }
  func.func @transform_8(%arg0: i32) -> (i32, i32, i32) {
    %c0_i32 = arith.constant 0 : i32
    %c0_i32_0 = arith.constant 0 : i32
    %c0_i32_1 = arith.constant 0 : i32
    %c0_i32_2 = arith.constant 0 : i32
    return %c0_i32, %c0_i32_0, %c0_i32_1 : i32, i32, i32
  }
  func.func @transform_9(%arg0: i32) -> (i32, i32) {
    %c0_i32 = arith.constant 0 : i32
    %c0_i32_0 = arith.constant 0 : i32
    %c0_i32_1 = arith.constant 0 : i32
    return %c0_i32, %c0_i32_0 : i32, i32
  }
  func.func @transform_10(%arg0: i32) -> (i32, i32) {
    %c0_i32 = arith.constant 0 : i32
    %c0_i32_0 = arith.constant 0 : i32
    %c0_i32_1 = arith.constant 0 : i32
    return %c0_i32, %c0_i32_0 : i32, i32
  }
  func.func @transform_11(%arg0: i32) -> (i32, i32) {
    %c0_i32 = arith.constant 0 : i32
    %c0_i32_0 = arith.constant 0 : i32
    %c0_i32_1 = arith.constant 0 : i32
    return %c0_i32, %c0_i32_0 : i32, i32
  }
  func.func @transform_12(%arg0: i32) -> (i32, i32) {
    %c0_i32 = arith.constant 0 : i32
    %c0_i32_0 = arith.constant 0 : i32
    %c0_i32_1 = arith.constant 0 : i32
    return %c0_i32, %c0_i32_0 : i32, i32
  }
  func.func @transform_13(%arg0: i32) -> (i32, i32) {
    %c0_i32 = arith.constant 0 : i32
    %c0_i32_0 = arith.constant 0 : i32
    %c0_i32_1 = arith.constant 0 : i32
    return %c0_i32, %c0_i32_0 : i32, i32
  }
  func.func @transform_14(%arg0: i32) -> (i32, i32, i32, i32) {
    %c0_i32 = arith.constant 0 : i32
    %c0_i32_0 = arith.constant 0 : i32
    %c0_i32_1 = arith.constant 0 : i32
    %c0_i32_2 = arith.constant 0 : i32
    return %arg0, %c0_i32, %c0_i32_0, %c0_i32_1 : i32, i32, i32, i32
  }
}

</mosaic_0001>

<bundles_post_ra>
// kernel: double_conv_forward.1
= control target key start
LH: loop header
LB: loop body
LE: loop exit
PB: predicated region body
PF: predicated region fallthrough
CT: control target
= control target key end

     0   :  { %s11408_s29 = smov 0   ;;  %s15693_s0 = inlined_call_operand.vmem [shape: f32[2,16,16,4], index: 0, kind: input, shape index: {}]   ;;  %s15694_s1 = inlined_call_operand.vmem [shape: f32[2,1,32], index: 1, kind: input, shape index: {}]   ;;  %s15695_s2 = inlined_call_operand.vmem [shape: f32[32,4], index: 2, kind: input, shape index: {}]   ;;  %s15696_s3 = inlined_call_operand.vmem [shape: f32[1,4], index: 3, kind: input, shape index: {}]   ;;  %s15697_s4 = inlined_call_operand.vmem [shape: bf16[9,4,16], index: 4, kind: input, shape index: {}]   ;;  %s15698_s5 = inlined_call_operand.vmem [shape: f32[1,16], index: 5, kind: input, shape index: {}]   ;;  %s15699_s6 = inlined_call_operand.vmem [shape: f32[1,16], index: 6, kind: input, shape index: {}]   ;;  %s15700_s7 = inlined_call_operand.vmem [shape: f32[1,16], index: 7, kind: input, shape index: {}]   ;;  %s15701_s8 = inlined_call_operand.vmem [shape: bf16[9,16,16], index: 8, kind: input, shape index: {}]   ;;  %s15702_s9 = inlined_call_operand.vmem [shape: f32[1,16], index: 9, kind: input, shape index: {}]   ;;  %s15703_s10 = inlined_call_operand.vmem [shape: f32[1,16], index: 10, kind: input, shape index: {}]   ;;  %s15704_s11 = inlined_call_operand.vmem [shape: f32[1,16], index: 11, kind: input, shape index: {}]   ;;  %s15705_s12 = inlined_call_operand.vmem [shape: f32[16,8], index: 12, kind: input, shape index: {}]   ;;  %s15706_s13 = inlined_call_operand.vmem [shape: f32[8,16], index: 13, kind: input, shape index: {}]   ;;  %s15707_s14 = inlined_call_operand.vmem [shape: f32[2,16,16,16], index: 14, kind: output, shape index: {}]  }
   0x1 LB: > { %s9086_s30 = sadd.s32 4294967295, %s11328_s29   ;;  %p9090_p0 = scmp.ge.s32.totalorder %s11328_s29, 1  ;;  %s11328_s29 = sphi %s11408_s29, %s24_s29  }
   0x2   : > { %p420_p1 = scmp.lt.s32.totalorder %s11328_s29, 3 }
   0x4   : > { %p421_p2 = pnand %p9090_p0, %p420_p1 }
   0x6   : > { %424 = sbr.rel (%p421_p2) target bundleno = 3405 (0xd4d), region = 76 }
   0xd   : > { %v484_v0 = vld [vmem:[%s15695_s2] sm:$0xff]  ;;  %v485_v1 = vld [vmem:[%s15695_s2 + $0x8] sm:$0xff]  ;;  %v486_v2 = vld [vmem:[%s15695_s2 + $0x10] sm:$0xff]  ;;  %v11330_v3 = vmov 0.0|0.0   ;;  %vm15909_vm0 = vmmov 0   ;;  %v15708_v6 = vmov 0.0   ;;  %v669_v37 = vlaneseq }
   0xe   : > { %10433 = vmatprep.subr.bf16.mxu0 %v11330_v3  ;;  %v10434_v4 = vpack.c.bf16 %v485_v1, %v484_v0  ;;  %v487_v5 = vld [vmem:[%s15695_s2 + $0x18] sm:$0xff]  ;;  %9770 = vmatprep.mubr.msk.f32.mxu0 %vm15909_vm0, %v15708_v6  ;;  %p469_p3 = scmp.lt.s32.totalorder %s9086_s30, 1  ;;  %vm489_vm1 = vcmask 261120   ;;  %v799_v9 = vld [vmem:[%s15697_s4] sm:$0x3]  ;;  %vm848_vm2 = vcmask 1041408  }
   0xf   : > { %v10437_v7 = vpack.c.bf16 %v487_v5, %v486_v2  ;;  %vm591_vm3 = vcmask 31744   ;;  %vm600_vm4 = vcmask 24576   ;;  %11027 = vmatprep.subr.msk.bf16.mxu1 %vm848_vm2, %v799_v9  ;;  %v850_v10 = vsel %vm848_vm2, %v799_v9, 0  ;;  %v11521_v11 = vld [vmem:[%s15697_s4 + $0x2] sm:$0x3] }
  0x10   : > { %10435 = vmatpush3.bf16.msra.mxu0 %v10434_v4  ;;  %s17311_s30 = smov (!%p469_p3, %s9086_s30), 1  ;;  %592 = vst.msk [vmem:[#allocation2] sm:$0xff] %vm591_vm3, %v15708_v6  ;;  %593 = vst.msk [vmem:[#allocation2 + $0x8] sm:$0xff] %vm591_vm3, %v15708_v6  ;;  %9774 = vmatpush3.bf16.msra.mxu1 %v850_v10  ;;  %vm594_vm5 = vcmask 25600   ;;  %v488_v15 = vld [vmem:[%s15696_s3] sm:$0x1] }
  0x11   : > { %10436 = vmatprep.subr.bf16.mxu0 %v11330_v3  ;;  %s476_s25 = scalar_lea.vmem %s15694_s1, %s17311_s30  ;;  %597 = vst.msk [vmem:[#allocation2 + $0x198] sm:$0xff] %vm591_vm3, %v15708_v6  ;;  %598 = vst.msk [vmem:[#allocation2 + $0x1a0] sm:$0xff] %vm591_vm3, %v15708_v6  ;;  %11028 = vmatprep.subr.msk.bf16.mxu1 %vm848_vm2, %v11521_v11  ;;  %s9429_s18 = sshll.u32 %s17311_s30, 8  ;;  %v670_v40 = vshrl.u32 %v669_v37, 7  ;;  %vm15912_vm7 = vcmask 130048   ;;  %vm15904_vm8 = vcmask 64512  }
  0x12   : > { %v483_v8 = vld [vmem:[%s476_s25] sm:$0x1]  ;;  %602 = vst.msk [vmem:[#allocation2 + $0x18] sm:$0x1] %vm600_vm4, %v15708_v6  ;;  %603 = vst.msk [vmem:[#allocation2 + $0x30] sm:$0x1] %vm600_vm4, %v15708_v6  ;;  %s11545_s21 = scalar_lea.vmem %s15693_s0, %s9429_s18  ;;  %s15592_s26 = scalar_lea.vmem %s15707_s14, %s9429_s18 }
  0x13   : > { %604 = vst.msk [vmem:[#allocation2 + $0x48] sm:$0x1] %vm600_vm4, %v15708_v6  ;;  %605 = vst.msk [vmem:[#allocation2 + $0x60] sm:$0x1] %vm600_vm4, %v15708_v6  ;;  %v11547_v45 = vsub.s32 0, %v670_v40  ;;  %v637_v46 = vld [vmem:[%s11545_s21] sm:$0xff] }
  0x14   : > { %10438 = vmatpush3.bf16.msra.mxu0 %v10437_v7  ;;  %606 = vst.msk [vmem:[#allocation2 + $0x78] sm:$0x1] %vm600_vm4, %v15708_v6  ;;  %607 = vst.msk [vmem:[#allocation2 + $0x90] sm:$0x1] %vm600_vm4, %v15708_v6  ;;  %v638_v47 = vld [vmem:[%s11545_s21 + $0x8] sm:$0xff]  ;;  %v639_v48 = vld [vmem:[%s11545_s21 + $0x10] sm:$0xff] }
  0x15   : > { %10442 = vmatprep.subr.bf16.mxu0 %v11330_v3  ;;  %608 = vst.msk [vmem:[#allocation2 + $0xa8] sm:$0x1] %vm600_vm4, %v15708_v6  ;;  %609 = vst.msk [vmem:[#allocation2 + $0xc0] sm:$0x1] %vm600_vm4, %v15708_v6  ;;  %v640_v49 = vld [vmem:[%s11545_s21 + $0x18] sm:$0xff]  ;;  %v641_v51 = vld [vmem:[%s11545_s21 + $0x20] sm:$0xff] }
  0x16   : > { %610 = vst.msk [vmem:[#allocation2 + $0xd8] sm:$0x1] %vm600_vm4, %v15708_v6  ;;  %611 = vst.msk [vmem:[#allocation2 + $0xf0] sm:$0x1] %vm600_vm4, %v15708_v6  ;;  %v642_v52 = vld [vmem:[%s11545_s21 + $0x28] sm:$0xff]  ;;  %v643_v53 = vld [vmem:[%s11545_s21 + $0x30] sm:$0xff] }
  0x17   : > { %9771 = vmatmul.mubr.msk.f32.vlgmr.msra.gmra.mrb[0].mxu0 %vm489_vm1, %v483_v8  ;;  %612 = vst.msk [vmem:[#allocation2 + $0x108] sm:$0x1] %vm600_vm4, %v15708_v6  ;;  %613 = vst.msk [vmem:[#allocation2 + $0x120] sm:$0x1] %vm600_vm4, %v15708_v6  ;;  %v752_v12 = vld [vmem:[#allocation2 + $0x8] sm:$0xff]  ;;  %v644_v54 = vld [vmem:[%s11545_s21 + $0x38] sm:$0xff] }
  0x18   : > { %10090 = vmatprep.mubr.msk.f32.mxu0 %vm15909_vm0, %v15708_v6  ;;  %614 = vst.msk [vmem:[#allocation2 + $0x138] sm:$0x1] %vm600_vm4, %v15708_v6  ;;  %615 = vst.msk [vmem:[#allocation2 + $0x150] sm:$0x1] %vm600_vm4, %v15708_v6  ;;  %v645_v55 = vld [vmem:[%s11545_s21 + $0x40] sm:$0xff]  ;;  %v646_v56 = vld [vmem:[%s11545_s21 + $0x48] sm:$0xff] }
  0x19   : > { %616 = vst.msk [vmem:[#allocation2 + $0x168] sm:$0x1] %vm600_vm4, %v15708_v6  ;;  %617 = vst.msk [vmem:[#allocation2 + $0x180] sm:$0x1] %vm600_vm4, %v15708_v6  ;;  %v647_v58 = vld [vmem:[%s11545_s21 + $0x50] sm:$0xff]  ;;  %v648_v59 = vld [vmem:[%s11545_s21 + $0x58] sm:$0xff] }
  0x1a   : > { %620 = vst.msk [vmem:[#allocation2 + $0x29] sm:$0x1] %vm600_vm4, %v15708_v6  ;;  %621 = vst.msk [vmem:[#allocation2 + $0x41] sm:$0x1] %vm600_vm4, %v15708_v6  ;;  %v649_v60 = vld [vmem:[%s11545_s21 + $0x60] sm:$0xff]  ;;  %v650_v61 = vld [vmem:[%s11545_s21 + $0x68] sm:$0xff] }
  0x1b   : > { %622 = vst.msk [vmem:[#allocation2 + $0x59] sm:$0x1] %vm600_vm4, %v15708_v6  ;;  %623 = vst.msk [vmem:[#allocation2 + $0x71] sm:$0x1] %vm600_vm4, %v15708_v6  ;;  %v651_v62 = vld [vmem:[%s11545_s21 + $0x70] sm:$0xff]  ;;  %v652_v63 = vld [vmem:[%s11545_s21 + $0x78] sm:$0xff] }
  0x1c   : > { %624 = vst.msk [vmem:[#allocation2 + $0x89] sm:$0x1] %vm600_vm4, %v15708_v6  ;;  %625 = vst.msk [vmem:[#allocation2 + $0xa1] sm:$0x1] %vm600_vm4, %v15708_v6  ;;  %v653_v5 = vld [vmem:[%s11545_s21 + $0x80] sm:$0xff]  ;;  %v654_v7 = vld [vmem:[%s11545_s21 + $0x88] sm:$0xff] }
  0x1d   : > { %626 = vst.msk [vmem:[#allocation2 + $0xb9] sm:$0x1] %vm600_vm4, %v15708_v6  ;;  %627 = vst.msk [vmem:[#allocation2 + $0xd1] sm:$0x1] %vm600_vm4, %v15708_v6  ;;  %v655_v8 = vld [vmem:[%s11545_s21 + $0x90] sm:$0xff] }
  0x1e   : > { %628 = vst.msk [vmem:[#allocation2 + $0xe9] sm:$0x1] %vm600_vm4, %v15708_v6  ;;  %629 = vst.msk [vmem:[#allocation2 + $0x101] sm:$0x1] %vm600_vm4, %v15708_v6  ;;  %v667_v37 = vld [vmem:[%s11545_s21 + $0xf0] sm:$0xff] }
  0x1f   : > { %630 = vst.msk [vmem:[#allocation2 + $0x119] sm:$0x1] %vm600_vm4, %v15708_v6  ;;  %631 = vst.msk [vmem:[#allocation2 + $0x131] sm:$0x1] %vm600_vm4, %v15708_v6 }
  0x20   : > { %632 = vst.msk [vmem:[#allocation2 + $0x149] sm:$0x1] %vm600_vm4, %v15708_v6  ;;  %633 = vst.msk [vmem:[#allocation2 + $0x161] sm:$0x1] %vm600_vm4, %v15708_v6 }
  0x21   : > { %634 = vst.msk [vmem:[#allocation2 + $0x179] sm:$0x1] %vm600_vm4, %v15708_v6  ;;  %635 = vst.msk [vmem:[#allocation2 + $0x191] sm:$0x1] %vm600_vm4, %v15708_v6 }
  0x22   : > { %601 = vst.msk [vmem:[#allocation2] sm:$0x1] %vm600_vm4, %v15708_v6  ;;  %618 = vst.msk [vmem:[#allocation2 + $0x198] sm:$0x1] %vm600_vm4, %v15708_v6 }
  0x23   : > { %595 = vst.msk [vmem:[#allocation2 + $0x10] sm:$0x3] %vm594_vm5, %v15708_v6  ;;  %599 = vst.msk [vmem:[#allocation2 + $0x1a8] sm:$0x3] %vm594_vm5, %v15708_v6 }
  0x24   : > { %619 = vst.msk [vmem:[#allocation2 + $0x11] sm:$0x1] %vm600_vm4, %v15708_v6  ;;  %636 = vst.msk [vmem:[#allocation2 + $0x1a9] sm:$0x1] %vm600_vm4, %v15708_v6 }
  0x25   : > { %16128 = vst [vmem:[#allocation4_spill] sm:$0xff] %v11547_v45  ;;  %4810 = vst.msk [vmem:[#allocation3] sm:$0xff] %vm15912_vm7, %v15708_v6 }
  0x26   : > { %4811 = vst.msk [vmem:[#allocation3 + $0x8] sm:$0xff] %vm15912_vm7, %v15708_v6  ;;  %4815 = vst.msk [vmem:[#allocation3 + $0x198] sm:$0xff] %vm15912_vm7, %v15708_v6 }
  0x27   : > { %4816 = vst.msk [vmem:[#allocation3 + $0x1a0] sm:$0xff] %vm15912_vm7, %v15708_v6 }
  0x29   : > { %v751_v13 = vld [vmem:[#allocation2] sm:$0xff] }
  0x2a   : > { %v783_v14 = vpack.c.bf16 %v752_v12, %v751_v13 }
  0x2c   : > { %9775 = vmatprep.mubr.msk.bf16.mxu1 %vm591_vm3, %v783_v14  ;;  %v656_v14 = vld [vmem:[%s11545_s21 + $0x98] sm:$0xff] }
  0xea   : > { %v559_v16 = vpop.f32.mrb[0].mxu0 }
  0xeb   : > { %v560_v17 = vadd.f32 %v559_v16, %v488_v15  ;;  %v9772_v18 = vpop.f32.mrb[1].mxu0  ;;  %v657_v15 = vld [vmem:[%s11545_s21 + $0xa0] sm:$0xff]  ;;  %v658_v16 = vld [vmem:[%s11545_s21 + $0xa8] sm:$0xff] }
  0xed   : > { %v565_v19 = vmul.f32 0.70710677, %v560_v17  ;;  %v563_v43 = vmul.f32 0.5, %v560_v17 }
  0xef   : > { %v566_v20 = vand.u32 2147483647, %v565_v19  ;;  %vm586_vm6 = vcmp.ge.f32.partialorder %v565_v19, 0.0 }
  0xf1   : > { %v567_v21 = vmul.f32 0.3275911, %v566_v20  ;;  %v580_v23 = vsub.f32 0.0, %v566_v20 }
  0xf3   : > { %v568_v22 = vadd.f32 1.0, %v567_v21  ;;  %v581_v25 = vmul.f32 %v580_v23, %v566_v20  ;;  %v659_v21 = vld [vmem:[%s11545_s21 + $0xb0] sm:$0xff]  ;;  %v661_v23 = vld [vmem:[%s11545_s21 + $0xc0] sm:$0xff] }
  0xf5   : > { %11056 = vrcp.f32 %v568_v22  ;;  %v582_v28 = vmul.f32 1.442695, %v581_v25  ;;  %v660_v22 = vld [vmem:[%s11545_s21 + $0xb8] sm:$0xff] }
  0xf7   : > { %11058 = vpow2.f32 %v582_v28  ;;  %v662_v28 = vld [vmem:[%s11545_s21 + $0xc8] sm:$0xff] }
  0xff   : > { %v11057_v24 = vpop.eup %11056 }
 0x100   : > { %v571_v26 = vmul.f32 1.0614054, %v11057_v24 }
 0x101   : > { %v11059_v36 = vpop.eup %11058 }
 0x102   : > { %v572_v27 = vadd.f32 -1.4531521, %v571_v26 }
 0x104   : > { %v573_v29 = vmul.f32 %v11057_v24, %v572_v27 }
 0x106   : > { %v574_v30 = vadd.f32 1.4214138, %v573_v29  ;;  %v663_v29 = vld [vmem:[%s11545_s21 + $0xd0] sm:$0xff] }
 0x108   : > { %v575_v31 = vmul.f32 %v11057_v24, %v574_v30  ;;  %v664_v30 = vld [vmem:[%s11545_s21 + $0xd8] sm:$0xff] }
 0x10a   : > { %v576_v32 = vadd.f32 -0.28449672, %v575_v31 }
 0x10c   : > { %v577_v33 = vmul.f32 %v11057_v24, %v576_v32 }
 0x10e   : > { %v578_v34 = vadd.f32 0.2548296, %v577_v33 }
 0x110   : > { %v579_v35 = vmul.f32 %v11057_v24, %v578_v34 }
 0x112   : > { %v584_v38 = vmul.f32 %v11059_v36, %v579_v35  ;;  %v665_v35 = vld [vmem:[%s11545_s21 + $0xe0] sm:$0xff]  ;;  %v666_v36 = vld [vmem:[%s11545_s21 + $0xe8] sm:$0xff] }
 0x114   : > { %v585_v39 = vsub.f32 1.0, %v584_v38 }
 0x116   : > { %v587_v41 = vsub.f32 0.0, %v585_v39 }
 0x118   : > { %v588_v42 = vsel %vm586_vm6, %v585_v39, %v587_v41 }
 0x119   : > { %v589_v44 = vadd.f32 1.0, %v588_v42  ;;  %v668_v42 = vld [vmem:[%s11545_s21 + $0xf8] sm:$0xff] }
 0x11b   : > { %v590_v50 = vmul.f32 %v589_v44, %v563_v43 }
 0x11d   : > { %v11560_v57 = vrot.slane %v590_v50, %v11547_v45 }
 0x11f   : > { %v673_v0 = vadd.f32 %v11560_v57, %v637_v46  ;;  %v674_v1 = vadd.f32 %v11560_v57, %v638_v47  ;;  %v675_v2 = vadd.f32 %v11560_v57, %v639_v48  ;;  %v676_v4 = vadd.f32 %v11560_v57, %v640_v49 }
 0x120   : > { %v677_v9 = vadd.f32 %v11560_v57, %v641_v51  ;;  %v678_v10 = vadd.f32 %v11560_v57, %v642_v52  ;;  %v679_v12 = vadd.f32 %v11560_v57, %v643_v53  ;;  %v680_v13 = vadd.f32 %v11560_v57, %v644_v54 }
 0x121   : > { %706 = vst.msk [vmem:[#allocation2 + $0x19] sm:$0xff] %vm591_vm3, %v673_v0  ;;  %707 = vst.msk [vmem:[#allocation2 + $0x21] sm:$0xff] %vm591_vm3, %v674_v1  ;;  %v681_v17 = vadd.f32 %v11560_v57, %v645_v55  ;;  %v682_v18 = vadd.f32 %v11560_v57, %v646_v56  ;;  %v683_v19 = vadd.f32 %v11560_v57, %v647_v58  ;;  %v1144_v56 = vsel %vm848_vm2, %v11521_v11, 0 }
 0x122   : > { %708 = vst.msk [vmem:[#allocation2 + $0x31] sm:$0xff] %vm591_vm3, %v675_v2  ;;  %709 = vst.msk [vmem:[#allocation2 + $0x39] sm:$0xff] %vm591_vm3, %v676_v4  ;;  %v684_v20 = vadd.f32 %v11560_v57, %v648_v59  ;;  %v685_v24 = vadd.f32 %v11560_v57, %v649_v60  ;;  %v686_v25 = vadd.f32 %v11560_v57, %v650_v61 }
 0x123   : > { %710 = vst.msk [vmem:[#allocation2 + $0x49] sm:$0xff] %vm591_vm3, %v677_v9  ;;  %711 = vst.msk [vmem:[#allocation2 + $0x51] sm:$0xff] %vm591_vm3, %v678_v10  ;;  %v687_v26 = vadd.f32 %v11560_v57, %v651_v62  ;;  %v688_v27 = vadd.f32 %v11560_v57, %v652_v63  ;;  %v689_v31 = vadd.f32 %v11560_v57, %v653_v5 }
 0x124   : > { %712 = vst.msk [vmem:[#allocation2 + $0x61] sm:$0xff] %vm591_vm3, %v679_v12  ;;  %713 = vst.msk [vmem:[#allocation2 + $0x69] sm:$0xff] %vm591_vm3, %v680_v13  ;;  %v690_v32 = vadd.f32 %v11560_v57, %v654_v7  ;;  %v691_v33 = vadd.f32 %v11560_v57, %v655_v8  ;;  %v692_v34 = vadd.f32 %v11560_v57, %v656_v14 }
 0x125   : > { %714 = vst.msk [vmem:[#allocation2 + $0x79] sm:$0xff] %vm591_vm3, %v681_v17  ;;  %715 = vst.msk [vmem:[#allocation2 + $0x81] sm:$0xff] %vm591_vm3, %v682_v18  ;;  %v693_v38 = vadd.f32 %v11560_v57, %v657_v15  ;;  %v694_v39 = vadd.f32 %v11560_v57, %v658_v16  ;;  %v695_v40 = vadd.f32 %v11560_v57, %v659_v21 }
 0x126   : > { %716 = vst.msk [vmem:[#allocation2 + $0x91] sm:$0xff] %vm591_vm3, %v683_v19  ;;  %717 = vst.msk [vmem:[#allocation2 + $0x99] sm:$0xff] %vm591_vm3, %v684_v20  ;;  %v696_v41 = vadd.f32 %v11560_v57, %v660_v22  ;;  %v697_v43 = vadd.f32 %v11560_v57, %v661_v23  ;;  %v698_v44 = vadd.f32 %v11560_v57, %v662_v28 }
 0x127   : > { %718 = vst.msk [vmem:[#allocation2 + $0xa9] sm:$0xff] %vm591_vm3, %v685_v24  ;;  %719 = vst.msk [vmem:[#allocation2 + $0xb1] sm:$0xff] %vm591_vm3, %v686_v25  ;;  %v699_v46 = vadd.f32 %v11560_v57, %v663_v29  ;;  %v700_v47 = vadd.f32 %v11560_v57, %v664_v30  ;;  %v701_v48 = vadd.f32 %v11560_v57, %v665_v35  ;;  %v1046_v35 = vld [vmem:[#allocation2 + $0x9] sm:$0xff] }
 0x128   : > { %720 = vst.msk [vmem:[#allocation2 + $0xc1] sm:$0xff] %vm591_vm3, %v687_v26  ;;  %721 = vst.msk [vmem:[#allocation2 + $0xc9] sm:$0xff] %vm591_vm3, %v688_v27  ;;  %v702_v49 = vadd.f32 %v11560_v57, %v666_v36  ;;  %v703_v50 = vadd.f32 %v11560_v57, %v667_v37  ;;  %v704_v51 = vadd.f32 %v11560_v57, %v668_v42  ;;  %v753_v52 = vld [vmem:[#allocation2 + $0x18] sm:$0xff]  ;;  %v754_v53 = vld [vmem:[#allocation2 + $0x20] sm:$0xff] }
 0x129   : > { %722 = vst.msk [vmem:[#allocation2 + $0xd9] sm:$0xff] %vm591_vm3, %v689_v31  ;;  %723 = vst.msk [vmem:[#allocation2 + $0xe1] sm:$0xff] %vm591_vm3, %v690_v32  ;;  %v755_v54 = vld [vmem:[#allocation2 + $0x30] sm:$0xff]  ;;  %v11647_v55 = vpack.c.bf16 %v754_v53, %v753_v52  ;;  %v756_v58 = vld [vmem:[#allocation2 + $0x38] sm:$0xff] }
 0x12a   : > { %724 = vst.msk [vmem:[#allocation2 + $0xf1] sm:$0xff] %vm591_vm3, %v691_v33  ;;  %725 = vst.msk [vmem:[#allocation2 + $0xf9] sm:$0xff] %vm591_vm3, %v692_v34  ;;  %v11652_v59 = vpack.c.bf16 %v756_v58, %v755_v54  ;;  %v11657_v57 = vld [vmem:[%s15697_s4 + $0x4] sm:$0x3]  ;;  %v757_v11 = vld [vmem:[#allocation2 + $0x48] sm:$0xff] }
 0x12b   : > { %726 = vst.msk [vmem:[#allocation2 + $0x109] sm:$0xff] %vm591_vm3, %v693_v38  ;;  %727 = vst.msk [vmem:[#allocation2 + $0x111] sm:$0xff] %vm591_vm3, %v694_v39  ;;  %9776 = vmatmul.mubr.msk.bf16.vlgmr.msra.gmra.mrb[0].mxu1 %vm591_vm3, %v11647_v55  ;;  %v758_v60 = vld [vmem:[#allocation2 + $0x50] sm:$0xff]  ;;  %v759_v61 = vld [vmem:[#allocation2 + $0x60] sm:$0xff] }
 0x12c   : > { %728 = vst.msk [vmem:[#allocation2 + $0x121] sm:$0xff] %vm591_vm3, %v695_v40  ;;  %729 = vst.msk [vmem:[#allocation2 + $0x129] sm:$0xff] %vm591_vm3, %v696_v41  ;;  %9808 = vmatpush3.bf16.msra.mxu1 %v1144_v56  ;;  %9779 = vmatprep.mubr.msk.bf16.mxu1 %vm591_vm3, %v11652_v59  ;;  %v760_v62 = vld [vmem:[#allocation2 + $0x68] sm:$0xff]  ;;  %v11665_v63 = vpack.c.bf16 %v758_v60, %v757_v11  ;;  %v761_v1 = vld [vmem:[#allocation2 + $0x78] sm:$0xff] }
 0x12d   : > { %730 = vst.msk [vmem:[#allocation2 + $0x139] sm:$0xff] %vm591_vm3, %v697_v43  ;;  %731 = vst.msk [vmem:[#allocation2 + $0x141] sm:$0xff] %vm591_vm3, %v698_v44  ;;  %11029 = vmatprep.subr.msk.bf16.mxu1 %vm848_vm2, %v11657_v57  ;;  %v11667_v0 = vpack.c.bf16 %v760_v62, %v759_v61  ;;  %v762_v2 = vld [vmem:[#allocation2 + $0x80] sm:$0xff]  ;;  %v763_v4 = vld [vmem:[#allocation2 + $0x90] sm:$0xff] }
 0x12e   : > { %732 = vst.msk [vmem:[#allocation2 + $0x151] sm:$0xff] %vm591_vm3, %v699_v46  ;;  %733 = vst.msk [vmem:[#allocation2 + $0x159] sm:$0xff] %vm591_vm3, %v700_v47  ;;  %v764_v5 = vld [vmem:[#allocation2 + $0x98] sm:$0xff]  ;;  %v11673_v7 = vpack.c.bf16 %v762_v2, %v761_v1  ;;  %v765_v9 = vld [vmem:[#allocation2 + $0xa8] sm:$0xff]  ;;  %v1438_v46 = vsel %vm848_vm2, %v11657_v57, 0 }
 0x12f   : > { %734 = vst.msk [vmem:[#allocation2 + $0x169] sm:$0xff] %vm591_vm3, %v701_v48  ;;  %735 = vst.msk [vmem:[#allocation2 + $0x171] sm:$0xff] %vm591_vm3, %v702_v49  ;;  %v11675_v8 = vpack.c.bf16 %v764_v5, %v763_v4  ;;  %v766_v10 = vld [vmem:[#allocation2 + $0xb0] sm:$0xff]  ;;  %v767_v12 = vld [vmem:[#allocation2 + $0xc0] sm:$0xff] }
 0x130   : > { %736 = vst.msk [vmem:[#allocation2 + $0x181] sm:$0xff] %vm591_vm3, %v703_v50  ;;  %737 = vst.msk [vmem:[#allocation2 + $0x189] sm:$0xff] %vm591_vm3, %v704_v51  ;;  %v768_v13 = vld [vmem:[#allocation2 + $0xc8] sm:$0xff]  ;;  %v11681_v14 = vpack.c.bf16 %v766_v10, %v765_v9  ;;  %v769_v16 = vld [vmem:[#allocation2 + $0xd8] sm:$0xff] }
 0x131   : > { %v11683_v15 = vpack.c.bf16 %v768_v13, %v767_v12  ;;  %v770_v17 = vld [vmem:[#allocation2 + $0xe0] sm:$0xff]  ;;  %v771_v18 = vld [vmem:[#allocation2 + $0xf0] sm:$0xff]  ;;  %v772_v19 = vld [vmem:[#allocation2 + $0xf8] sm:$0xff] }
 0x132   : > { %v11689_v20 = vpack.c.bf16 %v770_v17, %v769_v16  ;;  %v11691_v21 = vpack.c.bf16 %v772_v19, %v771_v18  ;;  %v773_v22 = vld [vmem:[#allocation2 + $0x108] sm:$0xff]  ;;  %v774_v23 = vld [vmem:[#allocation2 + $0x110] sm:$0xff]  ;;  %v1047_v40 = vld [vmem:[#allocation2 + $0x19] sm:$0xff] }
 0x133   : > { %9780 = vmatmul.mubr.msk.bf16.gmra.mrb[4].mxu1 %vm591_vm3, %v11665_v63  ;;  %v775_v24 = vld [vmem:[#allocation2 + $0x120] sm:$0xff]  ;;  %v776_v25 = vld [vmem:[#allocation2 + $0x128] sm:$0xff]  ;;  %v11697_v26 = vpack.c.bf16 %v774_v23, %v773_v22  ;;  %v1049_v42 = vld [vmem:[#allocation2 + $0x31] sm:$0xff] }
 0x134   : > { %9783 = vmatprep.mubr.msk.bf16.mxu1 %vm591_vm3, %v11667_v0  ;;  %v11699_v27 = vpack.c.bf16 %v776_v25, %v775_v24  ;;  %v777_v28 = vld [vmem:[#allocation2 + $0x138] sm:$0xff]  ;;  %v778_v29 = vld [vmem:[#allocation2 + $0x140] sm:$0xff]  ;;  %v1051_v49 = vld [vmem:[#allocation2 + $0x49] sm:$0xff] }
 0x135   : > { %v779_v30 = vld [vmem:[#allocation2 + $0x150] sm:$0xff]  ;;  %v780_v31 = vld [vmem:[#allocation2 + $0x158] sm:$0xff]  ;;  %v11705_v32 = vpack.c.bf16 %v778_v29, %v777_v28  ;;  %v1045_v34 = vld [vmem:[#allocation2 + $0x1] sm:$0xff] }
 0x136   : > { %v11707_v33 = vpack.c.bf16 %v780_v31, %v779_v30  ;;  %v781_v36 = vld [vmem:[#allocation2 + $0x168] sm:$0xff]  ;;  %v782_v37 = vld [vmem:[#allocation2 + $0x170] sm:$0xff]  ;;  %v1077_v38 = vpack.c.bf16 %v1046_v35, %v1045_v34  ;;  %v1050_v43 = vld [vmem:[#allocation2 + $0x39] sm:$0xff] }
 0x137   : > { %v11713_v39 = vpack.c.bf16 %v782_v37, %v781_v36  ;;  %v1048_v41 = vld [vmem:[#allocation2 + $0x21] sm:$0xff]  ;;  %v11722_v47 = vpack.c.bf16 %v1050_v43, %v1049_v42  ;;  %v1052_v50 = vld [vmem:[#allocation2 + $0x51] sm:$0xff]  ;;  %v1054_v52 = vld [vmem:[#allocation2 + $0x69] sm:$0xff] }
 0x138   : > { %v11718_v44 = vpack.c.bf16 %v1048_v41, %v1047_v40  ;;  %v11727_v48 = vld [vmem:[%s15697_s4 + $0x6] sm:$0x3]  ;;  %v11735_v53 = vpack.c.bf16 %v1052_v50, %v1051_v49  ;;  %v1055_v56 = vld [vmem:[#allocation2 + $0x79] sm:$0xff]  ;;  %v1057_v57 = vld [vmem:[#allocation2 + $0x91] sm:$0xff] }
 0x139   : > { %v1053_v51 = vld [vmem:[#allocation2 + $0x61] sm:$0xff]  ;;  %v1058_v11 = vld [vmem:[#allocation2 + $0x99] sm:$0xff]  ;;  %v1059_v62 = vld [vmem:[#allocation2 + $0xa9] sm:$0xff] }
 0x13a   : > { %v11737_v54 = vpack.c.bf16 %v1054_v52, %v1053_v51  ;;  %v1056_v58 = vld [vmem:[#allocation2 + $0x81] sm:$0xff]  ;;  %v11745_v61 = vpack.c.bf16 %v1058_v11, %v1057_v57  ;;  %v1060_v1 = vld [vmem:[#allocation2 + $0xb1] sm:$0xff]  ;;  %v1062_v4 = vld [vmem:[#allocation2 + $0xc9] sm:$0xff] }
 0x13b   : > { %9784 = vmatmul.mubr.msk.bf16.gmra.mrb[8].mxu1 %vm591_vm3, %v11673_v7  ;;  %v11743_v60 = vpack.c.bf16 %v1056_v58, %v1055_v56  ;;  %v1061_v2 = vld [vmem:[#allocation2 + $0xc1] sm:$0xff]  ;;  %v11751_v5 = vpack.c.bf16 %v1060_v1, %v1059_v62  ;;  %v1063_v10 = vld [vmem:[#allocation2 + $0xd9] sm:$0xff]  ;;  %v1065_v13 = vld [vmem:[#allocation2 + $0xf1] sm:$0xff]  ;;  %v1732_v56 = vsel %vm848_vm2, %v11727_v48, 0 }
 0x13c   : > { %9787 = vmatprep.mubr.msk.bf16.mxu1 %vm591_vm3, %v11675_v8  ;;  %v11753_v9 = vpack.c.bf16 %v1062_v4, %v1061_v2  ;;  %v1064_v12 = vld [vmem:[#allocation2 + $0xe1] sm:$0xff]  ;;  %v1066_v16 = vld [vmem:[#allocation2 + $0xf9] sm:$0xff]  ;;  %v1067_v19 = vld [vmem:[#allocation2 + $0x109] sm:$0xff] }
 0x13d   : > { %v11759_v17 = vpack.c.bf16 %v1064_v12, %v1063_v10  ;;  %v11761_v18 = vpack.c.bf16 %v1066_v16, %v1065_v13  ;;  %v1068_v22 = vld [vmem:[#allocation2 + $0x111] sm:$0xff]  ;;  %v1069_v23 = vld [vmem:[#allocation2 + $0x121] sm:$0xff]  ;;  %v1070_v24 = vld [vmem:[#allocation2 + $0x129] sm:$0xff] }
 0x13e   : > { %v11767_v25 = vpack.c.bf16 %v1068_v22, %v1067_v19  ;;  %v11769_v28 = vpack.c.bf16 %v1070_v24, %v1069_v23  ;;  %v1071_v29 = vld [vmem:[#allocation2 + $0x139] sm:$0xff]  ;;  %v1072_v30 = vld [vmem:[#allocation2 + $0x141] sm:$0xff]  ;;  %v1073_v31 = vld [vmem:[#allocation2 + $0x151] sm:$0xff] }
 0x13f   : > { %v1074_v34 = vld [vmem:[#allocation2 + $0x159] sm:$0xff]  ;;  %v11775_v35 = vpack.c.bf16 %v1072_v30, %v1071_v29  ;;  %v1339_v37 = vld [vmem:[#allocation2 + $0x2] sm:$0xff]  ;;  %v1076_v41 = vld [vmem:[#allocation2 + $0x171] sm:$0xff] }
 0x140   : > { %v11777_v36 = vpack.c.bf16 %v1074_v34, %v1073_v31  ;;  %v1075_v40 = vld [vmem:[#allocation2 + $0x169] sm:$0xff]  ;;  %v1343_v50 = vld [vmem:[#allocation2 + $0x32] sm:$0xff]  ;;  %v1344_v51 = vld [vmem:[#allocation2 + $0x3a] sm:$0xff] }
 0x141   : > { %v11783_v43 = vpack.c.bf16 %v1076_v41, %v1075_v40  ;;  %v1342_v49 = vld [vmem:[#allocation2 + $0x22] sm:$0xff]  ;;  %v11792_v58 = vpack.c.bf16 %v1344_v51, %v1343_v50  ;;  %v1345_v11 = vld [vmem:[#allocation2 + $0x4a] sm:$0xff]  ;;  %v1346_v62 = vld [vmem:[#allocation2 + $0x52] sm:$0xff] }
 0x142   : > { %v9164_v57 = vld [vmem:[%s15697_s4 + $0x8] sm:$0x3]  ;;  %v1348_v2 = vld [vmem:[#allocation2 + $0x6a] sm:$0xff]  ;;  %v1349_v10 = vld [vmem:[#allocation2 + $0x7a] sm:$0xff] }
 0x143   : > { %9788 = vmatmul.mubr.msk.bf16.gmra.mrb[12].mxu1 %vm591_vm3, %v11681_v14  ;;  %v1347_v1 = vld [vmem:[#allocation2 + $0x62] sm:$0xff]  ;;  %v1351_v13 = vld [vmem:[#allocation2 + $0x92] sm:$0xff]  ;;  %v1352_v16 = vld [vmem:[#allocation2 + $0x9a] sm:$0xff] }
 0x144   : > { %9791 = vmatprep.mubr.msk.bf16.mxu1 %vm591_vm3, %v11683_v15  ;;  %v11804_v4 = vpack.c.bf16 %v1348_v2, %v1347_v1  ;;  %v1350_v12 = vld [vmem:[#allocation2 + $0x82] sm:$0xff]  ;;  %v11812_v22 = vpack.c.bf16 %v1352_v16, %v1351_v13  ;;  %v1353_v23 = vld [vmem:[#allocation2 + $0xaa] sm:$0xff]  ;;  %v1354_v24 = vld [vmem:[#allocation2 + $0xb2] sm:$0xff] }
 0x145   : > { %v11810_v19 = vpack.c.bf16 %v1350_v12, %v1349_v10  ;;  %v1355_v29 = vld [vmem:[#allocation2 + $0xc2] sm:$0xff]  ;;  %v1356_v30 = vld [vmem:[#allocation2 + $0xca] sm:$0xff]  ;;  %v11818_v31 = vpack.c.bf16 %v1354_v24, %v1353_v23  ;;  %v1359_v40 = vld [vmem:[#allocation2 + $0xf2] sm:$0xff] }
 0x146   : > { %v11820_v34 = vpack.c.bf16 %v1356_v30, %v1355_v29  ;;  %v1360_v41 = vld [vmem:[#allocation2 + $0xfa] sm:$0xff]  ;;  %v1362_v50 = vld [vmem:[#allocation2 + $0x112] sm:$0xff]  ;;  %v1363_v51 = vld [vmem:[#allocation2 + $0x122] sm:$0xff]  ;;  %v2026_v30 = vsel %vm848_vm2, %v9164_v57, 0 }
 0x147   : > { %v1365_v1 = vld [vmem:[#allocation2 + $0x13a] sm:$0xff]  ;;  %v1366_v2 = vld [vmem:[#allocation2 + $0x142] sm:$0xff]  ;;  %v1367_v10 = vld [vmem:[#allocation2 + $0x152] sm:$0xff] }
 0x148   : > { %v1368_v12 = vld [vmem:[#allocation2 + $0x15a] sm:$0xff]  ;;  %v11842_v13 = vpack.c.bf16 %v1366_v2, %v1365_v1  ;;  %v1369_v23 = vld [vmem:[#allocation2 + $0x16a] sm:$0xff]  ;;  %v1370_v24 = vld [vmem:[#allocation2 + $0x172] sm:$0xff] }
 0x149   : > { %v11844_v16 = vpack.c.bf16 %v1368_v12, %v1367_v10  ;;  %v11850_v29 = vpack.c.bf16 %v1370_v24, %v1369_v23  ;;  %v2252_v1 = vld [vmem:[#allocation2 + $0x18a] sm:$0xff] }
 0x14a   : > { %v9232_v12 = vld [vmem:[%s15697_s4 + $0x10] sm:$0x3] }
 0x14b   : > { %9792 = vmatmul.mubr.msk.bf16.gmra.mrb[16].mxu1 %vm591_vm3, %v11689_v20 }
 0x14c   : > { %9795 = vmatprep.mubr.msk.bf16.mxu1 %vm591_vm3, %v11691_v21 }
 0x153   : > { %9796 = vmatmul.mubr.msk.bf16.gmra.mrb[20].mxu1 %vm591_vm3, %v11697_v26 }
 0x154   : > { %9799 = vmatprep.mubr.msk.bf16.mxu1 %vm591_vm3, %v11699_v27 }
 0x15b   : > { %9800 = vmatmul.mubr.msk.bf16.gmra.mrb[24].mxu1 %vm591_vm3, %v11705_v32 }
 0x15c   : > { %9803 = vmatprep.mubr.msk.bf16.mxu1 %vm591_vm3, %v11707_v33 }
 0x163   : > { %9804 = vmatmul.mubr.msk.bf16.gmra.mrb[28].mxu1 %vm591_vm3, %v11713_v39 }
 0x164   : > { %9809 = vmatprep.mubr.msk.bf16.mxu1 %vm591_vm3, %v1077_v38  ;;  %v1340_v38 = vld [vmem:[#allocation2 + $0xa] sm:$0xff] }
 0x165   : > { %v1371_v42 = vpack.c.bf16 %v1340_v38, %v1339_v37  ;;  %v1357_v37 = vld [vmem:[#allocation2 + $0xda] sm:$0xff]  ;;  %v1358_v38 = vld [vmem:[#allocation2 + $0xe2] sm:$0xff] }
 0x16b   : > { %9810 = vmatmul.mubr.msk.bf16.vlgmr.msra.gmra.mrb[0].mxu1 %vm591_vm3, %v11718_v44 }
 0x16c   : > { %9842 = vmatpush3.bf16.msra.mxu1 %v1438_v46  ;;  %9813 = vmatprep.mubr.msk.bf16.mxu1 %vm591_vm3, %v11722_v47  ;;  %v1341_v46 = vld [vmem:[#allocation2 + $0x1a] sm:$0xff] }
 0x16d   : > { %11030 = vmatprep.subr.msk.bf16.mxu1 %vm848_vm2, %v11727_v48  ;;  %v11788_v52 = vpack.c.bf16 %v1342_v49, %v1341_v46  ;;  %v11802_v48 = vpack.c.bf16 %v1346_v62, %v1345_v11  ;;  %v11828_v46 = vpack.c.bf16 %v1360_v41, %v1359_v40  ;;  %v1361_v49 = vld [vmem:[#allocation2 + $0x10a] sm:$0xff] }
 0x16e   : > { %v11834_v11 = vpack.c.bf16 %v1362_v50, %v1361_v49  ;;  %v9198_v41 = vld [vmem:[%s15697_s4 + $0xc] sm:$0x3] }
 0x16f   : > { %v1958_v49 = vld [vmem:[#allocation2 + $0x189] sm:$0xff] }
 0x173   : > { %9814 = vmatmul.mubr.msk.bf16.gmra.mrb[4].mxu1 %vm591_vm3, %v11735_v53 }
 0x174   : > { %9817 = vmatprep.mubr.msk.bf16.mxu1 %vm591_vm3, %v11737_v54 }
 0x17b   : > { %9818 = vmatmul.mubr.msk.bf16.gmra.mrb[8].mxu1 %vm591_vm3, %v11743_v60 }
 0x17c   : > { %9821 = vmatprep.mubr.msk.bf16.mxu1 %vm591_vm3, %v11745_v61 }
 0x183   : > { %9822 = vmatmul.mubr.msk.bf16.gmra.mrb[12].mxu1 %vm591_vm3, %v11751_v5 }
 0x184   : > { %9825 = vmatprep.mubr.msk.bf16.mxu1 %vm591_vm3, %v11753_v9 }
 0x18b   : > { %9826 = vmatmul.mubr.msk.bf16.gmra.mrb[16].mxu1 %vm591_vm3, %v11759_v17 }
 0x18c   : > { %9829 = vmatprep.mubr.msk.bf16.mxu1 %vm591_vm3, %v11761_v18 }
 0x193   : > { %9830 = vmatmul.mubr.msk.bf16.gmra.mrb[20].mxu1 %vm591_vm3, %v11767_v25 }
 0x194   : > { %9833 = vmatprep.mubr.msk.bf16.mxu1 %vm591_vm3, %v11769_v28 }
 0x19b   : > { %9834 = vmatmul.mubr.msk.bf16.gmra.mrb[24].mxu1 %vm591_vm3, %v11775_v35 }
 0x19c   : > { %9837 = vmatprep.mubr.msk.bf16.mxu1 %vm591_vm3, %v11777_v36 }
 0x1a3   : > { %9838 = vmatmul.mubr.msk.bf16.gmra.mrb[28].mxu1 %vm591_vm3, %v11783_v43 }
 0x1a4   : > { %9843 = vmatprep.mubr.msk.bf16.mxu1 %vm591_vm3, %v1371_v42  ;;  %v11826_v42 = vpack.c.bf16 %v1358_v38, %v1357_v37  ;;  %v9181_v37 = vld [vmem:[%s15697_s4 + $0xa] sm:$0x3] }
 0x1a5   : > { %v2320_v40 = vsel %vm848_vm2, %v9181_v37, 0 }
 0x1ab   : > { %9844 = vmatmul.mubr.msk.bf16.vlgmr.msra.gmra.mrb[0].mxu1 %vm591_vm3, %v11788_v52 }
 0x1ac   : > { %9876 = vmatpush3.bf16.msra.mxu1 %v1732_v56  ;;  %9847 = vmatprep.mubr.msk.bf16.mxu1 %vm591_vm3, %v11792_v58  ;;  %v1364_v56 = vld [vmem:[#allocation2 + $0x12a] sm:$0xff] }
 0x1ad   : > { %11031 = vmatprep.subr.msk.bf16.mxu1 %vm848_vm2, %v9164_v57  ;;  %v11836_v62 = vpack.c.bf16 %v1364_v56, %v1363_v51  ;;  %v1664_v57 = vld [vmem:[#allocation2 + $0x188] sm:$0xff]  ;;  %v2615_v51 = vsel %vm848_vm2, %v9198_v41, 0 }
 0x1ae   : > { %v9215_v56 = vld [vmem:[%s15697_s4 + $0xe] sm:$0x3] }
 0x1af   : > { %v2909_v10 = vsel %vm848_vm2, %v9215_v56, 0 }
 0x1b3   : > { %9848 = vmatmul.mubr.msk.bf16.gmra.mrb[4].mxu1 %vm591_vm3, %v11802_v48 }
 0x1b4   : > { %9851 = vmatprep.mubr.msk.bf16.mxu1 %vm591_vm3, %v11804_v4 }
 0x1bb   : > { %9852 = vmatmul.mubr.msk.bf16.gmra.mrb[8].mxu1 %vm591_vm3, %v11810_v19 }
 0x1bc   : > { %9855 = vmatprep.mubr.msk.bf16.mxu1 %vm591_vm3, %v11812_v22 }
 0x1c3   : > { %9856 = vmatmul.mubr.msk.bf16.gmra.mrb[12].mxu1 %vm591_vm3, %v11818_v31 }
 0x1c4   : > { %9859 = vmatprep.mubr.msk.bf16.mxu1 %vm591_vm3, %v11820_v34 }
 0x1cb   : > { %9860 = vmatmul.mubr.msk.bf16.gmra.mrb[16].mxu1 %vm591_vm3, %v11826_v42 }
 0x1cc   : > { %9863 = vmatprep.mubr.msk.bf16.mxu1 %vm591_vm3, %v11828_v46 }
 0x1d3   : > { %9864 = vmatmul.mubr.msk.bf16.gmra.mrb[20].mxu1 %vm591_vm3, %v11834_v11 }
 0x1d4   : > { %9867 = vmatprep.mubr.msk.bf16.mxu1 %vm591_vm3, %v11836_v62 }
 0x1db   : > { %9868 = vmatmul.mubr.msk.bf16.gmra.mrb[24].mxu1 %vm591_vm3, %v11842_v13 }
 0x1dc   : > { %9871 = vmatprep.mubr.msk.bf16.mxu1 %vm591_vm3, %v11844_v16 }
 0x1e3   : > { %9872 = vmatmul.mubr.msk.bf16.gmra.mrb[28].mxu1 %vm591_vm3, %v11850_v29 }
 0x1e4   : > { %9877 = vmatprep.mubr.msk.bf16.mxu1 %vm591_vm3, %v11647_v55  ;;  %v1663_v55 = vld [vmem:[#allocation2 + $0x180] sm:$0xff] }
 0x1e5   : > { %v11889_v38 = vpack.c.bf16 %v1664_v57, %v1663_v55 }
 0x1eb   : > { %9878 = vmatmul.mubr.msk.bf16.vlgmr.msra.gmra.mrb[0].mxu1 %vm591_vm3, %v11652_v59 }
 0x1ec   : > { %9910 = vmatpush3.bf16.msra.mxu1 %v2026_v30  ;;  %9881 = vmatprep.mubr.msk.bf16.mxu1 %vm591_vm3, %v11665_v63 }
 0x1ed   : > { %11032 = vmatprep.subr.msk.bf16.mxu1 %vm848_vm2, %v9181_v37 }
 0x1f3   : > { %9882 = vmatmul.mubr.msk.bf16.gmra.mrb[4].mxu1 %vm591_vm3, %v11667_v0 }
 0x1f4   : > { %9885 = vmatprep.mubr.msk.bf16.mxu1 %vm591_vm3, %v11673_v7 }
 0x1fb   : > { %9886 = vmatmul.mubr.msk.bf16.gmra.mrb[8].mxu1 %vm591_vm3, %v11675_v8 }
 0x1fc   : > { %9889 = vmatprep.mubr.msk.bf16.mxu1 %vm591_vm3, %v11681_v14 }
 0x203   : > { %9890 = vmatmul.mubr.msk.bf16.gmra.mrb[12].mxu1 %vm591_vm3, %v11683_v15 }
 0x204   : > { %9893 = vmatprep.mubr.msk.bf16.mxu1 %vm591_vm3, %v11689_v20 }
 0x20b   : > { %9894 = vmatmul.mubr.msk.bf16.gmra.mrb[16].mxu1 %vm591_vm3, %v11691_v21 }
 0x20c   : > { %9897 = vmatprep.mubr.msk.bf16.mxu1 %vm591_vm3, %v11697_v26 }
 0x213   : > { %9898 = vmatmul.mubr.msk.bf16.gmra.mrb[20].mxu1 %vm591_vm3, %v11699_v27 }
 0x214   : > { %9901 = vmatprep.mubr.msk.bf16.mxu1 %vm591_vm3, %v11705_v32 }
 0x21b   : > { %9902 = vmatmul.mubr.msk.bf16.gmra.mrb[24].mxu1 %vm591_vm3, %v11707_v33 }
 0x21c   : > { %9905 = vmatprep.mubr.msk.bf16.mxu1 %vm591_vm3, %v11713_v39 }
 0x223   : > { %9906 = vmatmul.mubr.msk.bf16.gmra.mrb[28].mxu1 %vm591_vm3, %v11889_v38 }
 0x224   : > { %9911 = vmatprep.mubr.msk.bf16.mxu1 %vm591_vm3, %v11718_v44  ;;  %v1957_v44 = vld [vmem:[#allocation2 + $0x181] sm:$0xff] }
 0x225   : > { %v11928_v50 = vpack.c.bf16 %v1958_v49, %v1957_v44 }
 0x22b   : > { %9912 = vmatmul.mubr.msk.bf16.vlgmr.msra.gmra.mrb[0].mxu1 %vm591_vm3, %v11722_v47 }
 0x22c   : > { %9944 = vmatpush3.bf16.msra.mxu1 %v2320_v40  ;;  %9915 = vmatprep.mubr.msk.bf16.mxu1 %vm591_vm3, %v11735_v53 }
 0x22d   : > { %11033 = vmatprep.subr.msk.bf16.mxu1 %vm848_vm2, %v9198_v41 }
 0x233   : > { %9916 = vmatmul.mubr.msk.bf16.gmra.mrb[4].mxu1 %vm591_vm3, %v11737_v54 }
 0x234   : > { %9919 = vmatprep.mubr.msk.bf16.mxu1 %vm591_vm3, %v11743_v60 }
 0x23b   : > { %9920 = vmatmul.mubr.msk.bf16.gmra.mrb[8].mxu1 %vm591_vm3, %v11745_v61 }
 0x23c   : > { %9923 = vmatprep.mubr.msk.bf16.mxu1 %vm591_vm3, %v11751_v5 }
 0x243   : > { %9924 = vmatmul.mubr.msk.bf16.gmra.mrb[12].mxu1 %vm591_vm3, %v11753_v9 }
 0x244   : > { %9927 = vmatprep.mubr.msk.bf16.mxu1 %vm591_vm3, %v11759_v17 }
 0x24b   : > { %9928 = vmatmul.mubr.msk.bf16.gmra.mrb[16].mxu1 %vm591_vm3, %v11761_v18 }
 0x24c   : > { %9931 = vmatprep.mubr.msk.bf16.mxu1 %vm591_vm3, %v11767_v25 }
 0x253   : > { %9932 = vmatmul.mubr.msk.bf16.gmra.mrb[20].mxu1 %vm591_vm3, %v11769_v28 }
 0x254   : > { %9935 = vmatprep.mubr.msk.bf16.mxu1 %vm591_vm3, %v11775_v35 }
 0x25b   : > { %9936 = vmatmul.mubr.msk.bf16.gmra.mrb[24].mxu1 %vm591_vm3, %v11777_v36 }
 0x25c   : > { %9939 = vmatprep.mubr.msk.bf16.mxu1 %vm591_vm3, %v11783_v43 }
 0x263   : > { %9940 = vmatmul.mubr.msk.bf16.gmra.mrb[28].mxu1 %vm591_vm3, %v11928_v50 }
 0x264   : > { %9945 = vmatprep.mubr.msk.bf16.mxu1 %vm591_vm3, %v11788_v52  ;;  %v2251_v52 = vld [vmem:[#allocation2 + $0x182] sm:$0xff] }
 0x265   : > { %v2268_v2 = vpack.c.bf16 %v2252_v1, %v2251_v52 }
 0x26b   : > { %9946 = vmatmul.mubr.msk.bf16.vlgmr.msra.gmra.mrb[0].mxu1 %vm591_vm3, %v11792_v58 }
 0x26c   : > { %9978 = vmatpush3.bf16.msra.mxu1 %v2615_v51  ;;  %9949 = vmatprep.mubr.msk.bf16.mxu1 %vm591_vm3, %v11802_v48 }
 0x26d   : > { %11034 = vmatprep.subr.msk.bf16.mxu1 %vm848_vm2, %v9215_v56 }
 0x273   : > { %9950 = vmatmul.mubr.msk.bf16.gmra.mrb[4].mxu1 %vm591_vm3, %v11804_v4 }
 0x274   : > { %9953 = vmatprep.mubr.msk.bf16.mxu1 %vm591_vm3, %v11810_v19 }
 0x27b   : > { %9954 = vmatmul.mubr.msk.bf16.gmra.mrb[8].mxu1 %vm591_vm3, %v11812_v22 }
 0x27c   : > { %9957 = vmatprep.mubr.msk.bf16.mxu1 %vm591_vm3, %v11818_v31 }
 0x283   : > { %9958 = vmatmul.mubr.msk.bf16.gmra.mrb[12].mxu1 %vm591_vm3, %v11820_v34 }
 0x284   : > { %9961 = vmatprep.mubr.msk.bf16.mxu1 %vm591_vm3, %v11826_v42 }
 0x28b   : > { %9962 = vmatmul.mubr.msk.bf16.gmra.mrb[16].mxu1 %vm591_vm3, %v11828_v46 }
 0x28c   : > { %9965 = vmatprep.mubr.msk.bf16.mxu1 %vm591_vm3, %v11834_v11 }
 0x293   : > { %9966 = vmatmul.mubr.msk.bf16.gmra.mrb[20].mxu1 %vm591_vm3, %v11836_v62 }
 0x294   : > { %9969 = vmatprep.mubr.msk.bf16.mxu1 %vm591_vm3, %v11842_v13 }
 0x29b   : > { %9970 = vmatmul.mubr.msk.bf16.gmra.mrb[24].mxu1 %vm591_vm3, %v11844_v16 }
 0x29c   : > { %9973 = vmatprep.mubr.msk.bf16.mxu1 %vm591_vm3, %v11850_v29 }
 0x2a3   : > { %9974 = vmatmul.mubr.msk.bf16.gmra.mrb[28].mxu1 %vm591_vm3, %v2268_v2 }
 0x2a4   : > { %9979 = vmatprep.mubr.msk.bf16.mxu1 %vm591_vm3, %v11652_v59  ;;  %v2546_v59 = vld [vmem:[#allocation2 + $0x198] sm:$0xff] }
 0x2ab   : > { %9980 = vmatmul.mubr.msk.bf16.vlgmr.msra.gmra.mrb[0].mxu1 %vm591_vm3, %v11665_v63  ;;  %v2547_v63 = vld [vmem:[#allocation2 + $0x1a0] sm:$0xff] }
 0x2ac   : > { %10012 = vmatpush3.bf16.msra.mxu1 %v2909_v10  ;;  %9983 = vmatprep.mubr.msk.bf16.mxu1 %vm591_vm3, %v11667_v0  ;;  %v2563_v0 = vpack.c.bf16 %v2547_v63, %v2546_v59 }
 0x2ad   : > { %11035 = vmatprep.subr.msk.bf16.mxu1 %vm848_vm2, %v9232_v12 }
 0x2b3   : > { %9984 = vmatmul.mubr.msk.bf16.gmra.mrb[4].mxu1 %vm591_vm3, %v11673_v7  ;;  %v3203_v7 = vsel %vm848_vm2, %v9232_v12, 0 }
 0x2b4   : > { %9987 = vmatprep.mubr.msk.bf16.mxu1 %vm591_vm3, %v11675_v8  ;;  %v2840_v8 = vld [vmem:[#allocation2 + $0x199] sm:$0xff] }
 0x2bb   : > { %9988 = vmatmul.mubr.msk.bf16.gmra.mrb[8].mxu1 %vm591_vm3, %v11681_v14  ;;  %v2841_v14 = vld [vmem:[#allocation2 + $0x1a1] sm:$0xff] }
 0x2bc   : > { %9991 = vmatprep.mubr.msk.bf16.mxu1 %vm591_vm3, %v11683_v15  ;;  %v2857_v15 = vpack.c.bf16 %v2841_v14, %v2840_v8 }
 0x2c3   : > { %9992 = vmatmul.mubr.msk.bf16.gmra.mrb[12].mxu1 %vm591_vm3, %v11689_v20  ;;  %v3134_v20 = vld [vmem:[#allocation2 + $0x19a] sm:$0xff] }
 0x2c4   : > { %9995 = vmatprep.mubr.msk.bf16.mxu1 %vm591_vm3, %v11691_v21  ;;  %v3135_v21 = vld [vmem:[#allocation2 + $0x1a2] sm:$0xff] }
 0x2cb   : > { %9996 = vmatmul.mubr.msk.bf16.gmra.mrb[16].mxu1 %vm591_vm3, %v11697_v26  ;;  %v3151_v26 = vpack.c.bf16 %v3135_v21, %v3134_v20 }
 0x2cc   : > { %9999 = vmatprep.mubr.msk.bf16.mxu1 %vm591_vm3, %v11699_v27  ;;  %v738_v27 = vld [vmem:[%s15705_s12] sm:$0xff] }
 0x2d3   : > { %10000 = vmatmul.mubr.msk.bf16.gmra.mrb[20].mxu1 %vm591_vm3, %v11705_v32  ;;  %v739_v32 = vld [vmem:[%s15705_s12 + $0x8] sm:$0xff] }
 0x2d4   : > { %10003 = vmatprep.mubr.msk.bf16.mxu1 %vm591_vm3, %v11707_v33  ;;  %v12083_v33 = vpack.c.bf16 %v739_v32, %v738_v27 }
 0x2d6   : > { %16129 = vst [vmem:[#allocation5_spill] sm:$0xff] %v12083_v33  ;;  %10444 = vmatpush3.bf16.msra.mxu0 %v12083_v33 }
 0x2d7   : > { %10093 = vmatprep.subr.mxu0 %v15708_v6 }
 0x2db   : > { %10004 = vmatmul.mubr.msk.bf16.gmra.mrb[24].mxu1 %vm591_vm3, %v11713_v39  ;;  %v12092_v39 = vld [vmem:[%s15698_s5] ss:$0 sm:$0xff] }
 0x2dc   : > { %10007 = vmatprep.mubr.msk.bf16.mxu1 %vm591_vm3, %v11889_v38 }
 0x2e3   : > { %10008 = vmatmul.mubr.msk.bf16.gmra.mrb[28].mxu1 %vm591_vm3, %v2563_v0 }
 0x2e4   : > { %10013 = vmatprep.mubr.msk.bf16.mxu1 %vm591_vm3, %v11722_v47 }
 0x2eb   : > { %10014 = vmatmul.mubr.msk.bf16.vlgmr.msra.gmra.mrb[0].mxu1 %vm591_vm3, %v11735_v53 }
 0x2ec   : > { %10046 = vmatpush3.bf16.msra.mxu1 %v3203_v7  ;;  %10017 = vmatprep.mubr.msk.bf16.mxu1 %vm591_vm3, %v11737_v54 }
 0x2ed   : > { %10439 = vmatprep.subr.bf16.mxu1 %v11330_v3 }
 0x2f3   : > { %10018 = vmatmul.mubr.msk.bf16.gmra.mrb[4].mxu1 %vm591_vm3, %v11743_v60 }
 0x2f4   : > { %10021 = vmatprep.mubr.msk.bf16.mxu1 %vm591_vm3, %v11745_v61 }
 0x2fb   : > { %10022 = vmatmul.mubr.msk.bf16.gmra.mrb[8].mxu1 %vm591_vm3, %v11751_v5 }
 0x2fc   : > { %10025 = vmatprep.mubr.msk.bf16.mxu1 %vm591_vm3, %v11753_v9 }
 0x303   : > { %10026 = vmatmul.mubr.msk.bf16.gmra.mrb[12].mxu1 %vm591_vm3, %v11759_v17 }
 0x304   : > { %10029 = vmatprep.mubr.msk.bf16.mxu1 %vm591_vm3, %v11761_v18 }
 0x30b   : > { %10030 = vmatmul.mubr.msk.bf16.gmra.mrb[16].mxu1 %vm591_vm3, %v11767_v25 }
 0x30c   : > { %10033 = vmatprep.mubr.msk.bf16.mxu1 %vm591_vm3, %v11769_v28 }
 0x313   : > { %10034 = vmatmul.mubr.msk.bf16.gmra.mrb[20].mxu1 %vm591_vm3, %v11775_v35 }
 0x314   : > { %10037 = vmatprep.mubr.msk.bf16.mxu1 %vm591_vm3, %v11777_v36 }
 0x31b   : > { %10038 = vmatmul.mubr.msk.bf16.gmra.mrb[24].mxu1 %vm591_vm3, %v11783_v43 }
 0x31c   : > { %10041 = vmatprep.mubr.msk.bf16.mxu1 %vm591_vm3, %v11928_v50 }
 0x323   : > { %10042 = vmatmul.mubr.msk.bf16.gmra.mrb[28].mxu1 %vm591_vm3, %v2857_v15 }
 0x324   : > { %10047 = vmatprep.mubr.msk.bf16.mxu1 %vm591_vm3, %v11792_v58 }
 0x32b   : > { %10048 = vmatmul.mubr.msk.bf16.vlgmr.msra.gmra.mrb[0].mxu1 %vm591_vm3, %v11802_v48 }
 0x32c   : > { %10051 = vmatprep.mubr.msk.bf16.mxu1 %vm591_vm3, %v11804_v4  ;;  %10441 = vmatpush3.bf16.msra.mxu1 %v12083_v33 }
 0x32d   : > { %10445 = vmatprep.subr.bf16.mxu1 %v11330_v3 }
 0x333   : > { %10052 = vmatmul.mubr.msk.bf16.gmra.mrb[4].mxu1 %vm591_vm3, %v11810_v19 }
 0x334   : > { %10055 = vmatprep.mubr.msk.bf16.mxu1 %vm591_vm3, %v11812_v22 }
 0x33b   : > { %10056 = vmatmul.mubr.msk.bf16.gmra.mrb[8].mxu1 %vm591_vm3, %v11818_v31 }
 0x33c   : > { %10059 = vmatprep.mubr.msk.bf16.mxu1 %vm591_vm3, %v11820_v34 }
 0x343   : > { %10060 = vmatmul.mubr.msk.bf16.gmra.mrb[12].mxu1 %vm591_vm3, %v11826_v42 }
 0x344   : > { %10063 = vmatprep.mubr.msk.bf16.mxu1 %vm591_vm3, %v11828_v46 }
 0x34b   : > { %10064 = vmatmul.mubr.msk.bf16.gmra.mrb[16].mxu1 %vm591_vm3, %v11834_v11 }
 0x34c   : > { %10067 = vmatprep.mubr.msk.bf16.mxu1 %vm591_vm3, %v11836_v62 }
 0x353   : > { %10068 = vmatmul.mubr.msk.bf16.gmra.mrb[20].mxu1 %vm591_vm3, %v11842_v13 }
 0x354   : > { %10071 = vmatprep.mubr.msk.bf16.mxu1 %vm591_vm3, %v11844_v16 }
 0x35b   : > { %10072 = vmatmul.mubr.msk.bf16.gmra.mrb[24].mxu1 %vm591_vm3, %v11850_v29 }
 0x35c   : > { %10075 = vmatprep.mubr.msk.bf16.mxu1 %vm591_vm3, %v2268_v2 }
 0x363   : > { %10076 = vmatmul.mubr.msk.bf16.gmra.mrb[28].mxu1 %vm591_vm3, %v3151_v26 }
 0x364   : > { %10083 = vmatprep.mubr.msk.f32.mxu1 %vm15909_vm0, %v15708_v6 }
 0x3fe   : > { %v10049_v47 = vpop.f32.mrb[0].mxu1 }
 0x3ff   : > { %v3239_v53 = vpop.f32.mrb[1].mxu1  ;;  %v12095_v54 = vadd.f32 %v10049_v47, %v12092_v39 }
 0x400   : > { %v12098_v60 = vadd.f32 %v12092_v39, %v3239_v53  ;;  %v10050_v61 = vpop.f32.mrb[2].mxu1 }
 0x401   : > { %v3242_v5 = vpop.f32.mrb[3].mxu1  ;;  %v12103_v17 = vadd.f32 %v10050_v61, %v12092_v39  ;;  %v3470_v25 = vmul.f32 %v12095_v54, %v12095_v54  ;;  %v3402_v58 = vsel %vm15912_vm7, %v12095_v54, 0.0 }
 0x402   : > { %v3468_v9 = vmul.f32 %v12098_v60, %v12098_v60  ;;  %v12106_v18 = vadd.f32 %v12092_v39, %v3242_v5  ;;  %v3399_v28 = vsel %vm15912_vm7, %v12098_v60, 0.0 }
 0x403   : > { %v3471_v4 = vmul.f32 %v12103_v17, %v12103_v17  ;;  %v3503_v46 = vsel %vm15912_vm7, %v3470_v25, 0.0  ;;  %v3404_v11 = vsel %vm15912_vm7, %v12103_v17, 0.0 }
 0x404   : > { %v3400_v35 = vsel %vm15912_vm7, %v12106_v18, 0.0  ;;  %v3469_v36 = vmul.f32 %v12106_v18, %v12106_v18  ;;  %v3500_v48 = vsel %vm15912_vm7, %v3468_v9, 0.0 }
 0x405   : > { %v3401_v43 = vadd.f32 %v3400_v35, %v3399_v28  ;;  %v3505_v30 = vsel %vm15912_vm7, %v3471_v4, 0.0 }
 0x406   : > { %v3501_v19 = vsel %vm15912_vm7, %v3469_v36, 0.0  ;;  %v10053_v22 = vpop.f32.mrb[4].mxu1 }
 0x407   : > { %v3403_v31 = vadd.f32 %v3402_v58, %v3401_v43  ;;  %v3502_v34 = vadd.f32 %v3501_v19, %v3500_v48  ;;  %v3255_v42 = vpop.f32.mrb[5].mxu1  ;;  %v12129_v23 = vadd.f32 %v10053_v22, %v12092_v39 }
 0x408   : > { %v12126_v62 = vadd.f32 %v12092_v39, %v3255_v42  ;;  %v10054_v13 = vpop.f32.mrb[6].mxu1 }
 0x409   : > { %v3504_v16 = vadd.f32 %v3503_v46, %v3502_v34  ;;  %v3405_v24 = vadd.f32 %v3404_v11, %v3403_v31  ;;  %v3258_v29 = vpop.f32.mrb[7].mxu1  ;;  %v12140_v41 = vadd.f32 %v10054_v13, %v12092_v39  ;;  %v3474_v50 = vmul.f32 %v12129_v23, %v12129_v23 }
 0x40a   : > { %v3406_v37 = vsel %vm15912_vm7, %v12126_v62, 0.0  ;;  %v3472_v55 = vmul.f32 %v12126_v62, %v12126_v62  ;;  %v12137_v57 = vadd.f32 %v12092_v39, %v3258_v29  ;;  %v3410_v1 = vsel %vm15912_vm7, %v12129_v23, 0.0 }
 0x40b   : > { %v3407_v38 = vadd.f32 %v3406_v37, %v3405_v24  ;;  %v3506_v40 = vadd.f32 %v3505_v30, %v3504_v16  ;;  %v3475_v10 = vmul.f32 %v12140_v41, %v12140_v41  ;;  %v3412_v0 = vsel %vm15912_vm7, %v12140_v41, 0.0 }
 0x40c   : > { %v3507_v44 = vsel %vm15912_vm7, %v3472_v55, 0.0  ;;  %v3408_v49 = vsel %vm15912_vm7, %v12137_v57, 0.0  ;;  %v3473_v52 = vmul.f32 %v12137_v57, %v12137_v57  ;;  %v3511_v15 = vsel %vm15912_vm7, %v3474_v50, 0.0 }
 0x40d   : > { %v3508_v51 = vadd.f32 %v3507_v44, %v3506_v40  ;;  %v3409_v56 = vadd.f32 %v3408_v49, %v3407_v38  ;;  %v3513_v61 = vsel %vm15912_vm7, %v3475_v10, 0.0 }
 0x40e   : > { %v10057_v2 = vpop.f32.mrb[8].mxu1  ;;  %v3509_v59 = vsel %vm15912_vm7, %v3473_v52, 0.0 }
 0x40f   : > { %v3411_v12 = vadd.f32 %v3410_v1, %v3409_v56  ;;  %v3271_v63 = vpop.f32.mrb[9].mxu1  ;;  %v3510_v7 = vadd.f32 %v3509_v59, %v3508_v51  ;;  %v12161_v20 = vadd.f32 %v10057_v2, %v12092_v39 }
 0x410   : > { %v12157_v8 = vadd.f32 %v12092_v39, %v3271_v63  ;;  %v10058_v14 = vpop.f32.mrb[10].mxu1 }
 0x411   : > { %v3413_v21 = vadd.f32 %v3412_v0, %v3411_v12  ;;  %v3274_v26 = vpop.f32.mrb[11].mxu1  ;;  %v3512_v27 = vadd.f32 %v3511_v15, %v3510_v7  ;;  %v12172_v9 = vadd.f32 %v10058_v14, %v12092_v39  ;;  %v3478_v43 = vmul.f32 %v12161_v20, %v12161_v20 }
 0x412   : > { %v3414_v32 = vsel %vm15912_vm7, %v12157_v8, 0.0  ;;  %v3476_v47 = vmul.f32 %v12157_v8, %v12157_v8  ;;  %v12168_v53 = vadd.f32 %v12092_v39, %v3274_v26  ;;  %v3418_v48 = vsel %vm15912_vm7, %v12161_v20, 0.0 }
 0x413   : > { %v3415_v5 = vadd.f32 %v3414_v32, %v3413_v21  ;;  %v3514_v25 = vadd.f32 %v3513_v61, %v3512_v27  ;;  %v3479_v31 = vmul.f32 %v12172_v9, %v12172_v9  ;;  %v3420_v46 = vsel %vm15912_vm7, %v12172_v9, 0.0 }
 0x414   : > { %v3515_v28 = vsel %vm15912_vm7, %v3476_v47, 0.0  ;;  %v3416_v35 = vsel %vm15912_vm7, %v12168_v53, 0.0  ;;  %v3477_v36 = vmul.f32 %v12168_v53, %v12168_v53  ;;  %v3519_v24 = vsel %vm15912_vm7, %v3478_v43, 0.0 }
 0x415   : > { %v3417_v58 = vadd.f32 %v3416_v35, %v3415_v5  ;;  %v3516_v4 = vadd.f32 %v3515_v28, %v3514_v25  ;;  %v3521_v49 = vsel %vm15912_vm7, %v3479_v31, 0.0 }
 0x416   : > { %v3517_v19 = vsel %vm15912_vm7, %v3477_v36, 0.0  ;;  %v10061_v22 = vpop.f32.mrb[12].mxu1 }
 0x417   : > { %v3419_v34 = vadd.f32 %v3418_v48, %v3417_v58  ;;  %v3287_v42 = vpop.f32.mrb[13].mxu1  ;;  %v3518_v11 = vadd.f32 %v3517_v19, %v3516_v4  ;;  %v12193_v29 = vadd.f32 %v10061_v22, %v12092_v39 }
 0x418   : > { %v12189_v13 = vadd.f32 %v12092_v39, %v3287_v42  ;;  %v10062_v16 = vpop.f32.mrb[14].mxu1 }
 0x419   : > { %v3421_v30 = vadd.f32 %v3420_v46, %v3419_v34  ;;  %v3290_v37 = vpop.f32.mrb[15].mxu1  ;;  %v3520_v55 = vadd.f32 %v3519_v24, %v3518_v11  ;;  %v12204_v51 = vadd.f32 %v10062_v16, %v12092_v39  ;;  %v3482_v10 = vmul.f32 %v12193_v29, %v12193_v29 }
 0x41a   : > { %v3422_v38 = vsel %vm15912_vm7, %v12189_v13, 0.0  ;;  %v3480_v40 = vmul.f32 %v12189_v13, %v12189_v13  ;;  %v12200_v44 = vadd.f32 %v12092_v39, %v3290_v37  ;;  %v3426_v59 = vsel %vm15912_vm7, %v12193_v29, 0.0 }
 0x41b   : > { %v3423_v50 = vadd.f32 %v3422_v38, %v3421_v30  ;;  %v3522_v56 = vadd.f32 %v3521_v49, %v3520_v55  ;;  %v3483_v14 = vmul.f32 %v12204_v51, %v12204_v51  ;;  %v3428_v26 = vsel %vm15912_vm7, %v12204_v51, 0.0 }
 0x41c   : > { %v3523_v52 = vsel %vm15912_vm7, %v3480_v40, 0.0  ;;  %v3424_v1 = vsel %vm15912_vm7, %v12200_v44, 0.0  ;;  %v3481_v2 = vmul.f32 %v12200_v44, %v12200_v44  ;;  %v3527_v61 = vsel %vm15912_vm7, %v3482_v10, 0.0 }
 0x41d   : > { %v3425_v12 = vadd.f32 %v3424_v1, %v3423_v50  ;;  %v3524_v63 = vadd.f32 %v3523_v52, %v3522_v56  ;;  %v3529_v48 = vsel %vm15912_vm7, %v3483_v14, 0.0 }
 0x41e   : > { %v3525_v0 = vsel %vm15912_vm7, %v3481_v2, 0.0  ;;  %v10065_v7 = vpop.f32.mrb[16].mxu1 }
 0x41f   : > { %v3427_v15 = vadd.f32 %v3426_v59, %v3425_v12  ;;  %v3303_v21 = vpop.f32.mrb[17].mxu1  ;;  %v3526_v27 = vadd.f32 %v3525_v0, %v3524_v63  ;;  %v12225_v5 = vadd.f32 %v10065_v7, %v12092_v39 }
 0x420   : > { %v12221_v32 = vadd.f32 %v12092_v39, %v3303_v21  ;;  %v10066_v47 = vpop.f32.mrb[18].mxu1 }
 0x421   : > { %v3429_v25 = vadd.f32 %v3428_v26, %v3427_v15  ;;  %v3306_v28 = vpop.f32.mrb[19].mxu1  ;;  %v3528_v35 = vadd.f32 %v3527_v61, %v3526_v27  ;;  %v12236_v19 = vadd.f32 %v10066_v47, %v12092_v39  ;;  %v3486_v46 = vmul.f32 %v12225_v5, %v12225_v5 }
 0x422   : > { %v3430_v36 = vsel %vm15912_vm7, %v12221_v32, 0.0  ;;  %v3484_v43 = vmul.f32 %v12221_v32, %v12221_v32  ;;  %v12232_v58 = vadd.f32 %v12092_v39, %v3306_v28  ;;  %v3434_v16 = vsel %vm15912_vm7, %v12225_v5, 0.0 }
 0x423   : > { %v3431_v4 = vadd.f32 %v3430_v36, %v3429_v25  ;;  %v3530_v22 = vadd.f32 %v3529_v48, %v3528_v35  ;;  %v3487_v55 = vmul.f32 %v12236_v19, %v12236_v19  ;;  %v3436_v49 = vsel %vm15912_vm7, %v12236_v19, 0.0 }
 0x424   : > { %v3531_v31 = vsel %vm15912_vm7, %v3484_v43, 0.0  ;;  %v3432_v34 = vsel %vm15912_vm7, %v12232_v58, 0.0  ;;  %v3485_v42 = vmul.f32 %v12232_v58, %v12232_v58  ;;  %v3535_v1 = vsel %vm15912_vm7, %v3486_v46, 0.0 }
 0x425   : > { %v3433_v11 = vadd.f32 %v3432_v34, %v3431_v4  ;;  %v3532_v24 = vadd.f32 %v3531_v31, %v3530_v22  ;;  %v3537_v14 = vsel %vm15912_vm7, %v3487_v55, 0.0 }
 0x426   : > { %v3533_v30 = vsel %vm15912_vm7, %v3485_v42, 0.0  ;;  %v10069_v37 = vpop.f32.mrb[20].mxu1 }
 0x427   : > { %v3435_v38 = vadd.f32 %v3434_v16, %v3433_v11  ;;  %v3319_v40 = vpop.f32.mrb[21].mxu1  ;;  %v3534_v50 = vadd.f32 %v3533_v30, %v3532_v24  ;;  %v12257_v2 = vadd.f32 %v10069_v37, %v12092_v39 }
 0x428   : > { %v12253_v56 = vadd.f32 %v12092_v39, %v3319_v40  ;;  %v10070_v52 = vpop.f32.mrb[22].mxu1 }
 0x429   : > { %v3437_v10 = vadd.f32 %v3436_v49, %v3435_v38  ;;  %v3322_v12 = vpop.f32.mrb[23].mxu1  ;;  %v3536_v59 = vadd.f32 %v3535_v1, %v3534_v50  ;;  %v12268_v21 = vadd.f32 %v10070_v52, %v12092_v39  ;;  %v3490_v25 = vmul.f32 %v12257_v2, %v12257_v2 }
 0x42a   : > { %v3438_v63 = vsel %vm15912_vm7, %v12253_v56, 0.0  ;;  %v3488_v0 = vmul.f32 %v12253_v56, %v12253_v56  ;;  %v12264_v7 = vadd.f32 %v12092_v39, %v3322_v12  ;;  %v3442_v35 = vsel %vm15912_vm7, %v12257_v2, 0.0 }
 0x42b   : > { %v3439_v15 = vadd.f32 %v3438_v63, %v3437_v10  ;;  %v3538_v26 = vadd.f32 %v3537_v14, %v3536_v59  ;;  %v3491_v4 = vmul.f32 %v12268_v21, %v12268_v21  ;;  %v3444_v34 = vsel %vm15912_vm7, %v12268_v21, 0.0 }
 0x42c   : > { %v3539_v27 = vsel %vm15912_vm7, %v3488_v0, 0.0  ;;  %v3440_v47 = vsel %vm15912_vm7, %v12264_v7, 0.0  ;;  %v3489_v61 = vmul.f32 %v12264_v7, %v12264_v7  ;;  %v3543_v16 = vsel %vm15912_vm7, %v3490_v25, 0.0 }
 0x42d   : > { %v3441_v28 = vadd.f32 %v3440_v47, %v3439_v15  ;;  %v3540_v36 = vadd.f32 %v3539_v27, %v3538_v26  ;;  %v3545_v50 = vsel %vm15912_vm7, %v3491_v4, 0.0 }
 0x42e   : > { %v3541_v43 = vsel %vm15912_vm7, %v3489_v61, 0.0  ;;  %v10073_v48 = vpop.f32.mrb[24].mxu1 }
 0x42f   : > { %v3443_v22 = vadd.f32 %v3442_v35, %v3441_v28  ;;  %v3335_v31 = vpop.f32.mrb[25].mxu1  ;;  %v3542_v42 = vadd.f32 %v3541_v43, %v3540_v36  ;;  %v12289_v24 = vadd.f32 %v10073_v48, %v12092_v39 }
 0x430   : > { %v12285_v46 = vadd.f32 %v12092_v39, %v3335_v31  ;;  %v10074_v11 = vpop.f32.mrb[26].mxu1 }
 0x431   : > { %v3445_v30 = vadd.f32 %v3444_v34, %v3443_v22  ;;  %v3338_v37 = vpop.f32.mrb[27].mxu1  ;;  %v3544_v55 = vadd.f32 %v3543_v16, %v3542_v42  ;;  %v12300_v1 = vadd.f32 %v10074_v11, %v12092_v39  ;;  %v3494_v0 = vmul.f32 %v12289_v24, %v12289_v24 }
 0x432   : > { %v3446_v38 = vsel %vm15912_vm7, %v12285_v46, 0.0  ;;  %v3492_v40 = vmul.f32 %v12285_v46, %v12285_v46  ;;  %v12296_v49 = vadd.f32 %v12092_v39, %v3338_v37  ;;  %v3450_v15 = vsel %vm15912_vm7, %v12289_v24, 0.0 }
 0x433   : > { %v3447_v52 = vadd.f32 %v3446_v38, %v3445_v30  ;;  %v3546_v10 = vadd.f32 %v3545_v50, %v3544_v55  ;;  %v3495_v61 = vmul.f32 %v12300_v1, %v12300_v1  ;;  %v3452_v35 = vsel %vm15912_vm7, %v12300_v1, 0.0 }
 0x434   : > { %v3547_v12 = vsel %vm15912_vm7, %v3492_v40, 0.0  ;;  %v3448_v59 = vsel %vm15912_vm7, %v12296_v49, 0.0  ;;  %v3493_v63 = vmul.f32 %v12296_v49, %v12296_v49  ;;  %v3551_v4 = vsel %vm15912_vm7, %v3494_v0, 0.0 }
 0x435   : > { %v3449_v14 = vadd.f32 %v3448_v59, %v3447_v52  ;;  %v3548_v26 = vadd.f32 %v3547_v12, %v3546_v10  ;;  %v3553_v37 = vsel %vm15912_vm7, %v3495_v61, 0.0 }
 0x436   : > { %v3549_v27 = vsel %vm15912_vm7, %v3493_v63, 0.0  ;;  %v10077_v47 = vpop.f32.mrb[28].mxu1 }
 0x437   : > { %v3451_v25 = vadd.f32 %v3450_v15, %v3449_v14  ;;  %v3351_v28 = vpop.f32.mrb[29].mxu1  ;;  %v3550_v36 = vadd.f32 %v3549_v27, %v3548_v26  ;;  %v12321_v22 = vadd.f32 %v10077_v47, %v12092_v39 }
 0x438   : > { %v12317_v43 = vadd.f32 %v12092_v39, %v3351_v28  ;;  %v10078_v48 = vpop.f32.mrb[30].mxu1 }
 0x439   : > { %v3453_v31 = vadd.f32 %v3452_v35, %v3451_v25  ;;  %v3354_v34 = vpop.f32.mrb[31].mxu1  ;;  %v3552_v42 = vadd.f32 %v3551_v4, %v3550_v36  ;;  %v12332_v38 = vadd.f32 %v10078_v48, %v12092_v39  ;;  %v3498_v12 = vmul.f32 %v12321_v22, %v12321_v22 }
 0x43a   : > { %v3454_v11 = vsel %vm15912_vm7, %v12317_v43, 0.0  ;;  %v3496_v16 = vmul.f32 %v12317_v43, %v12317_v43  ;;  %v12328_v30 = vadd.f32 %v12092_v39, %v3354_v34  ;;  %v3458_v63 = vsel %vm15912_vm7, %v12321_v22, 0.0 }
 0x43b   : > { %v3455_v55 = vadd.f32 %v3454_v11, %v3453_v31  ;;  %v3554_v40 = vadd.f32 %v3553_v37, %v3552_v42  ;;  %v3499_v14 = vmul.f32 %v12332_v38, %v12332_v38  ;;  %v3460_v26 = vsel %vm15912_vm7, %v12332_v38, 0.0 }
 0x43c   : > { %v3555_v50 = vsel %vm15912_vm7, %v3496_v16, 0.0  ;;  %v3456_v52 = vsel %vm15912_vm7, %v12328_v30, 0.0  ;;  %v3497_v10 = vmul.f32 %v12328_v30, %v12328_v30  ;;  %v3559_v47 = vsel %vm15912_vm7, %v3498_v12, 0.0 }
 0x43d   : > { %v3457_v59 = vadd.f32 %v3456_v52, %v3455_v55  ;;  %v3556_v0 = vadd.f32 %v3555_v50, %v3554_v40  ;;  %v3561_v28 = vsel %vm15912_vm7, %v3499_v14, 0.0  ;;  %v740_v52 = vld [vmem:[%s15706_s13] sm:$0xff] }
 0x43e   : > { %v3557_v39 = vsel %vm15912_vm7, %v3497_v10, 0.0 }
 0x43f   : > { %v3459_v15 = vadd.f32 %v3458_v63, %v3457_v59  ;;  %v3558_v27 = vadd.f32 %v3557_v39, %v3556_v0 }
 0x441   : > { %v3461_v61 = vadd.f32 %v3460_v26, %v3459_v15  ;;  %v3560_v25 = vadd.f32 %v3559_v47, %v3558_v27 }
 0x443   : > { %v3462_v35 = vrot.slane %v3461_v61, 4  ;;  %v3562_v36 = vadd.f32 %v3561_v28, %v3560_v25  ;;  %v742_v25 = vld [vmem:[%s15699_s6] sm:$0x1] }
 0x445   : > { %v3463_v48 = vadd.f32 %v3462_v35, %v3461_v61  ;;  %v3563_v4 = vrot.slane %v3562_v36, 4 }
 0x447   : > { %v3464_v31 = vrot.slane %v3463_v48, 2  ;;  %v3564_v34 = vadd.f32 %v3563_v4, %v3562_v36 }
 0x449   : > { %v3465_v42 = vadd.f32 %v3464_v31, %v3463_v48  ;;  %v3565_v11 = vrot.slane %v3564_v34, 2  ;;  %v743_v48 = vld [vmem:[%s15700_s7] sm:$0x1] }
 0x44b   : > { %v3466_v16 = vrot.slane %v3465_v42, 1  ;;  %v3566_v37 = vadd.f32 %v3565_v11, %v3564_v34 }
 0x44d   : > { %v3467_v55 = vadd.f32 %v3466_v16, %v3465_v42  ;;  %v3567_v40 = vrot.slane %v3566_v37, 1 }
 0x44f   : > { %10084 = vmatmul.mubr.msk.f32.vlgmr.msra.gmra.mrb[32].mxu1 %vm15912_vm7, %v3467_v55  ;;  %v3568_v50 = vadd.f32 %v3567_v40, %v3566_v37 }
 0x450   : > { %10447 = vmatpush3.bf16.msra.mxu1 %v12083_v33  ;;  %10413 = vmatprep.mubr.msk.f32.mxu1 %vm15909_vm0, %v15708_v6 }
 0x451   : > { %10448 = vmatprep.subr.bf16.mxu1 %v11330_v3  ;;  %10091 = vmatmul.mubr.msk.f32.vlgmr.msra.gmra.mrb[2].mxu0 %vm15912_vm7, %v3568_v50 }
 0x452   : > { %10095 = vmatprep.mubr.msk.f32.mxu0 %vm15909_vm0, %v15708_v6  ;;  %10094 = vmatpush3.msra.mxu0 %v740_v52 }
 0x453   : > { %10098 = vmatprep.subr.mxu0 %v15708_v6 }
 0x522   : > { %v3638_v10 = vpop.f32.mrb[32].mxu1 }
 0x523   : > { %v3642_v12 = vmul.f32 0.001953125, %v3638_v10  ;;  %v10085_v59 = vpop.f32.mrb[33].mxu1 }
 0x524   : > { %v3712_v0 = vpop.f32.mrb[2].mxu0 }
 0x525   : > { %v3717_v63 = vmul.f32 %v3642_v12, %v3642_v12  ;;  %10096 = vmatmul.mubr.msk.f32.vlgmr.msra.gmra.mrb[4].mxu0 %vm15904_vm8, %v3642_v12  ;;  %v3716_v3 = vmul.f32 0.001953125, %v3712_v0  ;;  %v10092_v39 = vpop.f32.mrb[3].mxu0 }
 0x526   : > { %10099 = vmatpush3.msra.mxu0 %v740_v52  ;;  %10100 = vmatprep.mubr.msk.f32.mxu0 %vm15909_vm0, %v15708_v6 }
 0x527   : > { %v3718_v14 = vsub.f32 %v3716_v3, %v3717_v63 }
 0x529   : > { %v3719_v15 = vmax.f32 %v3718_v14, 0.0 }
 0x52b   : > { %v3720_v26 = vadd.f32 1e-05, %v3719_v15 }
 0x52d   : > { %11060 = vrsqrt.f32 %v3720_v26 }
 0x537   : > { %v11061_v27 = vpop.eup %11060 }
 0x538   : > { %10101 = vmatmul.mubr.msk.f32.vlgmr.msra.gmra.mrb[6].mxu0 %vm15904_vm8, %v11061_v27 }
 0x5f8   : > { %v3792_v47 = vpop.f32.mrb[4].mxu0 }
 0x5f9   : > { %v10097_v61 = vpop.f32.mrb[5].mxu0 }
 0x60b   : > { %v3865_v28 = vpop.f32.mrb[6].mxu0 }
 0x60c   : > { %v3869_v35 = vmul.f32 %v3865_v28, %v742_v25  ;;  %v10102_v36 = vpop.f32.mrb[7].mxu0 }
 0x60e   : > { %v3870_v4 = vmul.f32 %v3869_v35, %v3792_v47  ;;  %v3875_v31 = vrot.slane %v3869_v35, %v11547_v45 }
 0x610   : > { %v3871_v34 = vsub.f32 %v743_v48, %v3870_v4  ;;  %v3876_v42 = vmul.f32 %v12098_v60, %v3875_v31  ;;  %v3877_v11 = vmul.f32 %v12106_v18, %v3875_v31  ;;  %v3878_v16 = vmul.f32 %v12095_v54, %v3875_v31 }
 0x611   : > { %v3879_v37 = vmul.f32 %v12103_v17, %v3875_v31  ;;  %v3880_v55 = vmul.f32 %v12126_v62, %v3875_v31  ;;  %v3881_v40 = vmul.f32 %v12137_v57, %v3875_v31  ;;  %v3882_v50 = vmul.f32 %v12129_v23, %v3875_v31 }
 0x612   : > { %v3912_v52 = vrot.slane %v3871_v34, %v11547_v45  ;;  %v3883_v10 = vmul.f32 %v12140_v41, %v3875_v31  ;;  %v3884_v12 = vmul.f32 %v12157_v8, %v3875_v31  ;;  %v3885_v60 = vmul.f32 %v12168_v53, %v3875_v31 }
 0x613   : > { %v3886_v18 = vmul.f32 %v12161_v20, %v3875_v31  ;;  %v3887_v54 = vmul.f32 %v12172_v9, %v3875_v31  ;;  %v3888_v17 = vmul.f32 %v12189_v13, %v3875_v31  ;;  %v3889_v62 = vmul.f32 %v12200_v44, %v3875_v31 }
 0x614   : > { %v3890_v57 = vmul.f32 %v12193_v29, %v3875_v31  ;;  %v3891_v23 = vmul.f32 %v12204_v51, %v3875_v31  ;;  %v3892_v59 = vmul.f32 %v12221_v32, %v3875_v31  ;;  %v3893_v41 = vmul.f32 %v12232_v58, %v3875_v31 }
 0x615   : > { %v3894_v8 = vmul.f32 %v12225_v5, %v3875_v31  ;;  %v3895_v53 = vmul.f32 %v12236_v19, %v3875_v31  ;;  %v3896_v20 = vmul.f32 %v12253_v56, %v3875_v31  ;;  %v3897_v9 = vmul.f32 %v12264_v7, %v3875_v31 }
 0x616   : > { %v3898_v13 = vmul.f32 %v12257_v2, %v3875_v31  ;;  %v3899_v44 = vmul.f32 %v12268_v21, %v3875_v31  ;;  %v3900_v29 = vmul.f32 %v12285_v46, %v3875_v31  ;;  %v3901_v51 = vmul.f32 %v12296_v49, %v3875_v31 }
 0x617   : > { %v3902_v32 = vmul.f32 %v12289_v24, %v3875_v31  ;;  %v3903_v58 = vmul.f32 %v12300_v1, %v3875_v31  ;;  %v3904_v5 = vmul.f32 %v12317_v43, %v3875_v31  ;;  %v3905_v19 = vmul.f32 %v12328_v30, %v3875_v31 }
 0x618   : > { %v3906_v56 = vmul.f32 %v12321_v22, %v3875_v31  ;;  %v3907_v7 = vmul.f32 %v12332_v38, %v3875_v31  ;;  %v3914_v63 = vadd.f32 %v3912_v52, %v3876_v42  ;;  %v3915_v2 = vadd.f32 %v3912_v52, %v3877_v11 }
 0x619   : > { %v3916_v0 = vadd.f32 %v3912_v52, %v3878_v16  ;;  %v3917_v21 = vadd.f32 %v3912_v52, %v3879_v37  ;;  %v3918_v3 = vadd.f32 %v3912_v52, %v3880_v55  ;;  %v3919_v46 = vadd.f32 %v3912_v52, %v3881_v40 }
 0x61a   : > { %v3920_v39 = vadd.f32 %v3912_v52, %v3882_v50  ;;  %v3921_v49 = vadd.f32 %v3912_v52, %v3883_v10  ;;  %v3922_v14 = vadd.f32 %v3912_v52, %v3884_v12  ;;  %v3923_v24 = vadd.f32 %v3912_v52, %v3885_v60 }
 0x61b   : > { %v3924_v15 = vadd.f32 %v3912_v52, %v3886_v18  ;;  %v3925_v1 = vadd.f32 %v3912_v52, %v3887_v54  ;;  %v3926_v26 = vadd.f32 %v3912_v52, %v3888_v17  ;;  %v3927_v43 = vadd.f32 %v3912_v52, %v3889_v62 }
 0x61c   : > { %v3928_v27 = vadd.f32 %v3912_v52, %v3890_v57  ;;  %v3929_v30 = vadd.f32 %v3912_v52, %v3891_v23  ;;  %v3930_v47 = vadd.f32 %v3912_v52, %v3892_v59  ;;  %v3931_v22 = vadd.f32 %v3912_v52, %v3893_v41 }
 0x61d   : > { %v3932_v61 = vadd.f32 %v3912_v52, %v3894_v8  ;;  %v3933_v38 = vadd.f32 %v3912_v52, %v3895_v53  ;;  %v3934_v25 = vadd.f32 %v3912_v52, %v3896_v20  ;;  %v3935_v28 = vadd.f32 %v3912_v52, %v3897_v9 }
 0x61e   : > { %v3936_v35 = vadd.f32 %v3912_v52, %v3898_v13  ;;  %v3937_v36 = vadd.f32 %v3912_v52, %v3899_v44  ;;  %v3938_v48 = vadd.f32 %v3912_v52, %v3900_v29  ;;  %v3939_v4 = vadd.f32 %v3912_v52, %v3901_v51 }
 0x61f   : > { %v3940_v31 = vadd.f32 %v3912_v52, %v3902_v32  ;;  %v3941_v34 = vadd.f32 %v3912_v52, %v3903_v58  ;;  %v3942_v42 = vadd.f32 %v3912_v52, %v3904_v5  ;;  %v12406_v11 = vadd.f32 %v3912_v52, %v3905_v19 }
 0x620   : > { %v12408_v16 = vadd.f32 %v3912_v52, %v3906_v56  ;;  %v12410_v37 = vadd.f32 %v3912_v52, %v3907_v7  ;;  %v12412_v55 = vmul.f32 0.5, %v3914_v63  ;;  %v12414_v40 = vmul.f32 0.5, %v3915_v2 }
 0x621   : > { %v12416_v50 = vmul.f32 0.5, %v3916_v0  ;;  %v12418_v10 = vmul.f32 0.5, %v3917_v21  ;;  %v12420_v12 = vmul.f32 0.5, %v3918_v3  ;;  %v12422_v60 = vmul.f32 0.5, %v3919_v46 }
 0x622   : > { %16130 = vst [vmem:[#allocation6_spill] sm:$0xff] %v12412_v55  ;;  %16131 = vst [vmem:[#allocation7_spill] sm:$0xff] %v12414_v40  ;;  %v12424_v18 = vmul.f32 0.5, %v3920_v39  ;;  %v12426_v54 = vmul.f32 0.5, %v3921_v49  ;;  %v12428_v17 = vmul.f32 0.5, %v3922_v14  ;;  %v12430_v52 = vmul.f32 0.5, %v3923_v24 }
 0x623   : > { %16132 = vst [vmem:[#allocation8_spill] sm:$0xff] %v12416_v50  ;;  %16133 = vst [vmem:[#allocation9_spill] sm:$0xff] %v12418_v10  ;;  %v12432_v62 = vmul.f32 0.5, %v3924_v15  ;;  %v12434_v57 = vmul.f32 0.5, %v3925_v1  ;;  %v12436_v23 = vmul.f32 0.5, %v3926_v26  ;;  %v12438_v59 = vmul.f32 0.5, %v3927_v43 }
 0x624   : > { %16134 = vst [vmem:[#allocation10_spill] sm:$0xff] %v12420_v12  ;;  %16135 = vst [vmem:[#allocation11_spill] sm:$0xff] %v12422_v60  ;;  %v12440_v41 = vmul.f32 0.5, %v3928_v27  ;;  %v12442_v8 = vmul.f32 0.5, %v3929_v30  ;;  %v12444_v53 = vmul.f32 0.5, %v3930_v47  ;;  %v12446_v20 = vmul.f32 0.5, %v3931_v22 }
 0x625   : > { %16136 = vst [vmem:[#allocation12_spill] sm:$0xff] %v12424_v18  ;;  %16137 = vst [vmem:[#allocation13_spill] sm:$0xff] %v12426_v54  ;;  %v12448_v9 = vmul.f32 0.5, %v3932_v61  ;;  %v12450_v13 = vmul.f32 0.5, %v3933_v38  ;;  %v12452_v44 = vmul.f32 0.5, %v3934_v25  ;;  %v12454_v29 = vmul.f32 0.5, %v3935_v28 }
 0x626   : > { %16138 = vst [vmem:[#allocation14_spill] sm:$0xff] %v12428_v17  ;;  %16139 = vst [vmem:[#allocation15_spill] sm:$0xff] %v12430_v52  ;;  %v12456_v51 = vmul.f32 0.5, %v3936_v35  ;;  %v12458_v32 = vmul.f32 0.5, %v3937_v36  ;;  %v12460_v58 = vmul.f32 0.5, %v3938_v48  ;;  %v12462_v5 = vmul.f32 0.5, %v3939_v4 }
 0x627   : > { %16140 = vst [vmem:[#allocation16_spill] sm:$0xff] %v12432_v62  ;;  %16141 = vst [vmem:[#allocation17_spill] sm:$0xff] %v12434_v57  ;;  %v12464_v19 = vmul.f32 0.5, %v3940_v31  ;;  %v12466_v56 = vmul.f32 0.5, %v3941_v34  ;;  %v12468_v7 = vmul.f32 0.5, %v3942_v42 }
 0x628   : > { %16142 = vst [vmem:[#allocation18_spill] sm:$0xff] %v12436_v23  ;;  %16143 = vst [vmem:[#allocation19_spill] sm:$0xff] %v12438_v59  ;;  %v12470_v6 = vmul.f32 0.70710677, %v3914_v63  ;;  %v12472_v45 = vmul.f32 0.70710677, %v3915_v2 }
 0x629   : > { %16144 = vst [vmem:[#allocation20_spill] sm:$0xff] %v12440_v41  ;;  %16145 = vst [vmem:[#allocation21_spill] sm:$0xff] %v12442_v8  ;;  %v12474_v33 = vmul.f32 0.70710677, %v3916_v0  ;;  %v12490_v63 = vmul.f32 0.70710677, %v3924_v15 }
 0x62a   : > { %16146 = vst [vmem:[#allocation22_spill] sm:$0xff] %v12444_v53  ;;  %16147 = vst [vmem:[#allocation23_spill] sm:$0xff] %v12446_v20  ;;  %v12492_v2 = vmul.f32 0.70710677, %v3925_v1  ;;  %v12494_v0 = vmul.f32 0.70710677, %v3926_v26 }
 0x62b   : > { %16148 = vst [vmem:[#allocation24_spill] sm:$0xff] %v12448_v9  ;;  %16149 = vst [vmem:[#allocation25_spill] sm:$0xff] %v12450_v13  ;;  %v12510_v15 = vmul.f32 0.70710677, %v3934_v25  ;;  %v12512_v1 = vmul.f32 0.70710677, %v3935_v28 }
 0x62c   : > { %16150 = vst [vmem:[#allocation26_spill] sm:$0xff] %v12452_v44  ;;  %16151 = vst [vmem:[#allocation27_spill] sm:$0xff] %v12454_v29  ;;  %v12476_v29 = vmul.f32 0.70710677, %v3917_v21  ;;  %v12496_v21 = vmul.f32 0.70710677, %v3927_v43 }
 0x62d   : > { %16152 = vst [vmem:[#allocation28_spill] sm:$0xff] %v12456_v51  ;;  %16153 = vst [vmem:[#allocation29_spill] sm:$0xff] %v12458_v32  ;;  %v12478_v51 = vmul.f32 0.70710677, %v3918_v3  ;;  %v12480_v32 = vmul.f32 0.70710677, %v3919_v46 }
 0x62e   : > { %16154 = vst [vmem:[#allocation30_spill] sm:$0xff] %v12460_v58  ;;  %16155 = vst [vmem:[#allocation31_spill] sm:$0xff] %v12462_v5  ;;  %v12482_v58 = vmul.f32 0.70710677, %v3920_v39  ;;  %v12484_v5 = vmul.f32 0.70710677, %v3921_v49 }
 0x62f   : > { %16156 = vst [vmem:[#allocation32_spill] sm:$0xff] %v12464_v19  ;;  %16157 = vst [vmem:[#allocation33_spill] sm:$0xff] %v12466_v56  ;;  %v12486_v19 = vmul.f32 0.70710677, %v3922_v14  ;;  %v12488_v56 = vmul.f32 0.70710677, %v3923_v24 }
 0x630   : > { %16158 = vst [vmem:[#allocation34_spill] sm:$0xff] %v12468_v7  ;;  %16159 = vst [vmem:[#allocation35_spill] sm:$0xff] %v12470_v6  ;;  %v12498_v3 = vmul.f32 0.70710677, %v3928_v27  ;;  %v12500_v46 = vmul.f32 0.70710677, %v3929_v30 }
 0x631   : > { %16160 = vst [vmem:[#allocation36_spill] sm:$0xff] %v12472_v45  ;;  %16161 = vst [vmem:[#allocation37_spill] sm:$0xff] %v12474_v33  ;;  %v12502_v39 = vmul.f32 0.70710677, %v3930_v47  ;;  %v12504_v49 = vmul.f32 0.70710677, %v3931_v22 }
 0x632   : > { %16162 = vst [vmem:[#allocation38_spill] sm:$0xff] %v12476_v29  ;;  %16163 = vst [vmem:[#allocation39_spill] sm:$0xff] %v12478_v51  ;;  %v12506_v14 = vmul.f32 0.70710677, %v3932_v61  ;;  %v12508_v24 = vmul.f32 0.70710677, %v3933_v38 }
 0x633   : > { %16164 = vst [vmem:[#allocation40_spill] sm:$0xff] %v12480_v32  ;;  %16165 = vst [vmem:[#allocation41_spill] sm:$0xff] %v12482_v58  ;;  %v12514_v26 = vmul.f32 0.70710677, %v3936_v35  ;;  %v12516_v43 = vmul.f32 0.70710677, %v3937_v36 }
 0x634   : > { %16166 = vst [vmem:[#allocation42_spill] sm:$0xff] %v12484_v5  ;;  %16167 = vst [vmem:[#allocation43_spill] sm:$0xff] %v12486_v19  ;;  %v12518_v27 = vmul.f32 0.70710677, %v3938_v48  ;;  %v12520_v30 = vmul.f32 0.70710677, %v3939_v4 }
 0x635   : > { %16168 = vst [vmem:[#allocation44_spill] sm:$0xff] %v12488_v56  ;;  %16169 = vst [vmem:[#allocation45_spill] sm:$0xff] %v12490_v63  ;;  %v12522_v47 = vmul.f32 0.70710677, %v3940_v31  ;;  %v12524_v22 = vmul.f32 0.70710677, %v3941_v34 }
 0x636   : > { %16170 = vst [vmem:[#allocation46_spill] sm:$0xff] %v12492_v2  ;;  %16171 = vst [vmem:[#allocation47_spill] sm:$0xff] %v12494_v0  ;;  %v12526_v61 = vmul.f32 0.70710677, %v3942_v42  ;;  %v12529_v38 = vmul.f32 0.70710677, %v12406_v11 }
 0x637   : > { %16172 = vst [vmem:[#allocation48_spill] sm:$0xff] %v12496_v21  ;;  %16173 = vst [vmem:[#allocation49_spill] sm:$0xff] %v12498_v3  ;;  %v12532_v25 = vmul.f32 0.70710677, %v12408_v16  ;;  %v12535_v28 = vmul.f32 0.70710677, %v12410_v37 }
 0x638   : > { %16174 = vst [vmem:[#allocation50_spill] sm:$0xff] %v12500_v46  ;;  %16175 = vst [vmem:[#allocation51_spill] sm:$0xff] %v12502_v39  ;;  %v12538_v35 = vand.u32 2147483647, %v12470_v6  ;;  %v12541_v36 = vand.u32 2147483647, %v12472_v45 }
 0x639   : > { %16176 = vst [vmem:[#allocation52_spill] sm:$0xff] %v12504_v49  ;;  %16177 = vst [vmem:[#allocation53_spill] sm:$0xff] %v12506_v14  ;;  %v12544_v48 = vand.u32 2147483647, %v12474_v33  ;;  %v12547_v4 = vand.u32 2147483647, %v12476_v29 }
 0x63a   : > { %16178 = vst [vmem:[#allocation54_spill] sm:$0xff] %v12508_v24  ;;  %16179 = vst [vmem:[#allocation55_spill] sm:$0xff] %v12510_v15  ;;  %v12550_v31 = vand.u32 2147483647, %v12478_v51  ;;  %v12553_v34 = vand.u32 2147483647, %v12480_v32 }
 0x63b   : > { %16180 = vst [vmem:[#allocation56_spill] sm:$0xff] %v12512_v1  ;;  %16181 = vst [vmem:[#allocation57_spill] sm:$0xff] %v12514_v26  ;;  %v12556_v42 = vand.u32 2147483647, %v12482_v58  ;;  %v12559_v7 = vand.u32 2147483647, %v12484_v5 }
 0x63c   : > { %16182 = vst [vmem:[#allocation58_spill] sm:$0xff] %v12516_v43  ;;  %16183 = vst [vmem:[#allocation59_spill] sm:$0xff] %v12518_v27  ;;  %v12562_v44 = vand.u32 2147483647, %v12486_v19  ;;  %v12565_v13 = vand.u32 2147483647, %v12488_v56 }
 0x63d   : > { %16184 = vst [vmem:[#allocation60_spill] sm:$0xff] %v12520_v30  ;;  %16185 = vst [vmem:[#allocation61_spill] sm:$0xff] %v12522_v47  ;;  %v12568_v9 = vand.u32 2147483647, %v12490_v63  ;;  %v12571_v20 = vand.u32 2147483647, %v12492_v2 }
 0x63e   : > { %16186 = vst [vmem:[#allocation62_spill] sm:$0xff] %v12524_v22  ;;  %16187 = vst [vmem:[#allocation63_spill] sm:$0xff] %v12526_v61  ;;  %v12574_v53 = vand.u32 2147483647, %v12494_v0  ;;  %v12577_v8 = vand.u32 2147483647, %v12496_v21 }
 0x63f   : > { %16188 = vst [vmem:[#allocation64_spill] sm:$0xff] %v12529_v38  ;;  %16189 = vst [vmem:[#allocation65_spill] sm:$0xff] %v12532_v25  ;;  %v12580_v41 = vand.u32 2147483647, %v12498_v3  ;;  %v12583_v59 = vand.u32 2147483647, %v12500_v46 }
 0x640   : > { %16190 = vst [vmem:[#allocation66_spill] sm:$0xff] %v12535_v28  ;;  %16191 = vst [vmem:[#allocation67_spill] sm:$0xff] %v12556_v42  ;;  %v12586_v23 = vand.u32 2147483647, %v12502_v39  ;;  %v12589_v57 = vand.u32 2147483647, %v12504_v49 }
 0x641   : > { %16192 = vst [vmem:[#allocation68_spill] sm:$0xff] %v12559_v7  ;;  %16193 = vst [vmem:[#allocation69_spill] sm:$0xff] %v12562_v44  ;;  %v12592_v62 = vand.u32 2147483647, %v12506_v14  ;;  %v12595_v52 = vand.u32 2147483647, %v12508_v24 }
 0x642   : > { %16194 = vst [vmem:[#allocation70_spill] sm:$0xff] %v12565_v13  ;;  %16195 = vst [vmem:[#allocation71_spill] sm:$0xff] %v12568_v9  ;;  %v12598_v17 = vand.u32 2147483647, %v12510_v15  ;;  %v12601_v54 = vand.u32 2147483647, %v12512_v1 }
 0x643   : > { %16196 = vst [vmem:[#allocation72_spill] sm:$0xff] %v12571_v20  ;;  %16197 = vst [vmem:[#allocation73_spill] sm:$0xff] %v12574_v53  ;;  %v12604_v18 = vand.u32 2147483647, %v12514_v26  ;;  %v12607_v60 = vand.u32 2147483647, %v12516_v43 }
 0x644   : > { %16198 = vst [vmem:[#allocation74_spill] sm:$0xff] %v12577_v8  ;;  %16199 = vst [vmem:[#allocation75_spill] sm:$0xff] %v12580_v41  ;;  %v12610_v12 = vand.u32 2147483647, %v12518_v27  ;;  %v12613_v10 = vand.u32 2147483647, %v12520_v30 }
 0x645   : > { %16200 = vst [vmem:[#allocation76_spill] sm:$0xff] %v12583_v59  ;;  %16201 = vst [vmem:[#allocation77_spill] sm:$0xff] %v12586_v23  ;;  %v12616_v50 = vand.u32 2147483647, %v12522_v47  ;;  %v12619_v40 = vand.u32 2147483647, %v12524_v22 }
 0x646   : > { %16202 = vst [vmem:[#allocation78_spill] sm:$0xff] %v12589_v57  ;;  %16203 = vst [vmem:[#allocation79_spill] sm:$0xff] %v12592_v62  ;;  %v12622_v55 = vand.u32 2147483647, %v12526_v61  ;;  %v12625_v26 = vand.u32 2147483647, %v12529_v38 }
 0x647   : > { %16204 = vst [vmem:[#allocation80_spill] sm:$0xff] %v12595_v52  ;;  %16205 = vst [vmem:[#allocation81_spill] sm:$0xff] %v12598_v17  ;;  %v12628_v43 = vand.u32 2147483647, %v12532_v25  ;;  %v12631_v27 = vand.u32 2147483647, %v12535_v28 }
 0x648   : > { %16206 = vst [vmem:[#allocation82_spill] sm:$0xff] %v12601_v54  ;;  %16207 = vst [vmem:[#allocation83_spill] sm:$0xff] %v12604_v18  ;;  %v4042_v30 = vmul.f32 0.3275911, %v12538_v35  ;;  %v4043_v47 = vmul.f32 0.3275911, %v12541_v36 }
 0x649   : > { %16208 = vst [vmem:[#allocation84_spill] sm:$0xff] %v12607_v60  ;;  %16209 = vst [vmem:[#allocation85_spill] sm:$0xff] %v12610_v12  ;;  %v4044_v1 = vmul.f32 0.3275911, %v12544_v48  ;;  %v4045_v22 = vmul.f32 0.3275911, %v12547_v4 }
 0x64a   : > { %16210 = vst [vmem:[#allocation86_spill] sm:$0xff] %v12613_v10  ;;  %16211 = vst [vmem:[#allocation87_spill] sm:$0xff] %v12616_v50  ;;  %v4046_v61 = vmul.f32 0.3275911, %v12550_v31  ;;  %v4047_v15 = vmul.f32 0.3275911, %v12553_v34 }
 0x64b   : > { %16212 = vst [vmem:[#allocation88_spill] sm:$0xff] %v12619_v40  ;;  %16213 = vst [vmem:[#allocation89_spill] sm:$0xff] %v12622_v55  ;;  %v4048_v38 = vmul.f32 0.3275911, %v12556_v42  ;;  %v4049_v25 = vmul.f32 0.3275911, %v12559_v7 }
 0x64c   : > { %16214 = vst [vmem:[#allocation90_spill] sm:$0xff] %v12625_v26  ;;  %16215 = vst [vmem:[#allocation91_spill] sm:$0xff] %v12628_v43  ;;  %v4050_v24 = vmul.f32 0.3275911, %v12562_v44  ;;  %v4051_v28 = vmul.f32 0.3275911, %v12565_v13 }
 0x64d   : > { %16216 = vst [vmem:[#allocation92_spill] sm:$0xff] %v12631_v27  ;;  %v4052_v14 = vmul.f32 0.3275911, %v12568_v9  ;;  %v4053_v49 = vmul.f32 0.3275911, %v12571_v20  ;;  %v12659_v29 = vmul.f32 0.5, %v12406_v11 }
 0x64e   : > { %v4054_v39 = vmul.f32 0.3275911, %v12574_v53  ;;  %v4055_v46 = vmul.f32 0.3275911, %v12577_v8  ;;  %v4056_v3 = vmul.f32 0.3275911, %v12580_v41 }
 0x64f   : > { %v4057_v21 = vmul.f32 0.3275911, %v12583_v59  ;;  %v4058_v0 = vmul.f32 0.3275911, %v12586_v23  ;;  %v4059_v2 = vmul.f32 0.3275911, %v12589_v57 }
 0x650   : > { %v4060_v63 = vmul.f32 0.3275911, %v12592_v62  ;;  %v4061_v56 = vmul.f32 0.3275911, %v12595_v52  ;;  %v4062_v19 = vmul.f32 0.3275911, %v12598_v17 }
 0x651   : > { %v4063_v5 = vmul.f32 0.3275911, %v12601_v54  ;;  %v4064_v58 = vmul.f32 0.3275911, %v12604_v18  ;;  %v4065_v32 = vmul.f32 0.3275911, %v12607_v60 }
 0x652   : > { %v4066_v51 = vmul.f32 0.3275911, %v12610_v12  ;;  %16217 = vst [vmem:[#allocation93_spill] sm:$0xff] %v12659_v29  ;;  %v4067_v33 = vmul.f32 0.3275911, %v12613_v10  ;;  %v4074_v6 = vadd.f32 1.0, %v4042_v30 }
 0x653   : > { %v4068_v45 = vmul.f32 0.3275911, %v12616_v50  ;;  %v12664_v52 = vmul.f32 0.5, %v12408_v16  ;;  %v4069_v17 = vmul.f32 0.3275911, %v12619_v40  ;;  %v4075_v18 = vadd.f32 1.0, %v4043_v47 }
 0x654   : > { %v4070_v54 = vmul.f32 0.3275911, %v12622_v55  ;;  %v12669_v60 = vmul.f32 0.5, %v12410_v37  ;;  %v4071_v12 = vmul.f32 0.3275911, %v12625_v26  ;;  %v4076_v29 = vadd.f32 1.0, %v4044_v1 }
 0x655   : > { %16218 = vst [vmem:[#allocation94_spill] sm:$0xff] %v12664_v52  ;;  %v4072_v11 = vmul.f32 0.3275911, %v12628_v43  ;;  %v4073_v10 = vmul.f32 0.3275911, %v12631_v27  ;;  %v4077_v50 = vadd.f32 1.0, %v4045_v22  ;;  %11062 = vrcp.f32 %v4074_v6 }
 0x656   : > { %16219 = vst [vmem:[#allocation95_spill] sm:$0xff] %v12669_v60  ;;  %v4078_v30 = vadd.f32 1.0, %v4046_v61  ;;  %v4079_v62 = vadd.f32 1.0, %v4047_v15  ;;  %v4080_v16 = vadd.f32 1.0, %v4048_v38  ;;  %v4081_v52 = vadd.f32 1.0, %v4049_v25 }
 0x657   : > { %v4082_v57 = vadd.f32 1.0, %v4050_v24  ;;  %v4083_v40 = vadd.f32 1.0, %v4051_v28  ;;  %v4084_v55 = vadd.f32 1.0, %v4052_v14  ;;  %v4085_v47 = vadd.f32 1.0, %v4053_v49 }
 0x658   : > { %11064 = vrcp.f32 %v4075_v18  ;;  %v4086_v37 = vadd.f32 1.0, %v4054_v39  ;;  %v4087_v60 = vadd.f32 1.0, %v4055_v46  ;;  %v4088_v23 = vadd.f32 1.0, %v4056_v3 }
 0x659   : > { %11066 = vrcp.f32 %v4076_v29  ;;  %v4089_v26 = vadd.f32 1.0, %v4057_v21  ;;  %v4090_v43 = vadd.f32 1.0, %v4058_v0  ;;  %v4091_v1 = vadd.f32 1.0, %v4059_v2 }
 0x65a   : > { %11068 = vrcp.f32 %v4077_v50  ;;  %v12674_v27 = vadd.f32 1.0, %v4060_v63  ;;  %v12676_v22 = vadd.f32 1.0, %v4061_v56  ;;  %v12678_v15 = vadd.f32 1.0, %v4062_v19 }
 0x65b   : > { %11070 = vrcp.f32 %v4078_v30  ;;  %v12680_v6 = vadd.f32 1.0, %v4063_v5  ;;  %v12682_v14 = vadd.f32 1.0, %v4064_v58  ;;  %v12684_v18 = vadd.f32 1.0, %v4065_v32 }
 0x65c   : > { %11072 = vrcp.f32 %v4079_v62  ;;  %v12686_v3 = vadd.f32 1.0, %v4066_v51  ;;  %v12688_v29 = vadd.f32 1.0, %v4067_v33  ;;  %v12690_v2 = vadd.f32 1.0, %v4068_v45 }
 0x65d   : > { %11074 = vrcp.f32 %v4080_v16  ;;  %v12692_v50 = vadd.f32 1.0, %v4069_v17  ;;  %v12694_v56 = vadd.f32 1.0, %v4070_v54  ;;  %v12696_v19 = vadd.f32 1.0, %v4071_v12 }
 0x65e   : > { %11076 = vrcp.f32 %v4081_v52  ;;  %v12698_v5 = vadd.f32 1.0, %v4072_v11  ;;  %v12700_v58 = vadd.f32 1.0, %v4073_v10  ;;  %v16251_v10 = vsub.f32 0.0, %v12541_v36 }
 0x65f   : > { %11078 = vrcp.f32 %v4082_v57  ;;  %v12706_v51 = vpop.eup %11062  ;;  %v16256_v54 = vsub.f32 0.0, %v12547_v4 }
 0x660   : > { %11080 = vrcp.f32 %v4083_v40  ;;  %16220 = vst [vmem:[#allocation96_spill] sm:$0xff] %v12706_v51 }
 0x661   : > { %11082 = vrcp.f32 %v4084_v55 }
 0x662   : > { %v12711_v52 = vpop.eup %11064  ;;  %11084 = vrcp.f32 %v4085_v47 }
 0x663   : > { %16221 = vst [vmem:[#allocation97_spill] sm:$0xff] %v12711_v52  ;;  %v12716_v63 = vpop.eup %11066  ;;  %11086 = vrcp.f32 %v4086_v37 }
 0x664   : > { %16222 = vst [vmem:[#allocation98_spill] sm:$0xff] %v12716_v63  ;;  %v12721_v46 = vpop.eup %11068  ;;  %11088 = vrcp.f32 %v4087_v60  ;;  %v4172_v60 = vmul.f32 1.0614054, %v12716_v63 }
 0x665   : > { %16223 = vst [vmem:[#allocation99_spill] sm:$0xff] %v12721_v46  ;;  %v12726_v61 = vpop.eup %11070  ;;  %11090 = vrcp.f32 %v4088_v23  ;;  %v4170_v23 = vmul.f32 1.0614054, %v12706_v51 }
 0x666   : > { %16224 = vst [vmem:[#allocation100_spill] sm:$0xff] %v12726_v61  ;;  %v12731_v47 = vpop.eup %11072  ;;  %11092 = vrcp.f32 %v4089_v26  ;;  %v4171_v26 = vmul.f32 1.0614054, %v12711_v52  ;;  %v4204_v16 = vadd.f32 -1.4531521, %v4172_v60 }
 0x667   : > { %16228 = vst [vmem:[#allocation101_spill] sm:$0xff] %v12731_v47  ;;  %v12736_v55 = vpop.eup %11074  ;;  %11094 = vrcp.f32 %v4090_v43  ;;  %v4175_v39 = vmul.f32 1.0614054, %v12731_v47  ;;  %v12779_v43 = vmul.f32 %v16251_v10, %v12541_v36 }
 0x668   : > { %16232 = vst [vmem:[#allocation102_spill] sm:$0xff] %v12736_v55  ;;  %v12741_v57 = vpop.eup %11076  ;;  %11096 = vrcp.f32 %v4091_v1  ;;  %v4173_v1 = vmul.f32 1.0614054, %v12721_v46  ;;  %v4203_v25 = vadd.f32 -1.4531521, %v4171_v26 }
 0x669   : > { %16235 = vst [vmem:[#allocation103_spill] sm:$0xff] %v12741_v57  ;;  %v12746_v40 = vpop.eup %11078  ;;  %11098 = vrcp.f32 %v12674_v27  ;;  %v4202_v27 = vadd.f32 -1.4531521, %v4170_v23  ;;  %16252 = vst [vmem:[#allocation110_spill] sm:$0xff] %v12779_v43  ;;  %v4176_v36 = vmul.f32 1.0614054, %v12736_v55 }
 0x66a   : > { %16237 = vst [vmem:[#allocation104_spill] sm:$0xff] %v12746_v40  ;;  %v12752_v11 = vpop.eup %11080  ;;  %11100 = vrcp.f32 %v12676_v22  ;;  %v4174_v22 = vmul.f32 1.0614054, %v12726_v61  ;;  %v4205_v60 = vadd.f32 -1.4531521, %v4173_v1 }
 0x66b   : > { %16241 = vst [vmem:[#allocation105_spill] sm:$0xff] %v12752_v11  ;;  %v12758_v62 = vpop.eup %11082  ;;  %11102 = vrcp.f32 %v12678_v15  ;;  %v16249_v15 = vsub.f32 0.0, %v12538_v35  ;;  %v12799_v10 = vmul.f32 %v12706_v51, %v4202_v27  ;;  %v4177_v27 = vmul.f32 1.0614054, %v12741_v57 }
 0x66c   : > { %16244 = vst [vmem:[#allocation106_spill] sm:$0xff] %v12758_v62  ;;  %v12763_v12 = vpop.eup %11084  ;;  %11104 = vrcp.f32 %v12680_v6 }
 0x66d   : > { %16247 = vst [vmem:[#allocation107_spill] sm:$0xff] %v12763_v12  ;;  %v12767_v45 = vpop.eup %11086  ;;  %11106 = vrcp.f32 %v12682_v14  ;;  %v12774_v23 = vmul.f32 %v16249_v15, %v12538_v35  ;;  %v16254_v14 = vsub.f32 0.0, %v12544_v48  ;;  %v12792_v35 = vmul.f32 %v16256_v54, %v12547_v4 }
 0x66e   : > { %16248 = vst [vmem:[#allocation108_spill] sm:$0xff] %v12767_v45  ;;  %v12781_v6 = vpop.eup %11088  ;;  %11108 = vrcp.f32 %v12684_v18  ;;  %v16259_v18 = vsub.f32 0.0, %v12550_v31  ;;  %v4206_v4 = vadd.f32 -1.4531521, %v4174_v22  ;;  %v12810_v54 = vmul.f32 %v12711_v52, %v4203_v25 }
 0x66f   : > { %16250 = vst [vmem:[#allocation109_spill] sm:$0xff] %v12774_v23  ;;  %16253 = vst [vmem:[#allocation111_spill] sm:$0xff] %v12781_v6  ;;  %v12787_v26 = vmul.f32 %v16254_v14, %v12544_v48  ;;  %v12794_v15 = vpop.eup %11090  ;;  %11110 = vrcp.f32 %v12686_v3  ;;  %v12813_v3 = vmul.f32 %v12716_v63, %v4204_v16  ;;  %v4180_v25 = vmul.f32 1.0614054, %v12758_v62 }
 0x670   : > { %16257 = vst [vmem:[#allocation113_spill] sm:$0xff] %v12792_v35  ;;  %16258 = vst [vmem:[#allocation114_spill] sm:$0xff] %v12794_v15  ;;  %v12804_v1 = vmul.f32 %v16259_v18, %v12550_v31  ;;  %v12806_v48 = vpop.eup %11092  ;;  %11112 = vrcp.f32 %v12688_v29  ;;  %v4178_v31 = vmul.f32 1.0614054, %v12746_v40  ;;  %v4207_v18 = vadd.f32 -1.4531521, %v4175_v39 }
 0x671   : > { %16255 = vst [vmem:[#allocation112_spill] sm:$0xff] %v12787_v26  ;;  %16261 = vst [vmem:[#allocation116_spill] sm:$0xff] %v12806_v48  ;;  %v12815_v14 = vpop.eup %11094  ;;  %11114 = vrcp.f32 %v12690_v2  ;;  %v4179_v29 = vmul.f32 1.0614054, %v12752_v11  ;;  %v12826_v16 = vmul.f32 %v12721_v46, %v4205_v60  ;;  %v4181_v2 = vmul.f32 1.0614054, %v12763_v12 }
 0x672   : > { %16260 = vst [vmem:[#allocation115_spill] sm:$0xff] %v12804_v1  ;;  %16262 = vst [vmem:[#allocation117_spill] sm:$0xff] %v12815_v14  ;;  %v12820_v49 = vpop.eup %11096  ;;  %11116 = vrcp.f32 %v12692_v50  ;;  %v4182_v33 = vmul.f32 1.0614054, %v12767_v45  ;;  %v4208_v39 = vadd.f32 -1.4531521, %v4176_v36  ;;  %v12839_v60 = vmul.f32 %v12726_v61, %v4206_v4 }
 0x673   : > { %16263 = vst [vmem:[#allocation118_spill] sm:$0xff] %v12820_v49  ;;  %v12828_v22 = vpop.eup %11098  ;;  %11118 = vrcp.f32 %v12694_v56  ;;  %v4183_v50 = vmul.f32 1.0614054, %v12781_v6  ;;  %v4184_v32 = vmul.f32 1.0614054, %v12794_v15 }
 0x674   : > { %16264 = vst [vmem:[#allocation119_spill] sm:$0xff] %v12828_v22  ;;  %v12833_v17 = vpop.eup %11100  ;;  %11120 = vrcp.f32 %v12696_v19  ;;  %v4185_v56 = vmul.f32 1.0614054, %v12806_v48  ;;  %v4209_v0 = vadd.f32 -1.4531521, %v4177_v27 }
 0x675   : > { %16265 = vst [vmem:[#allocation120_spill] sm:$0xff] %v12833_v17  ;;  %v12841_v24 = vpop.eup %11102  ;;  %11122 = vrcp.f32 %v12698_v5  ;;  %v4210_v21 = vadd.f32 -1.4531521, %v4178_v31  ;;  %v4186_v19 = vmul.f32 1.0614054, %v12815_v14  ;;  %v12853_v5 = vmul.f32 %v12731_v47, %v4207_v18 }
 0x676   : > { %16266 = vst [vmem:[#allocation121_spill] sm:$0xff] %v12841_v24  ;;  %v12845_v36 = vpop.eup %11104  ;;  %11124 = vrcp.f32 %v12700_v58  ;;  %v4211_v37 = vadd.f32 -1.4531521, %v4179_v29  ;;  %v4212_v30 = vadd.f32 -1.4531521, %v4180_v25  ;;  %v4240_v58 = vmul.f32 %v12736_v55, %v4208_v39 }
 0x677   : > { %16267 = vst [vmem:[#allocation122_spill] sm:$0xff] %v12845_v36  ;;  %v12849_v28 = vpop.eup %11106  ;;  %v4187_v4 = vmul.f32 1.0614054, %v12820_v49  ;;  %v4213_v38 = vadd.f32 -1.4531521, %v4181_v2  ;;  %v4241_v20 = vmul.f32 %v12741_v57, %v4209_v0 }
 0x678   : > { %16268 = vst [vmem:[#allocation123_spill] sm:$0xff] %v12849_v28  ;;  %v4214_v59 = vadd.f32 -1.4531521, %v4182_v33  ;;  %v12855_v41 = vpop.eup %11108  ;;  %v4188_v27 = vmul.f32 1.0614054, %v12828_v22  ;;  %v4242_v33 = vmul.f32 %v12746_v40, %v4210_v21  ;;  %v4243_v13 = vmul.f32 %v12752_v11, %v4211_v37 }
 0x679   : > { %16269 = vst [vmem:[#allocation124_spill] sm:$0xff] %v12855_v41  ;;  %v4215_v31 = vadd.f32 -1.4531521, %v4183_v50  ;;  %v4216_v8 = vadd.f32 -1.4531521, %v4184_v32  ;;  %v12859_v53 = vpop.eup %11110  ;;  %v4244_v32 = vmul.f32 %v12758_v62, %v4212_v30 }
 0x67a   : > { %16270 = vst [vmem:[#allocation125_spill] sm:$0xff] %v12859_v53  ;;  %v4189_v29 = vmul.f32 1.0614054, %v12833_v17  ;;  %v4217_v25 = vadd.f32 -1.4531521, %v4185_v56  ;;  %v12864_v2 = vpop.eup %11112  ;;  %v4245_v56 = vmul.f32 %v12763_v12, %v4213_v38  ;;  %v4246_v0 = vmul.f32 %v12767_v45, %v4214_v59 }
 0x67b   : > { %v4190_v18 = vmul.f32 1.0614054, %v12841_v24  ;;  %v4218_v9 = vadd.f32 -1.4531521, %v4186_v19  ;;  %v12869_v50 = vpop.eup %11114  ;;  %v4191_v39 = vmul.f32 1.0614054, %v12845_v36  ;;  %v4247_v19 = vmul.f32 %v12781_v6, %v4215_v31 }
 0x67c   : > { %16271 = vst [vmem:[#allocation126_spill] sm:$0xff] %v12869_v50  ;;  %v4219_v1 = vadd.f32 -1.4531521, %v4187_v4  ;;  %v12874_v35 = vpop.eup %11116  ;;  %v4192_v21 = vmul.f32 1.0614054, %v12849_v28  ;;  %v4248_v37 = vmul.f32 %v12794_v15, %v4216_v8  ;;  %v4249_v4 = vmul.f32 %v12806_v48, %v4217_v25 }
 0x67d   : > { %16272 = vst [vmem:[#allocation127_spill] sm:$0xff] %v12874_v35  ;;  %v4220_v26 = vadd.f32 -1.4531521, %v4188_v27  ;;  %v12879_v43 = vpop.eup %11118  ;;  %v4193_v30 = vmul.f32 1.0614054, %v12855_v41  ;;  %v4250_v27 = vmul.f32 %v12815_v14, %v4218_v9 }
 0x67e   : > { %16273 = vst [vmem:[#allocation128_spill] sm:$0xff] %v12879_v43  ;;  %v4221_v23 = vadd.f32 -1.4531521, %v4189_v29  ;;  %v12884_v38 = vadd.f32 1.4214138, %v12799_v10  ;;  %v12886_v59 = vpop.eup %11120  ;;  %v4251_v10 = vmul.f32 %v12820_v49, %v4219_v1 }
 0x67f   : > { %16274 = vst [vmem:[#allocation129_spill] sm:$0xff] %v12886_v59  ;;  %v4194_v44 = vmul.f32 1.0614054, %v12859_v53  ;;  %v4222_v7 = vadd.f32 -1.4531521, %v4190_v18  ;;  %v12893_v8 = vpop.eup %11122  ;;  %v4252_v9 = vmul.f32 %v12828_v22, %v4220_v26 }
 0x680   : > { %v12891_v31 = vadd.f32 1.4214138, %v12810_v54  ;;  %16275 = vst [vmem:[#allocation130_spill] sm:$0xff] %v12893_v8  ;;  %v4195_v42 = vmul.f32 1.0614054, %v12864_v2  ;;  %v12898_v48 = vpop.eup %11124  ;;  %v4253_v45 = vmul.f32 %v12833_v17, %v4221_v23 }
 0x681   : > { %v4196_v29 = vmul.f32 1.0614054, %v12869_v50  ;;  %v4223_v25 = vadd.f32 -1.4531521, %v4191_v39  ;;  %16276 = vst [vmem:[#allocation131_spill] sm:$0xff] %v12898_v48  ;;  %v4254_v1 = vmul.f32 %v12841_v24, %v4222_v7 }
 0x682   : > { %v4197_v15 = vmul.f32 1.0614054, %v12874_v35  ;;  %v4198_v18 = vmul.f32 1.0614054, %v12879_v43  ;;  %v4224_v6 = vadd.f32 -1.4531521, %v4192_v21 }
 0x683   : > { %v4199_v54 = vmul.f32 1.0614054, %v12886_v59  ;;  %v4225_v14 = vadd.f32 -1.4531521, %v4193_v30  ;;  %v4268_v12 = vadd.f32 1.4214138, %v12813_v3  ;;  %v4255_v26 = vmul.f32 %v12845_v36, %v4223_v25 }
 0x684   : > { %v4200_v39 = vmul.f32 1.0614054, %v12893_v8  ;;  %v4226_v62 = vadd.f32 -1.4531521, %v4194_v44  ;;  %v4269_v49 = vadd.f32 1.4214138, %v12826_v16  ;;  %v4256_v30 = vmul.f32 %v12849_v28, %v4224_v6 }
 0x685   : > { %v4201_v11 = vmul.f32 1.0614054, %v12898_v48  ;;  %v4227_v40 = vadd.f32 -1.4531521, %v4195_v42  ;;  %v4228_v21 = vadd.f32 -1.4531521, %v4196_v29  ;;  %v4257_v17 = vmul.f32 %v12855_v41, %v4225_v14 }
 0x686   : > { %v4229_v22 = vadd.f32 -1.4531521, %v4197_v15  ;;  %v4230_v57 = vadd.f32 -1.4531521, %v4198_v18  ;;  %v4270_v23 = vadd.f32 1.4214138, %v12839_v60  ;;  %v4258_v16 = vmul.f32 %v12859_v53, %v4226_v62 }
 0x687   : > { %v4231_v3 = vadd.f32 -1.4531521, %v4199_v54  ;;  %v4271_v44 = vadd.f32 1.4214138, %v12853_v5  ;;  %v4272_v7 = vadd.f32 1.4214138, %v4240_v58  ;;  %v4259_v25 = vmul.f32 %v12864_v2, %v4227_v40 }
 0x688   : > { %v4232_v24 = vadd.f32 -1.4531521, %v4200_v39  ;;  %v4273_v55 = vadd.f32 1.4214138, %v4241_v20  ;;  %v4274_v42 = vadd.f32 1.4214138, %v4242_v33  ;;  %v4260_v15 = vmul.f32 %v12869_v50, %v4228_v21 }
 0x689   : > { %v4233_v29 = vadd.f32 -1.4531521, %v4201_v11  ;;  %v4275_v18 = vadd.f32 1.4214138, %v4243_v13  ;;  %v11047_v6 = vld [vmem:[%s15701_s8] sm:$0xff]   ;;  %v4261_v14 = vmul.f32 %v12874_v35, %v4229_v22  ;;  %v4262_v60 = vmul.f32 %v12879_v43, %v4230_v57  ;;  %v11048_v20 = vld [vmem:[%s15701_s8 + $0x8] sm:$0xff]  }
 0x68a   : > { %v4276_v5 = vadd.f32 1.4214138, %v4244_v32  ;;  %v4277_v58 = vadd.f32 1.4214138, %v4245_v56  ;;  %v4263_v62 = vmul.f32 %v12886_v59, %v4231_v3  ;;  %v4278_v40 = vadd.f32 1.4214138, %v4246_v0  ;;  %10103 = vmatprep.subr.bf16.mxu0 %v11047_v6 }
 0x68b   : > { %v4279_v11 = vadd.f32 1.4214138, %v4247_v19  ;;  %v4280_v33 = vadd.f32 1.4214138, %v4248_v37  ;;  %v4264_v13 = vmul.f32 %v12893_v8, %v4232_v24  ;;  %v4281_v54 = vadd.f32 1.4214138, %v4249_v4  ;;  %10104 = vmatpush3.bf16.msra.mxu0 %v11047_v6 }
 0x68c   : > { %v4282_v39 = vadd.f32 1.4214138, %v4250_v27  ;;  %v4283_v21 = vadd.f32 1.4214138, %v4251_v10  ;;  %v4265_v57 = vmul.f32 %v12898_v48, %v4233_v29  ;;  %v4284_v22 = vadd.f32 1.4214138, %v4252_v9  ;;  %10137 = vmatprep.subr.bf16.mxu0 %v11048_v20 }
 0x68d   : > { %v4285_v32 = vadd.f32 1.4214138, %v4253_v45  ;;  %v4286_v56 = vadd.f32 1.4214138, %v4254_v1  ;;  %v4287_v43 = vadd.f32 1.4214138, %v4255_v26  ;;  %v4298_v27 = vmul.f32 %v12706_v51, %v12884_v38 }
 0x68e   : > { %v4288_v35 = vadd.f32 1.4214138, %v4256_v30  ;;  %v4289_v50 = vadd.f32 1.4214138, %v4257_v17  ;;  %v16277_v0 = vsub.f32 0.0, %v12553_v34  ;;  %v4299_v45 = vmul.f32 %v12711_v52, %v12891_v31  ;;  %v16279_v29 = vld [vmem:[#allocation102_spill] sm:$0xff] }
 0x68f   : > { %v4290_v37 = vadd.f32 1.4214138, %v4258_v16  ;;  %v4291_v24 = vadd.f32 1.4214138, %v4259_v25  ;;  %v4292_v4 = vadd.f32 1.4214138, %v4260_v15  ;;  %v4300_v17 = vmul.f32 %v12716_v63, %v4268_v12 }
 0x690   : > { %v12932_v19 = vmul.f32 %v16277_v0, %v12553_v34  ;;  %v4293_v10 = vadd.f32 1.4214138, %v4261_v14  ;;  %v4294_v3 = vadd.f32 1.4214138, %v4262_v60  ;;  %v4295_v9 = vadd.f32 1.4214138, %v4263_v62 }
 0x691   : > { %v4296_v1 = vadd.f32 1.4214138, %v4264_v13  ;;  %v4297_v26 = vadd.f32 1.4214138, %v4265_v57  ;;  %v4301_v30 = vmul.f32 %v12721_v46, %v4269_v49  ;;  %v4302_v34 = vmul.f32 %v12726_v61, %v4270_v23  ;;  %v16280_v15 = vld [vmem:[#allocation103_spill] sm:$0xff]  ;;  %v16281_v6 = vld [vmem:[#allocation104_spill] sm:$0xff] }
 0x692   : > { %16278 = vst [vmem:[#allocation132_spill] sm:$0xff] %v12932_v19  ;;  %v4303_v16 = vmul.f32 %v12731_v47, %v4271_v44  ;;  %v4304_v25 = vmul.f32 %v16279_v29, %v4272_v7  ;;  %v4305_v38 = vmul.f32 %v16280_v15, %v4273_v55  ;;  %v4306_v14 = vmul.f32 %v16281_v6, %v4274_v42  ;;  %v16282_v60 = vld [vmem:[#allocation105_spill] sm:$0xff]  ;;  %v16283_v62 = vld [vmem:[#allocation106_spill] sm:$0xff]  ;;  %v16284_v13 = vld [vmem:[#allocation107_spill] sm:$0xff] }
 0x693   : > { %v4307_v20 = vmul.f32 %v16282_v60, %v4275_v18  ;;  %v4308_v31 = vmul.f32 %v16283_v62, %v4276_v5  ;;  %v4309_v57 = vmul.f32 %v16284_v13, %v4277_v58  ;;  %v16285_v0 = vld [vmem:[#allocation108_spill] sm:$0xff]  ;;  %v16286_v19 = vld [vmem:[#allocation111_spill] sm:$0xff]  ;;  %v16287_v46 = vld [vmem:[#allocation114_spill] sm:$0xff]  ;;  %v4319_v58 = vmul.f32 %v12845_v36, %v4287_v43 }
 0x694   : > { %v4310_v12 = vmul.f32 %v16285_v0, %v4278_v40  ;;  %v4311_v49 = vmul.f32 %v16286_v19, %v4279_v11  ;;  %v4312_v23 = vmul.f32 %v16287_v46, %v4280_v33  ;;  %v16288_v61 = vld [vmem:[#allocation116_spill] sm:$0xff]  ;;  %v16289_v47 = vld [vmem:[#allocation117_spill] sm:$0xff]  ;;  %v16290_v29 = vld [vmem:[#allocation118_spill] sm:$0xff]  ;;  %v4320_v40 = vmul.f32 %v12849_v28, %v4288_v35 }
 0x695   : > { %v4313_v44 = vmul.f32 %v16288_v61, %v4281_v54  ;;  %v4314_v7 = vmul.f32 %v16289_v47, %v4282_v39  ;;  %v4315_v55 = vmul.f32 %v16290_v29, %v4283_v21  ;;  %v16291_v15 = vld [vmem:[#allocation119_spill] sm:$0xff]  ;;  %v16292_v6 = vld [vmem:[#allocation120_spill] sm:$0xff]  ;;  %v16293_v60 = vld [vmem:[#allocation121_spill] sm:$0xff]  ;;  %v4321_v11 = vmul.f32 %v12855_v41, %v4289_v50 }
 0x696   : > { %v4316_v42 = vmul.f32 %v16291_v15, %v4284_v22  ;;  %v4317_v18 = vmul.f32 %v16292_v6, %v4285_v32  ;;  %v4318_v5 = vmul.f32 %v16293_v60, %v4286_v56  ;;  %v4322_v33 = vmul.f32 %v12859_v53, %v4290_v37  ;;  %v16294_v61 = vld [vmem:[#allocation126_spill] sm:$0xff]  ;;  %v16295_v21 = vld [vmem:[#allocation127_spill] sm:$0xff]  ;;  %v16296_v22 = vld [vmem:[#allocation128_spill] sm:$0xff] }
 0x697   : > { %v4323_v54 = vmul.f32 %v12864_v2, %v4291_v24  ;;  %v4324_v39 = vmul.f32 %v16294_v61, %v4292_v4  ;;  %v4330_v47 = vadd.f32 -0.28449672, %v4298_v27  ;;  %v4325_v29 = vmul.f32 %v16295_v21, %v4293_v10  ;;  %v16297_v24 = vld [vmem:[#allocation67_spill] sm:$0xff] }
 0x698   : > { %v4326_v15 = vmul.f32 %v16296_v22, %v4294_v3  ;;  %v4327_v32 = vmul.f32 %v12886_v59, %v4295_v9  ;;  %v4331_v56 = vadd.f32 -0.28449672, %v4299_v45  ;;  %v4328_v43 = vmul.f32 %v12893_v8, %v4296_v1 }
 0x699   : > { %v4329_v35 = vmul.f32 %v12898_v48, %v4297_v26  ;;  %v4332_v28 = vadd.f32 -0.28449672, %v4300_v17  ;;  %v4333_v50 = vadd.f32 -0.28449672, %v4301_v30  ;;  %v4334_v41 = vadd.f32 -0.28449672, %v4302_v34 }
 0x69a   : > { %v4335_v37 = vadd.f32 -0.28449672, %v4303_v16  ;;  %v4336_v53 = vadd.f32 -0.28449672, %v4304_v25  ;;  %v16298_v4 = vsub.f32 0.0, %v16297_v24  ;;  %v4362_v9 = vmul.f32 %v12706_v51, %v4330_v47  ;;  %v16302_v51 = vld [vmem:[#allocation101_spill] sm:$0xff] }
 0x69b   : > { %v4337_v10 = vadd.f32 -0.28449672, %v4305_v38  ;;  %v4338_v21 = vadd.f32 -0.28449672, %v4306_v14  ;;  %v4339_v3 = vadd.f32 -0.28449672, %v4307_v20  ;;  %v4363_v26 = vmul.f32 %v12711_v52, %v4331_v56 }
 0x69c   : > { %v12971_v27 = vmul.f32 %v16298_v4, %v16297_v24  ;;  %v4340_v45 = vadd.f32 -0.28449672, %v4308_v31  ;;  %v4341_v59 = vadd.f32 -0.28449672, %v4309_v57  ;;  %v4342_v1 = vadd.f32 -0.28449672, %v4310_v12 }
 0x69d   : > { %v4343_v17 = vadd.f32 -0.28449672, %v4311_v49  ;;  %v4344_v30 = vadd.f32 -0.28449672, %v4312_v23  ;;  %v4345_v34 = vadd.f32 -0.28449672, %v4313_v44  ;;  %v4364_v16 = vmul.f32 %v12716_v63, %v4332_v28 }
 0x69e   : > { %16299 = vst [vmem:[#allocation106_spill] sm:$0xff] %v12971_v27  ;;  %v4346_v25 = vadd.f32 -0.28449672, %v4314_v7  ;;  %v4347_v48 = vadd.f32 -0.28449672, %v4315_v55  ;;  %v16300_v24 = vld [vmem:[#allocation99_spill] sm:$0xff]  ;;  %v4367_v56 = vmul.f32 %v16302_v51, %v4335_v37 }
 0x69f   : > { %v4348_v8 = vadd.f32 -0.28449672, %v4316_v42  ;;  %v4365_v4 = vmul.f32 %v16300_v24, %v4333_v50  ;;  %v4349_v38 = vadd.f32 -0.28449672, %v4317_v18  ;;  %v4350_v14 = vadd.f32 -0.28449672, %v4318_v5 }
 0x6a0   : > { %v4351_v20 = vadd.f32 -0.28449672, %v4319_v58  ;;  %v16301_v27 = vld [vmem:[#allocation100_spill] sm:$0xff]  ;;  %v4352_v31 = vadd.f32 -0.28449672, %v4320_v40  ;;  %v16303_v52 = vld [vmem:[#allocation102_spill] sm:$0xff]  ;;  %v4372_v40 = vmul.f32 %v16283_v62, %v4340_v45 }
 0x6a1   : > { %v4366_v47 = vmul.f32 %v16301_v27, %v4334_v41  ;;  %v4353_v57 = vadd.f32 -0.28449672, %v4321_v11  ;;  %v4354_v12 = vadd.f32 -0.28449672, %v4322_v33  ;;  %v4355_v49 = vadd.f32 -0.28449672, %v4323_v54 }
 0x6a2   : > { %v4356_v23 = vadd.f32 -0.28449672, %v4324_v39  ;;  %v4357_v44 = vadd.f32 -0.28449672, %v4325_v29  ;;  %v4368_v28 = vmul.f32 %v16303_v52, %v4336_v53  ;;  %v4358_v7 = vadd.f32 -0.28449672, %v4326_v15 }
 0x6a3   : > { %v4359_v55 = vadd.f32 -0.28449672, %v4327_v32  ;;  %v4360_v42 = vadd.f32 -0.28449672, %v4328_v43  ;;  %v16304_v63 = vld [vmem:[#allocation103_spill] sm:$0xff]  ;;  %v16305_v5 = vld [vmem:[#allocation104_spill] sm:$0xff]  ;;  %v4373_v11 = vmul.f32 %v16284_v13, %v4341_v59  ;;  %v4374_v33 = vmul.f32 %v16285_v0, %v4342_v1 }
 0x6a4   : > { %v4369_v50 = vmul.f32 %v16304_v63, %v4337_v10  ;;  %v4361_v18 = vadd.f32 -0.28449672, %v4329_v35  ;;  %v4370_v58 = vmul.f32 %v16305_v5, %v4338_v21  ;;  %v16306_v24 = vld [vmem:[#allocation105_spill] sm:$0xff]  ;;  %v4375_v29 = vmul.f32 %v16286_v19, %v4343_v17  ;;  %v16307_v15 = vld [vmem:[#allocation116_spill] sm:$0xff]  ;;  %v16309_v43 = vld [vmem:[#allocation118_spill] sm:$0xff] }
 0x6a5   : > { %v4371_v41 = vmul.f32 %v16306_v24, %v4339_v3  ;;  %v4376_v53 = vmul.f32 %v16287_v46, %v4344_v30  ;;  %v4377_v54 = vmul.f32 %v16307_v15, %v4345_v34  ;;  %v16308_v39 = vld [vmem:[#allocation117_spill] sm:$0xff]  ;;  %v4379_v35 = vmul.f32 %v16309_v43, %v4347_v48  ;;  %v16310_v37 = vld [vmem:[#allocation119_spill] sm:$0xff]  ;;  %v16312_v0 = vld [vmem:[#allocation124_spill] sm:$0xff] }
 0x6a6   : > { %v4378_v32 = vmul.f32 %v16308_v39, %v4346_v25  ;;  %v4380_v21 = vmul.f32 %v16310_v37, %v4348_v8  ;;  %v4381_v10 = vmul.f32 %v16292_v6, %v4349_v38  ;;  %v4382_v3 = vmul.f32 %v16293_v60, %v4350_v14  ;;  %v16311_v45 = vld [vmem:[#allocation123_spill] sm:$0xff]  ;;  %v16313_v19 = vld [vmem:[#allocation125_spill] sm:$0xff]  ;;  %v16316_v14 = vld [vmem:[#allocation130_spill] sm:$0xff] }
 0x6a7   : > { %v4383_v59 = vmul.f32 %v12845_v36, %v4351_v20  ;;  %v4384_v1 = vmul.f32 %v16311_v45, %v4352_v31  ;;  %v4385_v17 = vmul.f32 %v16312_v0, %v4353_v57  ;;  %v4386_v30 = vmul.f32 %v16313_v19, %v4354_v12  ;;  %v16314_v39 = vld [vmem:[#allocation127_spill] sm:$0xff]  ;;  %v16315_v37 = vld [vmem:[#allocation129_spill] sm:$0xff]  ;;  %v16318_v19 = vld [vmem:[#allocation68_spill] sm:$0xff] }
 0x6a8   : > { %v4387_v34 = vmul.f32 %v12864_v2, %v4355_v49  ;;  %v4388_v25 = vmul.f32 %v16294_v61, %v4356_v23  ;;  %v4389_v48 = vmul.f32 %v16314_v39, %v4357_v44  ;;  %v4390_v8 = vmul.f32 %v16296_v22, %v4358_v7  ;;  %v16317_v20 = vld [vmem:[#allocation131_spill] sm:$0xff]  ;;  %v16321_v22 = vld [vmem:[#allocation69_spill] sm:$0xff] }
 0x6a9   : > { %v4391_v38 = vmul.f32 %v16315_v37, %v4359_v55  ;;  %v4394_v6 = vadd.f32 0.2548296, %v4362_v9  ;;  %v4392_v60 = vmul.f32 %v16316_v14, %v4360_v42  ;;  %v4393_v36 = vmul.f32 %v16317_v20, %v4361_v18  ;;  %v16324_v14 = vld [vmem:[#allocation97_spill] sm:$0xff] }
 0x6aa   : > { %v4395_v31 = vadd.f32 0.2548296, %v4363_v26  ;;  %v4396_v45 = vadd.f32 0.2548296, %v4364_v16  ;;  %v4397_v57 = vadd.f32 0.2548296, %v4365_v4 }
 0x6ab   : > { %v4398_v0 = vadd.f32 0.2548296, %v4366_v47  ;;  %v4399_v12 = vadd.f32 0.2548296, %v4367_v56  ;;  %v16319_v49 = vsub.f32 0.0, %v16318_v19  ;;  %v16322_v9 = vsub.f32 0.0, %v16321_v22 }
 0x6ac   : > { %v4400_v44 = vadd.f32 0.2548296, %v4368_v28  ;;  %v4401_v39 = vadd.f32 0.2548296, %v4369_v50  ;;  %v4402_v7 = vadd.f32 0.2548296, %v4370_v58 }
 0x6ad   : > { %v13008_v23 = vmul.f32 %v16319_v49, %v16318_v19  ;;  %v13013_v55 = vmul.f32 %v16322_v9, %v16321_v22  ;;  %v4403_v42 = vadd.f32 0.2548296, %v4371_v41  ;;  %v4404_v18 = vadd.f32 0.2548296, %v4372_v40  ;;  %v16323_v16 = vld [vmem:[#allocation96_spill] sm:$0xff]  ;;  %v16325_v49 = vld [vmem:[#allocation98_spill] sm:$0xff] }
 0x6ae   : > { %v4405_v26 = vadd.f32 0.2548296, %v4373_v11  ;;  %v13016_v4 = vmul.f32 %v16323_v16, %v4394_v6  ;;  %v4406_v47 = vadd.f32 0.2548296, %v4374_v33  ;;  %v4407_v56 = vadd.f32 0.2548296, %v4375_v29 }
 0x6af   : > { %16320 = vst [vmem:[#allocation107_spill] sm:$0xff] %v13008_v23  ;;  %v4408_v20 = vadd.f32 0.2548296, %v4376_v53  ;;  %v13019_v19 = vmul.f32 %v16324_v14, %v4395_v31  ;;  %v4409_v28 = vadd.f32 0.2548296, %v4377_v54  ;;  %v13022_v23 = vmul.f32 %v16325_v49, %v4396_v45  ;;  %v16326_v40 = vld [vmem:[#allocation99_spill] sm:$0xff] }
 0x6b0   : > { %v4410_v50 = vadd.f32 0.2548296, %v4378_v32  ;;  %v4411_v58 = vadd.f32 0.2548296, %v4379_v35  ;;  %v4412_v22 = vadd.f32 0.2548296, %v4380_v21  ;;  %v13025_v11 = vmul.f32 %v16326_v40, %v4397_v57 }
 0x6b1   : > { %v4413_v9 = vadd.f32 0.2548296, %v4381_v10  ;;  %v4414_v41 = vadd.f32 0.2548296, %v4382_v3  ;;  %v4415_v6 = vadd.f32 0.2548296, %v4383_v59  ;;  %v13028_v29 = vmul.f32 %v16301_v27, %v4398_v0 }
 0x6b2   : > { %v4416_v16 = vadd.f32 0.2548296, %v4384_v1  ;;  %v4417_v33 = vadd.f32 0.2548296, %v4385_v17  ;;  %v4418_v53 = vadd.f32 0.2548296, %v4386_v30  ;;  %v13031_v32 = vmul.f32 %v16302_v51, %v4399_v12 }
 0x6b3   : > { %v4419_v14 = vadd.f32 0.2548296, %v4387_v34  ;;  %v4420_v54 = vadd.f32 0.2548296, %v4388_v25  ;;  %v4421_v35 = vadd.f32 0.2548296, %v4389_v48  ;;  %v13034_v10 = vmul.f32 %v16303_v52, %v4400_v44 }
 0x6b4   : > { %v4422_v45 = vadd.f32 0.2548296, %v4390_v8  ;;  %v4423_v21 = vadd.f32 0.2548296, %v4391_v38  ;;  %v4424_v3 = vadd.f32 0.2548296, %v4392_v60  ;;  %v13037_v59 = vmul.f32 %v16304_v63, %v4401_v39 }
 0x6b5   : > { %v4425_v31 = vadd.f32 0.2548296, %v4393_v36  ;;  %v13040_v0 = vmul.f32 %v16305_v5, %v4402_v7  ;;  %v13043_v27 = vmul.f32 %v16306_v24, %v4403_v42  ;;  %v13046_v51 = vmul.f32 %v16283_v62, %v4404_v18  ;;  %v16327_v17 = vld [vmem:[#allocation108_spill] sm:$0xff]  ;;  %v16328_v60 = vld [vmem:[#allocation111_spill] sm:$0xff]  ;;  %v16329_v24 = vld [vmem:[#allocation117_spill] sm:$0xff] }
 0x6b6   : > { %v13049_v1 = vmul.f32 %v16284_v13, %v4405_v26  ;;  %v13052_v52 = vmul.f32 %v16327_v17, %v4406_v47  ;;  %v13055_v36 = vmul.f32 %v16328_v60, %v4407_v56  ;;  %v13058_v63 = vmul.f32 %v16287_v46, %v4408_v20  ;;  %v16330_v13 = vld [vmem:[#allocation119_spill] sm:$0xff]  ;;  %v16331_v34 = vld [vmem:[#allocation120_spill] sm:$0xff]  ;;  %v16332_v48 = vld [vmem:[#allocation121_spill] sm:$0xff] }
 0x6b7   : > { %v13061_v5 = vmul.f32 %v16307_v15, %v4409_v28  ;;  %v13064_v39 = vmul.f32 %v16329_v24, %v4410_v50  ;;  %v13067_v62 = vmul.f32 %v16309_v43, %v4411_v58  ;;  %v13070_v30 = vmul.f32 %v16330_v13, %v4412_v22  ;;  %v16333_v46 = vld [vmem:[#allocation122_spill] sm:$0xff]  ;;  %v16334_v15 = vld [vmem:[#allocation109_spill] sm:$0xff]  ;;  %v16336_v44 = vld [vmem:[#allocation112_spill] sm:$0xff] }
 0x6b8   : > { %v13073_v25 = vmul.f32 %v16331_v34, %v4413_v9  ;;  %v13076_v8 = vmul.f32 %v16332_v48, %v4414_v41  ;;  %v13079_v38 = vmul.f32 %v16333_v46, %v4415_v6  ;;  %v4522_v20 = vmul.f32 1.442695, %v16334_v15  ;;  %v16335_v57 = vld [vmem:[#allocation110_spill] sm:$0xff]  ;;  %v16337_v43 = vld [vmem:[#allocation123_spill] sm:$0xff]  ;;  %v16338_v18 = vld [vmem:[#allocation124_spill] sm:$0xff] }
 0x6b9   : > { %v4524_v12 = vmul.f32 1.442695, %v16335_v57  ;;  %v4526_v7 = vmul.f32 1.442695, %v16336_v44  ;;  %v13085_v42 = vmul.f32 %v16337_v43, %v4416_v16  ;;  %v13088_v26 = vmul.f32 %v16338_v18, %v4417_v33  ;;  %v16339_v47 = vld [vmem:[#allocation125_spill] sm:$0xff]  ;;  %v16342_v22 = vld [vmem:[#allocation115_spill] sm:$0xff] }
 0x6ba   : > { %v13091_v56 = vmul.f32 %v16339_v47, %v4418_v53  ;;  %v16340_v28 = vld [vmem:[#allocation113_spill] sm:$0xff]  ;;  %v13095_v58 = vmul.f32 %v12864_v2, %v4419_v14  ;;  %v13098_v49 = vmul.f32 %v16294_v61, %v4420_v54  ;;  %11126 = vpow2.f32 %v4522_v20  ;;  %v16343_v41 = vld [vmem:[#allocation127_spill] sm:$0xff]  ;;  %v16345_v6 = vld [vmem:[#allocation70_spill] sm:$0xff] }
 0x6bb   : > { %v4528_v50 = vmul.f32 1.442695, %v16340_v28  ;;  %v4530_v9 = vmul.f32 1.442695, %v16342_v22  ;;  %v13102_v40 = vmul.f32 %v16343_v41, %v4421_v35  ;;  %v16346_v16 = vsub.f32 0.0, %v16345_v6  ;;  %v16347_v53 = vld [vmem:[#allocation132_spill] sm:$0xff] }
 0x6bc   : > { %16341 = vst [vmem:[#allocation114_spill] sm:$0xff] %v13098_v49  ;;  %11128 = vpow2.f32 %v4524_v12  ;;  %v4532_v17 = vmul.f32 1.442695, %v16347_v53  ;;  %v16348_v60 = vld [vmem:[#allocation128_spill] sm:$0xff]  ;;  %v16350_v2 = vld [vmem:[#allocation71_spill] sm:$0xff]  ;;  %v16352_v54 = vld [vmem:[#allocation106_spill] sm:$0xff]  ;;  %v13116_v35 = vmul.f32 %v16315_v37, %v4423_v21 }
 0x6bd   : > { %16344 = vst [vmem:[#allocation126_spill] sm:$0xff] %v13102_v40  ;;  %v4499_v33 = vmul.f32 %v16346_v16, %v16345_v6  ;;  %v13109_v24 = vmul.f32 %v16348_v60, %v4422_v45  ;;  %v16351_v61 = vsub.f32 0.0, %v16350_v2  ;;  %11130 = vpow2.f32 %v4526_v7  ;;  %v16354_v34 = vld [vmem:[#allocation72_spill] sm:$0xff]  ;;  %v16356_v15 = vld [vmem:[#allocation107_spill] sm:$0xff]  ;;  %v16357_v57 = vld [vmem:[#allocation130_spill] sm:$0xff] }
 0x6be   : > { %v4534_v13 = vmul.f32 1.442695, %v16352_v54  ;;  %16353 = vst [vmem:[#allocation100_spill] sm:$0xff] %v13116_v35  ;;  %v16355_v48 = vsub.f32 0.0, %v16354_v34  ;;  %11132 = vpow2.f32 %v4528_v50  ;;  %v4536_v20 = vmul.f32 1.442695, %v16356_v15 }
 0x6bf   : > { %16349 = vst [vmem:[#allocation67_spill] sm:$0xff] %v13109_v24  ;;  %v4500_v14 = vmul.f32 %v16351_v61, %v16350_v2  ;;  %v13123_v45 = vmul.f32 %v16357_v57, %v4424_v3  ;;  %v16359_v12 = vld [vmem:[#allocation73_spill] sm:$0xff]  ;;  %11134 = vpow2.f32 %v4530_v9  ;;  %v4538_v7 = vmul.f32 1.442695, %v13013_v55  ;;  %v16361_v18 = vld [vmem:[#allocation131_spill] sm:$0xff]  ;;  %v16363_v21 = vld [vmem:[#allocation74_spill] sm:$0xff] }
 0x6c0   : > { %v4501_v46 = vmul.f32 %v16355_v48, %v16354_v34  ;;  %v16360_v44 = vsub.f32 0.0, %v16359_v12  ;;  %v13130_v37 = vmul.f32 %v16361_v18, %v4425_v31  ;;  %v16364_v47 = vsub.f32 0.0, %v16363_v21  ;;  %v16365_v22 = vld [vmem:[#allocation75_spill] sm:$0xff]  ;;  %v16367_v6 = vld [vmem:[#allocation76_spill] sm:$0xff]  ;;  %v16369_v55 = vld [vmem:[#allocation77_spill] sm:$0xff] }
 0x6c1   : > { %16358 = vst [vmem:[#allocation101_spill] sm:$0xff] %v13123_v45  ;;  %11136 = vpow2.f32 %v4532_v17  ;;  %v4540_v50 = vmul.f32 1.442695, %v4499_v33  ;;  %v16366_v3 = vsub.f32 0.0, %v16365_v22  ;;  %v16368_v16 = vsub.f32 0.0, %v16367_v6  ;;  %v16371_v2 = vld [vmem:[#allocation78_spill] sm:$0xff] }
 0x6c2   : > { %v4502_v43 = vmul.f32 %v16360_v44, %v16359_v12  ;;  %16362 = vst [vmem:[#allocation102_spill] sm:$0xff] %v13130_v37  ;;  %v4503_v28 = vmul.f32 %v16364_v47, %v16363_v21  ;;  %11138 = vpow2.f32 %v4534_v13  ;;  %v4542_v9 = vmul.f32 1.442695, %v4500_v14  ;;  %v16373_v17 = vld [vmem:[#allocation79_spill] sm:$0xff]  ;;  %v16375_v15 = vld [vmem:[#allocation80_spill] sm:$0xff]  ;;  %v16377_v13 = vld [vmem:[#allocation81_spill] sm:$0xff] }
 0x6c3   : > { %v4504_v41 = vmul.f32 %v16366_v3, %v16365_v22  ;;  %v4505_v53 = vmul.f32 %v16368_v16, %v16367_v6  ;;  %v16370_v31 = vsub.f32 0.0, %v16369_v55  ;;  %v16372_v61 = vsub.f32 0.0, %v16371_v2  ;;  %v16379_v21 = vld [vmem:[#allocation82_spill] sm:$0xff]  ;;  %v16381_v3 = vld [vmem:[#allocation83_spill] sm:$0xff]  ;;  %v16399_v35 = vld [vmem:[#allocation92_spill] sm:$0xff] }
 0x6c4   : > { %11140 = vpow2.f32 %v4536_v20  ;;  %v4544_v33 = vmul.f32 1.442695, %v4501_v46  ;;  %v16374_v34 = vsub.f32 0.0, %v16373_v17  ;;  %v16376_v57 = vsub.f32 0.0, %v16375_v15  ;;  %v11127_v20 = vpop.eup %11126  ;;  %v16395_v37 = vld [vmem:[#allocation90_spill] sm:$0xff]  ;;  %v16397_v45 = vld [vmem:[#allocation91_spill] sm:$0xff] }
 0x6c5   : > { %v4506_v60 = vmul.f32 %v16370_v31, %v16369_v55  ;;  %v4507_v54 = vmul.f32 %v16372_v61, %v16371_v2  ;;  %11142 = vpow2.f32 %v4538_v7  ;;  %v4546_v14 = vmul.f32 1.442695, %v4502_v43  ;;  %v16383_v55 = vld [vmem:[#allocation84_spill] sm:$0xff]  ;;  %v16385_v61 = vld [vmem:[#allocation85_spill] sm:$0xff] }
 0x6c6   : > { %v4508_v48 = vmul.f32 %v16374_v34, %v16373_v17  ;;  %v4509_v12 = vmul.f32 %v16376_v57, %v16375_v15  ;;  %v16378_v44 = vsub.f32 0.0, %v16377_v13  ;;  %v16380_v47 = vsub.f32 0.0, %v16379_v21  ;;  %v11129_v2 = vpop.eup %11128  ;;  %v16387_v15 = vld [vmem:[#allocation86_spill] sm:$0xff] }
 0x6c7   : > { %11144 = vpow2.f32 %v4540_v50  ;;  %v4548_v46 = vmul.f32 1.442695, %v4503_v28  ;;  %v16382_v6 = vsub.f32 0.0, %v16381_v3  ;;  %v16384_v31 = vsub.f32 0.0, %v16383_v55 }
 0x6c8   : > { %v4510_v18 = vmul.f32 %v16378_v44, %v16377_v13  ;;  %v4511_v22 = vmul.f32 %v16380_v47, %v16379_v21  ;;  %11146 = vpow2.f32 %v4542_v9  ;;  %v4550_v43 = vmul.f32 1.442695, %v4504_v41  ;;  %v11131_v13 = vpop.eup %11130  ;;  %v16389_v44 = vld [vmem:[#allocation87_spill] sm:$0xff] }
 0x6c9   : > { %v4512_v16 = vmul.f32 %v16382_v6, %v16381_v3  ;;  %v4513_v7 = vmul.f32 %v16384_v31, %v16383_v55  ;;  %v16386_v17 = vsub.f32 0.0, %v16385_v61  ;;  %v16388_v50 = vsub.f32 0.0, %v16387_v15  ;;  %v16391_v3 = vld [vmem:[#allocation88_spill] sm:$0xff]  ;;  %v11133_v55 = vpop.eup %11132  ;;  %v16393_v31 = vld [vmem:[#allocation89_spill] sm:$0xff] }
 0x6ca   : > { %11148 = vpow2.f32 %v4544_v33  ;;  %v4552_v57 = vmul.f32 1.442695, %v4505_v53  ;;  %v16390_v21 = vsub.f32 0.0, %v16389_v44  ;;  %v16392_v9 = vsub.f32 0.0, %v16391_v3 }
 0x6cb   : > { %v4514_v34 = vmul.f32 %v16386_v17, %v16385_v61  ;;  %v4515_v28 = vmul.f32 %v16388_v50, %v16387_v15  ;;  %11150 = vpow2.f32 %v4546_v14  ;;  %v4554_v6 = vmul.f32 1.442695, %v4506_v60  ;;  %v11135_v50 = vpop.eup %11134 }
 0x6cc   : > { %v4516_v47 = vmul.f32 %v16390_v21, %v16389_v44  ;;  %v4517_v41 = vmul.f32 %v16392_v9, %v16391_v3  ;;  %v16394_v61 = vsub.f32 0.0, %v16393_v31  ;;  %v16396_v33 = vsub.f32 0.0, %v16395_v37  ;;  %v11137_v9 = vpop.eup %11136 }
 0x6cd   : > { %11152 = vpow2.f32 %v4548_v46  ;;  %v4556_v15 = vmul.f32 1.442695, %v4507_v54  ;;  %v16398_v44 = vsub.f32 0.0, %v16397_v45  ;;  %v16400_v14 = vsub.f32 0.0, %v16399_v35  ;;  %v11139_v40 = vpop.eup %11138 }
 0x6ce   : > { %v4518_v17 = vmul.f32 %v16394_v61, %v16393_v31  ;;  %v4519_v53 = vmul.f32 %v16396_v33, %v16395_v37  ;;  %11154 = vpow2.f32 %v4550_v43  ;;  %v4558_v3 = vmul.f32 1.442695, %v4508_v48  ;;  %v11141_v33 = vpop.eup %11140 }
 0x6cf   : > { %v4520_v21 = vmul.f32 %v16398_v44, %v16397_v45  ;;  %v4521_v60 = vmul.f32 %v16400_v14, %v16399_v35  ;;  %11156 = vpow2.f32 %v4552_v57  ;;  %v4560_v31 = vmul.f32 1.442695, %v4509_v12  ;;  %v11143_v35 = vpop.eup %11142 }
 0x6d0   : > { %v4562_v61 = vmul.f32 1.442695, %v4510_v18  ;;  %v4564_v24 = vmul.f32 1.442695, %v4511_v22  ;;  %11158 = vpow2.f32 %v4554_v6  ;;  %v4566_v37 = vmul.f32 1.442695, %v4512_v16 }
 0x6d1   : > { %v4568_v54 = vmul.f32 1.442695, %v4513_v7  ;;  %v4570_v46 = vmul.f32 1.442695, %v4514_v34  ;;  %11160 = vpow2.f32 %v4556_v15  ;;  %v4572_v49 = vmul.f32 1.442695, %v4515_v28  ;;  %v11145_v18 = vpop.eup %11144 }
 0x6d2   : > { %v4574_v45 = vmul.f32 1.442695, %v4516_v47  ;;  %v13190_v44 = vmul.f32 %v11127_v20, %v13016_v4  ;;  %11162 = vpow2.f32 %v4558_v3  ;;  %v4576_v48 = vmul.f32 1.442695, %v4517_v41  ;;  %v11147_v4 = vpop.eup %11146 }
 0x6d3   : > { %v13193_v43 = vmul.f32 %v11129_v2, %v13019_v19  ;;  %v13196_v12 = vmul.f32 %v11131_v13, %v13022_v23  ;;  %11164 = vpow2.f32 %v4560_v31  ;;  %v4578_v22 = vmul.f32 1.442695, %v4518_v17 }
 0x6d4   : > { %v13199_v16 = vmul.f32 %v11133_v55, %v13025_v11  ;;  %v13202_v7 = vmul.f32 %v11135_v50, %v13028_v29  ;;  %11166 = vpow2.f32 %v4562_v61  ;;  %v4580_v20 = vmul.f32 1.442695, %v4519_v53  ;;  %v11149_v19 = vpop.eup %11148 }
 0x6d5   : > { %v4582_v34 = vmul.f32 1.442695, %v4520_v21  ;;  %v13205_v28 = vmul.f32 %v11137_v9, %v13031_v32  ;;  %11168 = vpow2.f32 %v4564_v24  ;;  %v4584_v23 = vmul.f32 1.442695, %v4521_v60  ;;  %v11151_v11 = vpop.eup %11150 }
 0x6d6   : > { %v13208_v2 = vmul.f32 %v11139_v40, %v13034_v10  ;;  %v15899_v57 = vsub.f32 1.0, %v13190_v44  ;;  %11170 = vpow2.f32 %v4566_v37  ;;  %v13212_v29 = vmul.f32 %v11141_v33, %v13037_v59 }
 0x6d7   : > { %v15898_v13 = vsub.f32 1.0, %v13193_v43  ;;  %v15897_v47 = vsub.f32 1.0, %v13196_v12  ;;  %v11153_v41 = vpop.eup %11152  ;;  %11172 = vpow2.f32 %v4568_v54  ;;  %v13217_v32 = vmul.f32 %v11143_v35, %v13040_v0  ;;  %v16445_v54 = vld [vmem:[#allocation102_spill] sm:$0xff] }
 0x6d8   : > { %v15896_v24 = vsub.f32 1.0, %v13199_v16  ;;  %v15893_v10 = vsub.f32 1.0, %v13202_v7  ;;  %v11155_v40 = vpop.eup %11154  ;;  %11174 = vpow2.f32 %v4570_v46  ;;  %v13222_v6 = vmul.f32 %v11145_v18, %v13043_v27 }
 0x6d9   : > { %v13225_v59 = vmul.f32 %v11147_v4, %v13046_v51  ;;  %v15892_v55 = vsub.f32 1.0, %v13205_v28  ;;  %v11157_v17 = vpop.eup %11156  ;;  %11176 = vpow2.f32 %v4572_v49  ;;  %v13229_v53 = vmul.f32 %v11149_v19, %v13049_v1 }
 0x6da   : > { %v13232_v0 = vmul.f32 %v11151_v11, %v13052_v52  ;;  %v15894_v15 = vsub.f32 1.0, %v13208_v2  ;;  %v11159_v50 = vpop.eup %11158  ;;  %11178 = vpow2.f32 %v4574_v45  ;;  %v13236_v27 = vmul.f32 %v11153_v41, %v13055_v36  ;;  %v16426_v11 = vld [vmem:[#allocation42_spill] sm:$0xff] }
 0x6db   : > { %16401 = vst [vmem:[#allocation103_spill] sm:$0xff] %v13229_v53  ;;  %v13239_v51 = vmul.f32 %v11155_v40, %v13058_v63  ;;  %v15895_v21 = vsub.f32 1.0, %v13212_v29  ;;  %v11161_v14 = vpop.eup %11160  ;;  %11180 = vpow2.f32 %v4576_v48  ;;  %v13243_v1 = vmul.f32 %v11157_v17, %v13061_v5 }
 0x6dc   : > { %16402 = vst [vmem:[#allocation104_spill] sm:$0xff] %v13232_v0  ;;  %16403 = vst [vmem:[#allocation105_spill] sm:$0xff] %v13236_v27  ;;  %v13246_v52 = vmul.f32 %v11159_v50, %v13064_v39  ;;  %v15900_v49 = vsub.f32 1.0, %v13217_v32  ;;  %v11163_v60 = vpop.eup %11162  ;;  %11182 = vpow2.f32 %v4578_v22  ;;  %v13250_v36 = vmul.f32 %v11161_v14, %v13067_v62  ;;  %v16425_v50 = vld [vmem:[#allocation41_spill] sm:$0xff]  ;;  %v16428_v22 = vld [vmem:[#allocation44_spill] sm:$0xff] }
 0x6dd   : > { %16404 = vst [vmem:[#allocation116_spill] sm:$0xff] %v13239_v51  ;;  %16405 = vst [vmem:[#allocation118_spill] sm:$0xff] %v13243_v1  ;;  %v15901_v63 = vsub.f32 1.0, %v13222_v6  ;;  %v15902_v3 = vsub.f32 1.0, %v13225_v59  ;;  %v11165_v9 = vpop.eup %11164  ;;  %11184 = vpow2.f32 %v4580_v20  ;;  %v13255_v31 = vmul.f32 %v11163_v60, %v13070_v30 }
 0x6de   : > { %16406 = vst [vmem:[#allocation129_spill] sm:$0xff] %v13246_v52  ;;  %16407 = vst [vmem:[#allocation68_spill] sm:$0xff] %v13250_v36  ;;  %v15903_v5 = vsub.f32 1.0, %v13229_v53  ;;  %v15905_v39 = vsub.f32 1.0, %v13232_v0  ;;  %v11167_v61 = vpop.eup %11166  ;;  %11186 = vpow2.f32 %v4582_v34  ;;  %v13260_v37 = vmul.f32 %v11165_v9, %v13073_v25 }
 0x6df   : > { %16408 = vst [vmem:[#allocation69_spill] sm:$0xff] %v13255_v31  ;;  %v15907_v62 = vsub.f32 1.0, %v13236_v27  ;;  %v11169_v46 = vpop.eup %11168  ;;  %11188 = vpow2.f32 %v4584_v23  ;;  %v13265_v33 = vmul.f32 %v11167_v61, %v13076_v8  ;;  %v13281_v34 = vsub.f32 0.0, %v15899_v57  ;;  %v16421_v57 = vld [vmem:[#allocation39_spill] sm:$0xff] }
 0x6e0   : > { %16409 = vst [vmem:[#allocation96_spill] sm:$0xff] %v13260_v37  ;;  %v11171_v35 = vpop.eup %11170  ;;  %v13270_v48 = vmul.f32 %v11169_v46, %v13079_v38  ;;  %v13285_v38 = vsub.f32 0.0, %v15898_v13  ;;  %v13297_v41 = vsub.f32 0.0, %v15896_v24  ;;  %v13309_v14 = vsub.f32 0.0, %v15892_v55  ;;  %v16418_v24 = vld [vmem:[#allocation126_spill] sm:$0xff]  ;;  %v16422_v55 = vld [vmem:[#allocation40_spill] sm:$0xff] }
 0x6e1   : > { %16410 = vst [vmem:[#allocation97_spill] sm:$0xff] %v13265_v33  ;;  %v11173_v4 = vpop.eup %11172  ;;  %v13276_v20 = vmul.f32 %v11171_v35, %v13085_v42  ;;  %v13293_v42 = vsub.f32 0.0, %v15897_v47  ;;  %v13321_v46 = vsub.f32 0.0, %v15895_v21  ;;  %v16420_v13 = vld [vmem:[#allocation38_spill] sm:$0xff]  ;;  %vm4654_vm13 = vcmp.ge.f32.partialorder %v16421_v57, 0.0  ;;  %v16427_v8 = vld [vmem:[#allocation43_spill] sm:$0xff] }
 0x6e2   : > { %16411 = vst [vmem:[#allocation98_spill] sm:$0xff] %v13270_v48  ;;  %v11175_v19 = vpop.eup %11174  ;;  %v13288_v23 = vmul.f32 %v11173_v4, %v13088_v26  ;;  %v13305_v26 = vsub.f32 0.0, %v15893_v10  ;;  %v16415_v4 = vld [vmem:[#allocation114_spill] sm:$0xff]  ;;  %v16416_v10 = vld [vmem:[#allocation35_spill] sm:$0xff]  ;;  %vm4653_vm12 = vcmp.ge.f32.partialorder %v16420_v13, 0.0  ;;  %vm4655_vm14 = vcmp.ge.f32.partialorder %v16422_v55, 0.0 }
 0x6e3   : > { %16412 = vst [vmem:[#allocation99_spill] sm:$0xff] %v13276_v20  ;;  %v11177_v40 = vpop.eup %11176  ;;  %v13300_v17 = vmul.f32 %v11175_v19, %v13091_v56  ;;  %v13317_v56 = vsub.f32 0.0, %v15894_v15  ;;  %vm4650_vm9 = vcmp.ge.f32.partialorder %v16416_v10, 0.0  ;;  %v13335_v15 = vsub.f32 0.0, %v15901_v63 }
 0x6e4   : > { %16413 = vst [vmem:[#allocation108_spill] sm:$0xff] %v13288_v23  ;;  %v11179_v60 = vpop.eup %11178  ;;  %v13312_v9 = vmul.f32 %v11177_v40, %v13095_v58  ;;  %v16417_v58 = vld [vmem:[#allocation36_spill] sm:$0xff]  ;;  %v13331_v40 = vsub.f32 0.0, %v15900_v49  ;;  %v13347_v49 = vsub.f32 0.0, %v15902_v3  ;;  %v13351_v63 = vsub.f32 0.0, %v15903_v5 }
 0x6e5   : > { %16414 = vst [vmem:[#allocation111_spill] sm:$0xff] %v13300_v17  ;;  %v11181_v35 = vpop.eup %11180  ;;  %v13324_v19 = vmul.f32 %v11179_v60, %v16415_v4  ;;  %vm4651_vm10 = vcmp.ge.f32.partialorder %v16417_v58, 0.0  ;;  %v16419_v4 = vld [vmem:[#allocation37_spill] sm:$0xff]  ;;  %vm4656_vm15 = vcmp.ge.f32.partialorder %v16425_v50, 0.0  ;;  %vm4657_vm1 = vcmp.ge.f32.partialorder %v16426_v11, 0.0  ;;  %v16485_v50 = vld [vmem:[#allocation103_spill] sm:$0xff] }
 0x6e6   : > { %v11183_v21 = vpop.eup %11182  ;;  %v13338_v47 = vmul.f32 %v11181_v35, %v16418_v24  ;;  %vm4652_vm11 = vcmp.ge.f32.partialorder %v16419_v4, 0.0  ;;  %16423 = vst [vmem:[#allocation117_spill] sm:$0xff] %v13351_v63  ;;  %v16424_v35 = vld [vmem:[#allocation67_spill] sm:$0xff]  ;;  %vm4658_vm2 = vcmp.ge.f32.partialorder %v16427_v8, 0.0  ;;  %vm4659_vm3 = vcmp.ge.f32.partialorder %v16428_v22, 0.0  ;;  %v16497_v4 = vld [vmem:[#allocation48_spill] sm:$0xff] }
 0x6e7   : > { %v11185_v24 = vpop.eup %11184  ;;  %v13354_v61 = vmul.f32 %v11183_v21, %v16424_v35  ;;  %v13363_v3 = vsub.f32 0.0, %v15905_v39  ;;  %v13367_v5 = vsub.f32 0.0, %v15907_v62  ;;  %v16431_v35 = vld [vmem:[#allocation100_spill] sm:$0xff]  ;;  %v16436_v39 = vsub.f32 1.0, %v13239_v51  ;;  %v16492_v58 = vld [vmem:[#allocation47_spill] sm:$0xff] }
 0x6e8   : > { %v11187_v21 = vpop.eup %11186  ;;  %v13370_v18 = vmul.f32 %v11185_v24, %v16431_v35  ;;  %v16437_v62 = vsub.f32 1.0, %v13243_v1  ;;  %v16443_v51 = vsub.f32 1.0, %v13246_v52  ;;  %v16444_v1 = vsub.f32 1.0, %v13250_v36 }
 0x6e9   : > { %16429 = vst [vmem:[#allocation119_spill] sm:$0xff] %v13363_v3  ;;  %16430 = vst [vmem:[#allocation120_spill] sm:$0xff] %v13367_v5  ;;  %v4696_v0 = vsub.f32 0.0, %v16436_v39  ;;  %v11189_v5 = vpop.eup %11188  ;;  %v16438_v3 = vld [vmem:[#allocation101_spill] sm:$0xff]  ;;  %v16450_v30 = vsub.f32 1.0, %v13255_v31  ;;  %v16456_v53 = vsub.f32 1.0, %v13265_v33 }
 0x6ea   : > { %v4697_v27 = vsub.f32 0.0, %v16437_v62  ;;  %v13382_v24 = vmul.f32 %v11187_v21, %v16438_v3  ;;  %v4698_v39 = vsub.f32 0.0, %v16443_v51  ;;  %v4699_v62 = vsub.f32 0.0, %v16444_v1 }
 0x6eb   : > { %v13394_v63 = vmul.f32 %v11189_v5, %v16445_v54  ;;  %v4647_v3 = vsub.f32 1.0, %v13370_v18  ;;  %v4700_v52 = vsub.f32 0.0, %v16450_v30  ;;  %v16451_v51 = vsub.f32 1.0, %v13260_v37  ;;  %v16460_v5 = vld [vmem:[#allocation62_spill] sm:$0xff]  ;;  %v16461_v54 = vld [vmem:[#allocation63_spill] sm:$0xff]  ;;  %v16462_v18 = vld [vmem:[#allocation64_spill] sm:$0xff] }
 0x6ec   : > { %v4648_v1 = vsub.f32 1.0, %v13382_v24  ;;  %v4702_v35 = vsub.f32 0.0, %v16456_v53  ;;  %v16457_v45 = vsub.f32 1.0, %v13270_v48  ;;  %v16458_v30 = vsub.f32 1.0, %v13276_v20  ;;  %v16459_v24 = vld [vmem:[#allocation61_spill] sm:$0xff] }
 0x6ed   : > { %v4701_v36 = vsub.f32 0.0, %v16451_v51  ;;  %v4649_v51 = vsub.f32 1.0, %v13394_v63  ;;  %vm4676_vm6 = vcmp.ge.f32.partialorder %v16459_v24, 0.0  ;;  %vm4677_vm8 = vcmp.ge.f32.partialorder %v16460_v5, 0.0  ;;  %v16467_v63 = vld [vmem:[#allocation66_spill] sm:$0xff]  ;;  %v16484_v11 = vld [vmem:[#allocation117_spill] sm:$0xff] }
 0x6ee   : > { %v4703_v31 = vsub.f32 0.0, %v16457_v45  ;;  %v4704_v37 = vsub.f32 0.0, %v16458_v30  ;;  %vm4678_vm4 = vcmp.ge.f32.partialorder %v16461_v54, 0.0  ;;  %vm4679_vm5 = vcmp.ge.f32.partialorder %v16462_v18, 0.0  ;;  %v16466_v30 = vld [vmem:[#allocation65_spill] sm:$0xff] }
 0x6ef   : > { %v16463_v21 = vsub.f32 1.0, %v13288_v23  ;;  %v16464_v53 = vsub.f32 1.0, %v13300_v17  ;;  %v16465_v45 = vsub.f32 1.0, %v13312_v9  ;;  %vm4680_vm0 = vcmp.ge.f32.partialorder %v16466_v30, 0.0 }
 0x6f0   : > { %vm4681_vm7 = vcmp.ge.f32.partialorder %v16467_v63, 0.0  ;;  %v16468_v24 = vsub.f32 1.0, %v13324_v19  ;;  %v16469_v54 = vsub.f32 1.0, %v13338_v47  ;;  %v16470_v18 = vsub.f32 1.0, %v13354_v61  ;;  %v16489_v8 = vld [vmem:[#allocation119_spill] sm:$0xff]  ;;  %v16494_v22 = vld [vmem:[#allocation120_spill] sm:$0xff] }
 0x6f1   : > { %v4705_v33 = vsub.f32 0.0, %v16463_v21  ;;  %v4706_v48 = vsub.f32 0.0, %v16464_v53  ;;  %v4707_v20 = vsub.f32 0.0, %v16465_v45  ;;  %v4711_v21 = vsub.f32 0.0, %v4647_v3 }
 0x6f2   : > { %v4708_v5 = vsub.f32 0.0, %v16468_v24  ;;  %v4709_v60 = vsub.f32 0.0, %v16469_v54  ;;  %v4710_v23 = vsub.f32 0.0, %v16470_v18  ;;  %v4712_v25 = vsub.f32 0.0, %v4648_v1 }
 0x6f3   : > { %v4713_v17 = vsub.f32 0.0, %v4649_v51  ;;  %v16471_v53 = vsub.f32 1.0, %v13190_v44  ;;  %v16472_v63 = vsub.f32 1.0, %v13193_v43  ;;  %v16473_v54 = vsub.f32 1.0, %v13196_v12 }
 0x6f4   : > { %v16474_v30 = vsub.f32 1.0, %v13199_v16  ;;  %v16475_v10 = vsub.f32 1.0, %v13202_v7  ;;  %v16478_v13 = vsub.f32 1.0, %v13212_v29  ;;  %v16479_v57 = vsub.f32 1.0, %v13217_v32 }
 0x6f5   : > { %v4714_v45 = vsel %vm4650_vm9, %v16471_v53, %v13281_v34  ;;  %v4715_v24 = vsel %vm4651_vm10, %v16472_v63, %v13285_v38  ;;  %v4716_v18 = vsel %vm4652_vm11, %v16473_v54, %v13293_v42  ;;  %v16476_v34 = vsub.f32 1.0, %v13205_v28  ;;  %v16501_v63 = vld [vmem:[#allocation49_spill] sm:$0xff]  ;;  %v16503_v54 = vld [vmem:[#allocation118_spill] sm:$0xff] }
 0x6f6   : > { %v4717_v44 = vsel %vm4653_vm12, %v16474_v30, %v13297_v41  ;;  %v4718_v43 = vsel %vm4654_vm13, %v16475_v10, %v13305_v26  ;;  %v16477_v38 = vsub.f32 1.0, %v13208_v2  ;;  %v4721_v7 = vsel %vm4657_vm1, %v16478_v13, %v13321_v46  ;;  %v16482_v41 = vld [vmem:[#allocation45_spill] sm:$0xff]  ;;  %v16499_v30 = vld [vmem:[#allocation116_spill] sm:$0xff] }
 0x6f7   : > { %v4719_v12 = vsel %vm4655_vm14, %v16476_v34, %v13309_v14  ;;  %v4722_v28 = vsel %vm4658_vm2, %v16479_v57, %v13331_v40  ;;  %v16480_v55 = vsub.f32 1.0, %v13222_v6  ;;  %v16481_v42 = vsub.f32 1.0, %v13225_v59  ;;  %v16487_v14 = vld [vmem:[#allocation46_spill] sm:$0xff]  ;;  %v16507_v13 = vld [vmem:[#allocation129_spill] sm:$0xff] }
 0x6f8   : > { %v4720_v16 = vsel %vm4656_vm15, %v16477_v38, %v13317_v56  ;;  %vm16483_vm9 = vcmp.ge.f32.partialorder %v16482_v41, 0.0  ;;  %v16486_v26 = vsub.f32 1.0, %v16485_v50  ;;  %vm16488_vm10 = vcmp.ge.f32.partialorder %v16487_v14, 0.0  ;;  %v16490_v56 = vld [vmem:[#allocation104_spill] sm:$0xff]  ;;  %v16505_v34 = vld [vmem:[#allocation50_spill] sm:$0xff]  ;;  %v16515_v14 = vld [vmem:[#allocation69_spill] sm:$0xff] }
 0x6f9   : > { %v4723_v2 = vsel %vm4659_vm3, %v16480_v55, %v13335_v15  ;;  %v4724_v29 = vsel %vm16483_vm9, %v16481_v42, %v13347_v49  ;;  %v16491_v46 = vsub.f32 1.0, %v16490_v56  ;;  %vm16493_vm11 = vcmp.ge.f32.partialorder %v16492_v58, 0.0  ;;  %v16495_v15 = vld [vmem:[#allocation105_spill] sm:$0xff]  ;;  %v16509_v55 = vld [vmem:[#allocation51_spill] sm:$0xff]  ;;  %v16511_v41 = vld [vmem:[#allocation68_spill] sm:$0xff] }
 0x6fa   : > { %v4725_v32 = vsel %vm16488_vm10, %v16486_v26, %v16484_v11  ;;  %v16496_v40 = vsub.f32 1.0, %v16495_v15  ;;  %vm16498_vm12 = vcmp.ge.f32.partialorder %v16497_v4, 0.0  ;;  %v16500_v49 = vsub.f32 1.0, %v16499_v30  ;;  %v16513_v50 = vld [vmem:[#allocation52_spill] sm:$0xff]  ;;  %v16517_v56 = vld [vmem:[#allocation53_spill] sm:$0xff]  ;;  %v16525_v4 = vld [vmem:[#allocation55_spill] sm:$0xff] }
 0x6fb   : > { %v4726_v6 = vsel %vm16493_vm11, %v16491_v46, %v16489_v8  ;;  %vm16502_vm13 = vcmp.ge.f32.partialorder %v16501_v63, 0.0  ;;  %v16504_v10 = vsub.f32 1.0, %v16503_v54  ;;  %vm16506_vm14 = vcmp.ge.f32.partialorder %v16505_v34, 0.0  ;;  %v16519_v46 = vld [vmem:[#allocation96_spill] sm:$0xff]  ;;  %v16523_v15 = vld [vmem:[#allocation97_spill] sm:$0xff]  ;;  %v16527_v30 = vld [vmem:[#allocation98_spill] sm:$0xff] }
 0x6fc   : > { %v4727_v59 = vsel %vm16498_vm12, %v16496_v40, %v16494_v22  ;;  %v4728_v53 = vsel %vm16502_vm13, %v16500_v49, %v4696_v0  ;;  %v16508_v57 = vsub.f32 1.0, %v16507_v13  ;;  %vm16510_vm15 = vcmp.ge.f32.partialorder %v16509_v55, 0.0  ;;  %v16521_v22 = vld [vmem:[#allocation54_spill] sm:$0xff]  ;;  %v16529_v63 = vld [vmem:[#allocation56_spill] sm:$0xff]  ;;  %v16531_v54 = vld [vmem:[#allocation99_spill] sm:$0xff] }
 0x6fd   : > { %v4729_v38 = vsel %vm16506_vm14, %v16504_v10, %v4697_v27  ;;  %v16512_v11 = vsub.f32 1.0, %v16511_v41  ;;  %vm16514_vm1 = vcmp.ge.f32.partialorder %v16513_v50, 0.0  ;;  %v16516_v8 = vsub.f32 1.0, %v16515_v14  ;;  %v16533_v34 = vld [vmem:[#allocation57_spill] sm:$0xff]  ;;  %v16535_v13 = vld [vmem:[#allocation108_spill] sm:$0xff]  ;;  %v16537_v55 = vld [vmem:[#allocation58_spill] sm:$0xff] }
 0x6fe   : > { %v4730_v42 = vsel %vm16510_vm15, %v16508_v57, %v4698_v39  ;;  %vm16518_vm2 = vcmp.ge.f32.partialorder %v16517_v56, 0.0  ;;  %v16520_v58 = vsub.f32 1.0, %v16519_v46  ;;  %vm16522_vm3 = vcmp.ge.f32.partialorder %v16521_v22, 0.0  ;;  %v16539_v41 = vld [vmem:[#allocation111_spill] sm:$0xff] }
 0x6ff   : > { %v4731_v26 = vsel %vm16514_vm1, %v16512_v11, %v4699_v62  ;;  %v4732_v0 = vsel %vm16518_vm2, %v16516_v8, %v4700_v52  ;;  %v16524_v40 = vsub.f32 1.0, %v16523_v15  ;;  %vm16526_vm9 = vcmp.ge.f32.partialorder %v16525_v4, 0.0  ;;  %v16541_v50 = vld [vmem:[#allocation59_spill] sm:$0xff]  ;;  %v16544_v8 = vld [vmem:[#allocation60_spill] sm:$0xff] }
 0x700   : > { %v4733_v27 = vsel %vm16522_vm3, %v16520_v58, %v4701_v36  ;;  %v16528_v49 = vsub.f32 1.0, %v16527_v30  ;;  %vm16530_vm10 = vcmp.ge.f32.partialorder %v16529_v63, 0.0  ;;  %v16532_v10 = vsub.f32 1.0, %v16531_v54  ;;  %v16564_v46 = vld [vmem:[#allocation15_spill] sm:$0xff]  ;;  %v16575_v30 = vld [vmem:[#allocation20_spill] sm:$0xff] }
 0x701   : > { %v4734_v39 = vsel %vm16526_vm9, %v16524_v40, %v4702_v35  ;;  %vm16534_vm11 = vcmp.ge.f32.partialorder %v16533_v34, 0.0  ;;  %v16536_v57 = vsub.f32 1.0, %v16535_v13  ;;  %vm16538_vm12 = vcmp.ge.f32.partialorder %v16537_v55, 0.0  ;;  %v16569_v40 = vld [vmem:[#allocation18_spill] sm:$0xff]  ;;  %v16570_v4 = vld [vmem:[#allocation19_spill] sm:$0xff] }
 0x702   : > { %v4735_v62 = vsel %vm16530_vm10, %v16528_v49, %v4703_v31  ;;  %v4736_v52 = vsel %vm16534_vm11, %v16532_v10, %v4704_v37  ;;  %v16540_v11 = vsub.f32 1.0, %v16539_v41  ;;  %vm16542_vm13 = vcmp.ge.f32.partialorder %v16541_v50, 0.0 }
 0x703   : > { %v4737_v36 = vsel %vm16538_vm12, %v16536_v57, %v4705_v33  ;;  %v16543_v14 = vsub.f32 1.0, %v13312_v9  ;;  %vm16545_vm14 = vcmp.ge.f32.partialorder %v16544_v8, 0.0  ;;  %v16546_v56 = vsub.f32 1.0, %v13324_v19  ;;  %v16576_v19 = vld [vmem:[#allocation21_spill] sm:$0xff] }
 0x704   : > { %v4738_v35 = vsel %vm16542_vm13, %v16540_v11, %v4706_v48  ;;  %v16548_v58 = vsub.f32 1.0, %v13338_v47  ;;  %v16550_v15 = vsub.f32 1.0, %v13354_v61  ;;  %v4743_v9 = vsel %vm4679_vm5, %v4647_v3, %v4711_v21 }
 0x705   : > { %v4739_v31 = vsel %vm16545_vm14, %v16543_v14, %v4707_v20  ;;  %v4740_v37 = vsel %vm4676_vm6, %v16546_v56, %v4708_v5  ;;  %v4744_v20 = vsel %vm4680_vm0, %v4648_v1, %v4712_v25  ;;  %v4745_v49 = vsel %vm4681_vm7, %v4649_v51, %v4713_v17  ;;  %v16562_v14 = vld [vmem:[#allocation13_spill] sm:$0xff] }
 0x706   : > { %v4741_v33 = vsel %vm4677_vm8, %v16548_v58, %v4709_v60  ;;  %v4742_v48 = vsel %vm4678_vm4, %v16550_v15, %v4710_v23  ;;  %v4746_v5 = vadd.f32 1.0, %v4714_v45  ;;  %v4747_v63 = vadd.f32 1.0, %v4715_v24  ;;  %v16567_v58 = vld [vmem:[#allocation16_spill] sm:$0xff] }
 0x707   : > { %v4748_v47 = vadd.f32 1.0, %v4716_v18  ;;  %v4749_v54 = vadd.f32 1.0, %v4717_v44  ;;  %v4750_v10 = vadd.f32 1.0, %v4718_v43  ;;  %v4751_v60 = vadd.f32 1.0, %v4719_v12 }
 0x708   : > { %v4752_v34 = vadd.f32 1.0, %v4720_v16  ;;  %v4753_v61 = vadd.f32 1.0, %v4721_v7  ;;  %v4754_v13 = vadd.f32 1.0, %v4722_v28  ;;  %v4755_v57 = vadd.f32 1.0, %v4723_v2 }
 0x709   : > { %v4756_v23 = vadd.f32 1.0, %v4724_v29  ;;  %v4757_v55 = vadd.f32 1.0, %v4725_v32  ;;  %v4758_v41 = vadd.f32 1.0, %v4726_v6  ;;  %v4759_v3 = vadd.f32 1.0, %v4727_v59  ;;  %v16555_v32 = vld [vmem:[#allocation6_spill] sm:$0xff]  ;;  %v16556_v59 = vld [vmem:[#allocation7_spill] sm:$0xff] }
 0x70a   : > { %v4760_v21 = vadd.f32 1.0, %v4728_v53  ;;  %v4761_v11 = vadd.f32 1.0, %v4729_v38  ;;  %v4762_v25 = vadd.f32 1.0, %v4730_v42  ;;  %v4763_v1 = vadd.f32 1.0, %v4731_v26  ;;  %v16557_v38 = vld [vmem:[#allocation8_spill] sm:$0xff]  ;;  %v16558_v26 = vld [vmem:[#allocation9_spill] sm:$0xff] }
 0x70b   : > { %v4764_v50 = vadd.f32 1.0, %v4732_v0  ;;  %v4765_v17 = vadd.f32 1.0, %v4733_v27  ;;  %v4766_v51 = vadd.f32 1.0, %v4734_v39  ;;  %v4767_v45 = vadd.f32 1.0, %v4735_v62  ;;  %v16559_v27 = vld [vmem:[#allocation10_spill] sm:$0xff]  ;;  %v16560_v62 = vld [vmem:[#allocation11_spill] sm:$0xff] }
 0x70c   : > { %v4768_v24 = vadd.f32 1.0, %v4736_v52  ;;  %v4769_v18 = vadd.f32 1.0, %v4737_v36  ;;  %v4770_v44 = vadd.f32 1.0, %v4738_v35  ;;  %v4771_v43 = vadd.f32 1.0, %v4739_v31  ;;  %v16561_v36 = vld [vmem:[#allocation12_spill] sm:$0xff]  ;;  %v16563_v31 = vld [vmem:[#allocation14_spill] sm:$0xff] }
 0x70d   : > { %v4772_v12 = vadd.f32 1.0, %v4740_v37  ;;  %v4773_v16 = vadd.f32 1.0, %v4741_v33  ;;  %v4774_v7 = vadd.f32 1.0, %v4742_v48  ;;  %v4775_v28 = vadd.f32 1.0, %v4743_v9  ;;  %v16568_v33 = vld [vmem:[#allocation17_spill] sm:$0xff] }
 0x70e   : > { %v4776_v2 = vadd.f32 1.0, %v4744_v20  ;;  %v4777_v29 = vadd.f32 1.0, %v4745_v49  ;;  %v4778_v6 = vmul.f32 %v4746_v5, %v16555_v32  ;;  %v4779_v53 = vmul.f32 %v4747_v63, %v16556_v59  ;;  %v16577_v5 = vld [vmem:[#allocation22_spill] sm:$0xff]  ;;  %v16599_v32 = vld [vmem:[#allocation33_spill] sm:$0xff] }
 0x70f   : > { %v4780_v42 = vmul.f32 %v4748_v47, %v16557_v38  ;;  %v4781_v0 = vmul.f32 %v4749_v54, %v16558_v26  ;;  %v4782_v39 = vmul.f32 %v4750_v10, %v16559_v27  ;;  %v4783_v52 = vmul.f32 %v4751_v60, %v16560_v62  ;;  %v16578_v47 = vld [vmem:[#allocation23_spill] sm:$0xff]  ;;  %v16583_v10 = vld [vmem:[#allocation24_spill] sm:$0xff]  ;;  %v16600_v59 = vld [vmem:[#allocation34_spill] sm:$0xff] }
 0x710   : > { %v4784_v35 = vmul.f32 %v4752_v34, %v16561_v36  ;;  %v4785_v8 = vmul.f32 %v4753_v61, %v16562_v14  ;;  %v4786_v56 = vmul.f32 %v4754_v13, %v16563_v31  ;;  %v4787_v37 = vmul.f32 %v4755_v57, %v16564_v46  ;;  %v16584_v34 = vld [vmem:[#allocation25_spill] sm:$0xff]  ;;  %v16585_v13 = vld [vmem:[#allocation26_spill] sm:$0xff]  ;;  %v16607_v38 = vld [vmem:[#allocation95_spill] sm:$0xff] }
 0x711   : > { %vm16565_vm0 = vcmask 130048   ;;  %v4788_v22 = vmul.f32 %v4756_v23, %v16567_v58  ;;  %v4789_v15 = vmul.f32 %v4757_v55, %v16568_v33  ;;  %v4790_v48 = vmul.f32 %v4758_v41, %v16569_v40  ;;  %v16586_v23 = vld [vmem:[#allocation27_spill] sm:$0xff]  ;;  %v16591_v41 = vld [vmem:[#allocation28_spill] sm:$0xff]  ;;  %v13718_v62 = vld [vmem:[%s15701_s8 + $0x10] sm:$0xff]  }
 0x712   : > { %4856 = vst.msk [vmem:[#allocation3 + $0x19] sm:$0xff] %vm16565_vm0, %v4778_v6  ;;  %vm16566_vm7 = vmmov %vm16565_vm0  ;;  %v4791_v9 = vmul.f32 %v4759_v3, %v16570_v4  ;;  %v4792_v20 = vmul.f32 %v4760_v21, %v16575_v30  ;;  %v4793_v49 = vmul.f32 %v4761_v11, %v16576_v19  ;;  %v4794_v63 = vmul.f32 %v4762_v25, %v16577_v5  ;;  %v16592_v21 = vld [vmem:[#allocation29_spill] sm:$0xff]  ;;  %v16593_v25 = vld [vmem:[#allocation30_spill] sm:$0xff] }
 0x713   : > { %4857 = vst.msk [vmem:[#allocation3 + $0x21] sm:$0xff] %vm16566_vm7, %v4779_v53  ;;  %vm16571_vm8 = vmmov %vm16565_vm0  ;;  %v4795_v54 = vmul.f32 %v4763_v1, %v16578_v47  ;;  %v4796_v60 = vmul.f32 %v4764_v50, %v16583_v10  ;;  %v4797_v61 = vmul.f32 %v4765_v17, %v16584_v34  ;;  %v4798_v57 = vmul.f32 %v4766_v51, %v16585_v13  ;;  %v16594_v50 = vld [vmem:[#allocation31_spill] sm:$0xff]  ;;  %v16598_v51 = vld [vmem:[#allocation32_spill] sm:$0xff] }
 0x714   : > { %4858 = vst.msk [vmem:[#allocation3 + $0x31] sm:$0xff] %vm16571_vm8, %v4780_v42  ;;  %vm16572_vm4 = vmmov %vm16565_vm0  ;;  %v4799_v55 = vmul.f32 %v4767_v45, %v16586_v23  ;;  %v4800_v3 = vmul.f32 %v4768_v24, %v16591_v41  ;;  %v4801_v11 = vmul.f32 %v4769_v18, %v16592_v21  ;;  %v4802_v1 = vmul.f32 %v4770_v44, %v16593_v25  ;;  %v16601_v53 = vld [vmem:[#allocation93_spill] sm:$0xff]  ;;  %v16606_v44 = vld [vmem:[#allocation94_spill] sm:$0xff] }
 0x715   : > { %4859 = vst.msk [vmem:[#allocation3 + $0x39] sm:$0xff] %vm16572_vm4, %v4781_v0  ;;  %vm16573_vm5 = vmmov %vm16565_vm0  ;;  %v4803_v17 = vmul.f32 %v4771_v43, %v16594_v50  ;;  %v4804_v45 = vmul.f32 %v4772_v12, %v16598_v51  ;;  %v4805_v6 = vmul.f32 %v4773_v16, %v16599_v32  ;;  %v4806_v24 = vmul.f32 %v4774_v7, %v16600_v59  ;;  %v4899_v16 = vld [vmem:[#allocation3 + $0x8] sm:$0xff] }
 0x716   : > { %4860 = vst.msk [vmem:[#allocation3 + $0x49] sm:$0xff] %vm16573_vm5, %v4782_v39  ;;  %vm16574_vm6 = vmmov %vm16565_vm0  ;;  %v4807_v18 = vmul.f32 %v4775_v28, %v16601_v53  ;;  %v4808_v43 = vmul.f32 %v4776_v2, %v16606_v44  ;;  %v4809_v42 = vmul.f32 %v4777_v29, %v16607_v38  ;;  %v16616_v12 = vmov 0.0   ;;  %v5195_v25 = vld [vmem:[#allocation3 + $0x1] sm:$0xff] }
 0x717   : > { %4861 = vst.msk [vmem:[#allocation3 + $0x51] sm:$0xff] %vm16574_vm6, %v4783_v52  ;;  %vm16579_vm15 = vmmov %vm16565_vm0  ;;  %v11320_v52 = vld [vmem:[%s15701_s8 + $0x8] sm:$0xff]  }
 0x718   : > { %4862 = vst.msk [vmem:[#allocation3 + $0x61] sm:$0xff] %vm16579_vm15, %v4784_v35  ;;  %vm16580_vm1 = vmmov %vm16565_vm0 }
 0x719   : > { %4863 = vst.msk [vmem:[#allocation3 + $0x69] sm:$0xff] %vm16580_vm1, %v4785_v8  ;;  %vm16581_vm2 = vmmov %vm16565_vm0  ;;  %v5197_v32 = vld [vmem:[#allocation3 + $0x19] sm:$0xff] }
 0x71a   : > { %4864 = vst.msk [vmem:[#allocation3 + $0x79] sm:$0xff] %vm16581_vm2, %v4786_v56  ;;  %vm16582_vm3 = vmmov %vm16565_vm0  ;;  %v4901_v7 = vld [vmem:[#allocation3 + $0x20] sm:$0xff] }
 0x71b   : > { %4865 = vst.msk [vmem:[#allocation3 + $0x81] sm:$0xff] %vm16582_vm3, %v4787_v37  ;;  %vm16587_vm9 = vmmov %vm16565_vm0  ;;  %v5199_v59 = vld [vmem:[#allocation3 + $0x31] sm:$0xff] }
 0x71c   : > { %4866 = vst.msk [vmem:[#allocation3 + $0x91] sm:$0xff] %vm16587_vm9, %v4788_v22  ;;  %vm16588_vm10 = vmmov %vm16565_vm0  ;;  %vm4818_vm9 = vcmask 122880   ;;  %v4903_v28 = vld [vmem:[#allocation3 + $0x38] sm:$0xff] }
 0x71d   : > { %4867 = vst.msk [vmem:[#allocation3 + $0x99] sm:$0xff] %vm16588_vm10, %v4789_v15  ;;  %vm16589_vm11 = vmmov %vm16565_vm0  ;;  %vm4812_vm10 = vcmask 123904  }
 0x71e   : > { %4868 = vst.msk [vmem:[#allocation3 + $0xa9] sm:$0xff] %vm16589_vm11, %v4790_v48  ;;  %vm16590_vm12 = vmmov %vm16565_vm0  ;;  %v4905_v35 = vld [vmem:[#allocation3 + $0x50] sm:$0xff] }
 0x71f   : > { %4869 = vst.msk [vmem:[#allocation3 + $0xb1] sm:$0xff] %vm16590_vm12, %v4791_v9  ;;  %vm16595_vm13 = vmmov %vm16565_vm0  ;;  %v5202_v38 = vld [vmem:[#allocation3 + $0x51] sm:$0xff] }
 0x720   : > { %4870 = vst.msk [vmem:[#allocation3 + $0xc1] sm:$0xff] %vm16595_vm13, %v4792_v20  ;;  %vm16596_vm14 = vmmov %vm16565_vm0  ;;  %v4907_v8 = vld [vmem:[#allocation3 + $0x68] sm:$0xff] }
 0x721   : > { %4871 = vst.msk [vmem:[#allocation3 + $0xc9] sm:$0xff] %vm16596_vm14, %v4793_v49  ;;  %vm16597_vm7 = vmmov %vm16565_vm0 }
 0x722   : > { %4872 = vst.msk [vmem:[#allocation3 + $0xd9] sm:$0xff] %vm16565_vm0, %v4794_v63  ;;  %vm16602_vm8 = vmmov %vm16565_vm0  ;;  %v4909_v37 = vld [vmem:[#allocation3 + $0x80] sm:$0xff] }
 0x723   : > { %4873 = vst.msk [vmem:[#allocation3 + $0xe1] sm:$0xff] %vm16597_vm7, %v4795_v54  ;;  %vm16603_vm4 = vmmov %vm16565_vm0 }
 0x724   : > { %4874 = vst.msk [vmem:[#allocation3 + $0xf1] sm:$0xff] %vm16602_vm8, %v4796_v60  ;;  %vm16604_vm5 = vmmov %vm16565_vm0  ;;  %v4911_v22 = vld [vmem:[#allocation3 + $0x98] sm:$0xff] }
 0x725   : > { %4875 = vst.msk [vmem:[#allocation3 + $0xf9] sm:$0xff] %vm16603_vm4, %v4797_v61  ;;  %vm16605_vm6 = vmmov %vm16565_vm0 }
 0x726   : > { %4876 = vst.msk [vmem:[#allocation3 + $0x109] sm:$0xff] %vm16604_vm5, %v4798_v57  ;;  %vm16608_vm15 = vmmov %vm16565_vm0  ;;  %v4913_v48 = vld [vmem:[#allocation3 + $0xb0] sm:$0xff] }
 0x727   : > { %4877 = vst.msk [vmem:[#allocation3 + $0x111] sm:$0xff] %vm16605_vm6, %v4799_v55  ;;  %vm16609_vm1 = vmmov %vm16565_vm0 }
 0x728   : > { %4878 = vst.msk [vmem:[#allocation3 + $0x121] sm:$0xff] %vm16608_vm15, %v4800_v3  ;;  %vm16610_vm2 = vmmov %vm16565_vm0  ;;  %v4915_v9 = vld [vmem:[#allocation3 + $0xc8] sm:$0xff] }
 0x729   : > { %4879 = vst.msk [vmem:[#allocation3 + $0x129] sm:$0xff] %vm16609_vm1, %v4801_v11  ;;  %vm16611_vm3 = vmmov %vm16565_vm0 }
 0x72a   : > { %4880 = vst.msk [vmem:[#allocation3 + $0x139] sm:$0xff] %vm16610_vm2, %v4802_v1  ;;  %vm16612_vm11 = vmmov %vm16565_vm0  ;;  %v4917_v49 = vld [vmem:[#allocation3 + $0xe0] sm:$0xff] }
 0x72b   : > { %4881 = vst.msk [vmem:[#allocation3 + $0x141] sm:$0xff] %vm16611_vm3, %v4803_v17  ;;  %vm16613_vm12 = vmmov %vm16565_vm0 }
 0x72c   : > { %4882 = vst.msk [vmem:[#allocation3 + $0x151] sm:$0xff] %vm16612_vm11, %v4804_v45  ;;  %vm16614_vm13 = vmmov %vm16565_vm0  ;;  %v4919_v63 = vld [vmem:[#allocation3 + $0xf8] sm:$0xff] }
 0x72d   : > { %4883 = vst.msk [vmem:[#allocation3 + $0x159] sm:$0xff] %vm16613_vm12, %v4805_v6  ;;  %vm16615_vm14 = vmmov %vm16565_vm0  ;;  %v5198_v6 = vld [vmem:[#allocation3 + $0x21] sm:$0xff] }
 0x72e   : > { %4884 = vst.msk [vmem:[#allocation3 + $0x169] sm:$0xff] %vm16614_vm13, %v4806_v24  ;;  %vm16617_vm7 = vmmov %vm16565_vm0  ;;  %v4921_v60 = vld [vmem:[#allocation3 + $0x110] sm:$0xff]  ;;  %v5200_v24 = vld [vmem:[#allocation3 + $0x39] sm:$0xff]  ;;  %v13782_v53 = vpack.c.bf16 %v5198_v6, %v5197_v32 }
 0x72f   : > { %4885 = vst.msk [vmem:[#allocation3 + $0x171] sm:$0xff] %vm16615_vm14, %v4807_v18  ;;  %vm16618_vm8 = vmmov %vm16565_vm0  ;;  %v13787_v18 = vld [vmem:[%s15701_s8 + $0x18] sm:$0xff]   ;;  %v13789_v44 = vpack.c.bf16 %v5200_v24, %v5199_v59  ;;  %v5495_v6 = vld [vmem:[#allocation3 + $0x1a] sm:$0xff] }
 0x730   : > { %4819 = vst.msk [vmem:[#allocation3] sm:$0x1] %vm4818_vm9, %v16616_v12  ;;  %4820 = vst.msk [vmem:[#allocation3 + $0x18] sm:$0x1] %vm4818_vm9, %v16616_v12  ;;  %v4923_v61 = vld [vmem:[#allocation3 + $0x128] sm:$0xff]  ;;  %v5497_v24 = vld [vmem:[#allocation3 + $0x32] sm:$0xff] }
 0x731   : > { %4821 = vst.msk [vmem:[#allocation3 + $0x30] sm:$0x1] %vm4818_vm9, %v16616_v12  ;;  %4822 = vst.msk [vmem:[#allocation3 + $0x48] sm:$0x1] %vm4818_vm9, %v16616_v12 }
 0x732   : > { %4823 = vst.msk [vmem:[#allocation3 + $0x60] sm:$0x1] %vm4818_vm9, %v16616_v12  ;;  %4824 = vst.msk [vmem:[#allocation3 + $0x78] sm:$0x1] %vm4818_vm9, %v16616_v12  ;;  %v4925_v55 = vld [vmem:[#allocation3 + $0x140] sm:$0xff] }
 0x733   : > { %4825 = vst.msk [vmem:[#allocation3 + $0x90] sm:$0x1] %vm4818_vm9, %v16616_v12  ;;  %4826 = vst.msk [vmem:[#allocation3 + $0xa8] sm:$0x1] %vm4818_vm9, %v16616_v12 }
 0x734   : > { %4827 = vst.msk [vmem:[#allocation3 + $0xc0] sm:$0x1] %vm4818_vm9, %v16616_v12  ;;  %4828 = vst.msk [vmem:[#allocation3 + $0xd8] sm:$0x1] %vm4818_vm9, %v16616_v12  ;;  %v4927_v3 = vld [vmem:[#allocation3 + $0x158] sm:$0xff] }
 0x735   : > { %4829 = vst.msk [vmem:[#allocation3 + $0xf0] sm:$0x1] %vm4818_vm9, %v16616_v12  ;;  %4830 = vst.msk [vmem:[#allocation3 + $0x108] sm:$0x1] %vm4818_vm9, %v16616_v12 }
 0x736   : > { %4831 = vst.msk [vmem:[#allocation3 + $0x120] sm:$0x1] %vm4818_vm9, %v16616_v12  ;;  %4832 = vst.msk [vmem:[#allocation3 + $0x138] sm:$0x1] %vm4818_vm9, %v16616_v12  ;;  %v4929_v17 = vld [vmem:[#allocation3 + $0x170] sm:$0xff] }
 0x737   : > { %4833 = vst.msk [vmem:[#allocation3 + $0x150] sm:$0x1] %vm4818_vm9, %v16616_v12  ;;  %4834 = vst.msk [vmem:[#allocation3 + $0x168] sm:$0x1] %vm4818_vm9, %v16616_v12  ;;  %v4898_v2 = vld [vmem:[#allocation3] sm:$0xff]  ;;  %v4900_v29 = vld [vmem:[#allocation3 + $0x18] sm:$0xff] }
 0x738   : > { %4835 = vst.msk [vmem:[#allocation3 + $0x180] sm:$0x1] %vm4818_vm9, %v16616_v12  ;;  %4836 = vst.msk [vmem:[#allocation3 + $0x198] sm:$0x1] %vm4818_vm9, %v16616_v12  ;;  %v4902_v26 = vld [vmem:[#allocation3 + $0x30] sm:$0xff]  ;;  %v4930_v0 = vpack.c.bf16 %v4899_v16, %v4898_v2  ;;  %v13711_v27 = vpack.c.bf16 %v4901_v7, %v4900_v29  ;;  %v4904_v36 = vld [vmem:[#allocation3 + $0x48] sm:$0xff] }
 0x739   : > { %4838 = vst.msk [vmem:[#allocation3 + $0x29] sm:$0x1] %vm4818_vm9, %v16616_v12  ;;  %4839 = vst.msk [vmem:[#allocation3 + $0x41] sm:$0x1] %vm4818_vm9, %v16616_v12  ;;  %v13713_v39 = vpack.c.bf16 %v4903_v28, %v4902_v26  ;;  %v4906_v14 = vld [vmem:[#allocation3 + $0x60] sm:$0xff]  ;;  %v13729_v31 = vpack.c.bf16 %v4905_v35, %v4904_v36  ;;  %v4908_v46 = vld [vmem:[#allocation3 + $0x78] sm:$0xff] }
 0x73a   : > { %4840 = vst.msk [vmem:[#allocation3 + $0x59] sm:$0x1] %vm4818_vm9, %v16616_v12  ;;  %4841 = vst.msk [vmem:[#allocation3 + $0x71] sm:$0x1] %vm4818_vm9, %v16616_v12  ;;  %10105 = vmatprep.mubr.msk.bf16.mxu0 %vm16618_vm8, %v4930_v0  ;;  %v13731_v56 = vpack.c.bf16 %v4907_v8, %v4906_v14  ;;  %v4910_v58 = vld [vmem:[#allocation3 + $0x90] sm:$0xff]  ;;  %v13737_v33 = vpack.c.bf16 %v4909_v37, %v4908_v46  ;;  %v4912_v40 = vld [vmem:[#allocation3 + $0xa8] sm:$0xff] }
 0x73b   : > { %4842 = vst.msk [vmem:[#allocation3 + $0x89] sm:$0x1] %vm4818_vm9, %v16616_v12  ;;  %4843 = vst.msk [vmem:[#allocation3 + $0xa1] sm:$0x1] %vm4818_vm9, %v16616_v12  ;;  %v13739_v15 = vpack.c.bf16 %v4911_v22, %v4910_v58  ;;  %v4914_v4 = vld [vmem:[#allocation3 + $0xc0] sm:$0xff]  ;;  %v13745_v30 = vpack.c.bf16 %v4913_v48, %v4912_v40  ;;  %v4916_v19 = vld [vmem:[#allocation3 + $0xd8] sm:$0xff] }
 0x73c   : > { %4844 = vst.msk [vmem:[#allocation3 + $0xb9] sm:$0x1] %vm4818_vm9, %v16616_v12  ;;  %4845 = vst.msk [vmem:[#allocation3 + $0xd1] sm:$0x1] %vm4818_vm9, %v16616_v12  ;;  %v13747_v20 = vpack.c.bf16 %v4915_v9, %v4914_v4  ;;  %v4918_v5 = vld [vmem:[#allocation3 + $0xf0] sm:$0xff]  ;;  %v13753_v47 = vpack.c.bf16 %v4917_v49, %v4916_v19  ;;  %v4920_v10 = vld [vmem:[#allocation3 + $0x108] sm:$0xff] }
 0x73d   : > { %4846 = vst.msk [vmem:[#allocation3 + $0xe9] sm:$0x1] %vm4818_vm9, %v16616_v12  ;;  %4847 = vst.msk [vmem:[#allocation3 + $0x101] sm:$0x1] %vm4818_vm9, %v16616_v12  ;;  %v13755_v54 = vpack.c.bf16 %v4919_v63, %v4918_v5  ;;  %v4922_v34 = vld [vmem:[#allocation3 + $0x120] sm:$0xff]  ;;  %v13761_v13 = vpack.c.bf16 %v4921_v60, %v4920_v10  ;;  %v4924_v23 = vld [vmem:[#allocation3 + $0x138] sm:$0xff] }
 0x73e   : > { %4848 = vst.msk [vmem:[#allocation3 + $0x119] sm:$0x1] %vm4818_vm9, %v16616_v12  ;;  %4849 = vst.msk [vmem:[#allocation3 + $0x131] sm:$0x1] %vm4818_vm9, %v16616_v12  ;;  %v13763_v57 = vpack.c.bf16 %v4923_v61, %v4922_v34  ;;  %v4926_v41 = vld [vmem:[#allocation3 + $0x150] sm:$0xff]  ;;  %v13769_v21 = vpack.c.bf16 %v4925_v55, %v4924_v23  ;;  %v4928_v50 = vld [vmem:[#allocation3 + $0x168] sm:$0xff] }
 0x73f   : > { %4850 = vst.msk [vmem:[#allocation3 + $0x149] sm:$0x1] %vm4818_vm9, %v16616_v12  ;;  %4851 = vst.msk [vmem:[#allocation3 + $0x161] sm:$0x1] %vm4818_vm9, %v16616_v12  ;;  %v13771_v11 = vpack.c.bf16 %v4927_v3, %v4926_v41  ;;  %v13777_v45 = vpack.c.bf16 %v4929_v17, %v4928_v50  ;;  %v5204_v16 = vld [vmem:[#allocation3 + $0x69] sm:$0xff]  ;;  %v5205_v2 = vld [vmem:[#allocation3 + $0x79] sm:$0xff] }
 0x740   : > { %4852 = vst.msk [vmem:[#allocation3 + $0x179] sm:$0x1] %vm4818_vm9, %v16616_v12  ;;  %4853 = vst.msk [vmem:[#allocation3 + $0x191] sm:$0x1] %vm4818_vm9, %v16616_v12  ;;  %v5206_v29 = vld [vmem:[#allocation3 + $0x81] sm:$0xff]  ;;  %v5207_v26 = vld [vmem:[#allocation3 + $0x91] sm:$0xff] }
 0x741   : > { %4813 = vst.msk [vmem:[#allocation3 + $0x10] sm:$0x3] %vm4812_vm10, %v16616_v12  ;;  %4817 = vst.msk [vmem:[#allocation3 + $0x1a8] sm:$0x3] %vm4812_vm10, %v16616_v12  ;;  %v5208_v0 = vld [vmem:[#allocation3 + $0x99] sm:$0xff]  ;;  %v5209_v36 = vld [vmem:[#allocation3 + $0xa9] sm:$0xff] }
 0x742   : > { %4886 = vst.msk [vmem:[#allocation3 + $0x181] sm:$0xff] %vm16565_vm0, %v4808_v43  ;;  %vm16619_vm4 = vmmov %vm16565_vm0  ;;  %v5201_v43 = vld [vmem:[#allocation3 + $0x49] sm:$0xff]  ;;  %v5210_v35 = vld [vmem:[#allocation3 + $0xb1] sm:$0xff] }
 0x743   : > { %4887 = vst.msk [vmem:[#allocation3 + $0x189] sm:$0xff] %vm16617_vm7, %v4809_v42  ;;  %10106 = vmatmul.mubr.msk.bf16.vlgmr.msra.gmra.mrb[8].mxu0 %vm16619_vm4, %v13711_v27  ;;  %vm16620_vm5 = vmmov %vm16565_vm0  ;;  %v5203_v42 = vld [vmem:[#allocation3 + $0x61] sm:$0xff]  ;;  %v13797_v7 = vpack.c.bf16 %v5202_v38, %v5201_v43  ;;  %v5212_v8 = vld [vmem:[#allocation3 + $0xc9] sm:$0xff]  ;;  %v13813_v46 = vpack.c.bf16 %v5210_v35, %v5209_v36 }
 0x744   : > { %4837 = vst.msk [vmem:[#allocation3 + $0x11] sm:$0x1] %vm4818_vm9, %v16616_v12  ;;  %4854 = vst.msk [vmem:[#allocation3 + $0x1a9] sm:$0x1] %vm4818_vm9, %v16616_v12  ;;  %10138 = vmatpush3.bf16.msra.mxu0 %v11320_v52  ;;  %10109 = vmatprep.mubr.msk.bf16.mxu0 %vm16620_vm5, %v13713_v39  ;;  %v13799_v28 = vpack.c.bf16 %v5204_v16, %v5203_v42  ;;  %v13807_v52 = vpack.c.bf16 %v5208_v0, %v5207_v26  ;;  %v5211_v14 = vld [vmem:[#allocation3 + $0xc1] sm:$0xff]  ;;  %v5213_v58 = vld [vmem:[#allocation3 + $0xd9] sm:$0xff] }
 0x745   : > { %10171 = vmatprep.subr.bf16.mxu0 %v13718_v62  ;;  %vm16621_vm6 = vmmov %vm16565_vm0  ;;  %v13815_v37 = vpack.c.bf16 %v5212_v8, %v5211_v14  ;;  %v5214_v22 = vld [vmem:[#allocation3 + $0xe1] sm:$0xff]  ;;  %v5215_v40 = vld [vmem:[#allocation3 + $0xf1] sm:$0xff] }
 0x746   : > { %vm16622_vm15 = vmmov %vm16565_vm0  ;;  %v5216_v48 = vld [vmem:[#allocation3 + $0xf9] sm:$0xff]  ;;  %v13821_v4 = vpack.c.bf16 %v5214_v22, %v5213_v58  ;;  %v5217_v19 = vld [vmem:[#allocation3 + $0x109] sm:$0xff] }
 0x747   : > { %vm16623_vm1 = vmmov %vm16565_vm0  ;;  %v13823_v9 = vpack.c.bf16 %v5216_v48, %v5215_v40  ;;  %v5218_v49 = vld [vmem:[#allocation3 + $0x111] sm:$0xff]  ;;  %v5219_v5 = vld [vmem:[#allocation3 + $0x121] sm:$0xff] }
 0x748   : > { %vm16624_vm2 = vmmov %vm16565_vm0  ;;  %v5196_v1 = vld [vmem:[#allocation3 + $0x9] sm:$0xff]  ;;  %v13829_v10 = vpack.c.bf16 %v5218_v49, %v5217_v19  ;;  %v5221_v34 = vld [vmem:[#allocation3 + $0x139] sm:$0xff] }
 0x749   : > { %vm16625_vm3 = vmmov %vm16565_vm0  ;;  %v5227_v51 = vpack.c.bf16 %v5196_v1, %v5195_v25  ;;  %v5220_v63 = vld [vmem:[#allocation3 + $0x129] sm:$0xff]  ;;  %v5222_v61 = vld [vmem:[#allocation3 + $0x141] sm:$0xff] }
 0x74a   : > { %vm16626_vm9 = vmmov %vm16565_vm0  ;;  %v13831_v60 = vpack.c.bf16 %v5220_v63, %v5219_v5  ;;  %v5223_v23 = vld [vmem:[#allocation3 + $0x151] sm:$0xff]  ;;  %v5224_v55 = vld [vmem:[#allocation3 + $0x159] sm:$0xff]  ;;  %v13837_v41 = vpack.c.bf16 %v5222_v61, %v5221_v34 }
 0x74b   : > { %10110 = vmatmul.mubr.msk.bf16.gmra.mrb[12].mxu0 %vm16621_vm6, %v13729_v31  ;;  %vm16627_vm10 = vmmov %vm16565_vm0  ;;  %v13839_v3 = vpack.c.bf16 %v5224_v55, %v5223_v23  ;;  %v5493_v25 = vld [vmem:[#allocation3 + $0x2] sm:$0xff]  ;;  %v5494_v1 = vld [vmem:[#allocation3 + $0xa] sm:$0xff] }
 0x74c   : > { %10113 = vmatprep.mubr.msk.bf16.mxu0 %vm16622_vm15, %v13731_v56  ;;  %vm16628_vm11 = vmmov %vm16565_vm0  ;;  %v5225_v50 = vld [vmem:[#allocation3 + $0x169] sm:$0xff]  ;;  %v5226_v17 = vld [vmem:[#allocation3 + $0x171] sm:$0xff] }
 0x74d   : > { %vm16629_vm12 = vmmov %vm16565_vm0  ;;  %v13845_v32 = vpack.c.bf16 %v5226_v17, %v5225_v50  ;;  %v5496_v59 = vld [vmem:[#allocation3 + $0x22] sm:$0xff]  ;;  %v5498_v43 = vld [vmem:[#allocation3 + $0x3a] sm:$0xff] }
 0x74e   : > { %vm16630_vm13 = vmmov %vm16565_vm0  ;;  %v13850_v38 = vpack.c.bf16 %v5496_v59, %v5495_v6  ;;  %v11051_v42 = vld [vmem:[%s15701_s8 + $0x20] sm:$0xff]   ;;  %v13855_v16 = vpack.c.bf16 %v5498_v43, %v5497_v24  ;;  %v5501_v26 = vld [vmem:[#allocation3 + $0x62] sm:$0xff] }
 0x74f   : > { %vm16631_vm14 = vmmov %vm16565_vm0  ;;  %v5502_v0 = vld [vmem:[#allocation3 + $0x6a] sm:$0xff]  ;;  %v5503_v14 = vld [vmem:[#allocation3 + $0x7a] sm:$0xff] }
 0x750   : > { %vm16632_vm7 = vmmov %vm16565_vm0  ;;  %v13864_v35 = vpack.c.bf16 %v5502_v0, %v5501_v26  ;;  %v5505_v8 = vld [vmem:[#allocation3 + $0x92] sm:$0xff]  ;;  %v5506_v58 = vld [vmem:[#allocation3 + $0x9a] sm:$0xff] }
 0x751   : > { %vm16633_vm8 = vmmov %vm16565_vm0  ;;  %v13872_v40 = vpack.c.bf16 %v5506_v58, %v5505_v8  ;;  %v5507_v48 = vld [vmem:[#allocation3 + $0xaa] sm:$0xff]  ;;  %v5508_v19 = vld [vmem:[#allocation3 + $0xb2] sm:$0xff] }
 0x752   : > { %vm16634_vm4 = vmmov %vm16565_vm0  ;;  %v5509_v49 = vld [vmem:[#allocation3 + $0xc2] sm:$0xff]  ;;  %v5510_v5 = vld [vmem:[#allocation3 + $0xca] sm:$0xff]  ;;  %v13878_v63 = vpack.c.bf16 %v5508_v19, %v5507_v48 }
 0x753   : > { %10114 = vmatmul.mubr.msk.bf16.gmra.mrb[16].mxu0 %vm16623_vm1, %v13737_v33  ;;  %vm16635_vm5 = vmmov %vm16565_vm0  ;;  %v13880_v34 = vpack.c.bf16 %v5510_v5, %v5509_v49  ;;  %v5511_v61 = vld [vmem:[#allocation3 + $0xda] sm:$0xff]  ;;  %v5512_v23 = vld [vmem:[#allocation3 + $0xe2] sm:$0xff] }
 0x754   : > { %10117 = vmatprep.mubr.msk.bf16.mxu0 %vm16624_vm2, %v13739_v15  ;;  %vm16636_vm6 = vmmov %vm16565_vm0  ;;  %v5513_v55 = vld [vmem:[#allocation3 + $0xf2] sm:$0xff]  ;;  %v5515_v17 = vld [vmem:[#allocation3 + $0x10a] sm:$0xff] }
 0x755   : > { %vm16637_vm15 = vmmov %vm16565_vm0  ;;  %v5517_v6 = vld [vmem:[#allocation3 + $0x122] sm:$0xff]  ;;  %v5518_v59 = vld [vmem:[#allocation3 + $0x12a] sm:$0xff] }
 0x756   : > { %vm16638_vm1 = vmmov %vm16565_vm0  ;;  %v13896_v43 = vpack.c.bf16 %v5518_v59, %v5517_v6  ;;  %v5521_v26 = vld [vmem:[#allocation3 + $0x152] sm:$0xff]  ;;  %v5522_v0 = vld [vmem:[#allocation3 + $0x15a] sm:$0xff] }
 0x757   : > { %vm16639_vm2 = vmmov %vm16565_vm0  ;;  %v5523_v8 = vld [vmem:[#allocation3 + $0x16a] sm:$0xff]  ;;  %v5524_v58 = vld [vmem:[#allocation3 + $0x172] sm:$0xff] }
 0x758   : > { %v13910_v48 = vpack.c.bf16 %v5524_v58, %v5523_v8  ;;  %v11052_v19 = vld [vmem:[%s15701_s8 + $0x28] sm:$0xff]   ;;  %v11053_v5 = vld [vmem:[%s15701_s8 + $0x30] sm:$0xff]  }
 0x75b   : > { %10118 = vmatmul.mubr.msk.bf16.gmra.mrb[20].mxu0 %vm16625_vm3, %v13745_v30  ;;  %vm16640_vm3 = vmmov %vm16565_vm0 }
 0x75c   : > { %10121 = vmatprep.mubr.msk.bf16.mxu0 %vm16626_vm9, %v13747_v20  ;;  %vm16641_vm9 = vmmov %vm16565_vm0 }
 0x763   : > { %10122 = vmatmul.mubr.msk.bf16.gmra.mrb[24].mxu0 %vm16627_vm10, %v13753_v47  ;;  %vm16642_vm10 = vmmov %vm16565_vm0 }
 0x764   : > { %10125 = vmatprep.mubr.msk.bf16.mxu0 %vm16628_vm11, %v13755_v54  ;;  %vm16643_vm11 = vmmov %vm16565_vm0 }
 0x76b   : > { %10126 = vmatmul.mubr.msk.bf16.gmra.mrb[28].mxu0 %vm16629_vm12, %v13761_v13  ;;  %vm16644_vm12 = vmmov %vm16565_vm0 }
 0x76c   : > { %10129 = vmatprep.mubr.msk.bf16.mxu0 %vm16630_vm13, %v13763_v57  ;;  %vm16645_vm13 = vmmov %vm16565_vm0 }
 0x773   : > { %10130 = vmatmul.mubr.msk.bf16.gmra.mrb[32].mxu0 %vm16631_vm14, %v13769_v21  ;;  %vm16646_vm14 = vmmov %vm16565_vm0 }
 0x774   : > { %10133 = vmatprep.mubr.msk.bf16.mxu0 %vm16565_vm0, %v13771_v11 }
 0x77b   : > { %10134 = vmatmul.mubr.msk.bf16.gmra.mrb[36].mxu0 %vm16632_vm7, %v13777_v45  ;;  %vm16647_vm7 = vmmov %vm16565_vm0 }
 0x77c   : > { %10139 = vmatprep.mubr.msk.bf16.mxu0 %vm16633_vm8, %v5227_v51  ;;  %v5525_v51 = vpack.c.bf16 %v5494_v1, %v5493_v25  ;;  %vm16648_vm8 = vmmov %vm16565_vm0  ;;  %v5514_v25 = vld [vmem:[#allocation3 + $0xfa] sm:$0xff]  ;;  %v13886_v1 = vpack.c.bf16 %v5512_v23, %v5511_v61  ;;  %v6120_v61 = vld [vmem:[#allocation3 + $0x189] sm:$0xff] }
 0x77d   : > { %v13888_v50 = vpack.c.bf16 %v5514_v25, %v5513_v55  ;;  %v11054_v55 = vld [vmem:[%s15701_s8 + $0x38] sm:$0xff]  }
 0x77e   : > { %v6418_v25 = vld [vmem:[#allocation3 + $0x18a] sm:$0xff] }
 0x783   : > { %10140 = vmatmul.mubr.msk.bf16.vlgmr.msra.gmra.mrb[8].mxu0 %vm16634_vm4, %v13782_v53  ;;  %vm16649_vm4 = vmmov %vm16565_vm0 }
 0x784   : > { %10172 = vmatpush3.bf16.msra.mxu0 %v13718_v62  ;;  %10143 = vmatprep.mubr.msk.bf16.mxu0 %vm16635_vm5, %v13789_v44  ;;  %v13805_v62 = vpack.c.bf16 %v5206_v29, %v5205_v2  ;;  %vm16650_vm5 = vmmov %vm16565_vm0  ;;  %v5499_v2 = vld [vmem:[#allocation3 + $0x4a] sm:$0xff]  ;;  %v5500_v29 = vld [vmem:[#allocation3 + $0x52] sm:$0xff] }
 0x785   : > { %10205 = vmatprep.subr.bf16.mxu0 %v13787_v18  ;;  %v13862_v36 = vpack.c.bf16 %v5500_v29, %v5499_v2  ;;  %v5519_v2 = vld [vmem:[#allocation3 + $0x13a] sm:$0xff]  ;;  %v5520_v29 = vld [vmem:[#allocation3 + $0x142] sm:$0xff] }
 0x78b   : > { %10144 = vmatmul.mubr.msk.bf16.gmra.mrb[12].mxu0 %vm16636_vm6, %v13797_v7  ;;  %vm16651_vm6 = vmmov %vm16565_vm0 }
 0x78c   : > { %10147 = vmatprep.mubr.msk.bf16.mxu0 %vm16637_vm15, %v13799_v28  ;;  %vm16652_vm15 = vmmov %vm16565_vm0 }
 0x793   : > { %10148 = vmatmul.mubr.msk.bf16.gmra.mrb[16].mxu0 %vm16638_vm1, %v13805_v62  ;;  %vm16653_vm1 = vmmov %vm16565_vm0 }
 0x794   : > { %10151 = vmatprep.mubr.msk.bf16.mxu0 %vm16639_vm2, %v13807_v52  ;;  %vm16654_vm2 = vmmov %vm16565_vm0 }
 0x79b   : > { %10152 = vmatmul.mubr.msk.bf16.gmra.mrb[20].mxu0 %vm16640_vm3, %v13813_v46  ;;  %vm16655_vm3 = vmmov %vm16565_vm0 }
 0x79c   : > { %10155 = vmatprep.mubr.msk.bf16.mxu0 %vm16641_vm9, %v13815_v37  ;;  %vm16656_vm9 = vmmov %vm16565_vm0 }
 0x7a3   : > { %10156 = vmatmul.mubr.msk.bf16.gmra.mrb[24].mxu0 %vm16642_vm10, %v13821_v4  ;;  %vm16657_vm10 = vmmov %vm16565_vm0 }
 0x7a4   : > { %10159 = vmatprep.mubr.msk.bf16.mxu0 %vm16643_vm11, %v13823_v9  ;;  %vm16658_vm11 = vmmov %vm16565_vm0 }
 0x7ab   : > { %10160 = vmatmul.mubr.msk.bf16.gmra.mrb[28].mxu0 %vm16644_vm12, %v13829_v10  ;;  %vm16659_vm12 = vmmov %vm16565_vm0 }
 0x7ac   : > { %10163 = vmatprep.mubr.msk.bf16.mxu0 %vm16645_vm13, %v13831_v60  ;;  %vm16660_vm13 = vmmov %vm16565_vm0 }
 0x7b3   : > { %10164 = vmatmul.mubr.msk.bf16.gmra.mrb[32].mxu0 %vm16646_vm14, %v13837_v41  ;;  %vm16661_vm14 = vmmov %vm16565_vm0 }
 0x7b4   : > { %10167 = vmatprep.mubr.msk.bf16.mxu0 %vm16565_vm0, %v13839_v3 }
 0x7bb   : > { %10168 = vmatmul.mubr.msk.bf16.gmra.mrb[36].mxu0 %vm16647_vm7, %v13845_v32  ;;  %vm16662_vm7 = vmmov %vm16565_vm0 }
 0x7bc   : > { %10173 = vmatprep.mubr.msk.bf16.mxu0 %vm16648_vm8, %v5525_v51  ;;  %v5516_v51 = vld [vmem:[#allocation3 + $0x112] sm:$0xff]  ;;  %vm16663_vm8 = vmmov %vm16565_vm0 }
 0x7bd   : > { %v13894_v24 = vpack.c.bf16 %v5516_v51, %v5515_v17  ;;  %v11055_v51 = vld [vmem:[%s15701_s8 + $0x40] sm:$0xff]  }
 0x7c3   : > { %10174 = vmatmul.mubr.msk.bf16.vlgmr.msra.gmra.mrb[8].mxu0 %vm16649_vm4, %v13850_v38  ;;  %vm16664_vm4 = vmmov %vm16565_vm0 }
 0x7c4   : > { %10206 = vmatpush3.bf16.msra.mxu0 %v13787_v18  ;;  %10177 = vmatprep.mubr.msk.bf16.mxu0 %vm16650_vm5, %v13855_v16  ;;  %v5504_v18 = vld [vmem:[#allocation3 + $0x82] sm:$0xff]  ;;  %vm16665_vm5 = vmmov %vm16565_vm0 }
 0x7c5   : > { %10239 = vmatprep.subr.bf16.mxu0 %v11051_v42  ;;  %v13870_v22 = vpack.c.bf16 %v5504_v18, %v5503_v14  ;;  %v13902_v14 = vpack.c.bf16 %v5520_v29, %v5519_v2  ;;  %v13904_v18 = vpack.c.bf16 %v5522_v0, %v5521_v26 }
 0x7cb   : > { %10178 = vmatmul.mubr.msk.bf16.gmra.mrb[12].mxu0 %vm16651_vm6, %v13862_v36  ;;  %vm16666_vm6 = vmmov %vm16565_vm0 }
 0x7cc   : > { %10181 = vmatprep.mubr.msk.bf16.mxu0 %vm16652_vm15, %v13864_v35  ;;  %vm16667_vm15 = vmmov %vm16565_vm0 }
 0x7d3   : > { %10182 = vmatmul.mubr.msk.bf16.gmra.mrb[16].mxu0 %vm16653_vm1, %v13870_v22  ;;  %vm16668_vm1 = vmmov %vm16565_vm0 }
 0x7d4   : > { %10185 = vmatprep.mubr.msk.bf16.mxu0 %vm16654_vm2, %v13872_v40  ;;  %vm16669_vm2 = vmmov %vm16565_vm0 }
 0x7db   : > { %10186 = vmatmul.mubr.msk.bf16.gmra.mrb[20].mxu0 %vm16655_vm3, %v13878_v63  ;;  %vm16670_vm3 = vmmov %vm16565_vm0 }
 0x7dc   : > { %10189 = vmatprep.mubr.msk.bf16.mxu0 %vm16656_vm9, %v13880_v34  ;;  %vm16671_vm9 = vmmov %vm16565_vm0 }
 0x7e3   : > { %10190 = vmatmul.mubr.msk.bf16.gmra.mrb[24].mxu0 %vm16657_vm10, %v13886_v1  ;;  %vm16672_vm10 = vmmov %vm16565_vm0 }
 0x7e4   : > { %10193 = vmatprep.mubr.msk.bf16.mxu0 %vm16658_vm11, %v13888_v50  ;;  %vm16673_vm11 = vmmov %vm16565_vm0 }
 0x7eb   : > { %10194 = vmatmul.mubr.msk.bf16.gmra.mrb[28].mxu0 %vm16659_vm12, %v13894_v24  ;;  %vm16674_vm12 = vmmov %vm16565_vm0 }
 0x7ec   : > { %10197 = vmatprep.mubr.msk.bf16.mxu0 %vm16660_vm13, %v13896_v43  ;;  %vm16675_vm13 = vmmov %vm16565_vm0 }
 0x7f3   : > { %10198 = vmatmul.mubr.msk.bf16.gmra.mrb[32].mxu0 %vm16661_vm14, %v13902_v14  ;;  %vm16676_vm14 = vmmov %vm16565_vm0 }
 0x7f4   : > { %10201 = vmatprep.mubr.msk.bf16.mxu0 %vm16565_vm0, %v13904_v18 }
 0x7fb   : > { %10202 = vmatmul.mubr.msk.bf16.gmra.mrb[36].mxu0 %vm16662_vm7, %v13910_v48  ;;  %vm16677_vm7 = vmmov %vm16565_vm0 }
 0x7fc   : > { %10207 = vmatprep.mubr.msk.bf16.mxu0 %vm16663_vm8, %v13711_v27  ;;  %v5821_v27 = vld [vmem:[#allocation3 + $0x180] sm:$0xff]  ;;  %vm16678_vm8 = vmmov %vm16565_vm0 }
 0x803   : > { %10208 = vmatmul.mubr.msk.bf16.vlgmr.msra.gmra.mrb[8].mxu0 %vm16664_vm4, %v13713_v39  ;;  %vm16679_vm4 = vmmov %vm16565_vm0 }
 0x804   : > { %10240 = vmatpush3.bf16.msra.mxu0 %v11051_v42  ;;  %10211 = vmatprep.mubr.msk.bf16.mxu0 %vm16665_vm5, %v13729_v31  ;;  %v5822_v42 = vld [vmem:[#allocation3 + $0x188] sm:$0xff]  ;;  %vm16680_vm5 = vmmov %vm16565_vm0 }
 0x805   : > { %10273 = vmatprep.subr.bf16.mxu0 %v11052_v19  ;;  %v13947_v49 = vpack.c.bf16 %v5822_v42, %v5821_v27 }
 0x80b   : > { %10212 = vmatmul.mubr.msk.bf16.gmra.mrb[12].mxu0 %vm16666_vm6, %v13731_v56  ;;  %vm16681_vm6 = vmmov %vm16565_vm0 }
 0x80c   : > { %10215 = vmatprep.mubr.msk.bf16.mxu0 %vm16667_vm15, %v13737_v33  ;;  %vm16682_vm15 = vmmov %vm16565_vm0 }
 0x813   : > { %10216 = vmatmul.mubr.msk.bf16.gmra.mrb[16].mxu0 %vm16668_vm1, %v13739_v15  ;;  %vm16683_vm1 = vmmov %vm16565_vm0 }
 0x814   : > { %10219 = vmatprep.mubr.msk.bf16.mxu0 %vm16669_vm2, %v13745_v30  ;;  %vm16684_vm2 = vmmov %vm16565_vm0 }
 0x81b   : > { %10220 = vmatmul.mubr.msk.bf16.gmra.mrb[20].mxu0 %vm16670_vm3, %v13747_v20  ;;  %vm16685_vm3 = vmmov %vm16565_vm0 }
 0x81c   : > { %10223 = vmatprep.mubr.msk.bf16.mxu0 %vm16671_vm9, %v13753_v47  ;;  %vm16686_vm9 = vmmov %vm16565_vm0 }
 0x823   : > { %10224 = vmatmul.mubr.msk.bf16.gmra.mrb[24].mxu0 %vm16672_vm10, %v13755_v54  ;;  %vm16687_vm10 = vmmov %vm16565_vm0 }
 0x824   : > { %10227 = vmatprep.mubr.msk.bf16.mxu0 %vm16673_vm11, %v13761_v13  ;;  %vm16688_vm11 = vmmov %vm16565_vm0 }
 0x82b   : > { %10228 = vmatmul.mubr.msk.bf16.gmra.mrb[28].mxu0 %vm16674_vm12, %v13763_v57  ;;  %vm16689_vm12 = vmmov %vm16565_vm0 }
 0x82c   : > { %10231 = vmatprep.mubr.msk.bf16.mxu0 %vm16675_vm13, %v13769_v21  ;;  %vm16690_vm13 = vmmov %vm16565_vm0 }
 0x833   : > { %10232 = vmatmul.mubr.msk.bf16.gmra.mrb[32].mxu0 %vm16676_vm14, %v13771_v11  ;;  %vm16691_vm14 = vmmov %vm16565_vm0 }
 0x834   : > { %10235 = vmatprep.mubr.msk.bf16.mxu0 %vm16565_vm0, %v13777_v45 }
 0x83b   : > { %10236 = vmatmul.mubr.msk.bf16.gmra.mrb[36].mxu0 %vm16677_vm7, %v13947_v49  ;;  %vm16692_vm7 = vmmov %vm16565_vm0 }
 0x83c   : > { %10241 = vmatprep.mubr.msk.bf16.mxu0 %vm16678_vm8, %v13782_v53  ;;  %v6119_v53 = vld [vmem:[#allocation3 + $0x181] sm:$0xff]  ;;  %vm16693_vm8 = vmmov %vm16565_vm0 }
 0x83d   : > { %v6136_v23 = vpack.c.bf16 %v6120_v61, %v6119_v53 }
 0x843   : > { %10242 = vmatmul.mubr.msk.bf16.vlgmr.msra.gmra.mrb[8].mxu0 %vm16679_vm4, %v13789_v44  ;;  %vm16694_vm4 = vmmov %vm16565_vm0 }
 0x844   : > { %10274 = vmatpush3.bf16.msra.mxu0 %v11052_v19  ;;  %10245 = vmatprep.mubr.msk.bf16.mxu0 %vm16680_vm5, %v13797_v7  ;;  %vm16695_vm5 = vmmov %vm16565_vm0 }
 0x845   : > { %10307 = vmatprep.subr.bf16.mxu0 %v11053_v5 }
 0x84b   : > { %10246 = vmatmul.mubr.msk.bf16.gmra.mrb[12].mxu0 %vm16681_vm6, %v13799_v28  ;;  %vm16696_vm6 = vmmov %vm16565_vm0 }
 0x84c   : > { %10249 = vmatprep.mubr.msk.bf16.mxu0 %vm16682_vm15, %v13805_v62  ;;  %vm16697_vm15 = vmmov %vm16565_vm0 }
 0x853   : > { %10250 = vmatmul.mubr.msk.bf16.gmra.mrb[16].mxu0 %vm16683_vm1, %v13807_v52  ;;  %vm16698_vm1 = vmmov %vm16565_vm0 }
 0x854   : > { %10253 = vmatprep.mubr.msk.bf16.mxu0 %vm16684_vm2, %v13813_v46  ;;  %vm16699_vm2 = vmmov %vm16565_vm0 }
 0x85b   : > { %10254 = vmatmul.mubr.msk.bf16.gmra.mrb[20].mxu0 %vm16685_vm3, %v13815_v37  ;;  %vm16700_vm3 = vmmov %vm16565_vm0 }
 0x85c   : > { %10257 = vmatprep.mubr.msk.bf16.mxu0 %vm16686_vm9, %v13821_v4  ;;  %vm16701_vm9 = vmmov %vm16565_vm0 }
 0x863   : > { %10258 = vmatmul.mubr.msk.bf16.gmra.mrb[24].mxu0 %vm16687_vm10, %v13823_v9  ;;  %vm16702_vm10 = vmmov %vm16565_vm0 }
 0x864   : > { %10261 = vmatprep.mubr.msk.bf16.mxu0 %vm16688_vm11, %v13829_v10  ;;  %vm16703_vm11 = vmmov %vm16565_vm0 }
 0x86b   : > { %10262 = vmatmul.mubr.msk.bf16.gmra.mrb[28].mxu0 %vm16689_vm12, %v13831_v60  ;;  %vm16704_vm12 = vmmov %vm16565_vm0 }
 0x86c   : > { %10265 = vmatprep.mubr.msk.bf16.mxu0 %vm16690_vm13, %v13837_v41  ;;  %vm16705_vm13 = vmmov %vm16565_vm0 }
 0x873   : > { %10266 = vmatmul.mubr.msk.bf16.gmra.mrb[32].mxu0 %vm16691_vm14, %v13839_v3  ;;  %vm16706_vm14 = vmmov %vm16565_vm0 }
 0x874   : > { %10269 = vmatprep.mubr.msk.bf16.mxu0 %vm16565_vm0, %v13845_v32 }
 0x87b   : > { %10270 = vmatmul.mubr.msk.bf16.gmra.mrb[36].mxu0 %vm16692_vm7, %v6136_v23  ;;  %vm16707_vm7 = vmmov %vm16565_vm0 }
 0x87c   : > { %10275 = vmatprep.mubr.msk.bf16.mxu0 %vm16693_vm8, %v13850_v38  ;;  %v6417_v38 = vld [vmem:[#allocation3 + $0x182] sm:$0xff]  ;;  %vm16708_vm8 = vmmov %vm16565_vm0 }
 0x87d   : > { %v6434_v17 = vpack.c.bf16 %v6418_v25, %v6417_v38 }
 0x883   : > { %10276 = vmatmul.mubr.msk.bf16.vlgmr.msra.gmra.mrb[8].mxu0 %vm16694_vm4, %v13855_v16  ;;  %vm16709_vm4 = vmmov %vm16565_vm0 }
 0x884   : > { %10308 = vmatpush3.bf16.msra.mxu0 %v11053_v5  ;;  %10279 = vmatprep.mubr.msk.bf16.mxu0 %vm16695_vm5, %v13862_v36  ;;  %vm16710_vm5 = vmmov %vm16565_vm0 }
 0x885   : > { %10341 = vmatprep.subr.bf16.mxu0 %v11054_v55 }
 0x88b   : > { %10280 = vmatmul.mubr.msk.bf16.gmra.mrb[12].mxu0 %vm16696_vm6, %v13864_v35  ;;  %vm16711_vm6 = vmmov %vm16565_vm0 }
 0x88c   : > { %10283 = vmatprep.mubr.msk.bf16.mxu0 %vm16697_vm15, %v13870_v22  ;;  %vm16712_vm15 = vmmov %vm16565_vm0 }
 0x893   : > { %10284 = vmatmul.mubr.msk.bf16.gmra.mrb[16].mxu0 %vm16698_vm1, %v13872_v40  ;;  %vm16713_vm1 = vmmov %vm16565_vm0 }
 0x894   : > { %10287 = vmatprep.mubr.msk.bf16.mxu0 %vm16699_vm2, %v13878_v63  ;;  %vm16714_vm2 = vmmov %vm16565_vm0 }
 0x89b   : > { %10288 = vmatmul.mubr.msk.bf16.gmra.mrb[20].mxu0 %vm16700_vm3, %v13880_v34  ;;  %vm16715_vm3 = vmmov %vm16565_vm0 }
 0x89c   : > { %10291 = vmatprep.mubr.msk.bf16.mxu0 %vm16701_vm9, %v13886_v1  ;;  %vm16716_vm9 = vmmov %vm16565_vm0 }
 0x8a3   : > { %10292 = vmatmul.mubr.msk.bf16.gmra.mrb[24].mxu0 %vm16702_vm10, %v13888_v50  ;;  %vm16717_vm10 = vmmov %vm16565_vm0 }
 0x8a4   : > { %10295 = vmatprep.mubr.msk.bf16.mxu0 %vm16703_vm11, %v13894_v24  ;;  %vm16718_vm11 = vmmov %vm16565_vm0 }
 0x8ab   : > { %10296 = vmatmul.mubr.msk.bf16.gmra.mrb[28].mxu0 %vm16704_vm12, %v13896_v43  ;;  %vm16719_vm12 = vmmov %vm16565_vm0 }
 0x8ac   : > { %10299 = vmatprep.mubr.msk.bf16.mxu0 %vm16705_vm13, %v13902_v14  ;;  %vm16720_vm13 = vmmov %vm16565_vm0 }
 0x8b3   : > { %10300 = vmatmul.mubr.msk.bf16.gmra.mrb[32].mxu0 %vm16706_vm14, %v13904_v18  ;;  %vm16721_vm14 = vmmov %vm16565_vm0 }
 0x8b4   : > { %10303 = vmatprep.mubr.msk.bf16.mxu0 %vm16565_vm0, %v13910_v48 }
 0x8bb   : > { %10304 = vmatmul.mubr.msk.bf16.gmra.mrb[36].mxu0 %vm16707_vm7, %v6434_v17  ;;  %vm16722_vm7 = vmmov %vm16565_vm0 }
 0x8bc   : > { %10309 = vmatprep.mubr.msk.bf16.mxu0 %vm16708_vm8, %v13713_v39  ;;  %v6716_v39 = vld [vmem:[#allocation3 + $0x198] sm:$0xff]  ;;  %vm16723_vm8 = vmmov %vm16565_vm0 }
 0x8c3   : > { %10310 = vmatmul.mubr.msk.bf16.vlgmr.msra.gmra.mrb[8].mxu0 %vm16709_vm4, %v13729_v31  ;;  %v6717_v31 = vld [vmem:[#allocation3 + $0x1a0] sm:$0xff]  ;;  %vm16724_vm4 = vmmov %vm16565_vm0 }
 0x8c4   : > { %10342 = vmatpush3.bf16.msra.mxu0 %v11054_v55  ;;  %10313 = vmatprep.mubr.msk.bf16.mxu0 %vm16710_vm5, %v13731_v56  ;;  %v6733_v56 = vpack.c.bf16 %v6717_v31, %v6716_v39  ;;  %vm16725_vm5 = vmmov %vm16565_vm0 }
 0x8c5   : > { %10375 = vmatprep.subr.bf16.mxu0 %v11055_v51 }
 0x8cb   : > { %10314 = vmatmul.mubr.msk.bf16.gmra.mrb[12].mxu0 %vm16711_vm6, %v13737_v33  ;;  %vm16726_vm6 = vmmov %vm16565_vm0  ;;  %v7014_v33 = vld [vmem:[#allocation3 + $0x199] sm:$0xff] }
 0x8cc   : > { %10317 = vmatprep.mubr.msk.bf16.mxu0 %vm16712_vm15, %v13739_v15  ;;  %vm16727_vm15 = vmmov %vm16565_vm0  ;;  %v7015_v15 = vld [vmem:[#allocation3 + $0x1a1] sm:$0xff] }
 0x8d3   : > { %10318 = vmatmul.mubr.msk.bf16.gmra.mrb[16].mxu0 %vm16713_vm1, %v13745_v30  ;;  %vm16728_vm1 = vmmov %vm16565_vm0  ;;  %v7031_v30 = vpack.c.bf16 %v7015_v15, %v7014_v33 }
 0x8d4   : > { %10321 = vmatprep.mubr.msk.bf16.mxu0 %vm16714_vm2, %v13747_v20  ;;  %vm16729_vm2 = vmmov %vm16565_vm0  ;;  %v7312_v20 = vld [vmem:[#allocation3 + $0x19a] sm:$0xff] }
 0x8db   : > { %10322 = vmatmul.mubr.msk.bf16.gmra.mrb[20].mxu0 %vm16715_vm3, %v13753_v47  ;;  %vm16730_vm3 = vmmov %vm16565_vm0  ;;  %v7313_v47 = vld [vmem:[#allocation3 + $0x1a2] sm:$0xff] }
 0x8dc   : > { %10325 = vmatprep.mubr.msk.bf16.mxu0 %vm16716_vm9, %v13755_v54  ;;  %vm16731_vm9 = vmmov %vm16565_vm0  ;;  %v7329_v54 = vpack.c.bf16 %v7313_v47, %v7312_v20 }
 0x8e3   : > { %10326 = vmatmul.mubr.msk.bf16.gmra.mrb[24].mxu0 %vm16717_vm10, %v13761_v13  ;;  %vm16732_vm10 = vmmov %vm16565_vm0  ;;  %v14116_v13 = vld [vmem:[%s15702_s9] ss:$0 sm:$0xff] }
 0x8e4   : > { %10329 = vmatprep.mubr.msk.bf16.mxu0 %vm16718_vm11, %v13763_v57  ;;  %vm16733_vm11 = vmmov %vm16565_vm0 }
 0x8eb   : > { %10330 = vmatmul.mubr.msk.bf16.gmra.mrb[28].mxu0 %vm16719_vm12, %v13769_v21  ;;  %vm16734_vm12 = vmmov %vm16565_vm0 }
 0x8ec   : > { %10333 = vmatprep.mubr.msk.bf16.mxu0 %vm16720_vm13, %v13771_v11  ;;  %vm16735_vm13 = vmmov %vm16565_vm0 }
 0x8f3   : > { %10334 = vmatmul.mubr.msk.bf16.gmra.mrb[32].mxu0 %vm16721_vm14, %v13777_v45  ;;  %vm16736_vm14 = vmmov %vm16565_vm0 }
 0x8f4   : > { %10337 = vmatprep.mubr.msk.bf16.mxu0 %vm16565_vm0, %v13947_v49 }
 0x8fb   : > { %10338 = vmatmul.mubr.msk.bf16.gmra.mrb[36].mxu0 %vm16722_vm7, %v6733_v56  ;;  %vm16737_vm7 = vmmov %vm16565_vm0 }
 0x8fc   : > { %10343 = vmatprep.mubr.msk.bf16.mxu0 %vm16723_vm8, %v13789_v44  ;;  %vm16738_vm8 = vmmov %vm16565_vm0 }
 0x903   : > { %10344 = vmatmul.mubr.msk.bf16.vlgmr.msra.gmra.mrb[8].mxu0 %vm16724_vm4, %v13797_v7  ;;  %vm16739_vm4 = vmmov %vm16565_vm0 }
 0x904   : > { %10376 = vmatpush3.bf16.msra.mxu0 %v11055_v51  ;;  %10347 = vmatprep.mubr.msk.bf16.mxu0 %vm16725_vm5, %v13799_v28  ;;  %vm16740_vm5 = vmmov %vm16565_vm0 }
 0x90b   : > { %10348 = vmatmul.mubr.msk.bf16.gmra.mrb[12].mxu0 %vm16726_vm6, %v13805_v62  ;;  %vm16741_vm6 = vmmov %vm16565_vm0 }
 0x90c   : > { %10351 = vmatprep.mubr.msk.bf16.mxu0 %vm16727_vm15, %v13807_v52  ;;  %vm16742_vm15 = vmmov %vm16565_vm0 }
 0x913   : > { %10352 = vmatmul.mubr.msk.bf16.gmra.mrb[16].mxu0 %vm16728_vm1, %v13813_v46  ;;  %vm16743_vm1 = vmmov %vm16565_vm0 }
 0x914   : > { %10355 = vmatprep.mubr.msk.bf16.mxu0 %vm16729_vm2, %v13815_v37  ;;  %vm16744_vm2 = vmmov %vm16565_vm0 }
 0x91b   : > { %10356 = vmatmul.mubr.msk.bf16.gmra.mrb[20].mxu0 %vm16730_vm3, %v13821_v4  ;;  %vm16745_vm3 = vmmov %vm16565_vm0 }
 0x91c   : > { %10359 = vmatprep.mubr.msk.bf16.mxu0 %vm16731_vm9, %v13823_v9  ;;  %vm16746_vm9 = vmmov %vm16565_vm0 }
 0x923   : > { %10360 = vmatmul.mubr.msk.bf16.gmra.mrb[24].mxu0 %vm16732_vm10, %v13829_v10  ;;  %vm16747_vm10 = vmmov %vm16565_vm0 }
 0x924   : > { %10363 = vmatprep.mubr.msk.bf16.mxu0 %vm16733_vm11, %v13831_v60  ;;  %vm16748_vm11 = vmmov %vm16565_vm0 }
 0x92b   : > { %10364 = vmatmul.mubr.msk.bf16.gmra.mrb[28].mxu0 %vm16734_vm12, %v13837_v41  ;;  %vm16749_vm12 = vmmov %vm16565_vm0 }
 0x92c   : > { %10367 = vmatprep.mubr.msk.bf16.mxu0 %vm16735_vm13, %v13839_v3  ;;  %vm16750_vm13 = vmmov %vm16565_vm0 }
 0x933   : > { %10368 = vmatmul.mubr.msk.bf16.gmra.mrb[32].mxu0 %vm16736_vm14, %v13845_v32  ;;  %vm16751_vm14 = vmmov %vm16565_vm0 }
 0x934   : > { %10371 = vmatprep.mubr.msk.bf16.mxu0 %vm16565_vm0, %v6136_v23 }
 0x93b   : > { %10372 = vmatmul.mubr.msk.bf16.gmra.mrb[36].mxu0 %vm16737_vm7, %v7031_v30  ;;  %vm16752_vm7 = vmmov %vm16565_vm0 }
 0x93c   : > { %10377 = vmatprep.mubr.msk.bf16.mxu0 %vm16738_vm8, %v13855_v16  ;;  %vm16753_vm8 = vmmov %vm16565_vm0 }
 0x943   : > { %10378 = vmatmul.mubr.msk.bf16.vlgmr.msra.gmra.mrb[8].mxu0 %vm16739_vm4, %v13862_v36  ;;  %vm16754_vm4 = vmmov %vm16565_vm0 }
 0x944   : > { %10381 = vmatprep.mubr.msk.bf16.mxu0 %vm16740_vm5, %v13864_v35  ;;  %vm16755_vm5 = vmmov %vm16565_vm0 }
 0x94b   : > { %10382 = vmatmul.mubr.msk.bf16.gmra.mrb[12].mxu0 %vm16741_vm6, %v13870_v22  ;;  %vm16756_vm6 = vmmov %vm16565_vm0 }
 0x94c   : > { %10385 = vmatprep.mubr.msk.bf16.mxu0 %vm16742_vm15, %v13872_v40  ;;  %vm16757_vm15 = vmmov %vm16565_vm0 }
 0x953   : > { %10386 = vmatmul.mubr.msk.bf16.gmra.mrb[16].mxu0 %vm16743_vm1, %v13878_v63  ;;  %vm16758_vm1 = vmmov %vm16565_vm0 }
 0x954   : > { %10389 = vmatprep.mubr.msk.bf16.mxu0 %vm16744_vm2, %v13880_v34  ;;  %vm16759_vm2 = vmmov %vm16565_vm0 }
 0x95b   : > { %10390 = vmatmul.mubr.msk.bf16.gmra.mrb[20].mxu0 %vm16745_vm3, %v13886_v1  ;;  %vm16760_vm3 = vmmov %vm16565_vm0 }
 0x95c   : > { %10393 = vmatprep.mubr.msk.bf16.mxu0 %vm16746_vm9, %v13888_v50  ;;  %vm16761_vm9 = vmmov %vm16565_vm0 }
 0x963   : > { %10394 = vmatmul.mubr.msk.bf16.gmra.mrb[24].mxu0 %vm16747_vm10, %v13894_v24  ;;  %vm16762_vm10 = vmmov %vm16565_vm0 }
 0x964   : > { %10397 = vmatprep.mubr.msk.bf16.mxu0 %vm16748_vm11, %v13896_v43  ;;  %vm16763_vm11 = vmmov %vm16565_vm0 }
 0x96b   : > { %10398 = vmatmul.mubr.msk.bf16.gmra.mrb[28].mxu0 %vm16749_vm12, %v13902_v14  ;;  %vm16764_vm12 = vmmov %vm16565_vm0 }
 0x96c   : > { %10401 = vmatprep.mubr.msk.bf16.mxu0 %vm16750_vm13, %v13904_v18  ;;  %vm16765_vm13 = vmmov %vm16565_vm0 }
 0x973   : > { %10402 = vmatmul.mubr.msk.bf16.gmra.mrb[32].mxu0 %vm16751_vm14, %v13910_v48  ;;  %vm16766_vm14 = vmmov %vm16565_vm0 }
 0x974   : > { %10405 = vmatprep.mubr.msk.bf16.mxu0 %vm16565_vm0, %v6434_v17 }
 0x97b   : > { %10406 = vmatmul.mubr.msk.bf16.gmra.mrb[36].mxu0 %vm16752_vm7, %v7329_v54  ;;  %vm16767_vm7 = vmmov %vm16565_vm0 }
 0xa16   : > { %v10379_v57 = vpop.f32.mrb[8].mxu0 }
 0xa17   : > { %v7421_v21 = vpop.f32.mrb[9].mxu0  ;;  %v14119_v11 = vadd.f32 %v10379_v57, %v14116_v13 }
 0xa18   : > { %v14122_v45 = vadd.f32 %v14116_v13, %v7421_v21  ;;  %v10380_v44 = vpop.f32.mrb[10].mxu0 }
 0xa19   : > { %v7424_v7 = vpop.f32.mrb[11].mxu0  ;;  %v14127_v62 = vadd.f32 %v10380_v44, %v14116_v13  ;;  %v7651_v46 = vmul.f32 %v14119_v11, %v14119_v11  ;;  %v7583_v60 = vsel %vm16755_vm5, %v14119_v11, 0.0  ;;  %vm16770_vm5 = vmmov %vm16565_vm0 }
 0xa1a   : > { %v7649_v28 = vmul.f32 %v14122_v45, %v14122_v45  ;;  %v14130_v52 = vadd.f32 %v14116_v13, %v7424_v7  ;;  %v7580_v37 = vsel %vm16753_vm8, %v14122_v45, 0.0  ;;  %vm16768_vm8 = vmmov %vm16565_vm0 }
 0xa1b   : > { %v7652_v3 = vmul.f32 %v14127_v62, %v14127_v62  ;;  %v7684_v40 = vsel %vm16758_vm1, %v7651_v46, 0.0  ;;  %v7585_v63 = vsel %vm16759_vm2, %v14127_v62, 0.0  ;;  %vm16773_vm1 = vmmov %vm16565_vm0 }
 0xa1c   : > { %v7581_v4 = vsel %vm16754_vm4, %v14130_v52, 0.0  ;;  %v7650_v9 = vmul.f32 %v14130_v52, %v14130_v52  ;;  %v7681_v41 = vsel %vm16756_vm6, %v7649_v28, 0.0  ;;  %vm16769_vm4 = vmmov %vm16565_vm0 }
 0xa1d   : > { %v7582_v10 = vadd.f32 %v7581_v4, %v7580_v37  ;;  %v7686_v43 = vsel %vm16760_vm3, %v7652_v3, 0.0  ;;  %vm16771_vm6 = vmmov %vm16565_vm0 }
 0xa1e   : > { %v7682_v32 = vsel %vm16757_vm15, %v7650_v9, 0.0  ;;  %v10383_v16 = vpop.f32.mrb[12].mxu0  ;;  %vm16772_vm15 = vmmov %vm16565_vm0 }
 0xa1f   : > { %v7584_v36 = vadd.f32 %v7583_v60, %v7582_v10  ;;  %v7683_v35 = vadd.f32 %v7682_v32, %v7681_v41  ;;  %v7437_v22 = vpop.f32.mrb[13].mxu0  ;;  %v14153_v6 = vadd.f32 %v10383_v16, %v14116_v13  ;;  %vm16774_vm2 = vmmov %vm16565_vm0 }
 0xa20   : > { %v14150_v34 = vadd.f32 %v14116_v13, %v7437_v22  ;;  %v10384_v1 = vpop.f32.mrb[14].mxu0  ;;  %vm16775_vm3 = vmmov %vm16565_vm0 }
 0xa21   : > { %v7685_v50 = vadd.f32 %v7684_v40, %v7683_v35  ;;  %v7586_v59 = vadd.f32 %v7585_v63, %v7584_v36  ;;  %v7440_v24 = vpop.f32.mrb[15].mxu0  ;;  %v14164_v18 = vadd.f32 %v10384_v1, %v14116_v13  ;;  %v7655_v48 = vmul.f32 %v14153_v6, %v14153_v6 }
 0xa22   : > { %v7587_v2 = vsel %vm16761_vm9, %v14150_v34, 0.0  ;;  %v7653_v29 = vmul.f32 %v14150_v34, %v14150_v34  ;;  %v14161_v26 = vadd.f32 %v14116_v13, %v7440_v24  ;;  %v7591_v49 = vsel %vm16764_vm12, %v14153_v6, 0.0  ;;  %vm16776_vm9 = vmmov %vm16565_vm0 }
 0xa23   : > { %v7588_v0 = vadd.f32 %v7587_v2, %v7586_v59  ;;  %v7687_v14 = vadd.f32 %v7686_v43, %v7685_v50  ;;  %v7656_v53 = vmul.f32 %v14164_v18, %v14164_v18  ;;  %v7593_v38 = vsel %vm16766_vm14, %v14164_v18, 0.0  ;;  %vm16779_vm12 = vmmov %vm16565_vm0 }
 0xa24   : > { %v7688_v8 = vsel %vm16762_vm10, %v7653_v29, 0.0  ;;  %v7589_v58 = vsel %vm16763_vm11, %v14161_v26, 0.0  ;;  %v7654_v42 = vmul.f32 %v14161_v26, %v14161_v26  ;;  %v7692_v39 = vsel %vm16565_vm0, %v7655_v48, 0.0  ;;  %vm16777_vm10 = vmmov %vm16565_vm0 }
 0xa25   : > { %v7689_v19 = vadd.f32 %v7688_v8, %v7687_v14  ;;  %v7590_v27 = vadd.f32 %v7589_v58, %v7588_v0  ;;  %v7694_v54 = vsel %vm16768_vm8, %v7656_v53, 0.0  ;;  %vm16778_vm11 = vmmov %vm16565_vm0 }
 0xa26   : > { %v10387_v5 = vpop.f32.mrb[16].mxu0  ;;  %v7690_v23 = vsel %vm16765_vm13, %v7654_v42, 0.0  ;;  %vm16780_vm13 = vmmov %vm16565_vm0 }
 0xa27   : > { %v7592_v61 = vadd.f32 %v7591_v49, %v7590_v27  ;;  %v7453_v55 = vpop.f32.mrb[17].mxu0  ;;  %v7691_v25 = vadd.f32 %v7690_v23, %v7689_v19  ;;  %v14185_v31 = vadd.f32 %v10387_v5, %v14116_v13  ;;  %vm16781_vm14 = vmmov %vm16565_vm0 }
 0xa28   : > { %v14181_v17 = vadd.f32 %v14116_v13, %v7453_v55  ;;  %v10388_v51 = vpop.f32.mrb[18].mxu0  ;;  %vm16783_vm8 = vmmov %vm16565_vm0 }
 0xa29   : > { %v7594_v56 = vadd.f32 %v7593_v38, %v7592_v61  ;;  %v7456_v33 = vpop.f32.mrb[19].mxu0  ;;  %v7693_v15 = vadd.f32 %v7692_v39, %v7691_v25  ;;  %v14196_v21 = vadd.f32 %v10388_v51, %v14116_v13  ;;  %v7659_v37 = vmul.f32 %v14185_v31, %v14185_v31 }
 0xa2a   : > { %v7595_v30 = vsel %vm16767_vm7, %v14181_v17, 0.0  ;;  %v7657_v20 = vmul.f32 %v14181_v17, %v14181_v17  ;;  %v14192_v47 = vadd.f32 %v14116_v13, %v7456_v33  ;;  %v7599_v9 = vsel %vm16771_vm6, %v14185_v31, 0.0  ;;  %vm16782_vm7 = vmmov %vm16565_vm0 }
 0xa2b   : > { %v7596_v57 = vadd.f32 %v7595_v30, %v7594_v56  ;;  %v7695_v44 = vadd.f32 %v7694_v54, %v7693_v15  ;;  %v7660_v3 = vmul.f32 %v14196_v21, %v14196_v21  ;;  %v7601_v36 = vsel %vm16773_vm1, %v14196_v21, 0.0  ;;  %vm16786_vm6 = vmmov %vm16565_vm0 }
 0xa2c   : > { %v7696_v7 = vsel %vm16769_vm4, %v7657_v20, 0.0  ;;  %v7597_v28 = vsel %vm16770_vm5, %v14192_v47, 0.0  ;;  %v7658_v46 = vmul.f32 %v14192_v47, %v14192_v47  ;;  %v7700_v63 = vsel %vm16774_vm2, %v7659_v37, 0.0  ;;  %vm16784_vm4 = vmmov %vm16565_vm0 }
 0xa2d   : > { %v7598_v4 = vadd.f32 %v7597_v28, %v7596_v57  ;;  %v7697_v10 = vadd.f32 %v7696_v7, %v7695_v44  ;;  %v7702_v0 = vsel %vm16776_vm9, %v7660_v3, 0.0  ;;  %vm16785_vm5 = vmmov %vm16565_vm0 }
 0xa2e   : > { %v7698_v60 = vsel %vm16772_vm15, %v7658_v46, 0.0  ;;  %v10391_v41 = vpop.f32.mrb[20].mxu0  ;;  %vm16787_vm15 = vmmov %vm16565_vm0 }
 0xa2f   : > { %v7600_v32 = vadd.f32 %v7599_v9, %v7598_v4  ;;  %v7469_v16 = vpop.f32.mrb[21].mxu0  ;;  %v7699_v35 = vadd.f32 %v7698_v60, %v7697_v10  ;;  %v14217_v1 = vadd.f32 %v10391_v41, %v14116_v13  ;;  %vm16788_vm1 = vmmov %vm16565_vm0 }
 0xa30   : > { %v14213_v22 = vadd.f32 %v14116_v13, %v7469_v16  ;;  %v10392_v40 = vpop.f32.mrb[22].mxu0  ;;  %vm16789_vm2 = vmmov %vm16565_vm0 }
 0xa31   : > { %v7602_v50 = vadd.f32 %v7601_v36, %v7600_v32  ;;  %v7472_v59 = vpop.f32.mrb[23].mxu0  ;;  %v7701_v24 = vadd.f32 %v7700_v63, %v7699_v35  ;;  %v14228_v8 = vadd.f32 %v10392_v40, %v14116_v13  ;;  %v7663_v42 = vmul.f32 %v14217_v1, %v14217_v1  ;;  %vm16791_vm9 = vmmov %vm16565_vm0 }
 0xa32   : > { %v7603_v43 = vsel %vm16775_vm3, %v14213_v22, 0.0  ;;  %v7661_v2 = vmul.f32 %v14213_v22, %v14213_v22  ;;  %v14224_v29 = vadd.f32 %v14116_v13, %v7472_v59  ;;  %v7607_v5 = vsel %vm16779_vm12, %v14217_v1, 0.0  ;;  %vm16790_vm3 = vmmov %vm16565_vm0 }
 0xa33   : > { %v7604_v14 = vadd.f32 %v7603_v43, %v7602_v50  ;;  %v7703_v58 = vadd.f32 %v7702_v0, %v7701_v24  ;;  %v7664_v55 = vmul.f32 %v14228_v8, %v14228_v8  ;;  %v7609_v51 = vsel %vm16781_vm14, %v14228_v8, 0.0  ;;  %vm16794_vm12 = vmmov %vm16565_vm0 }
 0xa34   : > { %v7704_v48 = vsel %vm16777_vm10, %v7661_v2, 0.0  ;;  %v7605_v19 = vsel %vm16778_vm11, %v14224_v29, 0.0  ;;  %v7662_v27 = vmul.f32 %v14224_v29, %v14224_v29  ;;  %v7708_v15 = vsel %vm16565_vm0, %v7663_v42, 0.0  ;;  %vm16792_vm10 = vmmov %vm16565_vm0 }
 0xa35   : > { %v7606_v49 = vadd.f32 %v7605_v19, %v7604_v14  ;;  %v7705_v53 = vadd.f32 %v7704_v48, %v7703_v58  ;;  %v7710_v46 = vsel %vm16783_vm8, %v7664_v55, 0.0  ;;  %vm16793_vm11 = vmmov %vm16565_vm0 }
 0xa36   : > { %v7706_v61 = vsel %vm16780_vm13, %v7662_v27, 0.0  ;;  %v10395_v23 = vpop.f32.mrb[24].mxu0  ;;  %vm16795_vm13 = vmmov %vm16565_vm0 }
 0xa37   : > { %v7608_v38 = vadd.f32 %v7607_v5, %v7606_v49  ;;  %v7485_v25 = vpop.f32.mrb[25].mxu0  ;;  %v7707_v39 = vadd.f32 %v7706_v61, %v7705_v53  ;;  %v14249_v30 = vadd.f32 %v10395_v23, %v14116_v13  ;;  %vm16796_vm14 = vmmov %vm16565_vm0 }
 0xa38   : > { %v14245_v56 = vadd.f32 %v14116_v13, %v7485_v25  ;;  %v10396_v33 = vpop.f32.mrb[26].mxu0  ;;  %vm16798_vm8 = vmmov %vm16565_vm0 }
 0xa39   : > { %v7610_v20 = vadd.f32 %v7609_v51, %v7608_v38  ;;  %v7488_v54 = vpop.f32.mrb[27].mxu0  ;;  %v7709_v57 = vadd.f32 %v7708_v15, %v7707_v39  ;;  %v14260_v4 = vadd.f32 %v10396_v33, %v14116_v13  ;;  %v7667_v3 = vmul.f32 %v14249_v30, %v14249_v30 }
 0xa3a   : > { %v7611_v44 = vsel %vm16782_vm7, %v14245_v56, 0.0  ;;  %v7665_v7 = vmul.f32 %v14245_v56, %v14245_v56  ;;  %v14256_v28 = vadd.f32 %v14116_v13, %v7488_v54  ;;  %v7615_v16 = vsel %vm16786_vm6, %v14249_v30, 0.0  ;;  %vm16797_vm7 = vmmov %vm16565_vm0 }
 0xa3b   : > { %v7612_v37 = vadd.f32 %v7611_v44, %v7610_v20  ;;  %v7711_v9 = vadd.f32 %v7710_v46, %v7709_v57  ;;  %v7668_v63 = vmul.f32 %v14260_v4, %v14260_v4  ;;  %v7617_v24 = vsel %vm16788_vm1, %v14260_v4, 0.0  ;;  %vm16801_vm6 = vmmov %vm16565_vm0 }
 0xa3c   : > { %v7712_v10 = vsel %vm16784_vm4, %v7665_v7, 0.0  ;;  %v7613_v60 = vsel %vm16785_vm5, %v14256_v28, 0.0  ;;  %v7666_v41 = vmul.f32 %v14256_v28, %v14256_v28  ;;  %v7716_v14 = vsel %vm16789_vm2, %v7667_v3, 0.0  ;;  %vm16799_vm4 = vmmov %vm16565_vm0 }
 0xa3d   : > { %v7614_v32 = vadd.f32 %v7613_v60, %v7612_v37  ;;  %v7713_v36 = vadd.f32 %v7712_v10, %v7711_v9  ;;  %v7718_v53 = vsel %vm16791_vm9, %v7668_v63, 0.0  ;;  %vm16800_vm5 = vmmov %vm16565_vm0 }
 0xa3e   : > { %v7714_v35 = vsel %vm16787_vm15, %v7666_v41, 0.0  ;;  %v10399_v40 = vpop.f32.mrb[28].mxu0  ;;  %vm16802_vm15 = vmmov %vm16565_vm0 }
 0xa3f   : > { %v7616_v50 = vadd.f32 %v7615_v16, %v7614_v32  ;;  %v7501_v59 = vpop.f32.mrb[29].mxu0  ;;  %v7715_v43 = vadd.f32 %v7714_v35, %v7713_v36  ;;  %v14281_v58 = vadd.f32 %v10399_v40, %v14116_v13  ;;  %vm16803_vm1 = vmmov %vm16565_vm0 }
 0xa40   : > { %v14277_v2 = vadd.f32 %v14116_v13, %v7501_v59  ;;  %v10400_v0 = vpop.f32.mrb[30].mxu0  ;;  %vm16804_vm2 = vmmov %vm16565_vm0 }
 0xa41   : > { %v7618_v48 = vadd.f32 %v7617_v24, %v7616_v50  ;;  %v7504_v19 = vpop.f32.mrb[31].mxu0  ;;  %v7717_v27 = vadd.f32 %v7716_v14, %v7715_v43  ;;  %v14292_v23 = vadd.f32 %v10400_v0, %v14116_v13  ;;  %v7671_v39 = vmul.f32 %v14281_v58, %v14281_v58  ;;  %vm16806_vm9 = vmmov %vm16565_vm0 }
 0xa42   : > { %v7619_v42 = vsel %vm16790_vm3, %v14277_v2, 0.0  ;;  %v7669_v49 = vmul.f32 %v14277_v2, %v14277_v2  ;;  %v14288_v5 = vadd.f32 %v14116_v13, %v7504_v19  ;;  %v7623_v15 = vsel %vm16794_vm12, %v14281_v58, 0.0  ;;  %vm16805_vm3 = vmmov %vm16565_vm0 }
 0xa43   : > { %v7620_v61 = vadd.f32 %v7619_v42, %v7618_v48  ;;  %v7719_v55 = vadd.f32 %v7718_v53, %v7717_v27  ;;  %v7672_v44 = vmul.f32 %v14292_v23, %v14292_v23  ;;  %v7625_v37 = vsel %vm16796_vm14, %v14292_v23, 0.0  ;;  %vm16809_vm12 = vmmov %vm16565_vm0 }
 0xa44   : > { %v7720_v38 = vsel %vm16792_vm10, %v7669_v49, 0.0  ;;  %v7621_v25 = vsel %vm16793_vm11, %v14288_v5, 0.0  ;;  %v7670_v51 = vmul.f32 %v14288_v5, %v14288_v5  ;;  %v7724_v41 = vsel %vm16565_vm0, %v7671_v39, 0.0  ;;  %vm16807_vm10 = vmmov %vm16565_vm0 }
 0xa45   : > { %v7622_v33 = vadd.f32 %v7621_v25, %v7620_v61  ;;  %v7721_v20 = vadd.f32 %v7720_v38, %v7719_v55  ;;  %v7726_v50 = vsel %vm16798_vm8, %v7672_v44, 0.0  ;;  %vm16808_vm11 = vmmov %vm16565_vm0 }
 0xa46   : > { %v7722_v54 = vsel %vm16795_vm13, %v7670_v51, 0.0  ;;  %v10403_v57 = vpop.f32.mrb[32].mxu0  ;;  %vm16810_vm13 = vmmov %vm16565_vm0 }
 0xa47   : > { %v7624_v7 = vadd.f32 %v7623_v15, %v7622_v33  ;;  %v7517_v46 = vpop.f32.mrb[33].mxu0  ;;  %v7723_v9 = vadd.f32 %v7722_v54, %v7721_v20  ;;  %v14313_v3 = vadd.f32 %v10403_v57, %v14116_v13  ;;  %vm16811_vm14 = vmmov %vm16565_vm0 }
 0xa48   : > { %v14309_v10 = vadd.f32 %v14116_v13, %v7517_v46  ;;  %v10404_v60 = vpop.f32.mrb[34].mxu0  ;;  %vm16813_vm8 = vmmov %vm16565_vm0 }
 0xa49   : > { %v7626_v32 = vadd.f32 %v7625_v37, %v7624_v7  ;;  %v7520_v16 = vpop.f32.mrb[35].mxu0  ;;  %v7725_v36 = vadd.f32 %v7724_v41, %v7723_v9  ;;  %v14324_v24 = vadd.f32 %v10404_v60, %v14116_v13  ;;  %v7675_v19 = vmul.f32 %v14313_v3, %v14313_v3 }
 0xa4a   : > { %v7627_v35 = vsel %vm16797_vm7, %v14309_v10, 0.0  ;;  %v7673_v40 = vmul.f32 %v14309_v10, %v14309_v10  ;;  %v14320_v63 = vadd.f32 %v14116_v13, %v7520_v16  ;;  %v7631_v42 = vsel %vm16801_vm6, %v14313_v3, 0.0  ;;  %vm16812_vm7 = vmmov %vm16565_vm0 }
 0xa4b   : > { %v7628_v59 = vadd.f32 %v7627_v35, %v7626_v32  ;;  %v7727_v43 = vadd.f32 %v7726_v50, %v7725_v36  ;;  %v7676_v55 = vmul.f32 %v14324_v24, %v14324_v24  ;;  %v7633_v51 = vsel %vm16803_vm1, %v14324_v24, 0.0 }
 0xa4c   : > { %v7728_v0 = vsel %vm16799_vm4, %v7673_v40, 0.0  ;;  %v7629_v14 = vsel %vm16800_vm5, %v14320_v63, 0.0  ;;  %v7674_v48 = vmul.f32 %v14320_v63, %v14320_v63  ;;  %v7732_v20 = vsel %vm16804_vm2, %v7675_v19, 0.0  ;;  %vm16816_vm5 = vmmov %vm16565_vm0 }
 0xa4d   : > { %v7630_v27 = vadd.f32 %v7629_v14, %v7628_v59  ;;  %v7729_v49 = vadd.f32 %v7728_v0, %v7727_v43  ;;  %v7734_v60 = vsel %vm16806_vm9, %v7676_v55, 0.0  ;;  %vm16815_vm4 = vmmov 0  }
 0xa4e   : > { %v7730_v53 = vsel %vm16802_vm15, %v7674_v48, 0.0  ;;  %v10407_v61 = vpop.f32.mrb[36].mxu0  ;;  %vm16817_vm6 = vcmask 64512  }
 0xa4f   : > { %v7632_v38 = vadd.f32 %v7631_v42, %v7630_v27  ;;  %v7533_v25 = vpop.f32.mrb[37].mxu0  ;;  %v7731_v39 = vadd.f32 %v7730_v53, %v7729_v49  ;;  %v14345_v54 = vadd.f32 %v10407_v61, %v14116_v13  ;;  %vm16818_vm15 = vmmov %vm16817_vm6 }
 0xa50   : > { %v14341_v33 = vadd.f32 %v14116_v13, %v7533_v25  ;;  %v10408_v15 = vpop.f32.mrb[38].mxu0 }
 0xa51   : > { %v7634_v57 = vadd.f32 %v7633_v51, %v7632_v38  ;;  %v7536_v44 = vpop.f32.mrb[39].mxu0  ;;  %v7733_v7 = vadd.f32 %v7732_v20, %v7731_v39  ;;  %v14356_v32 = vadd.f32 %v10408_v15, %v14116_v13  ;;  %v7679_v50 = vmul.f32 %v14345_v54, %v14345_v54 }
 0xa52   : > { %v7635_v46 = vsel %vm16805_vm3, %v14341_v33, 0.0  ;;  %v7677_v37 = vmul.f32 %v14341_v33, %v14341_v33  ;;  %v14352_v9 = vadd.f32 %v14116_v13, %v7536_v44  ;;  %v7639_v43 = vsel %vm16809_vm12, %v14345_v54, 0.0 }
 0xa53   : > { %v7636_v41 = vadd.f32 %v7635_v46, %v7634_v57  ;;  %v7735_v16 = vadd.f32 %v7734_v60, %v7733_v7  ;;  %v7680_v14 = vmul.f32 %v14356_v32, %v14356_v32  ;;  %v7641_v19 = vsel %vm16811_vm14, %v14356_v32, 0.0  ;;  %v16814_v60 = vld [vmem:[#allocation5_spill] sm:$0xff] }
 0xa54   : > { %v7736_v36 = vsel %vm16807_vm10, %v7677_v37, 0.0  ;;  %v7637_v35 = vsel %vm16808_vm11, %v14352_v9, 0.0  ;;  %v7678_v40 = vmul.f32 %v14352_v9, %v14352_v9  ;;  %v7740_v42 = vsel %vm16565_vm0, %v7679_v50, 0.0 }
 0xa55   : > { %v7638_v59 = vadd.f32 %v7637_v35, %v7636_v41  ;;  %v7737_v0 = vadd.f32 %v7736_v36, %v7735_v16  ;;  %v7742_v61 = vsel %vm16812_vm7, %v7680_v14, 0.0  ;;  %v11321_v16 = vld [vmem:[%s15706_s13] sm:$0xff] }
 0xa56   : > { %v7738_v13 = vsel %vm16810_vm13, %v7678_v40, 0.0 }
 0xa57   : > { %v7640_v48 = vadd.f32 %v7639_v43, %v7638_v59  ;;  %v7739_v27 = vadd.f32 %v7738_v13, %v7737_v0 }
 0xa59   : > { %v7642_v49 = vadd.f32 %v7641_v19, %v7640_v48  ;;  %v7741_v53 = vadd.f32 %v7740_v42, %v7739_v27 }
 0xa5b   : > { %v7643_v55 = vrot.slane %v7642_v49, 4  ;;  %v7743_v38 = vadd.f32 %v7742_v61, %v7741_v53 }
 0xa5d   : > { %v7644_v25 = vadd.f32 %v7643_v55, %v7642_v49  ;;  %v7744_v51 = vrot.slane %v7743_v38, 4  ;;  %v4889_v49 = vld [vmem:[%s15703_s10] sm:$0x1] }
 0xa5f   : > { %v7645_v39 = vrot.slane %v7644_v25, 2  ;;  %v7745_v15 = vadd.f32 %v7744_v51, %v7743_v38 }
 0xa61   : > { %v7646_v20 = vadd.f32 %v7645_v39, %v7644_v25  ;;  %v7746_v57 = vrot.slane %v7745_v15, 2  ;;  %v16819_v25 = vld [vmem:[#allocation4_spill] sm:$0xff] }
 0xa63   : > { %v7647_v44 = vrot.slane %v7646_v20, 1  ;;  %v7747_v7 = vadd.f32 %v7746_v57, %v7745_v15 }
 0xa65   : > { %v7648_v46 = vadd.f32 %v7647_v44, %v7646_v20  ;;  %v7748_v37 = vrot.slane %v7747_v7, 1 }
 0xa67   : > { %10414 = vmatmul.mubr.msk.f32.vlgmr.msra.gmra.mrb[34].mxu1 %vm16813_vm8, %v7648_v46  ;;  %v7749_v41 = vadd.f32 %v7748_v37, %v7747_v7 }
 0xa68   : > { %10450 = vmatpush3.bf16.msra.mxu1 %v16814_v60  ;;  %10420 = vmatprep.mubr.msk.f32.mxu1 %vm16815_vm4, %v16616_v12 }
 0xa69   : > { %10423 = vmatprep.subr.mxu1 %v16616_v12 }
 0xa6b   : > { %10421 = vmatmul.mubr.msk.f32.vlgmr.msra.gmra.mrb[36].mxu1 %vm16816_vm5, %v7749_v41 }
 0xa6c   : > { %10424 = vmatpush3.msra.mxu1 %v11321_v16  ;;  %10425 = vmatprep.mubr.msk.f32.mxu1 %vm16815_vm4, %v16616_v12 }
 0xa6d   : > { %10428 = vmatprep.subr.mxu1 %v16616_v12 }
 0xb3a   : > { %v7819_v36 = vpop.f32.mrb[34].mxu1 }
 0xb3b   : > { %v7823_v35 = vmul.f32 0.001953125, %v7819_v36  ;;  %v10415_v40 = vpop.f32.mrb[35].mxu1 }
 0xb3d   : > { %10426 = vmatmul.mubr.msk.f32.vlgmr.msra.gmra.mrb[38].mxu1 %vm16817_vm6, %v7823_v35  ;;  %v7898_v59 = vmul.f32 %v7823_v35, %v7823_v35 }
 0xb3e   : > { %v7893_v50 = vpop.f32.mrb[36].mxu1  ;;  %10429 = vmatpush3.msra.mxu1 %v11321_v16  ;;  %10430 = vmatprep.mubr.msk.f32.mxu1 %vm16815_vm4, %v16616_v12  ;;  %v4890_v12 = vld [vmem:[%s15704_s11] sm:$0x1] }
 0xb3f   : > { %v7897_v43 = vmul.f32 0.001953125, %v7893_v50  ;;  %v10422_v0 = vpop.f32.mrb[37].mxu1 }
 0xb41   : > { %v7899_v13 = vsub.f32 %v7897_v43, %v7898_v59 }
 0xb43   : > { %v7900_v14 = vmax.f32 %v7899_v13, 0.0 }
 0xb45   : > { %v7901_v48 = vadd.f32 1e-05, %v7900_v14 }
 0xb47   : > { %11190 = vrsqrt.f32 %v7901_v48 }
 0xb51   : > { %v11191_v19 = vpop.eup %11190 }
 0xb52   : > { %10431 = vmatmul.mubr.msk.f32.vlgmr.msra.gmra.mrb[40].mxu1 %vm16818_vm15, %v11191_v19 }
 0xc10   : > { %v7972_v27 = vpop.f32.mrb[38].mxu1 }
 0xc11   : > { %v10427_v42 = vpop.f32.mrb[39].mxu1 }
 0xc25   : > { %v8045_v53 = vpop.f32.mrb[40].mxu1 }
 0xc26   : > { %v8049_v61 = vmul.f32 %v8045_v53, %v4889_v49  ;;  %v10432_v55 = vpop.f32.mrb[41].mxu1 }
 0xc28   : > { %v8050_v38 = vmul.f32 %v8049_v61, %v7972_v27  ;;  %v8055_v51 = vrot.slane %v8049_v61, %v16819_v25 }
 0xc2a   : > { %v8051_v39 = vsub.f32 %v4890_v12, %v8050_v38  ;;  %v8056_v15 = vmul.f32 %v14122_v45, %v8055_v51  ;;  %v8057_v20 = vmul.f32 %v14130_v52, %v8055_v51  ;;  %v8058_v57 = vmul.f32 %v14119_v11, %v8055_v51 }
 0xc2b   : > { %v8059_v44 = vmul.f32 %v14127_v62, %v8055_v51  ;;  %v8060_v7 = vmul.f32 %v14150_v34, %v8055_v51  ;;  %v8061_v46 = vmul.f32 %v14161_v26, %v8055_v51  ;;  %v8062_v37 = vmul.f32 %v14153_v6, %v8055_v51 }
 0xc2c   : > { %v8063_v60 = vmul.f32 %v14164_v18, %v8055_v51  ;;  %v8064_v41 = vmul.f32 %v14181_v17, %v8055_v51  ;;  %v8065_v16 = vmul.f32 %v14192_v47, %v8055_v51  ;;  %v8066_v45 = vmul.f32 %v14185_v31, %v8055_v51 }
 0xc2d   : > { %v8067_v52 = vmul.f32 %v14196_v21, %v8055_v51  ;;  %v8068_v11 = vmul.f32 %v14213_v22, %v8055_v51  ;;  %v8069_v62 = vmul.f32 %v14224_v29, %v8055_v51  ;;  %v8070_v34 = vmul.f32 %v14217_v1, %v8055_v51 }
 0xc2e   : > { %v8071_v26 = vmul.f32 %v14228_v8, %v8055_v51  ;;  %v8072_v6 = vmul.f32 %v14245_v56, %v8055_v51  ;;  %v8073_v18 = vmul.f32 %v14256_v28, %v8055_v51  ;;  %v8074_v17 = vmul.f32 %v14249_v30, %v8055_v51 }
 0xc2f   : > { %v8075_v47 = vmul.f32 %v14260_v4, %v8055_v51  ;;  %v8076_v31 = vmul.f32 %v14277_v2, %v8055_v51  ;;  %v8077_v21 = vmul.f32 %v14288_v5, %v8055_v51  ;;  %v8078_v22 = vmul.f32 %v14281_v58, %v8055_v51 }
 0xc30   : > { %v8079_v29 = vmul.f32 %v14292_v23, %v8055_v51  ;;  %v8080_v1 = vmul.f32 %v14309_v10, %v8055_v51  ;;  %v8081_v8 = vmul.f32 %v14320_v63, %v8055_v51  ;;  %v8082_v56 = vmul.f32 %v14313_v3, %v8055_v51 }
 0xc31   : > { %v8083_v28 = vmul.f32 %v14324_v24, %v8055_v51  ;;  %v8092_v30 = vrot.slane %v8051_v39, %v16819_v25  ;;  %v8084_v4 = vmul.f32 %v14341_v33, %v8055_v51  ;;  %v8085_v2 = vmul.f32 %v14352_v9, %v8055_v51 }
 0xc32   : > { %v8086_v5 = vmul.f32 %v14345_v54, %v8055_v51  ;;  %v8087_v58 = vmul.f32 %v14356_v32, %v8055_v51 }
 0xc33   : > { %v8094_v36 = vadd.f32 %v8092_v30, %v8056_v15  ;;  %v8095_v23 = vadd.f32 %v8092_v30, %v8057_v20  ;;  %v8096_v35 = vadd.f32 %v8092_v30, %v8058_v57  ;;  %v8097_v10 = vadd.f32 %v8092_v30, %v8059_v44 }
 0xc34   : > { %v8098_v40 = vadd.f32 %v8092_v30, %v8060_v7  ;;  %v8099_v63 = vadd.f32 %v8092_v30, %v8061_v46  ;;  %v8100_v50 = vadd.f32 %v8092_v30, %v8062_v37  ;;  %v8101_v3 = vadd.f32 %v8092_v30, %v8063_v60 }
 0xc35   : > { %v8102_v59 = vadd.f32 %v8092_v30, %v8064_v41  ;;  %v8103_v24 = vadd.f32 %v8092_v30, %v8065_v16  ;;  %v8104_v43 = vadd.f32 %v8092_v30, %v8066_v45  ;;  %v8105_v0 = vadd.f32 %v8092_v30, %v8067_v52 }
 0xc36   : > { %v8106_v13 = vadd.f32 %v8092_v30, %v8068_v11  ;;  %v8107_v33 = vadd.f32 %v8092_v30, %v8069_v62  ;;  %v8108_v14 = vadd.f32 %v8092_v30, %v8070_v34  ;;  %v8109_v9 = vadd.f32 %v8092_v30, %v8071_v26 }
 0xc37   : > { %v8110_v48 = vadd.f32 %v8092_v30, %v8072_v6  ;;  %v8111_v54 = vadd.f32 %v8092_v30, %v8073_v18  ;;  %v8112_v19 = vadd.f32 %v8092_v30, %v8074_v17  ;;  %v8113_v32 = vadd.f32 %v8092_v30, %v8075_v47 }
 0xc38   : > { %v8114_v27 = vadd.f32 %v8092_v30, %v8076_v31  ;;  %v8115_v42 = vadd.f32 %v8092_v30, %v8077_v21  ;;  %v8116_v49 = vadd.f32 %v8092_v30, %v8078_v22  ;;  %v8117_v53 = vadd.f32 %v8092_v30, %v8079_v29 }
 0xc39   : > { %v8118_v61 = vadd.f32 %v8092_v30, %v8080_v1  ;;  %v8119_v55 = vadd.f32 %v8092_v30, %v8081_v8  ;;  %v8120_v12 = vadd.f32 %v8092_v30, %v8082_v56  ;;  %v8121_v38 = vadd.f32 %v8092_v30, %v8083_v28 }
 0xc3a   : > { %v8122_v25 = vadd.f32 %v8092_v30, %v8084_v4  ;;  %v14430_v51 = vadd.f32 %v8092_v30, %v8085_v2  ;;  %v14432_v39 = vadd.f32 %v8092_v30, %v8086_v5  ;;  %v14434_v15 = vadd.f32 %v8092_v30, %v8087_v58 }
 0xc3b   : > { %v14436_v20 = vmul.f32 0.5, %v8094_v36  ;;  %v14438_v57 = vmul.f32 0.5, %v8095_v23  ;;  %v14440_v44 = vmul.f32 0.5, %v8096_v35  ;;  %v14442_v7 = vmul.f32 0.5, %v8097_v10 }
 0xc3c   : > { %v14444_v46 = vmul.f32 0.5, %v8098_v40  ;;  %v14446_v37 = vmul.f32 0.5, %v8099_v63  ;;  %v14448_v60 = vmul.f32 0.5, %v8100_v50  ;;  %v14450_v41 = vmul.f32 0.5, %v8101_v3 }
 0xc3d   : > { %16820 = vst [vmem:[#allocation121_spill] sm:$0xff] %v14436_v20  ;;  %16821 = vst [vmem:[#allocation122_spill] sm:$0xff] %v14438_v57  ;;  %v14452_v16 = vmul.f32 0.5, %v8102_v59  ;;  %v14454_v45 = vmul.f32 0.5, %v8103_v24  ;;  %v14456_v52 = vmul.f32 0.5, %v8104_v43  ;;  %v14458_v11 = vmul.f32 0.5, %v8105_v0 }
 0xc3e   : > { %16822 = vst [vmem:[#allocation109_spill] sm:$0xff] %v14440_v44  ;;  %16823 = vst [vmem:[#allocation110_spill] sm:$0xff] %v14442_v7  ;;  %v14460_v62 = vmul.f32 0.5, %v8106_v13  ;;  %v14462_v34 = vmul.f32 0.5, %v8107_v33  ;;  %v14464_v26 = vmul.f32 0.5, %v8108_v14  ;;  %v14466_v6 = vmul.f32 0.5, %v8109_v9 }
 0xc3f   : > { %16824 = vst [vmem:[#allocation112_spill] sm:$0xff] %v14444_v46  ;;  %16825 = vst [vmem:[#allocation123_spill] sm:$0xff] %v14446_v37  ;;  %v14468_v18 = vmul.f32 0.5, %v8110_v48  ;;  %v14470_v17 = vmul.f32 0.5, %v8111_v54  ;;  %v14472_v47 = vmul.f32 0.5, %v8112_v19  ;;  %v14474_v31 = vmul.f32 0.5, %v8113_v32 }
 0xc40   : > { %16826 = vst [vmem:[#allocation124_spill] sm:$0xff] %v14448_v60  ;;  %16827 = vst [vmem:[#allocation125_spill] sm:$0xff] %v14450_v41  ;;  %v14476_v21 = vmul.f32 0.5, %v8114_v27  ;;  %v14478_v22 = vmul.f32 0.5, %v8115_v42  ;;  %v14480_v29 = vmul.f32 0.5, %v8116_v49  ;;  %v14482_v1 = vmul.f32 0.5, %v8117_v53 }
 0xc41   : > { %16828 = vst [vmem:[#allocation113_spill] sm:$0xff] %v14452_v16  ;;  %16829 = vst [vmem:[#allocation115_spill] sm:$0xff] %v14454_v45  ;;  %v14484_v8 = vmul.f32 0.5, %v8118_v61  ;;  %v14486_v56 = vmul.f32 0.5, %v8119_v55  ;;  %v14488_v28 = vmul.f32 0.5, %v8120_v12  ;;  %v14490_v30 = vmul.f32 0.5, %v8121_v38 }
 0xc42   : > { %16830 = vst [vmem:[#allocation127_spill] sm:$0xff] %v14456_v52  ;;  %16831 = vst [vmem:[#allocation70_spill] sm:$0xff] %v14458_v11  ;;  %v14492_v4 = vmul.f32 0.5, %v8122_v25  ;;  %v14494_v2 = vmul.f32 0.70710677, %v8094_v36 }
 0xc43   : > { %16832 = vst [vmem:[#allocation132_spill] sm:$0xff] %v14460_v62  ;;  %16833 = vst [vmem:[#allocation128_spill] sm:$0xff] %v14462_v34  ;;  %v14496_v5 = vmul.f32 0.70710677, %v8095_v23  ;;  %v14498_v58 = vmul.f32 0.70710677, %v8096_v35 }
 0xc44   : > { %16834 = vst [vmem:[#allocation71_spill] sm:$0xff] %v14464_v26  ;;  %16835 = vst [vmem:[#allocation106_spill] sm:$0xff] %v14466_v6  ;;  %v14514_v36 = vmul.f32 0.70710677, %v8104_v43  ;;  %v14516_v23 = vmul.f32 0.70710677, %v8105_v0 }
 0xc45   : > { %16836 = vst [vmem:[#allocation72_spill] sm:$0xff] %v14468_v18  ;;  %16837 = vst [vmem:[#allocation107_spill] sm:$0xff] %v14470_v17  ;;  %v14518_v35 = vmul.f32 0.70710677, %v8106_v13  ;;  %v14534_v43 = vmul.f32 0.70710677, %v8114_v27 }
 0xc46   : > { %16838 = vst [vmem:[#allocation130_spill] sm:$0xff] %v14472_v47  ;;  %16839 = vst [vmem:[#allocation73_spill] sm:$0xff] %v14474_v31  ;;  %v14536_v0 = vmul.f32 0.70710677, %v8115_v42  ;;  %v14538_v13 = vmul.f32 0.70710677, %v8116_v49 }
 0xc47   : > { %16840 = vst [vmem:[#allocation131_spill] sm:$0xff] %v14476_v21  ;;  %16841 = vst [vmem:[#allocation74_spill] sm:$0xff] %v14478_v22  ;;  %v14500_v22 = vmul.f32 0.70710677, %v8097_v10  ;;  %v14520_v10 = vmul.f32 0.70710677, %v8107_v33 }
 0xc48   : > { %16842 = vst [vmem:[#allocation75_spill] sm:$0xff] %v14480_v29  ;;  %16843 = vst [vmem:[#allocation76_spill] sm:$0xff] %v14482_v1  ;;  %v14502_v29 = vmul.f32 0.70710677, %v8098_v40  ;;  %v14504_v1 = vmul.f32 0.70710677, %v8099_v63 }
 0xc49   : > { %16844 = vst [vmem:[#allocation77_spill] sm:$0xff] %v14484_v8  ;;  %16845 = vst [vmem:[#allocation78_spill] sm:$0xff] %v14486_v56  ;;  %v14506_v8 = vmul.f32 0.70710677, %v8100_v50  ;;  %v14508_v56 = vmul.f32 0.70710677, %v8101_v3 }
 0xc4a   : > { %16846 = vst [vmem:[#allocation79_spill] sm:$0xff] %v14488_v28  ;;  %16847 = vst [vmem:[#allocation80_spill] sm:$0xff] %v14490_v30  ;;  %v14510_v28 = vmul.f32 0.70710677, %v8102_v59  ;;  %v14512_v30 = vmul.f32 0.70710677, %v8103_v24 }
 0xc4b   : > { %16848 = vst [vmem:[#allocation81_spill] sm:$0xff] %v14492_v4  ;;  %16849 = vst [vmem:[#allocation82_spill] sm:$0xff] %v14494_v2  ;;  %v14522_v40 = vmul.f32 0.70710677, %v8108_v14  ;;  %v14524_v63 = vmul.f32 0.70710677, %v8109_v9 }
 0xc4c   : > { %16850 = vst [vmem:[#allocation83_spill] sm:$0xff] %v14496_v5  ;;  %16851 = vst [vmem:[#allocation84_spill] sm:$0xff] %v14498_v58  ;;  %v14526_v50 = vmul.f32 0.70710677, %v8110_v48  ;;  %v14528_v3 = vmul.f32 0.70710677, %v8111_v54 }
 0xc4d   : > { %16852 = vst [vmem:[#allocation85_spill] sm:$0xff] %v14500_v22  ;;  %16853 = vst [vmem:[#allocation86_spill] sm:$0xff] %v14502_v29  ;;  %v14530_v59 = vmul.f32 0.70710677, %v8112_v19  ;;  %v14532_v24 = vmul.f32 0.70710677, %v8113_v32 }
 0xc4e   : > { %16854 = vst [vmem:[#allocation87_spill] sm:$0xff] %v14504_v1  ;;  %16855 = vst [vmem:[#allocation88_spill] sm:$0xff] %v14506_v8  ;;  %v14540_v33 = vmul.f32 0.70710677, %v8117_v53  ;;  %v14542_v14 = vmul.f32 0.70710677, %v8118_v61 }
 0xc4f   : > { %16856 = vst [vmem:[#allocation89_spill] sm:$0xff] %v14508_v56  ;;  %16857 = vst [vmem:[#allocation90_spill] sm:$0xff] %v14510_v28  ;;  %v14544_v9 = vmul.f32 0.70710677, %v8119_v55  ;;  %v14546_v48 = vmul.f32 0.70710677, %v8120_v12 }
 0xc50   : > { %16858 = vst [vmem:[#allocation91_spill] sm:$0xff] %v14512_v30  ;;  %16859 = vst [vmem:[#allocation92_spill] sm:$0xff] %v14514_v36  ;;  %v14548_v54 = vmul.f32 0.70710677, %v8121_v38  ;;  %v14550_v19 = vmul.f32 0.70710677, %v8122_v25 }
 0xc51   : > { %16860 = vst [vmem:[#allocation114_spill] sm:$0xff] %v14516_v23  ;;  %16861 = vst [vmem:[#allocation35_spill] sm:$0xff] %v14518_v35  ;;  %v14553_v32 = vmul.f32 0.70710677, %v14430_v51  ;;  %v14556_v27 = vmul.f32 0.70710677, %v14432_v39 }
 0xc52   : > { %16862 = vst [vmem:[#allocation36_spill] sm:$0xff] %v14520_v10  ;;  %16863 = vst [vmem:[#allocation126_spill] sm:$0xff] %v14522_v40  ;;  %v14559_v42 = vmul.f32 0.70710677, %v14434_v15  ;;  %v14562_v49 = vand.u32 2147483647, %v14494_v2 }
 0xc53   : > { %16864 = vst [vmem:[#allocation37_spill] sm:$0xff] %v14524_v63  ;;  %16865 = vst [vmem:[#allocation38_spill] sm:$0xff] %v14526_v50  ;;  %v14565_v53 = vand.u32 2147483647, %v14496_v5  ;;  %v14568_v61 = vand.u32 2147483647, %v14498_v58 }
 0xc54   : > { %16866 = vst [vmem:[#allocation39_spill] sm:$0xff] %v14528_v3  ;;  %16867 = vst [vmem:[#allocation40_spill] sm:$0xff] %v14530_v59  ;;  %v14571_v55 = vand.u32 2147483647, %v14500_v22  ;;  %v14574_v12 = vand.u32 2147483647, %v14502_v29 }
 0xc55   : > { %16868 = vst [vmem:[#allocation67_spill] sm:$0xff] %v14532_v24  ;;  %16869 = vst [vmem:[#allocation41_spill] sm:$0xff] %v14534_v43  ;;  %v14577_v38 = vand.u32 2147483647, %v14504_v1  ;;  %v14580_v25 = vand.u32 2147483647, %v14506_v8 }
 0xc56   : > { %16870 = vst [vmem:[#allocation42_spill] sm:$0xff] %v14536_v0  ;;  %16871 = vst [vmem:[#allocation43_spill] sm:$0xff] %v14538_v13  ;;  %v14583_v4 = vand.u32 2147483647, %v14508_v56  ;;  %v14586_v21 = vand.u32 2147483647, %v14510_v28 }
 0xc57   : > { %16872 = vst [vmem:[#allocation44_spill] sm:$0xff] %v14540_v33  ;;  %16873 = vst [vmem:[#allocation100_spill] sm:$0xff] %v14542_v14  ;;  %v14589_v31 = vand.u32 2147483647, %v14512_v30  ;;  %v14592_v47 = vand.u32 2147483647, %v14514_v36 }
 0xc58   : > { %16874 = vst [vmem:[#allocation101_spill] sm:$0xff] %v14544_v9  ;;  %16875 = vst [vmem:[#allocation102_spill] sm:$0xff] %v14546_v48  ;;  %v14595_v17 = vand.u32 2147483647, %v14516_v23  ;;  %v14598_v18 = vand.u32 2147483647, %v14518_v35 }
 0xc59   : > { %16876 = vst [vmem:[#allocation45_spill] sm:$0xff] %v14548_v54  ;;  %16877 = vst [vmem:[#allocation117_spill] sm:$0xff] %v14550_v19  ;;  %v14601_v6 = vand.u32 2147483647, %v14520_v10  ;;  %v14604_v26 = vand.u32 2147483647, %v14522_v40 }
 0xc5a   : > { %16878 = vst [vmem:[#allocation103_spill] sm:$0xff] %v14553_v32  ;;  %16879 = vst [vmem:[#allocation46_spill] sm:$0xff] %v14556_v27  ;;  %v14607_v34 = vand.u32 2147483647, %v14524_v63  ;;  %v14610_v62 = vand.u32 2147483647, %v14526_v50 }
 0xc5b   : > { %16880 = vst [vmem:[#allocation119_spill] sm:$0xff] %v14559_v42  ;;  %16881 = vst [vmem:[#allocation104_spill] sm:$0xff] %v14583_v4  ;;  %v14613_v11 = vand.u32 2147483647, %v14528_v3  ;;  %v14616_v52 = vand.u32 2147483647, %v14530_v59 }
 0xc5c   : > { %16882 = vst [vmem:[#allocation47_spill] sm:$0xff] %v14586_v21  ;;  %16883 = vst [vmem:[#allocation120_spill] sm:$0xff] %v14589_v31  ;;  %v14619_v45 = vand.u32 2147483647, %v14532_v24  ;;  %v14622_v16 = vand.u32 2147483647, %v14534_v43 }
 0xc5d   : > { %16884 = vst [vmem:[#allocation105_spill] sm:$0xff] %v14592_v47  ;;  %16885 = vst [vmem:[#allocation48_spill] sm:$0xff] %v14595_v17  ;;  %v14625_v41 = vand.u32 2147483647, %v14536_v0  ;;  %v14628_v60 = vand.u32 2147483647, %v14538_v13 }
 0xc5e   : > { %16886 = vst [vmem:[#allocation116_spill] sm:$0xff] %v14598_v18  ;;  %16887 = vst [vmem:[#allocation49_spill] sm:$0xff] %v14601_v6  ;;  %v14631_v37 = vand.u32 2147483647, %v14540_v33  ;;  %v14634_v46 = vand.u32 2147483647, %v14542_v14 }
 0xc5f   : > { %16888 = vst [vmem:[#allocation118_spill] sm:$0xff] %v14604_v26  ;;  %16889 = vst [vmem:[#allocation50_spill] sm:$0xff] %v14607_v34  ;;  %v14637_v7 = vand.u32 2147483647, %v14544_v9  ;;  %v14640_v44 = vand.u32 2147483647, %v14546_v48 }
 0xc60   : > { %16890 = vst [vmem:[#allocation129_spill] sm:$0xff] %v14610_v62  ;;  %16891 = vst [vmem:[#allocation51_spill] sm:$0xff] %v14613_v11  ;;  %v14643_v57 = vand.u32 2147483647, %v14548_v54  ;;  %v14646_v20 = vand.u32 2147483647, %v14550_v19 }
 0xc61   : > { %16892 = vst [vmem:[#allocation68_spill] sm:$0xff] %v14616_v52  ;;  %16893 = vst [vmem:[#allocation52_spill] sm:$0xff] %v14619_v45  ;;  %v14649_v13 = vand.u32 2147483647, %v14553_v32  ;;  %v14652_v33 = vand.u32 2147483647, %v14556_v27 }
 0xc62   : > { %16894 = vst [vmem:[#allocation69_spill] sm:$0xff] %v14622_v16  ;;  %16895 = vst [vmem:[#allocation53_spill] sm:$0xff] %v14625_v41  ;;  %v14655_v14 = vand.u32 2147483647, %v14559_v42  ;;  %v8222_v9 = vmul.f32 0.3275911, %v14562_v49 }
 0xc63   : > { %16896 = vst [vmem:[#allocation96_spill] sm:$0xff] %v14628_v60  ;;  %16897 = vst [vmem:[#allocation54_spill] sm:$0xff] %v14631_v37  ;;  %v8223_v48 = vmul.f32 0.3275911, %v14565_v53  ;;  %v8224_v0 = vmul.f32 0.3275911, %v14568_v61 }
 0xc64   : > { %16898 = vst [vmem:[#allocation97_spill] sm:$0xff] %v14634_v46  ;;  %16899 = vst [vmem:[#allocation55_spill] sm:$0xff] %v14637_v7  ;;  %v8225_v54 = vmul.f32 0.3275911, %v14571_v55  ;;  %v8226_v19 = vmul.f32 0.3275911, %v14574_v12 }
 0xc65   : > { %16900 = vst [vmem:[#allocation98_spill] sm:$0xff] %v14640_v44  ;;  %16901 = vst [vmem:[#allocation56_spill] sm:$0xff] %v14643_v57  ;;  %v8227_v43 = vmul.f32 0.3275911, %v14577_v38  ;;  %v8228_v32 = vmul.f32 0.3275911, %v14580_v25 }
 0xc66   : > { %16902 = vst [vmem:[#allocation99_spill] sm:$0xff] %v14646_v20  ;;  %16903 = vst [vmem:[#allocation57_spill] sm:$0xff] %v14649_v13  ;;  %v8229_v27 = vmul.f32 0.3275911, %v14583_v4  ;;  %v8230_v24 = vmul.f32 0.3275911, %v14586_v21 }
 0xc67   : > { %16904 = vst [vmem:[#allocation108_spill] sm:$0xff] %v14652_v33  ;;  %16905 = vst [vmem:[#allocation58_spill] sm:$0xff] %v14655_v14  ;;  %v8231_v42 = vmul.f32 0.3275911, %v14589_v31  ;;  %v8232_v59 = vmul.f32 0.3275911, %v14592_v47 }
 0xc68   : > { %v8233_v3 = vmul.f32 0.3275911, %v14595_v17  ;;  %v8234_v50 = vmul.f32 0.3275911, %v14598_v18  ;;  %v8235_v63 = vmul.f32 0.3275911, %v14601_v6 }
 0xc69   : > { %v8236_v40 = vmul.f32 0.3275911, %v14604_v26  ;;  %v8237_v10 = vmul.f32 0.3275911, %v14607_v34  ;;  %v8238_v35 = vmul.f32 0.3275911, %v14610_v62 }
 0xc6a   : > { %v8239_v23 = vmul.f32 0.3275911, %v14613_v11  ;;  %v8240_v36 = vmul.f32 0.3275911, %v14616_v52  ;;  %v8241_v30 = vmul.f32 0.3275911, %v14619_v45 }
 0xc6b   : > { %v8242_v28 = vmul.f32 0.3275911, %v14622_v16  ;;  %v8243_v56 = vmul.f32 0.3275911, %v14625_v41  ;;  %v8244_v8 = vmul.f32 0.3275911, %v14628_v60 }
 0xc6c   : > { %v8245_v1 = vmul.f32 0.3275911, %v14631_v37  ;;  %v8246_v29 = vmul.f32 0.3275911, %v14634_v46  ;;  %v14683_v22 = vmul.f32 0.5, %v14430_v51  ;;  %v8254_v2 = vadd.f32 1.0, %v8222_v9 }
 0xc6d   : > { %v8247_v58 = vmul.f32 0.3275911, %v14637_v7  ;;  %v8248_v5 = vmul.f32 0.3275911, %v14640_v44  ;;  %v14688_v45 = vmul.f32 0.5, %v14432_v39  ;;  %v8255_v60 = vadd.f32 1.0, %v8223_v48 }
 0xc6e   : > { %16906 = vst [vmem:[#allocation111_spill] sm:$0xff] %v14683_v22  ;;  %v8249_v16 = vmul.f32 0.3275911, %v14643_v57  ;;  %v8250_v41 = vmul.f32 0.3275911, %v14646_v20  ;;  %v14693_v37 = vmul.f32 0.5, %v14434_v15  ;;  %11192 = vrcp.f32 %v8254_v2 }
 0xc6f   : > { %16907 = vst [vmem:[#allocation59_spill] sm:$0xff] %v14688_v45  ;;  %v8251_v46 = vmul.f32 0.3275911, %v14649_v13  ;;  %v8252_v51 = vmul.f32 0.3275911, %v14652_v33  ;;  %v8256_v22 = vadd.f32 1.0, %v8224_v0  ;;  %11194 = vrcp.f32 %v8255_v60 }
 0xc70   : > { %16908 = vst [vmem:[#allocation60_spill] sm:$0xff] %v14693_v37  ;;  %v8253_v7 = vmul.f32 0.3275911, %v14655_v14  ;;  %v8257_v44 = vadd.f32 1.0, %v8225_v54  ;;  %v8258_v9 = vadd.f32 1.0, %v8226_v19  ;;  %v8259_v52 = vadd.f32 1.0, %v8227_v43 }
 0xc71   : > { %v8260_v39 = vadd.f32 1.0, %v8228_v32  ;;  %v8261_v45 = vadd.f32 1.0, %v8229_v27  ;;  %v8262_v11 = vadd.f32 1.0, %v8230_v24  ;;  %v8263_v57 = vadd.f32 1.0, %v8231_v42 }
 0xc72   : > { %v8264_v20 = vadd.f32 1.0, %v8232_v59  ;;  %v8265_v48 = vadd.f32 1.0, %v8233_v3  ;;  %v8266_v15 = vadd.f32 1.0, %v8234_v50  ;;  %v8267_v37 = vadd.f32 1.0, %v8235_v63 }
 0xc73   : > { %v8268_v62 = vadd.f32 1.0, %v8236_v40  ;;  %11196 = vrcp.f32 %v8256_v22  ;;  %v8269_v13 = vadd.f32 1.0, %v8237_v10  ;;  %v8270_v33 = vadd.f32 1.0, %v8238_v35 }
 0xc74   : > { %v8271_v0 = vadd.f32 1.0, %v8239_v23  ;;  %11198 = vrcp.f32 %v8257_v44  ;;  %v14698_v14 = vadd.f32 1.0, %v8240_v36  ;;  %v14700_v54 = vadd.f32 1.0, %v8241_v30 }
 0xc75   : > { %v14702_v43 = vadd.f32 1.0, %v8242_v28  ;;  %11200 = vrcp.f32 %v8258_v9  ;;  %v14704_v2 = vadd.f32 1.0, %v8243_v56  ;;  %v14706_v59 = vadd.f32 1.0, %v8244_v8 }
 0xc76   : > { %v14708_v60 = vadd.f32 1.0, %v8245_v1  ;;  %11202 = vrcp.f32 %v8259_v52  ;;  %v14710_v40 = vadd.f32 1.0, %v8246_v29  ;;  %v14712_v22 = vadd.f32 1.0, %v8247_v58 }
 0xc77   : > { %v14714_v23 = vadd.f32 1.0, %v8248_v5  ;;  %11204 = vrcp.f32 %v8260_v39  ;;  %v14716_v44 = vadd.f32 1.0, %v8249_v16  ;;  %v14718_v30 = vadd.f32 1.0, %v8250_v41 }
 0xc78   : > { %v14720_v28 = vadd.f32 1.0, %v8251_v46  ;;  %11206 = vrcp.f32 %v8261_v45  ;;  %v14722_v56 = vadd.f32 1.0, %v8252_v51  ;;  %v14724_v8 = vadd.f32 1.0, %v8253_v7  ;;  %v14730_v5 = vpop.eup %11192 }
 0xc79   : > { %11208 = vrcp.f32 %v8262_v11  ;;  %v8639_v29 = vsub.f32 0.0, %v14565_v53  ;;  %16909 = vst [vmem:[#allocation61_spill] sm:$0xff] %v14730_v5  ;;  %v14735_v45 = vpop.eup %11194  ;;  %v16937_v27 = vsub.f32 0.0, %v14562_v49 }
 0xc7a   : > { %11210 = vrcp.f32 %v8263_v57  ;;  %16910 = vst [vmem:[#allocation62_spill] sm:$0xff] %v14735_v45 }
 0xc7b   : > { %11212 = vrcp.f32 %v8264_v20  ;;  %v14796_v50 = vmul.f32 %v8639_v29, %v14565_v53 }
 0xc7c   : > { %11214 = vrcp.f32 %v8265_v48 }
 0xc7d   : > { %v14740_v36 = vpop.eup %11196  ;;  %11216 = vrcp.f32 %v8266_v15  ;;  %16939 = vst [vmem:[#allocation13_spill] sm:$0xff] %v14796_v50 }
 0xc7e   : > { %16911 = vst [vmem:[#allocation63_spill] sm:$0xff] %v14740_v36  ;;  %v14745_v63 = vpop.eup %11198  ;;  %11218 = vrcp.f32 %v8267_v37  ;;  %v14793_v37 = vmul.f32 %v16937_v27, %v14562_v49  ;;  %v16948_v27 = vsub.f32 0.0, %v14577_v38 }
 0xc7f   : > { %16912 = vst [vmem:[#allocation64_spill] sm:$0xff] %v14745_v63  ;;  %v14750_v19 = vpop.eup %11200  ;;  %11220 = vrcp.f32 %v8268_v62  ;;  %v8350_v62 = vmul.f32 1.0614054, %v14730_v5 }
 0xc80   : > { %16913 = vst [vmem:[#allocation65_spill] sm:$0xff] %v14750_v19  ;;  %v14755_v48 = vpop.eup %11202  ;;  %11222 = vrcp.f32 %v8269_v13  ;;  %v8351_v13 = vmul.f32 1.0614054, %v14735_v45  ;;  %16938 = vst [vmem:[#allocation12_spill] sm:$0xff] %v14793_v37 }
 0xc81   : > { %16917 = vst [vmem:[#allocation66_spill] sm:$0xff] %v14755_v48  ;;  %v14760_v20 = vpop.eup %11204  ;;  %11224 = vrcp.f32 %v8270_v33  ;;  %v8382_v3 = vadd.f32 -1.4531521, %v8350_v62  ;;  %v16941_v62 = vsub.f32 0.0, %v14568_v61 }
 0xc82   : > { %16921 = vst [vmem:[#allocation6_spill] sm:$0xff] %v14760_v20  ;;  %v14765_v11 = vpop.eup %11206  ;;  %11226 = vrcp.f32 %v8271_v0  ;;  %v8352_v0 = vmul.f32 1.0614054, %v14740_v36 }
 0xc83   : > { %16924 = vst [vmem:[#allocation7_spill] sm:$0xff] %v14765_v11  ;;  %v14770_v7 = vpop.eup %11208  ;;  %11228 = vrcp.f32 %v14698_v14  ;;  %v8353_v14 = vmul.f32 1.0614054, %v14745_v63  ;;  %v14805_v41 = vmul.f32 %v16941_v62, %v14568_v61  ;;  %v14823_v61 = vmul.f32 %v16948_v27, %v14577_v38 }
 0xc84   : > { %16927 = vst [vmem:[#allocation8_spill] sm:$0xff] %v14770_v7  ;;  %v14776_v51 = vpop.eup %11210  ;;  %11230 = vrcp.f32 %v14700_v54  ;;  %v8383_v54 = vadd.f32 -1.4531521, %v8351_v13  ;;  %v8384_v53 = vadd.f32 -1.4531521, %v8352_v0 }
 0xc85   : > { %16931 = vst [vmem:[#allocation9_spill] sm:$0xff] %v14776_v51  ;;  %v14782_v57 = vpop.eup %11212  ;;  %11232 = vrcp.f32 %v14702_v43  ;;  %v8354_v43 = vmul.f32 1.0614054, %v14750_v19  ;;  %16942 = vst [vmem:[#allocation15_spill] sm:$0xff] %v14805_v41 }
 0xc86   : > { %16934 = vst [vmem:[#allocation10_spill] sm:$0xff] %v14782_v57  ;;  %v14787_v16 = vpop.eup %11214  ;;  %11234 = vrcp.f32 %v14704_v2  ;;  %v16943_v2 = vsub.f32 0.0, %v14571_v55  ;;  %16949 = vst [vmem:[#allocation19_spill] sm:$0xff] %v14823_v61  ;;  %v14838_v38 = vmul.f32 %v14735_v45, %v8383_v54  ;;  %v14851_v54 = vmul.f32 %v14740_v36, %v8384_v53 }
 0xc87   : > { %16936 = vst [vmem:[#allocation11_spill] sm:$0xff] %v14787_v16  ;;  %v14798_v52 = vpop.eup %11216  ;;  %11236 = vrcp.f32 %v14706_v59  ;;  %v16946_v59 = vsub.f32 0.0, %v14574_v12  ;;  %v8361_v1 = vmul.f32 1.0614054, %v14787_v16 }
 0xc88   : > { %16940 = vst [vmem:[#allocation14_spill] sm:$0xff] %v14798_v52  ;;  %v14810_v13 = vmul.f32 %v16943_v2, %v14571_v55  ;;  %v14812_v49 = vpop.eup %11218  ;;  %11238 = vrcp.f32 %v14708_v60  ;;  %v8355_v55 = vmul.f32 1.0614054, %v14755_v48  ;;  %v8385_v2 = vadd.f32 -1.4531521, %v8353_v14 }
 0xc89   : > { %16945 = vst [vmem:[#allocation17_spill] sm:$0xff] %v14812_v49  ;;  %v14818_v29 = vmul.f32 %v16946_v59, %v14574_v12  ;;  %v14825_v62 = vpop.eup %11220  ;;  %11240 = vrcp.f32 %v14710_v40  ;;  %v14830_v60 = vmul.f32 %v14730_v5, %v8382_v3  ;;  %v8356_v12 = vmul.f32 1.0614054, %v14760_v20 }
 0xc8a   : > { %16944 = vst [vmem:[#allocation16_spill] sm:$0xff] %v14810_v13  ;;  %16950 = vst [vmem:[#allocation20_spill] sm:$0xff] %v14825_v62  ;;  %v14832_v0 = vpop.eup %11222  ;;  %11242 = vrcp.f32 %v14712_v22  ;;  %v8357_v59 = vmul.f32 1.0614054, %v14765_v11  ;;  %v8358_v40 = vmul.f32 1.0614054, %v14770_v7  ;;  %v14862_v35 = vmul.f32 %v14745_v63, %v8385_v2 }
 0xc8b   : > { %16947 = vst [vmem:[#allocation18_spill] sm:$0xff] %v14818_v29  ;;  %16951 = vst [vmem:[#allocation21_spill] sm:$0xff] %v14832_v0  ;;  %v14840_v27 = vpop.eup %11224  ;;  %11244 = vrcp.f32 %v14714_v23  ;;  %v8359_v3 = vmul.f32 1.0614054, %v14776_v51  ;;  %v8386_v14 = vadd.f32 -1.4531521, %v8354_v43 }
 0xc8c   : > { %16952 = vst [vmem:[#allocation22_spill] sm:$0xff] %v14840_v27  ;;  %v14845_v46 = vpop.eup %11226  ;;  %11246 = vrcp.f32 %v14716_v44  ;;  %v8360_v22 = vmul.f32 1.0614054, %v14782_v57  ;;  %v8362_v23 = vmul.f32 1.0614054, %v14798_v52 }
 0xc8d   : > { %16953 = vst [vmem:[#allocation23_spill] sm:$0xff] %v14845_v46  ;;  %v14853_v33 = vpop.eup %11228  ;;  %11248 = vrcp.f32 %v14718_v30  ;;  %v8363_v39 = vmul.f32 1.0614054, %v14812_v49  ;;  %v8387_v43 = vadd.f32 -1.4531521, %v8355_v55 }
 0xc8e   : > { %16954 = vst [vmem:[#allocation24_spill] sm:$0xff] %v14853_v33  ;;  %v14858_v58 = vpop.eup %11230  ;;  %11250 = vrcp.f32 %v14720_v28  ;;  %v8388_v44 = vadd.f32 -1.4531521, %v8356_v12  ;;  %v8389_v24 = vadd.f32 -1.4531521, %v8357_v59 }
 0xc8f   : > { %16955 = vst [vmem:[#allocation25_spill] sm:$0xff] %v14858_v58  ;;  %v14864_v53 = vpop.eup %11232  ;;  %11252 = vrcp.f32 %v14722_v56  ;;  %v8364_v30 = vmul.f32 1.0614054, %v14825_v62  ;;  %v8390_v10 = vadd.f32 -1.4531521, %v8358_v40  ;;  %v8418_v56 = vmul.f32 %v14750_v19, %v8386_v14 }
 0xc90   : > { %16956 = vst [vmem:[#allocation26_spill] sm:$0xff] %v14864_v53  ;;  %v8391_v15 = vadd.f32 -1.4531521, %v8359_v3  ;;  %v14868_v9 = vpop.eup %11234  ;;  %11254 = vrcp.f32 %v14724_v8  ;;  %v8365_v55 = vmul.f32 1.0614054, %v14832_v0  ;;  %v8419_v26 = vmul.f32 %v14755_v48, %v8387_v43 }
 0xc91   : > { %16957 = vst [vmem:[#allocation27_spill] sm:$0xff] %v14868_v9  ;;  %v8392_v28 = vadd.f32 -1.4531521, %v8360_v22  ;;  %v8393_v12 = vadd.f32 -1.4531521, %v8361_v1  ;;  %v14872_v59 = vpop.eup %11236  ;;  %v8420_v6 = vmul.f32 %v14760_v20, %v8388_v44 }
 0xc92   : > { %16958 = vst [vmem:[#allocation28_spill] sm:$0xff] %v14872_v59  ;;  %v8366_v2 = vmul.f32 1.0614054, %v14840_v27  ;;  %v8394_v42 = vadd.f32 -1.4531521, %v8362_v23  ;;  %v14876_v34 = vpop.eup %11238  ;;  %v8421_v23 = vmul.f32 %v14765_v11, %v8389_v24  ;;  %v8423_v47 = vmul.f32 %v14776_v51, %v8391_v15 }
 0xc93   : > { %v8395_v32 = vadd.f32 -1.4531521, %v8363_v39  ;;  %16959 = vst [vmem:[#allocation29_spill] sm:$0xff] %v14876_v34  ;;  %v8367_v40 = vmul.f32 1.0614054, %v14845_v46  ;;  %v14882_v22 = vpop.eup %11240  ;;  %v14887_v39 = vmul.f32 %v14770_v7, %v8390_v10  ;;  %v8424_v61 = vmul.f32 %v14782_v57, %v8392_v28 }
 0xc94   : > { %v8368_v3 = vmul.f32 1.0614054, %v14853_v33  ;;  %v8369_v8 = vmul.f32 1.0614054, %v14858_v58  ;;  %16960 = vst [vmem:[#allocation30_spill] sm:$0xff] %v14882_v22  ;;  %v14889_v14 = vpop.eup %11242  ;;  %v8425_v44 = vmul.f32 %v14787_v16, %v8393_v12  ;;  %v8426_v24 = vmul.f32 %v14798_v52, %v8394_v42 }
 0xc95   : > { %v8396_v1 = vadd.f32 -1.4531521, %v8364_v30  ;;  %16961 = vst [vmem:[#allocation31_spill] sm:$0xff] %v14889_v14  ;;  %v8370_v18 = vmul.f32 1.0614054, %v14864_v53  ;;  %v14894_v43 = vpop.eup %11244 }
 0xc96   : > { %v8397_v17 = vadd.f32 -1.4531521, %v8365_v55  ;;  %16962 = vst [vmem:[#allocation32_spill] sm:$0xff] %v14894_v43  ;;  %v8371_v30 = vmul.f32 1.0614054, %v14868_v9  ;;  %v14899_v10 = vpop.eup %11246  ;;  %v8427_v55 = vmul.f32 %v14812_v49, %v8395_v32 }
 0xc97   : > { %v8398_v29 = vadd.f32 -1.4531521, %v8366_v2  ;;  %16963 = vst [vmem:[#allocation33_spill] sm:$0xff] %v14899_v10  ;;  %v8399_v13 = vadd.f32 -1.4531521, %v8367_v40  ;;  %v14902_v37 = vpop.eup %11248  ;;  %v8428_v31 = vmul.f32 %v14825_v62, %v8396_v1 }
 0xc98   : > { %v8400_v41 = vadd.f32 -1.4531521, %v8368_v3  ;;  %v8401_v50 = vadd.f32 -1.4531521, %v8369_v8  ;;  %16964 = vst [vmem:[#allocation34_spill] sm:$0xff] %v14902_v37  ;;  %v14910_v12 = vpop.eup %11250  ;;  %v8429_v3 = vmul.f32 %v14832_v0, %v8397_v17 }
 0xc99   : > { %v8372_v15 = vmul.f32 1.0614054, %v14872_v59  ;;  %v8373_v28 = vmul.f32 1.0614054, %v14876_v34  ;;  %v14908_v2 = vadd.f32 1.4214138, %v14830_v60  ;;  %v14917_v8 = vpop.eup %11252  ;;  %v8430_v60 = vmul.f32 %v14840_v27, %v8398_v29 }
 0xc9a   : > { %16965 = vst [vmem:[#allocation93_spill] sm:$0xff] %v14910_v12  ;;  %v8374_v42 = vmul.f32 1.0614054, %v14882_v22  ;;  %v8402_v40 = vadd.f32 -1.4531521, %v8370_v18  ;;  %16966 = vst [vmem:[#allocation94_spill] sm:$0xff] %v14917_v8  ;;  %v14922_v62 = vpop.eup %11254  ;;  %v8431_v17 = vmul.f32 %v14845_v46, %v8399_v13  ;;  %v8432_v57 = vmul.f32 %v14853_v33, %v8400_v41 }
 0xc9b   : > { %v14915_v32 = vadd.f32 1.4214138, %v14838_v38  ;;  %v8375_v21 = vmul.f32 1.0614054, %v14889_v14  ;;  %v8376_v4 = vmul.f32 1.0614054, %v14894_v43  ;;  %v8433_v29 = vmul.f32 %v14858_v58, %v8401_v50 }
 0xc9c   : > { %v8403_v1 = vadd.f32 -1.4531521, %v8371_v30  ;;  %16967 = vst [vmem:[#allocation95_spill] sm:$0xff] %v14922_v62  ;;  %v8377_v49 = vmul.f32 1.0614054, %v14899_v10  ;;  %v8434_v13 = vmul.f32 %v14864_v53, %v8402_v40 }
 0xc9d   : > { %v8378_v18 = vmul.f32 1.0614054, %v14902_v37  ;;  %v8448_v38 = vadd.f32 1.4214138, %v14851_v54  ;;  %v8379_v0 = vmul.f32 1.0614054, %v14910_v12 }
 0xc9e   : > { %v8404_v52 = vadd.f32 -1.4531521, %v8372_v15  ;;  %v8405_v16 = vadd.f32 -1.4531521, %v8373_v28  ;;  %v8380_v30 = vmul.f32 1.0614054, %v14917_v8  ;;  %v8435_v15 = vmul.f32 %v14868_v9, %v8403_v1 }
 0xc9f   : > { %v8406_v51 = vadd.f32 -1.4531521, %v8374_v42  ;;  %v8449_v27 = vadd.f32 1.4214138, %v14862_v35  ;;  %v8381_v7 = vmul.f32 1.0614054, %v14922_v62 }
 0xca0   : > { %v8407_v11 = vadd.f32 -1.4531521, %v8375_v21  ;;  %v8408_v20 = vadd.f32 -1.4531521, %v8376_v4  ;;  %v8409_v54 = vadd.f32 -1.4531521, %v8377_v49  ;;  %v8436_v41 = vmul.f32 %v14872_v59, %v8404_v52 }
 0xca1   : > { %v8410_v46 = vadd.f32 -1.4531521, %v8378_v18  ;;  %v8450_v28 = vadd.f32 1.4214138, %v8418_v56  ;;  %v8411_v48 = vadd.f32 -1.4531521, %v8379_v0  ;;  %v8437_v42 = vmul.f32 %v14876_v34, %v8405_v16 }
 0xca2   : > { %v8451_v33 = vadd.f32 1.4214138, %v8419_v26  ;;  %v8412_v50 = vadd.f32 -1.4531521, %v8380_v30  ;;  %v8438_v35 = vmul.f32 %v14882_v22, %v8406_v51  ;;  %v8452_v58 = vadd.f32 1.4214138, %v8420_v6 }
 0xca3   : > { %v8453_v19 = vadd.f32 1.4214138, %v8421_v23  ;;  %v8413_v21 = vadd.f32 -1.4531521, %v8381_v7  ;;  %v8439_v4 = vmul.f32 %v14889_v14, %v8407_v11  ;;  %v8440_v49 = vmul.f32 %v14894_v43, %v8408_v20 }
 0xca4   : > { %v8454_v40 = vadd.f32 1.4214138, %v14887_v39  ;;  %v8441_v56 = vmul.f32 %v14899_v10, %v8409_v54  ;;  %v8442_v0 = vmul.f32 %v14902_v37, %v8410_v46  ;;  %v8455_v52 = vadd.f32 1.4214138, %v8423_v47 }
 0xca5   : > { %v8456_v1 = vadd.f32 1.4214138, %v8424_v61  ;;  %v8443_v26 = vmul.f32 %v14910_v12, %v8411_v48  ;;  %v8457_v16 = vadd.f32 1.4214138, %v8425_v44  ;;  %v8458_v18 = vadd.f32 1.4214138, %v8426_v24 }
 0xca6   : > { %v8459_v51 = vadd.f32 1.4214138, %v8427_v55  ;;  %v8444_v6 = vmul.f32 %v14917_v8, %v8412_v50  ;;  %v8460_v7 = vadd.f32 1.4214138, %v8428_v31  ;;  %v8461_v23 = vadd.f32 1.4214138, %v8429_v3 }
 0xca7   : > { %v8462_v11 = vadd.f32 1.4214138, %v8430_v60  ;;  %v8445_v20 = vmul.f32 %v14922_v62, %v8413_v21  ;;  %v8463_v30 = vadd.f32 1.4214138, %v8431_v17  ;;  %v8464_v39 = vadd.f32 1.4214138, %v8432_v57 }
 0xca8   : > { %v8465_v43 = vadd.f32 1.4214138, %v8433_v29  ;;  %v8466_v54 = vadd.f32 1.4214138, %v8434_v13  ;;  %v8467_v10 = vadd.f32 1.4214138, %v8435_v15  ;;  %v8478_v31 = vmul.f32 %v14730_v5, %v14908_v2 }
 0xca9   : > { %v8468_v46 = vadd.f32 1.4214138, %v8436_v41  ;;  %v16968_v47 = vsub.f32 0.0, %v14580_v25  ;;  %v8469_v61 = vadd.f32 1.4214138, %v8437_v42  ;;  %v8479_v57 = vmul.f32 %v14735_v45, %v14915_v32  ;;  %v16970_v41 = vld [vmem:[#allocation65_spill] sm:$0xff] }
 0xcaa   : > { %v8470_v44 = vadd.f32 1.4214138, %v8438_v35  ;;  %v8471_v24 = vadd.f32 1.4214138, %v8439_v4  ;;  %v8472_v55 = vadd.f32 1.4214138, %v8440_v49  ;;  %v8480_v15 = vmul.f32 %v14740_v36, %v8448_v38 }
 0xcab   : > { %v14950_v48 = vmul.f32 %v16968_v47, %v14580_v25  ;;  %v8473_v3 = vadd.f32 1.4214138, %v8441_v56  ;;  %v8474_v60 = vadd.f32 1.4214138, %v8442_v0  ;;  %v8475_v17 = vadd.f32 1.4214138, %v8443_v26 }
 0xcac   : > { %v8476_v29 = vadd.f32 1.4214138, %v8444_v6  ;;  %v8477_v13 = vadd.f32 1.4214138, %v8445_v20  ;;  %v8481_v25 = vmul.f32 %v14745_v63, %v8449_v27  ;;  %v8482_v42 = vmul.f32 %v16970_v41, %v8450_v28  ;;  %v16971_v50 = vld [vmem:[#allocation66_spill] sm:$0xff]  ;;  %v16973_v2 = vld [vmem:[#allocation7_spill] sm:$0xff] }
 0xcad   : > { %16969 = vst [vmem:[#allocation5_spill] sm:$0xff] %v14950_v48  ;;  %v8483_v35 = vmul.f32 %v16971_v50, %v8451_v33  ;;  %v16972_v21 = vld [vmem:[#allocation6_spill] sm:$0xff]  ;;  %v8485_v49 = vmul.f32 %v16973_v2, %v8453_v19  ;;  %v16974_v56 = vld [vmem:[#allocation8_spill] sm:$0xff]  ;;  %v16975_v47 = vld [vmem:[#allocation9_spill] sm:$0xff] }
 0xcae   : > { %v8484_v4 = vmul.f32 %v16972_v21, %v8452_v58  ;;  %v8486_v0 = vmul.f32 %v16974_v56, %v8454_v40  ;;  %v8487_v48 = vmul.f32 %v16975_v47, %v8455_v52  ;;  %v16976_v32 = vld [vmem:[#allocation10_spill] sm:$0xff]  ;;  %v16977_v6 = vld [vmem:[#allocation11_spill] sm:$0xff]  ;;  %v16979_v36 = vld [vmem:[#allocation17_spill] sm:$0xff] }
 0xcaf   : > { %v8488_v26 = vmul.f32 %v16976_v32, %v8456_v1  ;;  %v8489_v20 = vmul.f32 %v16977_v6, %v8457_v16  ;;  %v16978_v45 = vld [vmem:[#allocation14_spill] sm:$0xff]  ;;  %v8491_v27 = vmul.f32 %v16979_v36, %v8459_v51  ;;  %v16980_v63 = vld [vmem:[#allocation20_spill] sm:$0xff]  ;;  %v16981_v41 = vld [vmem:[#allocation21_spill] sm:$0xff]  ;;  %v8498_v1 = vmul.f32 %v14864_v53, %v8466_v54 }
 0xcb0   : > { %v8490_v38 = vmul.f32 %v16978_v45, %v8458_v18  ;;  %v8492_v28 = vmul.f32 %v16980_v63, %v8460_v7  ;;  %v8493_v33 = vmul.f32 %v16981_v41, %v8461_v23  ;;  %v16982_v50 = vld [vmem:[#allocation22_spill] sm:$0xff]  ;;  %v16983_v21 = vld [vmem:[#allocation23_spill] sm:$0xff]  ;;  %v16984_v2 = vld [vmem:[#allocation24_spill] sm:$0xff]  ;;  %v8499_v16 = vmul.f32 %v14868_v9, %v8467_v10 }
 0xcb1   : > { %v8494_v58 = vmul.f32 %v16982_v50, %v8462_v11  ;;  %v8495_v19 = vmul.f32 %v16983_v21, %v8463_v30  ;;  %v8496_v40 = vmul.f32 %v16984_v2, %v8464_v39  ;;  %v16985_v56 = vld [vmem:[#allocation25_spill] sm:$0xff]  ;;  %v8500_v18 = vmul.f32 %v14872_v59, %v8468_v46  ;;  %v16986_v11 = vld [vmem:[#allocation32_spill] sm:$0xff] }
 0xcb2   : > { %v8497_v52 = vmul.f32 %v16985_v56, %v8465_v43  ;;  %v8501_v51 = vmul.f32 %v14876_v34, %v8469_v61  ;;  %v8502_v7 = vmul.f32 %v14882_v22, %v8470_v44  ;;  %v8503_v23 = vmul.f32 %v14889_v14, %v8471_v24  ;;  %v16987_v30 = vld [vmem:[#allocation33_spill] sm:$0xff]  ;;  %v16988_v22 = vld [vmem:[#allocation104_spill] sm:$0xff] }
 0xcb3   : > { %v8510_v41 = vadd.f32 -0.28449672, %v8478_v31  ;;  %v8504_v50 = vmul.f32 %v16986_v11, %v8472_v55  ;;  %v8505_v21 = vmul.f32 %v16987_v30, %v8473_v3  ;;  %v8506_v39 = vmul.f32 %v14902_v37, %v8474_v60 }
 0xcb4   : > { %v8511_v43 = vadd.f32 -0.28449672, %v8479_v57  ;;  %v8507_v54 = vmul.f32 %v14910_v12, %v8475_v17  ;;  %v8508_v10 = vmul.f32 %v14917_v8, %v8476_v29  ;;  %v8509_v46 = vmul.f32 %v14922_v62, %v8477_v13  ;;  %v16991_v29 = vld [vmem:[#allocation62_spill] sm:$0xff] }
 0xcb5   : > { %v8512_v59 = vadd.f32 -0.28449672, %v8480_v15  ;;  %v8513_v61 = vadd.f32 -0.28449672, %v8481_v25  ;;  %v8514_v34 = vadd.f32 -0.28449672, %v8482_v42  ;;  %v8542_v60 = vmul.f32 %v14730_v5, %v8510_v41 }
 0xcb6   : > { %v8515_v44 = vadd.f32 -0.28449672, %v8483_v35  ;;  %v16989_v24 = vsub.f32 0.0, %v16988_v22  ;;  %v8516_v55 = vadd.f32 -0.28449672, %v8484_v4  ;;  %v8543_v8 = vmul.f32 %v16991_v29, %v8511_v43  ;;  %v16992_v42 = vld [vmem:[#allocation63_spill] sm:$0xff] }
 0xcb7   : > { %v8517_v3 = vadd.f32 -0.28449672, %v8485_v49  ;;  %v8518_v30 = vadd.f32 -0.28449672, %v8486_v0  ;;  %v8519_v57 = vadd.f32 -0.28449672, %v8487_v48  ;;  %v8544_v35 = vmul.f32 %v16992_v42, %v8512_v59 }
 0xcb8   : > { %v14989_v31 = vmul.f32 %v16989_v24, %v16988_v22  ;;  %v8520_v17 = vadd.f32 -0.28449672, %v8488_v26  ;;  %v8521_v12 = vadd.f32 -0.28449672, %v8489_v20  ;;  %v8522_v13 = vadd.f32 -0.28449672, %v8490_v38 }
 0xcb9   : > { %v8523_v15 = vadd.f32 -0.28449672, %v8491_v27  ;;  %v8524_v25 = vadd.f32 -0.28449672, %v8492_v28  ;;  %v8525_v62 = vadd.f32 -0.28449672, %v8493_v33 }
 0xcba   : > { %16990 = vst [vmem:[#allocation4_spill] sm:$0xff] %v14989_v31  ;;  %v8526_v37 = vadd.f32 -0.28449672, %v8494_v58  ;;  %v8527_v11 = vadd.f32 -0.28449672, %v8495_v19  ;;  %v16993_v22 = vld [vmem:[#allocation64_spill] sm:$0xff] }
 0xcbb   : > { %v8545_v24 = vmul.f32 %v16993_v22, %v8513_v61  ;;  %v8528_v4 = vadd.f32 -0.28449672, %v8496_v40  ;;  %v8529_v49 = vadd.f32 -0.28449672, %v8497_v52  ;;  %v8530_v0 = vadd.f32 -0.28449672, %v8498_v1 }
 0xcbc   : > { %v16994_v31 = vld [vmem:[#allocation65_spill] sm:$0xff]  ;;  %v8531_v48 = vadd.f32 -0.28449672, %v8499_v16  ;;  %v8532_v26 = vadd.f32 -0.28449672, %v8500_v18  ;;  %v16995_v5 = vld [vmem:[#allocation66_spill] sm:$0xff]  ;;  %v8552_v16 = vmul.f32 %v16976_v32, %v8520_v17  ;;  %v8553_v18 = vmul.f32 %v16977_v6, %v8521_v12 }
 0xcbd   : > { %v8546_v41 = vmul.f32 %v16994_v31, %v8514_v34  ;;  %v8533_v20 = vadd.f32 -0.28449672, %v8501_v51  ;;  %v8547_v43 = vmul.f32 %v16995_v5, %v8515_v44  ;;  %v8534_v38 = vadd.f32 -0.28449672, %v8502_v7  ;;  %v16996_v29 = vld [vmem:[#allocation6_spill] sm:$0xff]  ;;  %v16997_v42 = vld [vmem:[#allocation7_spill] sm:$0xff] }
 0xcbe   : > { %v8535_v27 = vadd.f32 -0.28449672, %v8503_v23  ;;  %v8536_v28 = vadd.f32 -0.28449672, %v8504_v50  ;;  %v8548_v59 = vmul.f32 %v16996_v29, %v8516_v55  ;;  %v8537_v33 = vadd.f32 -0.28449672, %v8505_v21 }
 0xcbf   : > { %v8538_v58 = vadd.f32 -0.28449672, %v8506_v39  ;;  %v8539_v19 = vadd.f32 -0.28449672, %v8507_v54  ;;  %v8549_v61 = vmul.f32 %v16997_v42, %v8517_v3  ;;  %v8540_v40 = vadd.f32 -0.28449672, %v8508_v10 }
 0xcc0   : > { %v8541_v52 = vadd.f32 -0.28449672, %v8509_v46  ;;  %v16998_v1 = vld [vmem:[#allocation8_spill] sm:$0xff]  ;;  %v8551_v34 = vmul.f32 %v16975_v47, %v8519_v57  ;;  %v8554_v51 = vmul.f32 %v16978_v45, %v8522_v13  ;;  %v8555_v50 = vmul.f32 %v16979_v36, %v8523_v15  ;;  %v16999_v7 = vld [vmem:[#allocation21_spill] sm:$0xff]  ;;  %v17000_v39 = vld [vmem:[#allocation22_spill] sm:$0xff] }
 0xcc1   : > { %v8550_v22 = vmul.f32 %v16998_v1, %v8518_v30  ;;  %v8556_v21 = vmul.f32 %v16980_v63, %v8524_v25  ;;  %v8557_v23 = vmul.f32 %v16999_v7, %v8525_v62  ;;  %v8558_v54 = vmul.f32 %v17000_v39, %v8526_v37  ;;  %v17001_v10 = vld [vmem:[#allocation23_spill] sm:$0xff]  ;;  %v17002_v3 = vld [vmem:[#allocation28_spill] sm:$0xff]  ;;  %v17003_v17 = vld [vmem:[#allocation29_spill] sm:$0xff] }
 0xcc2   : > { %v8559_v46 = vmul.f32 %v17001_v10, %v8527_v11  ;;  %v8560_v30 = vmul.f32 %v16984_v2, %v8528_v4  ;;  %v8561_v44 = vmul.f32 %v16985_v56, %v8529_v49  ;;  %v8562_v55 = vmul.f32 %v14864_v53, %v8530_v0  ;;  %v17004_v15 = vld [vmem:[#allocation30_spill] sm:$0xff]  ;;  %v17005_v7 = vld [vmem:[#allocation32_spill] sm:$0xff]  ;;  %v17006_v39 = vld [vmem:[#allocation33_spill] sm:$0xff] }
 0xcc3   : > { %v8563_v12 = vmul.f32 %v14868_v9, %v8531_v48  ;;  %v8564_v57 = vmul.f32 %v17002_v3, %v8532_v26  ;;  %v8565_v13 = vmul.f32 %v17003_v17, %v8533_v20  ;;  %v8566_v25 = vmul.f32 %v17004_v15, %v8534_v38  ;;  %v17007_v10 = vld [vmem:[#allocation34_spill] sm:$0xff]  ;;  %v17008_v49 = vld [vmem:[#allocation93_spill] sm:$0xff]  ;;  %v17010_v48 = vld [vmem:[#allocation95_spill] sm:$0xff] }
 0xcc4   : > { %v8567_v62 = vmul.f32 %v14889_v14, %v8535_v27  ;;  %v8568_v37 = vmul.f32 %v17005_v7, %v8536_v28  ;;  %v8569_v11 = vmul.f32 %v17006_v39, %v8537_v33  ;;  %v8570_v4 = vmul.f32 %v17007_v10, %v8538_v58  ;;  %v17009_v0 = vld [vmem:[#allocation94_spill] sm:$0xff]  ;;  %v17011_v38 = vld [vmem:[#allocation47_spill] sm:$0xff]  ;;  %v17014_v58 = vld [vmem:[#allocation120_spill] sm:$0xff] }
 0xcc5   : > { %v8574_v2 = vadd.f32 0.2548296, %v8542_v60  ;;  %v8571_v56 = vmul.f32 %v17008_v49, %v8539_v19  ;;  %v8572_v53 = vmul.f32 %v17009_v0, %v8540_v40  ;;  %v8573_v9 = vmul.f32 %v17010_v48, %v8541_v52  ;;  %v17017_v49 = vld [vmem:[#allocation62_spill] sm:$0xff] }
 0xcc6   : > { %v8575_v26 = vadd.f32 0.2548296, %v8543_v8  ;;  %v8576_v3 = vadd.f32 0.2548296, %v8544_v35  ;;  %v8577_v20 = vadd.f32 0.2548296, %v8545_v24 }
 0xcc7   : > { %v8578_v17 = vadd.f32 0.2548296, %v8546_v41  ;;  %v17012_v27 = vsub.f32 0.0, %v17011_v38  ;;  %v8579_v28 = vadd.f32 0.2548296, %v8547_v43  ;;  %v17015_v60 = vsub.f32 0.0, %v17014_v58 }
 0xcc8   : > { %v8580_v33 = vadd.f32 0.2548296, %v8548_v59  ;;  %v8581_v39 = vadd.f32 0.2548296, %v8549_v61  ;;  %v8582_v40 = vadd.f32 0.2548296, %v8550_v22 }
 0xcc9   : > { %v15026_v14 = vmul.f32 %v17012_v27, %v17011_v38  ;;  %v15031_v19 = vmul.f32 %v17015_v60, %v17014_v58  ;;  %v8583_v0 = vadd.f32 0.2548296, %v8551_v34  ;;  %v8584_v52 = vadd.f32 0.2548296, %v8552_v16  ;;  %v17016_v8 = vld [vmem:[#allocation61_spill] sm:$0xff]  ;;  %v17018_v27 = vld [vmem:[#allocation63_spill] sm:$0xff] }
 0xcca   : > { %v15034_v35 = vmul.f32 %v17016_v8, %v8574_v2  ;;  %v8585_v24 = vadd.f32 0.2548296, %v8553_v18  ;;  %v8586_v41 = vadd.f32 0.2548296, %v8554_v51  ;;  %v8587_v48 = vadd.f32 0.2548296, %v8555_v50 }
 0xccb   : > { %17013 = vst [vmem:[#allocation9_spill] sm:$0xff] %v15026_v14  ;;  %v15037_v38 = vmul.f32 %v17017_v49, %v8575_v26  ;;  %v8588_v43 = vadd.f32 0.2548296, %v8556_v21  ;;  %v8589_v59 = vadd.f32 0.2548296, %v8557_v23  ;;  %v15040_v14 = vmul.f32 %v17018_v27, %v8576_v3  ;;  %v17019_v34 = vld [vmem:[#allocation64_spill] sm:$0xff] }
 0xccc   : > { %v8590_v61 = vadd.f32 0.2548296, %v8558_v54  ;;  %v8591_v58 = vadd.f32 0.2548296, %v8559_v46  ;;  %v8592_v60 = vadd.f32 0.2548296, %v8560_v30  ;;  %v15043_v16 = vmul.f32 %v17019_v34, %v8577_v20 }
 0xccd   : > { %v8593_v22 = vadd.f32 0.2548296, %v8561_v44  ;;  %v8594_v2 = vadd.f32 0.2548296, %v8562_v55  ;;  %v8595_v8 = vadd.f32 0.2548296, %v8563_v12  ;;  %v15046_v51 = vmul.f32 %v16994_v31, %v8578_v17 }
 0xcce   : > { %v8596_v18 = vadd.f32 0.2548296, %v8564_v57  ;;  %v8597_v50 = vadd.f32 0.2548296, %v8565_v13  ;;  %v8598_v49 = vadd.f32 0.2548296, %v8566_v25  ;;  %v15049_v23 = vmul.f32 %v16995_v5, %v8579_v28 }
 0xccf   : > { %v8599_v21 = vadd.f32 0.2548296, %v8567_v62  ;;  %v8600_v54 = vadd.f32 0.2548296, %v8568_v37  ;;  %v8601_v3 = vadd.f32 0.2548296, %v8569_v11  ;;  %v15052_v30 = vmul.f32 %v16996_v29, %v8580_v33 }
 0xcd0   : > { %v8602_v46 = vadd.f32 0.2548296, %v8570_v4  ;;  %v8603_v44 = vadd.f32 0.2548296, %v8571_v56  ;;  %v8604_v26 = vadd.f32 0.2548296, %v8572_v53  ;;  %v15055_v12 = vmul.f32 %v16997_v42, %v8581_v39 }
 0xcd1   : > { %v8605_v55 = vadd.f32 0.2548296, %v8573_v9  ;;  %v15058_v31 = vmul.f32 %v16998_v1, %v8582_v40  ;;  %v15061_v57 = vmul.f32 %v16975_v47, %v8583_v0  ;;  %v15064_v5 = vmul.f32 %v16976_v32, %v8584_v52  ;;  %v17020_v56 = vld [vmem:[#allocation21_spill] sm:$0xff]  ;;  %v17021_v47 = vld [vmem:[#allocation22_spill] sm:$0xff]  ;;  %v17022_v32 = vld [vmem:[#allocation23_spill] sm:$0xff] }
 0xcd2   : > { %v15067_v17 = vmul.f32 %v16977_v6, %v8585_v24  ;;  %v15070_v29 = vmul.f32 %v16978_v45, %v8586_v41  ;;  %v15073_v9 = vmul.f32 %v16979_v36, %v8587_v48  ;;  %v15076_v53 = vmul.f32 %v16980_v63, %v8588_v43  ;;  %v17023_v6 = vld [vmem:[#allocation24_spill] sm:$0xff]  ;;  %v17024_v45 = vld [vmem:[#allocation25_spill] sm:$0xff]  ;;  %v17025_v36 = vld [vmem:[#allocation26_spill] sm:$0xff] }
 0xcd3   : > { %v15079_v42 = vmul.f32 %v17020_v56, %v8589_v59  ;;  %v15082_v1 = vmul.f32 %v17021_v47, %v8590_v61  ;;  %v15085_v39 = vmul.f32 %v17022_v32, %v8591_v58  ;;  %v15088_v13 = vmul.f32 %v17023_v6, %v8592_v60  ;;  %v17026_v63 = vld [vmem:[#allocation12_spill] sm:$0xff]  ;;  %v17027_v11 = vld [vmem:[#allocation13_spill] sm:$0xff]  ;;  %v17028_v0 = vld [vmem:[#allocation15_spill] sm:$0xff] }
 0xcd4   : > { %v15091_v25 = vmul.f32 %v17024_v45, %v8593_v22  ;;  %v15094_v62 = vmul.f32 %v17025_v36, %v8594_v2  ;;  %v8702_v37 = vmul.f32 1.442695, %v17026_v63  ;;  %v8704_v4 = vmul.f32 1.442695, %v17027_v11  ;;  %v17029_v20 = vld [vmem:[#allocation27_spill] sm:$0xff]  ;;  %v17030_v33 = vld [vmem:[#allocation28_spill] sm:$0xff] }
 0xcd5   : > { %v8706_v48 = vmul.f32 1.442695, %v17028_v0  ;;  %v15100_v28 = vmul.f32 %v17029_v20, %v8595_v8  ;;  %v15103_v40 = vmul.f32 %v17030_v33, %v8596_v18  ;;  %v17031_v52 = vld [vmem:[#allocation29_spill] sm:$0xff]  ;;  %v17032_v41 = vld [vmem:[#allocation16_spill] sm:$0xff]  ;;  %v15110_v59 = vmul.f32 %v17004_v15, %v8598_v49  ;;  %v17033_v61 = vld [vmem:[#allocation31_spill] sm:$0xff] }
 0xcd6   : > { %v15106_v24 = vmul.f32 %v17031_v52, %v8597_v50  ;;  %v8708_v43 = vmul.f32 1.442695, %v17032_v41  ;;  %v15113_v27 = vmul.f32 %v17033_v61, %v8599_v21  ;;  %11256 = vpow2.f32 %v8702_v37  ;;  %v17034_v58 = vld [vmem:[#allocation18_spill] sm:$0xff]  ;;  %v17036_v34 = vld [vmem:[#allocation33_spill] sm:$0xff]  ;;  %v17038_v8 = vld [vmem:[#allocation19_spill] sm:$0xff] }
 0xcd7   : > { %v8710_v60 = vmul.f32 1.442695, %v17034_v58  ;;  %v15117_v22 = vmul.f32 %v17005_v7, %v8600_v54  ;;  %v15120_v2 = vmul.f32 %v17036_v34, %v8601_v3  ;;  %11258 = vpow2.f32 %v8704_v4  ;;  %v17040_v15 = vld [vmem:[#allocation105_spill] sm:$0xff]  ;;  %v17045_v7 = vld [vmem:[#allocation48_spill] sm:$0xff]  ;;  %v17048_v63 = vld [vmem:[#allocation94_spill] sm:$0xff] }
 0xcd8   : > { %v8712_v18 = vmul.f32 1.442695, %v17038_v8  ;;  %v15124_v50 = vmul.f32 %v17007_v10, %v8602_v46  ;;  %v17041_v49 = vsub.f32 0.0, %v17040_v15  ;;  %11260 = vpow2.f32 %v8706_v48  ;;  %v17042_v56 = vld [vmem:[#allocation5_spill] sm:$0xff]  ;;  %v17047_v45 = vld [vmem:[#allocation4_spill] sm:$0xff]  ;;  %v17053_v48 = vld [vmem:[#allocation95_spill] sm:$0xff] }
 0xcd9   : > { %17035 = vst [vmem:[#allocation10_spill] sm:$0xff] %v15117_v22  ;;  %17037 = vst [vmem:[#allocation11_spill] sm:$0xff] %v15120_v2  ;;  %v8714_v47 = vmul.f32 1.442695, %v17042_v56  ;;  %v17043_v32 = vld [vmem:[#allocation93_spill] sm:$0xff]  ;;  %v17046_v54 = vsub.f32 0.0, %v17045_v7  ;;  %11262 = vpow2.f32 %v8708_v43  ;;  %v15138_v10 = vmul.f32 %v17048_v63, %v8604_v26 }
 0xcda   : > { %17039 = vst [vmem:[#allocation14_spill] sm:$0xff] %v15124_v50  ;;  %v8680_v21 = vmul.f32 %v17041_v49, %v17040_v15  ;;  %v15131_v6 = vmul.f32 %v17043_v32, %v8603_v44  ;;  %v8716_v36 = vmul.f32 1.442695, %v17047_v45  ;;  %v17050_v46 = vld [vmem:[#allocation116_spill] sm:$0xff]  ;;  %11264 = vpow2.f32 %v8710_v60  ;;  %v17052_v4 = vld [vmem:[#allocation9_spill] sm:$0xff]  ;;  %v17057_v43 = vld [vmem:[#allocation118_spill] sm:$0xff] }
 0xcdb   : > { %v8681_v3 = vmul.f32 %v17046_v54, %v17045_v7  ;;  %17049 = vst [vmem:[#allocation20_spill] sm:$0xff] %v15138_v10  ;;  %v17051_v37 = vsub.f32 0.0, %v17050_v46  ;;  %v8718_v0 = vmul.f32 1.442695, %v17052_v4  ;;  %v15145_v44 = vmul.f32 %v17053_v48, %v8605_v55  ;;  %v17055_v20 = vld [vmem:[#allocation49_spill] sm:$0xff]  ;;  %v17059_v58 = vld [vmem:[#allocation50_spill] sm:$0xff] }
 0xcdc   : > { %17044 = vst [vmem:[#allocation17_spill] sm:$0xff] %v15131_v6  ;;  %v17056_v33 = vsub.f32 0.0, %v17055_v20  ;;  %11266 = vpow2.f32 %v8712_v18  ;;  %v8720_v41 = vmul.f32 1.442695, %v15031_v19  ;;  %v17058_v26 = vsub.f32 0.0, %v17057_v43  ;;  %v17061_v15 = vld [vmem:[#allocation129_spill] sm:$0xff] }
 0xcdd   : > { %v8682_v11 = vmul.f32 %v17051_v37, %v17050_v46  ;;  %17054 = vst [vmem:[#allocation104_spill] sm:$0xff] %v15145_v44  ;;  %v17060_v34 = vsub.f32 0.0, %v17059_v58  ;;  %11268 = vpow2.f32 %v8714_v47  ;;  %v8722_v8 = vmul.f32 1.442695, %v8680_v21  ;;  %v17063_v56 = vld [vmem:[#allocation51_spill] sm:$0xff]  ;;  %v17065_v7 = vld [vmem:[#allocation68_spill] sm:$0xff] }
 0xcde   : > { %v8683_v52 = vmul.f32 %v17056_v33, %v17055_v20  ;;  %v8684_v61 = vmul.f32 %v17058_v26, %v17057_v43  ;;  %v17062_v55 = vsub.f32 0.0, %v17061_v15  ;;  %v17064_v32 = vsub.f32 0.0, %v17063_v56  ;;  %v17067_v63 = vld [vmem:[#allocation52_spill] sm:$0xff]  ;;  %v17069_v47 = vld [vmem:[#allocation69_spill] sm:$0xff]  ;;  %v17091_v6 = vld [vmem:[#allocation58_spill] sm:$0xff] }
 0xcdf   : > { %v8685_v60 = vmul.f32 %v17060_v34, %v17059_v58  ;;  %11270 = vpow2.f32 %v8716_v36  ;;  %v8724_v19 = vmul.f32 1.442695, %v8681_v3  ;;  %v17066_v54 = vsub.f32 0.0, %v17065_v7  ;;  %v17071_v20 = vld [vmem:[#allocation53_spill] sm:$0xff]  ;;  %v17073_v26 = vld [vmem:[#allocation96_spill] sm:$0xff] }
 0xce0   : > { %v8686_v49 = vmul.f32 %v17062_v55, %v17061_v15  ;;  %v8687_v18 = vmul.f32 %v17064_v32, %v17063_v56  ;;  %v17068_v46 = vsub.f32 0.0, %v17067_v63  ;;  %11272 = vpow2.f32 %v8718_v0  ;;  %v11257_v36 = vpop.eup %11256  ;;  %v17075_v15 = vld [vmem:[#allocation54_spill] sm:$0xff]  ;;  %v17077_v32 = vld [vmem:[#allocation97_spill] sm:$0xff]  ;;  %v17089_v10 = vld [vmem:[#allocation108_spill] sm:$0xff] }
 0xce1   : > { %v8688_v45 = vmul.f32 %v17066_v54, %v17065_v7  ;;  %v8726_v21 = vmul.f32 1.442695, %v8682_v11  ;;  %v17070_v4 = vsub.f32 0.0, %v17069_v47  ;;  %v17072_v33 = vsub.f32 0.0, %v17071_v20  ;;  %v11259_v56 = vpop.eup %11258  ;;  %v17087_v44 = vld [vmem:[#allocation57_spill] sm:$0xff] }
 0xce2   : > { %v8689_v37 = vmul.f32 %v17068_v46, %v17067_v63  ;;  %11274 = vpow2.f32 %v8720_v41  ;;  %v8728_v3 = vmul.f32 1.442695, %v8683_v52  ;;  %v17074_v58 = vsub.f32 0.0, %v17073_v26  ;;  %v17079_v63 = vld [vmem:[#allocation55_spill] sm:$0xff] }
 0xce3   : > { %v8690_v48 = vmul.f32 %v17070_v4, %v17069_v47  ;;  %v8691_v43 = vmul.f32 %v17072_v33, %v17071_v20  ;;  %v17076_v55 = vsub.f32 0.0, %v17075_v15  ;;  %11276 = vpow2.f32 %v8722_v8  ;;  %v11261_v47 = vpop.eup %11260  ;;  %v17081_v4 = vld [vmem:[#allocation98_spill] sm:$0xff] }
 0xce4   : > { %v8692_v34 = vmul.f32 %v17074_v58, %v17073_v26  ;;  %v8730_v11 = vmul.f32 1.442695, %v8684_v61  ;;  %v17078_v7 = vsub.f32 0.0, %v17077_v32  ;;  %v17080_v41 = vsub.f32 0.0, %v17079_v63  ;;  %v17083_v26 = vld [vmem:[#allocation56_spill] sm:$0xff] }
 0xce5   : > { %v8693_v0 = vmul.f32 %v17076_v55, %v17075_v15  ;;  %11278 = vpow2.f32 %v8724_v19  ;;  %v8732_v46 = vmul.f32 1.442695, %v8685_v60  ;;  %v17082_v20 = vsub.f32 0.0, %v17081_v4  ;;  %v11263_v15 = vpop.eup %11262  ;;  %v17085_v55 = vld [vmem:[#allocation99_spill] sm:$0xff] }
 0xce6   : > { %v8694_v54 = vmul.f32 %v17078_v7, %v17077_v32  ;;  %v8695_v52 = vmul.f32 %v17080_v41, %v17079_v63  ;;  %v17084_v8 = vsub.f32 0.0, %v17083_v26  ;;  %11280 = vpow2.f32 %v8726_v21  ;;  %v11265_v41 = vpop.eup %11264 }
 0xce7   : > { %v8696_v33 = vmul.f32 %v17082_v20, %v17081_v4  ;;  %v8734_v58 = vmul.f32 1.442695, %v8686_v49  ;;  %v17086_v32 = vsub.f32 0.0, %v17085_v55  ;;  %v17088_v19 = vsub.f32 0.0, %v17087_v44 }
 0xce8   : > { %v8697_v61 = vmul.f32 %v17084_v8, %v17083_v26  ;;  %11282 = vpow2.f32 %v8728_v3  ;;  %v8736_v63 = vmul.f32 1.442695, %v8687_v18  ;;  %v17090_v4 = vsub.f32 0.0, %v17089_v10  ;;  %v11267_v8 = vpop.eup %11266 }
 0xce9   : > { %v8698_v7 = vmul.f32 %v17086_v32, %v17085_v55  ;;  %v8699_v60 = vmul.f32 %v17088_v19, %v17087_v44  ;;  %v17092_v21 = vsub.f32 0.0, %v17091_v6  ;;  %11284 = vpow2.f32 %v8730_v11  ;;  %v11269_v2 = vpop.eup %11268 }
 0xcea   : > { %v8700_v20 = vmul.f32 %v17090_v4, %v17089_v10  ;;  %v8738_v26 = vmul.f32 1.442695, %v8688_v45  ;;  %11286 = vpow2.f32 %v8732_v46  ;;  %v8740_v55 = vmul.f32 1.442695, %v8689_v37  ;;  %v11271_v19 = vpop.eup %11270 }
 0xceb   : > { %v8701_v49 = vmul.f32 %v17092_v21, %v17091_v6  ;;  %v8742_v32 = vmul.f32 1.442695, %v8690_v48  ;;  %v8744_v50 = vmul.f32 1.442695, %v8691_v43  ;;  %11288 = vpow2.f32 %v8734_v58  ;;  %v11273_v6 = vpop.eup %11272 }
 0xcec   : > { %v8746_v44 = vmul.f32 1.442695, %v8692_v34  ;;  %v8748_v18 = vmul.f32 1.442695, %v8693_v0  ;;  %v8750_v3 = vmul.f32 1.442695, %v8694_v54  ;;  %11290 = vpow2.f32 %v8736_v63  ;;  %v11275_v48 = vpop.eup %11274 }
 0xced   : > { %v8752_v22 = vmul.f32 1.442695, %v8695_v52  ;;  %v8754_v10 = vmul.f32 1.442695, %v8696_v33  ;;  %v15206_v4 = vmul.f32 %v11257_v36, %v15034_v35  ;;  %11292 = vpow2.f32 %v8738_v26  ;;  %v11277_v35 = vpop.eup %11276 }
 0xcee   : > { %v8756_v45 = vmul.f32 1.442695, %v8697_v61  ;;  %v15209_v11 = vmul.f32 %v11259_v56, %v15037_v38  ;;  %v15212_v37 = vmul.f32 %v11261_v47, %v15040_v14  ;;  %11294 = vpow2.f32 %v8740_v55 }
 0xcef   : > { %v8758_v43 = vmul.f32 1.442695, %v8698_v7  ;;  %v15215_v34 = vmul.f32 %v11263_v15, %v15043_v16  ;;  %v15218_v0 = vmul.f32 %v11265_v41, %v15046_v51  ;;  %11296 = vpow2.f32 %v8742_v32  ;;  %v11279_v38 = vpop.eup %11278 }
 0xcf0   : > { %v8760_v36 = vmul.f32 1.442695, %v8699_v60  ;;  %v8762_v54 = vmul.f32 1.442695, %v8700_v20  ;;  %v15221_v52 = vmul.f32 %v11267_v8, %v15049_v23  ;;  %11298 = vpow2.f32 %v8744_v50  ;;  %v11281_v16 = vpop.eup %11280 }
 0xcf1   : > { %v8764_v14 = vmul.f32 1.442695, %v8701_v49  ;;  %v15224_v56 = vmul.f32 %v11269_v2, %v15052_v30  ;;  %v16107_v46 = vsub.f32 1.0, %v15206_v4  ;;  %11300 = vpow2.f32 %v8746_v44 }
 0xcf2   : > { %v15228_v51 = vmul.f32 %v11271_v19, %v15055_v12  ;;  %v16106_v47 = vsub.f32 1.0, %v15209_v11  ;;  %v16105_v33 = vsub.f32 1.0, %v15212_v37  ;;  %v11283_v61 = vpop.eup %11282  ;;  %11302 = vpow2.f32 %v8748_v18  ;;  %v17137_v18 = vld [vmem:[#allocation104_spill] sm:$0xff] }
 0xcf3   : > { %v15233_v23 = vmul.f32 %v11273_v6, %v15058_v31  ;;  %v16104_v50 = vsub.f32 1.0, %v15215_v34  ;;  %v16101_v30 = vsub.f32 1.0, %v15218_v0  ;;  %v11285_v2 = vpop.eup %11284  ;;  %11304 = vpow2.f32 %v8750_v3 }
 0xcf4   : > { %v15238_v58 = vmul.f32 %v11275_v48, %v15061_v57  ;;  %v15241_v12 = vmul.f32 %v11277_v35, %v15064_v5  ;;  %v16100_v15 = vsub.f32 1.0, %v15221_v52  ;;  %v11287_v7 = vpop.eup %11286  ;;  %11306 = vpow2.f32 %v8752_v22 }
 0xcf5   : > { %v15245_v60 = vmul.f32 %v11279_v38, %v15067_v17  ;;  %v15248_v31 = vmul.f32 %v11281_v16, %v15070_v29  ;;  %v16102_v63 = vsub.f32 1.0, %v15224_v56  ;;  %v11289_v41 = vpop.eup %11288  ;;  %11308 = vpow2.f32 %v8754_v10  ;;  %v17118_v16 = vld [vmem:[#allocation89_spill] sm:$0xff] }
 0xcf6   : > { %v15252_v57 = vmul.f32 %v11283_v61, %v15073_v9  ;;  %v15255_v5 = vmul.f32 %v11285_v2, %v15076_v53  ;;  %v16103_v20 = vsub.f32 1.0, %v15228_v51  ;;  %v11291_v21 = vpop.eup %11290  ;;  %11310 = vpow2.f32 %v8756_v45 }
 0xcf7   : > { %17093 = vst [vmem:[#allocation65_spill] sm:$0xff] %v15245_v60  ;;  %17094 = vst [vmem:[#allocation66_spill] sm:$0xff] %v15248_v31  ;;  %v15259_v17 = vmul.f32 %v11287_v7, %v15079_v42  ;;  %v15262_v29 = vmul.f32 %v11289_v41, %v15082_v1  ;;  %v16108_v22 = vsub.f32 1.0, %v15233_v23  ;;  %v11293_v49 = vpop.eup %11292  ;;  %11312 = vpow2.f32 %v8758_v43  ;;  %v17117_v41 = vld [vmem:[#allocation88_spill] sm:$0xff]  ;;  %v17120_v43 = vld [vmem:[#allocation91_spill] sm:$0xff] }
 0xcf8   : > { %17095 = vst [vmem:[#allocation6_spill] sm:$0xff] %v15252_v57  ;;  %17096 = vst [vmem:[#allocation7_spill] sm:$0xff] %v15255_v5  ;;  %v15266_v9 = vmul.f32 %v11291_v21, %v15085_v39  ;;  %v16109_v53 = vsub.f32 1.0, %v15238_v58  ;;  %v16110_v26 = vsub.f32 1.0, %v15241_v12  ;;  %v11295_v8 = vpop.eup %11294  ;;  %11314 = vpow2.f32 %v8760_v36 }
 0xcf9   : > { %17097 = vst [vmem:[#allocation8_spill] sm:$0xff] %v15259_v17  ;;  %17098 = vst [vmem:[#allocation30_spill] sm:$0xff] %v15262_v29  ;;  %v15271_v55 = vmul.f32 %v11293_v49, %v15088_v13  ;;  %v16111_v42 = vsub.f32 1.0, %v15245_v60  ;;  %v16112_v1 = vsub.f32 1.0, %v15248_v31  ;;  %v11297_v32 = vpop.eup %11296  ;;  %11316 = vpow2.f32 %v8762_v54 }
 0xcfa   : > { %17099 = vst [vmem:[#allocation32_spill] sm:$0xff] %v15266_v9  ;;  %v15276_v44 = vmul.f32 %v11295_v8, %v15091_v25  ;;  %v16114_v39 = vsub.f32 1.0, %v15252_v57  ;;  %v11299_v3 = vpop.eup %11298  ;;  %11318 = vpow2.f32 %v8764_v14  ;;  %v15281_v19 = vmul.f32 %v11297_v32, %v15094_v62  ;;  %v17119_v62 = vld [vmem:[#allocation90_spill] sm:$0xff] }
 0xcfb   : > { %17100 = vst [vmem:[#allocation34_spill] sm:$0xff] %v15271_v55  ;;  %v11301_v6 = vpop.eup %11300  ;;  %v15286_v45 = vmul.f32 %v11299_v3, %v15100_v28  ;;  %v15297_v54 = vsub.f32 0.0, %v16107_v46  ;;  %v15301_v28 = vsub.f32 0.0, %v16106_v47  ;;  %v15313_v61 = vsub.f32 0.0, %v16104_v50  ;;  %v17110_v50 = vld [vmem:[#allocation11_spill] sm:$0xff]  ;;  %v17112_v47 = vld [vmem:[#allocation85_spill] sm:$0xff] }
 0xcfc   : > { %17101 = vst [vmem:[#allocation47_spill] sm:$0xff] %v15276_v44  ;;  %17102 = vst [vmem:[#allocation120_spill] sm:$0xff] %v15281_v19  ;;  %v11303_v35 = vpop.eup %11302  ;;  %v15292_v36 = vmul.f32 %v11301_v6, %v15103_v40  ;;  %v15309_v40 = vsub.f32 0.0, %v16105_v33  ;;  %v15325_v21 = vsub.f32 0.0, %v16100_v15  ;;  %v15337_v3 = vsub.f32 0.0, %v16103_v20  ;;  %v17113_v46 = vld [vmem:[#allocation86_spill] sm:$0xff] }
 0xcfd   : > { %17103 = vst [vmem:[#allocation61_spill] sm:$0xff] %v15286_v45  ;;  %v11305_v38 = vpop.eup %11304  ;;  %v15304_v14 = vmul.f32 %v11303_v35, %v15106_v24  ;;  %v15321_v24 = vsub.f32 0.0, %v16101_v30  ;;  %v17107_v35 = vld [vmem:[#allocation10_spill] sm:$0xff]  ;;  %vm8833_vm9 = vcmp.ge.f32.partialorder %v17112_v47, 0.0  ;;  %vm8834_vm10 = vcmp.ge.f32.partialorder %v17113_v46, 0.0  ;;  %v17114_v15 = vld [vmem:[#allocation87_spill] sm:$0xff] }
 0xcfe   : > { %17104 = vst [vmem:[#allocation62_spill] sm:$0xff] %v15292_v36  ;;  %v11307_v2 = vpop.eup %11306  ;;  %v15316_v7 = vmul.f32 %v11305_v38, %v15110_v59  ;;  %v15333_v59 = vsub.f32 0.0, %v16102_v63  ;;  %v17108_v30 = vld [vmem:[#allocation82_spill] sm:$0xff]  ;;  %v15351_v63 = vsub.f32 0.0, %v16109_v53  ;;  %vm8835_vm11 = vcmp.ge.f32.partialorder %v17114_v15, 0.0 }
 0xcff   : > { %17105 = vst [vmem:[#allocation63_spill] sm:$0xff] %v15304_v14  ;;  %v11309_v49 = vpop.eup %11308  ;;  %v15328_v8 = vmul.f32 %v11307_v2, %v15113_v27  ;;  %vm8830_vm1 = vcmp.ge.f32.partialorder %v17108_v30, 0.0  ;;  %v17109_v27 = vld [vmem:[#allocation83_spill] sm:$0xff]  ;;  %v15347_v2 = vsub.f32 0.0, %v16108_v22  ;;  %v15363_v22 = vsub.f32 0.0, %v16110_v26 }
 0xd00   : > { %17106 = vst [vmem:[#allocation64_spill] sm:$0xff] %v15316_v7  ;;  %v11311_v6 = vpop.eup %11310  ;;  %v15340_v38 = vmul.f32 %v11309_v49, %v17107_v35  ;;  %vm8831_vm2 = vcmp.ge.f32.partialorder %v17109_v27, 0.0  ;;  %v17111_v35 = vld [vmem:[#allocation84_spill] sm:$0xff]  ;;  %v15367_v53 = vsub.f32 0.0, %v16111_v42  ;;  %vm8836_vm12 = vcmp.ge.f32.partialorder %v17117_v41, 0.0  ;;  %v17177_v41 = vld [vmem:[#allocation65_spill] sm:$0xff] }
 0xd01   : > { %v11313_v20 = vpop.eup %11312  ;;  %v15354_v33 = vmul.f32 %v11311_v6, %v17110_v50  ;;  %vm8832_vm3 = vcmp.ge.f32.partialorder %v17111_v35, 0.0  ;;  %v17116_v6 = vld [vmem:[#allocation14_spill] sm:$0xff]  ;;  %vm8837_vm13 = vcmp.ge.f32.partialorder %v17118_v16, 0.0  ;;  %vm8838_vm14 = vcmp.ge.f32.partialorder %v17119_v62, 0.0  ;;  %v17184_v27 = vld [vmem:[#allocation35_spill] sm:$0xff]  ;;  %v17189_v35 = vld [vmem:[#allocation36_spill] sm:$0xff] }
 0xd02   : > { %17115 = vst [vmem:[#allocation21_spill] sm:$0xff] %v15367_v53  ;;  %v11315_v50 = vpop.eup %11314  ;;  %v15370_v32 = vmul.f32 %v11313_v20, %v17116_v6  ;;  %vm8839_vm0 = vcmp.ge.f32.partialorder %v17120_v43, 0.0  ;;  %v15379_v26 = vsub.f32 0.0, %v16112_v1  ;;  %v15383_v42 = vsub.f32 0.0, %v16114_v39  ;;  %v17123_v6 = vld [vmem:[#allocation17_spill] sm:$0xff] }
 0xd03   : > { %v11317_v20 = vpop.eup %11316  ;;  %v15386_v48 = vmul.f32 %v11315_v50, %v17123_v6  ;;  %v17128_v1 = vsub.f32 1.0, %v15255_v5  ;;  %v17129_v39 = vsub.f32 1.0, %v15259_v17  ;;  %v17135_v5 = vsub.f32 1.0, %v15262_v29 }
 0xd04   : > { %17121 = vst [vmem:[#allocation22_spill] sm:$0xff] %v15379_v26  ;;  %17122 = vst [vmem:[#allocation23_spill] sm:$0xff] %v15383_v42  ;;  %v11319_v42 = vpop.eup %11318  ;;  %v17130_v26 = vld [vmem:[#allocation20_spill] sm:$0xff]  ;;  %v17136_v17 = vsub.f32 1.0, %v15266_v9  ;;  %v17142_v13 = vsub.f32 1.0, %v15271_v55  ;;  %v17148_v60 = vsub.f32 1.0, %v15281_v19 }
 0xd05   : > { %v8876_v31 = vsub.f32 0.0, %v17128_v1  ;;  %v8877_v57 = vsub.f32 0.0, %v17129_v39  ;;  %v15398_v50 = vmul.f32 %v11317_v20, %v17130_v26  ;;  %v8878_v1 = vsub.f32 0.0, %v17135_v5 }
 0xd06   : > { %v8879_v39 = vsub.f32 0.0, %v17136_v17  ;;  %v15410_v53 = vmul.f32 %v11319_v42, %v17137_v18  ;;  %v8827_v26 = vsub.f32 1.0, %v15386_v48  ;;  %v8880_v29 = vsub.f32 0.0, %v17142_v13  ;;  %v17152_v42 = vld [vmem:[#allocation45_spill] sm:$0xff]  ;;  %v17154_v48 = vld [vmem:[#allocation103_spill] sm:$0xff] }
 0xd07   : > { %v17143_v5 = vsub.f32 1.0, %v15276_v44  ;;  %v8828_v17 = vsub.f32 1.0, %v15398_v50  ;;  %v8882_v6 = vsub.f32 0.0, %v17148_v60  ;;  %v17149_v10 = vsub.f32 1.0, %v15286_v45  ;;  %v17151_v50 = vld [vmem:[#allocation102_spill] sm:$0xff]  ;;  %v17153_v18 = vld [vmem:[#allocation117_spill] sm:$0xff] }
 0xd08   : > { %v17150_v13 = vsub.f32 1.0, %v15292_v36  ;;  %vm8856_vm4 = vcmp.ge.f32.partialorder %v17151_v50, 0.0  ;;  %vm8857_vm5 = vcmp.ge.f32.partialorder %v17152_v42, 0.0  ;;  %vm8858_vm7 = vcmp.ge.f32.partialorder %v17153_v18, 0.0 }
 0xd09   : > { %v8881_v9 = vsub.f32 0.0, %v17143_v5  ;;  %v8883_v55 = vsub.f32 0.0, %v17149_v10  ;;  %v8829_v5 = vsub.f32 1.0, %v15410_v53  ;;  %vm8859_vm8 = vcmp.ge.f32.partialorder %v17154_v48, 0.0  ;;  %v17159_v53 = vld [vmem:[#allocation119_spill] sm:$0xff]  ;;  %v17176_v16 = vld [vmem:[#allocation21_spill] sm:$0xff] }
 0xd0a   : > { %v8884_v44 = vsub.f32 0.0, %v17150_v13  ;;  %v17155_v20 = vsub.f32 1.0, %v15304_v14  ;;  %v17156_v60 = vsub.f32 1.0, %v15316_v7  ;;  %v17157_v10 = vsub.f32 1.0, %v15328_v8  ;;  %v17158_v13 = vld [vmem:[#allocation46_spill] sm:$0xff] }
 0xd0b   : > { %vm8860_vm6 = vcmp.ge.f32.partialorder %v17158_v13, 0.0  ;;  %vm8861_vm15 = vcmp.ge.f32.partialorder %v17159_v53, 0.0  ;;  %v17160_v50 = vsub.f32 1.0, %v15340_v38  ;;  %v17161_v18 = vsub.f32 1.0, %v15354_v33  ;;  %v17181_v62 = vld [vmem:[#allocation22_spill] sm:$0xff]  ;;  %v17186_v43 = vld [vmem:[#allocation23_spill] sm:$0xff] }
 0xd0c   : > { %v8885_v19 = vsub.f32 0.0, %v17155_v20  ;;  %v8886_v45 = vsub.f32 0.0, %v17156_v60  ;;  %v8887_v36 = vsub.f32 0.0, %v17157_v10  ;;  %v17162_v48 = vsub.f32 1.0, %v15370_v32 }
 0xd0d   : > { %v8888_v42 = vsub.f32 0.0, %v17160_v50  ;;  %v8889_v49 = vsub.f32 0.0, %v17161_v18  ;;  %v8891_v20 = vsub.f32 0.0, %v8827_v26  ;;  %v8892_v25 = vsub.f32 0.0, %v8828_v17 }
 0xd0e   : > { %v8890_v14 = vsub.f32 0.0, %v17162_v48  ;;  %v8893_v7 = vsub.f32 0.0, %v8829_v5  ;;  %v17163_v60 = vsub.f32 1.0, %v15206_v4  ;;  %v17164_v53 = vsub.f32 1.0, %v15209_v11 }
 0xd0f   : > { %v17165_v18 = vsub.f32 1.0, %v15212_v37  ;;  %v17166_v13 = vsub.f32 1.0, %v15215_v34  ;;  %v17167_v30 = vsub.f32 1.0, %v15218_v0  ;;  %v17170_v47 = vsub.f32 1.0, %v15228_v51 }
 0xd10   : > { %v8894_v10 = vsel %vm8830_vm1, %v17163_v60, %v15297_v54  ;;  %v8895_v50 = vsel %vm8831_vm2, %v17164_v53, %v15301_v28  ;;  %v17168_v54 = vsub.f32 1.0, %v15221_v52  ;;  %v17169_v28 = vsub.f32 1.0, %v15224_v56  ;;  %v17193_v53 = vld [vmem:[#allocation126_spill] sm:$0xff] }
 0xd11   : > { %v8896_v48 = vsel %vm8832_vm3, %v17165_v18, %v15309_v40  ;;  %v8897_v4 = vsel %vm8833_vm9, %v17166_v13, %v15313_v61  ;;  %v8898_v11 = vsel %vm8834_vm10, %v17167_v30, %v15321_v24  ;;  %v8901_v0 = vsel %vm8837_vm13, %v17170_v47, %v15337_v3  ;;  %v17174_v61 = vld [vmem:[#allocation92_spill] sm:$0xff]  ;;  %v17191_v13 = vld [vmem:[#allocation7_spill] sm:$0xff]  ;;  %v17199_v47 = vld [vmem:[#allocation30_spill] sm:$0xff] }
 0xd12   : > { %v8899_v37 = vsel %vm8835_vm11, %v17168_v54, %v15325_v21  ;;  %v8900_v34 = vsel %vm8836_vm12, %v17169_v28, %v15333_v59  ;;  %v17171_v46 = vsub.f32 1.0, %v15233_v23  ;;  %v17172_v15 = vsub.f32 1.0, %v15238_v58  ;;  %v17179_v21 = vld [vmem:[#allocation114_spill] sm:$0xff]  ;;  %v17195_v18 = vld [vmem:[#allocation8_spill] sm:$0xff]  ;;  %v17197_v54 = vld [vmem:[#allocation37_spill] sm:$0xff] }
 0xd13   : > { %v17173_v40 = vsub.f32 1.0, %v15241_v12  ;;  %vm17175_vm1 = vcmp.ge.f32.partialorder %v17174_v61, 0.0  ;;  %v17178_v24 = vsub.f32 1.0, %v17177_v41  ;;  %vm17180_vm2 = vcmp.ge.f32.partialorder %v17179_v21, 0.0  ;;  %v17182_v59 = vld [vmem:[#allocation66_spill] sm:$0xff]  ;;  %v17203_v61 = vld [vmem:[#allocation32_spill] sm:$0xff] }
 0xd14   : > { %v8902_v52 = vsel %vm8838_vm14, %v17171_v46, %v15347_v2  ;;  %v8903_v56 = vsel %vm8839_vm0, %v17172_v15, %v15351_v63  ;;  %v17183_v3 = vsub.f32 1.0, %v17182_v59  ;;  %vm17185_vm3 = vcmp.ge.f32.partialorder %v17184_v27, 0.0  ;;  %v17187_v63 = vld [vmem:[#allocation6_spill] sm:$0xff]  ;;  %v17205_v41 = vld [vmem:[#allocation39_spill] sm:$0xff]  ;;  %v17209_v59 = vld [vmem:[#allocation40_spill] sm:$0xff] }
 0xd15   : > { %v8904_v51 = vsel %vm17175_vm1, %v17173_v40, %v15363_v22  ;;  %v8905_v23 = vsel %vm17180_vm2, %v17178_v24, %v17176_v16  ;;  %v17188_v2 = vsub.f32 1.0, %v17187_v63  ;;  %vm17190_vm9 = vcmp.ge.f32.partialorder %v17189_v35, 0.0  ;;  %v17201_v15 = vld [vmem:[#allocation38_spill] sm:$0xff]  ;;  %v17215_v63 = vld [vmem:[#allocation120_spill] sm:$0xff]  ;;  %v17217_v35 = vld [vmem:[#allocation41_spill] sm:$0xff] }
 0xd16   : > { %v8906_v58 = vsel %vm17185_vm3, %v17183_v3, %v17181_v62  ;;  %v17192_v22 = vsub.f32 1.0, %v17191_v13  ;;  %vm17194_vm10 = vcmp.ge.f32.partialorder %v17193_v53, 0.0  ;;  %v17196_v30 = vsub.f32 1.0, %v17195_v18  ;;  %v17207_v21 = vld [vmem:[#allocation34_spill] sm:$0xff]  ;;  %v17211_v3 = vld [vmem:[#allocation47_spill] sm:$0xff]  ;;  %v17219_v13 = vld [vmem:[#allocation61_spill] sm:$0xff] }
 0xd17   : > { %v8907_v12 = vsel %vm17190_vm9, %v17188_v2, %v17186_v43  ;;  %vm17198_vm11 = vcmp.ge.f32.partialorder %v17197_v54, 0.0  ;;  %v17200_v46 = vsub.f32 1.0, %v17199_v47  ;;  %vm17202_vm12 = vcmp.ge.f32.partialorder %v17201_v15, 0.0  ;;  %v17213_v43 = vld [vmem:[#allocation67_spill] sm:$0xff]  ;;  %v17221_v53 = vld [vmem:[#allocation42_spill] sm:$0xff]  ;;  %v17229_v15 = vld [vmem:[#allocation44_spill] sm:$0xff] }
 0xd18   : > { %v8908_v60 = vsel %vm17194_vm10, %v17192_v22, %v8876_v31  ;;  %v8909_v28 = vsel %vm17198_vm11, %v17196_v30, %v8877_v57  ;;  %v17204_v16 = vsub.f32 1.0, %v17203_v61  ;;  %vm17206_vm13 = vcmp.ge.f32.partialorder %v17205_v41, 0.0  ;;  %v17223_v18 = vld [vmem:[#allocation62_spill] sm:$0xff]  ;;  %v17225_v54 = vld [vmem:[#allocation43_spill] sm:$0xff]  ;;  %v17231_v61 = vld [vmem:[#allocation64_spill] sm:$0xff] }
 0xd19   : > { %v8910_v40 = vsel %vm17202_vm12, %v17200_v46, %v8878_v1  ;;  %v17208_v62 = vsub.f32 1.0, %v17207_v21  ;;  %vm17210_vm14 = vcmp.ge.f32.partialorder %v17209_v59, 0.0  ;;  %v17212_v27 = vsub.f32 1.0, %v17211_v3  ;;  %v17227_v47 = vld [vmem:[#allocation63_spill] sm:$0xff]  ;;  %v17233_v41 = vld [vmem:[#allocation100_spill] sm:$0xff] }
 0xd1a   : > { %v8911_v24 = vsel %vm17206_vm13, %v17204_v16, %v8879_v39  ;;  %vm17214_vm0 = vcmp.ge.f32.partialorder %v17213_v43, 0.0  ;;  %v17216_v2 = vsub.f32 1.0, %v17215_v63  ;;  %vm17218_vm1 = vcmp.ge.f32.partialorder %v17217_v35, 0.0  ;;  %v17256_v3 = vld [vmem:[#allocation115_spill] sm:$0xff]  ;;  %v17262_v35 = vld [vmem:[#allocation128_spill] sm:$0xff] }
 0xd1b   : > { %v8912_v31 = vsel %vm17210_vm14, %v17208_v62, %v8880_v29  ;;  %v8913_v57 = vsel %vm17214_vm0, %v17212_v27, %v8881_v9  ;;  %v17220_v22 = vsub.f32 1.0, %v17219_v13  ;;  %vm17222_vm2 = vcmp.ge.f32.partialorder %v17221_v53, 0.0  ;;  %v17236_v62 = vld [vmem:[#allocation101_spill] sm:$0xff]  ;;  %v17267_v13 = vld [vmem:[#allocation71_spill] sm:$0xff] }
 0xd1c   : > { %v8914_v1 = vsel %vm17218_vm1, %v17216_v2, %v8882_v6  ;;  %v17224_v30 = vsub.f32 1.0, %v17223_v18  ;;  %vm17226_vm3 = vcmp.ge.f32.partialorder %v17225_v54, 0.0  ;;  %v17228_v46 = vsub.f32 1.0, %v17227_v47  ;;  %v17261_v2 = vld [vmem:[#allocation132_spill] sm:$0xff] }
 0xd1d   : > { %v8915_v39 = vsel %vm17222_vm2, %v17220_v22, %v8883_v55  ;;  %vm17230_vm9 = vcmp.ge.f32.partialorder %v17229_v15, 0.0  ;;  %v17232_v16 = vsub.f32 1.0, %v17231_v61  ;;  %vm17234_vm10 = vcmp.ge.f32.partialorder %v17233_v41, 0.0  ;;  %v17253_v41 = vld [vmem:[#allocation124_spill] sm:$0xff] }
 0xd1e   : > { %v8916_v29 = vsel %vm17226_vm3, %v17224_v30, %v8884_v44  ;;  %v8917_v9 = vsel %vm17230_vm9, %v17228_v46, %v8885_v19  ;;  %v17235_v21 = vsub.f32 1.0, %v15328_v8  ;;  %vm17237_vm11 = vcmp.ge.f32.partialorder %v17236_v62, 0.0 }
 0xd1f   : > { %v8918_v6 = vsel %vm17234_vm10, %v17232_v16, %v8886_v45  ;;  %v17238_v59 = vsub.f32 1.0, %v15340_v38  ;;  %v17240_v27 = vsub.f32 1.0, %v15354_v33  ;;  %v17242_v63 = vsub.f32 1.0, %v15370_v32  ;;  %v17268_v38 = vld [vmem:[#allocation106_spill] sm:$0xff] }
 0xd20   : > { %v8919_v55 = vsel %vm17237_vm11, %v17235_v21, %v8887_v36  ;;  %v8923_v8 = vsel %vm8859_vm8, %v8827_v26, %v8891_v20  ;;  %v8924_v36 = vsel %vm8860_vm6, %v8828_v17, %v8892_v25  ;;  %v8925_v22 = vsel %vm8861_vm15, %v8829_v5, %v8893_v7  ;;  %v17254_v21 = vld [vmem:[#allocation125_spill] sm:$0xff] }
 0xd21   : > { %v8920_v44 = vsel %vm8856_vm4, %v17238_v59, %v8888_v42  ;;  %v8921_v19 = vsel %vm8857_vm5, %v17240_v27, %v8889_v49  ;;  %v8922_v45 = vsel %vm8858_vm7, %v17242_v63, %v8890_v14  ;;  %v8926_v42 = vadd.f32 1.0, %v8894_v10  ;;  %v17259_v27 = vld [vmem:[#allocation127_spill] sm:$0xff] }
 0xd22   : > { %v8927_v53 = vadd.f32 1.0, %v8895_v50  ;;  %v8928_v33 = vadd.f32 1.0, %v8896_v48  ;;  %v8929_v18 = vadd.f32 1.0, %v8897_v4  ;;  %v8930_v30 = vadd.f32 1.0, %v8898_v11 }
 0xd23   : > { %v8931_v49 = vadd.f32 1.0, %v8899_v37  ;;  %v8932_v54 = vadd.f32 1.0, %v8900_v34  ;;  %v8933_v32 = vadd.f32 1.0, %v8901_v0  ;;  %v8934_v47 = vadd.f32 1.0, %v8902_v52 }
 0xd24   : > { %v8935_v46 = vadd.f32 1.0, %v8903_v56  ;;  %v8936_v14 = vadd.f32 1.0, %v8904_v51  ;;  %v8937_v15 = vadd.f32 1.0, %v8905_v23  ;;  %v8938_v26 = vadd.f32 1.0, %v8906_v58  ;;  %v17247_v58 = vld [vmem:[#allocation121_spill] sm:$0xff] }
 0xd25   : > { %v8939_v20 = vadd.f32 1.0, %v8907_v12  ;;  %v8940_v61 = vadd.f32 1.0, %v8908_v60  ;;  %v8941_v25 = vadd.f32 1.0, %v8909_v28  ;;  %v8942_v17 = vadd.f32 1.0, %v8910_v40  ;;  %v17248_v60 = vld [vmem:[#allocation122_spill] sm:$0xff]  ;;  %v17249_v40 = vld [vmem:[#allocation109_spill] sm:$0xff] }
 0xd26   : > { %v8943_v16 = vadd.f32 1.0, %v8911_v24  ;;  %v8944_v7 = vadd.f32 1.0, %v8912_v31  ;;  %v8945_v5 = vadd.f32 1.0, %v8913_v57  ;;  %v8946_v10 = vadd.f32 1.0, %v8914_v1  ;;  %v17250_v31 = vld [vmem:[#allocation110_spill] sm:$0xff]  ;;  %v17251_v1 = vld [vmem:[#allocation112_spill] sm:$0xff] }
 0xd27   : > { %v8947_v50 = vadd.f32 1.0, %v8915_v39  ;;  %v8948_v48 = vadd.f32 1.0, %v8916_v29  ;;  %v8949_v4 = vadd.f32 1.0, %v8917_v9  ;;  %v8950_v11 = vadd.f32 1.0, %v8918_v6  ;;  %v17252_v29 = vld [vmem:[#allocation123_spill] sm:$0xff] }
 0xd28   : > { %v8951_v37 = vadd.f32 1.0, %v8919_v55  ;;  %v8952_v34 = vadd.f32 1.0, %v8920_v44  ;;  %v8953_v0 = vadd.f32 1.0, %v8921_v19  ;;  %v8954_v52 = vadd.f32 1.0, %v8922_v45  ;;  %v17255_v55 = vld [vmem:[#allocation113_spill] sm:$0xff]  ;;  %v17260_v19 = vld [vmem:[#allocation70_spill] sm:$0xff] }
 0xd29   : > { %v8955_v56 = vadd.f32 1.0, %v8923_v8  ;;  %v8956_v51 = vadd.f32 1.0, %v8924_v36  ;;  %v8957_v23 = vadd.f32 1.0, %v8925_v22  ;;  %v8958_v12 = vmul.f32 %v8926_v42, %v17247_v58  ;;  %v17269_v42 = vld [vmem:[#allocation72_spill] sm:$0xff]  ;;  %v17294_v58 = vld [vmem:[#allocation111_spill] sm:$0xff] }
 0xd2a   : > { %v8959_v28 = vmul.f32 %v8927_v53, %v17248_v60  ;;  %v8960_v24 = vmul.f32 %v8928_v33, %v17249_v40  ;;  %v8961_v57 = vmul.f32 %v8929_v18, %v17250_v31  ;;  %v8962_v39 = vmul.f32 %v8930_v30, %v17251_v1  ;;  %v17270_v33 = vld [vmem:[#allocation107_spill] sm:$0xff]  ;;  %v17275_v30 = vld [vmem:[#allocation130_spill] sm:$0xff] }
 0xd2b   : > { %v8963_v9 = vmul.f32 %v8931_v49, %v17252_v29  ;;  %v8964_v6 = vmul.f32 %v8932_v54, %v17253_v41  ;;  %v8965_v62 = vmul.f32 %v8933_v32, %v17254_v21  ;;  %v8966_v59 = vmul.f32 %v8934_v47, %v17255_v55  ;;  %v17276_v54 = vld [vmem:[#allocation73_spill] sm:$0xff]  ;;  %v17277_v47 = vld [vmem:[#allocation131_spill] sm:$0xff] }
 0xd2c   : > { %v8967_v44 = vmul.f32 %v8935_v46, %v17256_v3  ;;  %vm17257_vm7 = vcmask 130048   ;;  %v8968_v43 = vmul.f32 %v8936_v14, %v17259_v27  ;;  %v8969_v63 = vmul.f32 %v8937_v15, %v17260_v19  ;;  %v17278_v14 = vld [vmem:[#allocation74_spill] sm:$0xff]  ;;  %v17299_v60 = vld [vmem:[#allocation59_spill] sm:$0xff] }
 0xd2d   : > { %8990 = vst.msk [vmem:[%s15592_s26] sm:$0xff] %vm17257_vm7, %v8958_v12  ;;  %vm17258_vm8 = vmmov %vm17257_vm7  ;;  %v8970_v45 = vmul.f32 %v8938_v26, %v17261_v2  ;;  %v8971_v8 = vmul.f32 %v8939_v20, %v17262_v35  ;;  %v8972_v36 = vmul.f32 %v8940_v61, %v17267_v13  ;;  %v8973_v22 = vmul.f32 %v8941_v25, %v17268_v38  ;;  %v17283_v26 = vld [vmem:[#allocation75_spill] sm:$0xff]  ;;  %v17284_v61 = vld [vmem:[#allocation76_spill] sm:$0xff] }
 0xd2e   : > { %8991 = vst.msk [vmem:[%s15592_s26 + $0x8] sm:$0xff] %vm17258_vm8, %v8959_v28  ;;  %vm17263_vm4 = vmmov %vm17257_vm7  ;;  %v8974_v53 = vmul.f32 %v8942_v17, %v17269_v42  ;;  %v8975_v18 = vmul.f32 %v8943_v16, %v17270_v33  ;;  %v8976_v49 = vmul.f32 %v8944_v7, %v17275_v30  ;;  %v8977_v32 = vmul.f32 %v8945_v5, %v17276_v54  ;;  %v17285_v17 = vld [vmem:[#allocation77_spill] sm:$0xff]  ;;  %v17286_v7 = vld [vmem:[#allocation78_spill] sm:$0xff] }
 0xd2f   : > { %8992 = vst.msk [vmem:[%s15592_s26 + $0x10] sm:$0xff] %vm17263_vm4, %v8960_v24  ;;  %vm17264_vm5 = vmmov %vm17263_vm4  ;;  %v8978_v46 = vmul.f32 %v8946_v10, %v17277_v47  ;;  %v8979_v15 = vmul.f32 %v8947_v50, %v17278_v14  ;;  %v8980_v20 = vmul.f32 %v8948_v48, %v17283_v26  ;;  %v8981_v25 = vmul.f32 %v8949_v4, %v17284_v61  ;;  %v17291_v10 = vld [vmem:[#allocation79_spill] sm:$0xff]  ;;  %v17292_v48 = vld [vmem:[#allocation80_spill] sm:$0xff] }
 0xd30   : > { %8993 = vst.msk [vmem:[%s15592_s26 + $0x18] sm:$0xff] %vm17264_vm5, %v8961_v57  ;;  %vm17265_vm6 = vmmov %vm17263_vm4  ;;  %v8982_v16 = vmul.f32 %v8950_v11, %v17285_v17  ;;  %v8983_v5 = vmul.f32 %v8951_v37, %v17286_v7  ;;  %v8984_v50 = vmul.f32 %v8952_v34, %v17291_v10  ;;  %v8985_v4 = vmul.f32 %v8953_v0, %v17292_v48  ;;  %v17293_v11 = vld [vmem:[#allocation81_spill] sm:$0xff]  ;;  %v17300_v28 = vld [vmem:[#allocation60_spill] sm:$0xff] }
 0xd31   : > { %8994 = vst.msk [vmem:[%s15592_s26 + $0x20] sm:$0xff] %vm17265_vm6, %v8962_v39  ;;  %vm17266_vm15 = vmmov %vm17263_vm4  ;;  %v8986_v37 = vmul.f32 %v8954_v52, %v17293_v11  ;;  %v8987_v12 = vmul.f32 %v8955_v56, %v17294_v58  ;;  %v8988_v34 = vmul.f32 %v8956_v51, %v17299_v60  ;;  %v8989_v40 = vmul.f32 %v8957_v23, %v17300_v28 }
 0xd32   : > { %8995 = vst.msk [vmem:[%s15592_s26 + $0x28] sm:$0xff] %vm17266_vm15, %v8963_v9  ;;  %vm17271_vm12 = vmmov %vm17263_vm4 }
 0xd33   : > { %8996 = vst.msk [vmem:[%s15592_s26 + $0x30] sm:$0xff] %vm17271_vm12, %v8964_v6  ;;  %vm17272_vm13 = vmmov %vm17263_vm4 }
 0xd34   : > { %8997 = vst.msk [vmem:[%s15592_s26 + $0x38] sm:$0xff] %vm17272_vm13, %v8965_v62  ;;  %vm17273_vm14 = vmmov %vm17263_vm4 }
 0xd35   : > { %8998 = vst.msk [vmem:[%s15592_s26 + $0x40] sm:$0xff] %vm17273_vm14, %v8966_v59  ;;  %vm17274_vm0 = vmmov %vm17263_vm4 }
 0xd36   : > { %8999 = vst.msk [vmem:[%s15592_s26 + $0x48] sm:$0xff] %vm17274_vm0, %v8967_v44  ;;  %vm17279_vm1 = vmmov %vm17274_vm0 }
 0xd37   : > { %9000 = vst.msk [vmem:[%s15592_s26 + $0x50] sm:$0xff] %vm17279_vm1, %v8968_v43  ;;  %vm17280_vm2 = vmmov %vm17274_vm0 }
 0xd38   : > { %9001 = vst.msk [vmem:[%s15592_s26 + $0x58] sm:$0xff] %vm17280_vm2, %v8969_v63  ;;  %vm17281_vm3 = vmmov %vm17274_vm0 }
 0xd39   : > { %9002 = vst.msk [vmem:[%s15592_s26 + $0x60] sm:$0xff] %vm17281_vm3, %v8970_v45  ;;  %vm17282_vm9 = vmmov %vm17274_vm0 }
 0xd3a   : > { %9003 = vst.msk [vmem:[%s15592_s26 + $0x68] sm:$0xff] %vm17282_vm9, %v8971_v8  ;;  %vm17287_vm10 = vmmov %vm17274_vm0 }
 0xd3b   : > { %9004 = vst.msk [vmem:[%s15592_s26 + $0x70] sm:$0xff] %vm17287_vm10, %v8972_v36  ;;  %vm17288_vm11 = vmmov %vm17274_vm0 }
 0xd3c   : > { %9005 = vst.msk [vmem:[%s15592_s26 + $0x78] sm:$0xff] %vm17288_vm11, %v8973_v22  ;;  %vm17289_vm7 = vmmov %vm17274_vm0 }
 0xd3d   : > { %9006 = vst.msk [vmem:[%s15592_s26 + $0x80] sm:$0xff] %vm17289_vm7, %v8974_v53  ;;  %vm17290_vm8 = vmmov %vm17274_vm0 }
 0xd3e   : > { %9007 = vst.msk [vmem:[%s15592_s26 + $0x88] sm:$0xff] %vm17290_vm8, %v8975_v18  ;;  %vm17295_vm4 = vmmov %vm17274_vm0 }
 0xd3f   : > { %9008 = vst.msk [vmem:[%s15592_s26 + $0x90] sm:$0xff] %vm17295_vm4, %v8976_v49  ;;  %vm17296_vm5 = vmmov %vm17274_vm0 }
 0xd40   : > { %9009 = vst.msk [vmem:[%s15592_s26 + $0x98] sm:$0xff] %vm17296_vm5, %v8977_v32  ;;  %vm17297_vm6 = vmmov %vm17274_vm0 }
 0xd41   : > { %9010 = vst.msk [vmem:[%s15592_s26 + $0xa0] sm:$0xff] %vm17297_vm6, %v8978_v46  ;;  %vm17298_vm15 = vmmov %vm17274_vm0 }
 0xd42   : > { %9011 = vst.msk [vmem:[%s15592_s26 + $0xa8] sm:$0xff] %vm17298_vm15, %v8979_v15  ;;  %vm17301_vm12 = vmmov %vm17274_vm0 }
 0xd43   : > { %9012 = vst.msk [vmem:[%s15592_s26 + $0xb0] sm:$0xff] %vm17301_vm12, %v8980_v20  ;;  %vm17302_vm13 = vmmov %vm17274_vm0 }
 0xd44   : > { %9013 = vst.msk [vmem:[%s15592_s26 + $0xb8] sm:$0xff] %vm17302_vm13, %v8981_v25  ;;  %vm17303_vm14 = vmmov %vm17274_vm0 }
 0xd45   : > { %9014 = vst.msk [vmem:[%s15592_s26 + $0xc0] sm:$0xff] %vm17303_vm14, %v8982_v16  ;;  %vm17304_vm1 = vmmov %vm17274_vm0 }
 0xd46   : > { %9015 = vst.msk [vmem:[%s15592_s26 + $0xc8] sm:$0xff] %vm17274_vm0, %v8983_v5  ;;  %vm17305_vm2 = vmmov %vm17274_vm0 }
 0xd47   : > { %9016 = vst.msk [vmem:[%s15592_s26 + $0xd0] sm:$0xff] %vm17304_vm1, %v8984_v50  ;;  %vm17306_vm3 = vmmov %vm17274_vm0 }
 0xd48   : > { %9017 = vst.msk [vmem:[%s15592_s26 + $0xd8] sm:$0xff] %vm17305_vm2, %v8985_v4  ;;  %vm17307_vm9 = vmmov %vm17274_vm0 }
 0xd49   : > { %9018 = vst.msk [vmem:[%s15592_s26 + $0xe0] sm:$0xff] %vm17306_vm3, %v8986_v37  ;;  %vm17308_vm10 = vmmov %vm17274_vm0 }
 0xd4a   : > { %9019 = vst.msk [vmem:[%s15592_s26 + $0xe8] sm:$0xff] %vm17307_vm9, %v8987_v12  ;;  %vm17309_vm11 = vmmov %vm17274_vm0 }
 0xd4b   : > { %9020 = vst.msk [vmem:[%s15592_s26 + $0xf0] sm:$0xff] %vm17308_vm10, %v8988_v34 }
 0xd4c   : > { %9021 = vst.msk [vmem:[%s15592_s26 + $0xf8] sm:$0xff] %vm17309_vm11, %v8989_v40 }
 0xd4d PF: > { %s24_s29 = sadd.s32 1, %s11328_s29  }
 0xd4e   : > { %p21_p4 = scmp.ge.s32.totalorder %s24_s29, 4  }
 0xd50   :  { %23 = sbr.rel (!%p21_p4) target bundleno = 1 (0x1), region = 131 }

</bundles_post_ra>
